<compile_context>
chip_gen: v5e
topology: v5e:2x2
jax: 0.10.0
libtpu: 0.0.40
codegen_flags: <defaults>
</compile_context>

<pallas_src>
import jax
import jax.numpy as jnp
from jax.experimental import pallas as pl
from jax.experimental.pallas import tpu as pltpu


def _round_up(x, m):
    return (x + m - 1) // m * m


def _chip_config():
    """Tile caps / VMEM budget per TPU generation (safe fallback = v7x-conservative)."""
    try:
        vmem_cap = int(pltpu.get_tpu_info().vmem_capacity_bytes)
    except Exception:
        vmem_cap = 64 * 1024 * 1024
    if vmem_cap >= 100 * 1024 * 1024:
        # v5e / v6e: 128 MiB VMEM, single TensorCore -> biggest tiles, no 2-tile N requirement.
        return dict(max_tk=1024, max_tn=2048, want_two_n_tiles=False,
                    vmem_limit_bytes=96 * 1024 * 1024)
    # v7x (64 MiB VMEM, 2 TensorCores) or unknown chip: conservative tiles, >=2 N tiles.
    return dict(max_tk=1024, max_tn=1024, want_two_n_tiles=True,
                vmem_limit_bytes=48 * 1024 * 1024)


def _k_tiling(dim, max_tile):
    """(padded_dim, tile) for the reduction axis: one full-width step when it fits,
    otherwise the multiple-of-128 tile <= max_tile minimizing padded bytes (ties -> larger)."""
    d = _round_up(dim, 128)
    if d <= max_tile:
        return d, d
    best_pad, best_tile = None, None
    for t in range(max_tile, 0, -128):
        p = _round_up(d, t)
        if best_pad is None or p < best_pad:
            best_pad, best_tile = p, t
    return best_pad, best_tile


def _n_tiling(dim, max_tile, want_two_tiles):
    """(padded_dim, tile) for the parallel (output) axis."""
    d = _round_up(dim, 128)
    if want_two_tiles and d >= 256:
        # Keep >=2 N tiles so megacore sharding can use the second TensorCore (v7x).
        t = min(max_tile, _round_up((d + 1) // 2, 128))
        return _round_up(d, t), t
    return _k_tiling(dim, max_tile)


@jax.jit
def bayesian_layer_forward(x, weight_mu, weight_logsigma, bias_mu, bias_logsigma,
                           eps_w, eps_b):
    """x: (B, In). weight_* / eps_w: (In, Out). bias_* / eps_b: (Out,)."""
    B, In = x.shape
    Out = weight_mu.shape[1]

    cfg = _chip_config()
    B_pad = _round_up(B, 8)
    In_pad, tk = _k_tiling(In, cfg["max_tk"])
    Out_pad, tn = _n_tiling(Out, cfg["max_tn"], cfg["want_two_n_tiles"])

    def pad2(a, rows, cols):
        return jnp.pad(a, ((0, rows - a.shape[0]), (0, cols - a.shape[1])))

    xp = pad2(x.astype(jnp.float32), B_pad, In_pad)
    wmu = pad2(weight_mu, In_pad, Out_pad)
    wls = pad2(weight_logsigma, In_pad, Out_pad)
    # Noise streamed as bf16 (statistically indistinguishable, halves this HBM stream).
    ew = pad2(eps_w.astype(jnp.bfloat16), In_pad, Out_pad)

    # Pack the three Out-sized vectors into one sublane-aligned (8, Out_pad) block.
    bias_pack = jnp.zeros((8, Out_pad), jnp.float32)
    bias_pack = bias_pack.at[0, :Out].set(bias_mu)
    bias_pack = bias_pack.at[1, :Out].set(bias_logsigma)
    bias_pack = bias_pack.at[2, :Out].set(eps_b.astype(jnp.float32))

    # Keep x resident across the whole K loop when it is small (it always is for a
    # feedforward layer); otherwise fall back to per-K-step x tiles.
    x_resident = B_pad * In_pad * 4 <= 4 * 1024 * 1024
    if x_resident:
        x_spec = pl.BlockSpec((B_pad, In_pad), lambda n, k: (0, 0))
    else:
        x_spec = pl.BlockSpec((B_pad, tk), lambda n, k: (0, k))

    def kernel(x_ref, wmu_ref, wls_ref, epsw_ref, bias_ref, o_ref, acc_ref):
        k = pl.program_id(1)

        @pl.when(k == 0)
        def _():
            acc_ref[...] = jnp.zeros_like(acc_ref)

        # Reparameterized weight sample for this (tk, tn) tile:
        #   scale = softplus(ls) * exp(ls)  ->  e = exp(ls); scale = log1p(e) * e
        wls_t = wls_ref[...]
        e = jnp.exp(wls_t)
        w = wmu_ref[...] + jnp.log1p(e) * e * epsw_ref[...].astype(jnp.float32)

        if x_resident:
            x_t = x_ref[:, pl.ds(pl.multiple_of(k * tk, 128), tk)]
        else:
            x_t = x_ref[...]

        # MXU matmul with f32 accumulation into the resident scratch tile.
        acc_ref[...] += jnp.dot(x_t, w, preferred_element_type=jnp.float32)

        # Bias reparameterization + add + store once per output tile (last K step).
        @pl.when(k == pl.num_programs(1) - 1)
        def _():
            bls = bias_ref[1:2, :]
            eb = jnp.exp(bls)
            b = bias_ref[0:1, :] + jnp.log1p(eb) * eb * bias_ref[2:3, :]
            o_ref[...] = (acc_ref[...] + b).astype(o_ref.dtype)

    grid = (Out_pad // tn, In_pad // tk)  # (parallel N tiles, reduction K tiles last)

    out = pl.pallas_call(
        kernel,
        out_shape=jax.ShapeDtypeStruct((B_pad, Out_pad), jnp.float32),
        grid_spec=pltpu.PrefetchScalarGridSpec(
            num_scalar_prefetch=0,
            grid=grid,
            in_specs=[
                x_spec,                                        # x (VMEM-resident across K)
                pl.BlockSpec((tk, tn), lambda n, k: (k, n)),   # weight_mu
                pl.BlockSpec((tk, tn), lambda n, k: (k, n)),   # weight_logsigma
                pl.BlockSpec((tk, tn), lambda n, k: (k, n)),   # eps_w (bf16)
                pl.BlockSpec((8, tn), lambda n, k: (0, n)),    # [bias_mu; bias_logsigma; eps_b]
            ],
            out_specs=pl.BlockSpec((B_pad, tn), lambda n, k: (0, n)),
            scratch_shapes=[pltpu.VMEM((B_pad, tn), jnp.float32)],
        ),
        compiler_params=pltpu.CompilerParams(
            dimension_semantics=("parallel", "arbitrary"),
            vmem_limit_bytes=cfg["vmem_limit_bytes"],
        ),
    )(xp, wmu, wls, ew, bias_pack)

    return out[:B, :Out]


if __name__ == "__main__":
    # Shapes chosen so the kernel exercises batch/In/Out padding, >1 K accumulation step
    # and (on v7x) >1 parallel N tile, while staying small.
    batch, input_dim, output_dim = 6, 1500, 300

    # Deterministic parameter init matching the module's __init__:
    #   weight_mu = 0, weight_logsigma = log(1 - 0.925) = log(0.075)
    #   bias_mu = 0,   bias_logsigma = 0
    weight_mu = jnp.zeros((input_dim, output_dim), jnp.float32)
    weight_logsigma = jnp.full((input_dim, output_dim), jnp.log(0.075), jnp.float32)
    bias_mu = jnp.zeros((output_dim,), jnp.float32)
    bias_logsigma = jnp.zeros((output_dim,), jnp.float32)

    key = jax.random.PRNGKey(0)
    kx, kw, kb = jax.random.split(key, 3)
    x = jax.random.normal(kx, (batch, input_dim), jnp.float32)
    eps_w = jax.random.normal(kw, (input_dim, output_dim), jnp.float32)
    eps_b = jax.random.normal(kb, (output_dim,), jnp.float32)

    out = bayesian_layer_forward(x, weight_mu, weight_logsigma,
                                 bias_mu, bias_logsigma, eps_w, eps_b)
    out = jax.block_until_ready(out)

    # Pure-JAX reference of the same reparameterized forward (kernel streams the weight
    # noise as bf16, so the reference uses the identically-rounded noise).
    eps_w_k = eps_w.astype(jnp.bfloat16).astype(jnp.float32)
    w_ref = weight_mu + jax.nn.softplus(weight_logsigma) * jnp.exp(weight_logsigma) * eps_w_k
    b_ref = bias_mu + jax.nn.softplus(bias_logsigma) * jnp.exp(bias_logsigma) * eps_b
    ref = jnp.dot(x, w_ref, precision=jax.lax.Precision.HIGHEST) + b_ref

    assert out.shape == (batch, output_dim)
    assert jnp.allclose(out, ref, atol=5e-4, rtol=5e-4), float(jnp.max(jnp.abs(out - ref)))

    print("KERNEL_OK")
</pallas_src>

<mosaic_0001>
module attributes {stable_mosaic.version = 11 : i64} {
  func.func @kernel(%arg0: i32, %arg1: i32, %arg2: memref<8x1536xf32, #tpu.memory_space<vmem>>, %arg3: memref<768x256xf32, #tpu.memory_space<vmem>>, %arg4: memref<768x256xf32, #tpu.memory_space<vmem>>, %arg5: memref<768x256xbf16, #tpu.memory_space<vmem>>, %arg6: memref<8x256xf32, #tpu.memory_space<vmem>>, %arg7: memref<8x256xf32, #tpu.memory_space<vmem>>, %arg8: memref<8x256xf32, #tpu.memory_space<vmem>>) attributes {dimension_semantics = [#tpu.dimension_semantics<parallel>, #tpu.dimension_semantics<arbitrary>], iteration_bounds = array<i64: 2, 2>, scalar_prefetch = 0 : i64, scratch_operands = 1 : i64, tpu.core_type = #tpu.core_type<tc>, window_params = [{pipeline_mode = #tpu.pipeline_mode<synchronous>, transform_indices = @transform_0, window_bounds = array<i64: 8, 1536>}, {transform_indices = @transform_1, window_bounds = array<i64: 768, 256>}, {transform_indices = @transform_2, window_bounds = array<i64: 768, 256>}, {transform_indices = @transform_3, window_bounds = array<i64: 768, 256>}, {transform_indices = @transform_4, window_bounds = array<i64: 8, 256>}, {transform_indices = @transform_5, window_bounds = array<i64: 8, 256>}]} {
    %c0_i32 = arith.constant 0 : i32
    %0 = arith.cmpi eq, %arg1, %c0_i32 : i32
    %1 = arith.extui %0 : i1 to i32
    %c0_i32_0 = arith.constant 0 : i32
    %2 = arith.cmpi ne, %1, %c0_i32_0 : i32
    scf.if %2 {
      %cst_12 = arith.constant 0.000000e+00 : f32
      %23 = vector.broadcast %cst_12 : f32 to vector<8x256xf32>
      %c0_13 = arith.constant 0 : index
      %c0_14 = arith.constant 0 : index
      %24 = vector.load %arg8[%c0_13, %c0_14] : memref<8x256xf32, #tpu.memory_space<vmem>>, vector<8x256xf32>
      tpu.vector_store %arg8[%c0_13, %c0_14], %23 {strides = array<i32>} : memref<8x256xf32, #tpu.memory_space<vmem>>, vector<8x256xf32>,
    } else {
    }
    %c0 = arith.constant 0 : index
    %c0_1 = arith.constant 0 : index
    %3 = vector.load %arg4[%c0, %c0_1] : memref<768x256xf32, #tpu.memory_space<vmem>>, vector<768x256xf32>
    %4 = math.exp %3 : vector<768x256xf32>
    %c0_2 = arith.constant 0 : index
    %c0_3 = arith.constant 0 : index
    %5 = vector.load %arg3[%c0_2, %c0_3] : memref<768x256xf32, #tpu.memory_space<vmem>>, vector<768x256xf32>
    %6 = math.log1p %4 : vector<768x256xf32>
    %7 = arith.mulf %6, %4 : vector<768x256xf32>
    %c0_4 = arith.constant 0 : index
    %c0_5 = arith.constant 0 : index
    %8 = vector.load %arg5[%c0_4, %c0_5] : memref<768x256xbf16, #tpu.memory_space<vmem>>, vector<768x256xbf16>
    %9 = arith.extf %8 : vector<768x256xbf16> to vector<768x256xf32>
    %10 = arith.mulf %7, %9 : vector<768x256xf32>
    %11 = arith.addf %5, %10 : vector<768x256xf32>
    %c768_i32 = arith.constant 768 : i32
    %12 = arith.muli %arg1, %c768_i32 : i32
    %13 = tpu.assume_multiple %12, 128 : i32
    %c0_6 = arith.constant 0 : index
    %14 = arith.index_cast %13 : i32 to index
    %15 = vector.load %arg2[%c0_6, %14] : memref<8x1536xf32, #tpu.memory_space<vmem>>, vector<8x768xf32>
    %c0_7 = arith.constant 0 : index
    %c0_8 = arith.constant 0 : index
    %16 = vector.load %arg8[%c0_7, %c0_8] : memref<8x256xf32, #tpu.memory_space<vmem>>, vector<8x256xf32>
    %cst = arith.constant dense<0.000000e+00> : vector<8x256xf32>
    %17 = tpu.matmul %15, %11, %cst {dimension_numbers = #tpu.dot_dimension_numbers<[1], [0], [0], [1], [0, 0, 1, 1], [], []>} : vector<8x768xf32>, vector<768x256xf32>, vector<8x256xf32> -> vector<8x256xf32>
    %18 = arith.addf %16, %17 : vector<8x256xf32>
    %c0_9 = arith.constant 0 : index
    %c0_10 = arith.constant 0 : index
    %19 = vector.load %arg8[%c0_9, %c0_10] : memref<8x256xf32, #tpu.memory_space<vmem>>, vector<8x256xf32>
    tpu.vector_store %arg8[%c0_9, %c0_10], %18 {strides = array<i32>} : memref<8x256xf32, #tpu.memory_space<vmem>>, vector<8x256xf32>,
    %c1_i32 = arith.constant 1 : i32
    %20 = arith.cmpi eq, %arg1, %c1_i32 : i32
    %21 = arith.extui %20 : i1 to i32
    %c0_i32_11 = arith.constant 0 : i32
    %22 = arith.cmpi ne, %21, %c0_i32_11 : i32
    scf.if %22 {
      %c1 = arith.constant 1 : index
      %c0_12 = arith.constant 0 : index
      %23 = vector.load %arg6[%c1, %c0_12] : memref<8x256xf32, #tpu.memory_space<vmem>>, vector<1x256xf32>
      %24 = math.exp %23 : vector<1x256xf32>
      %c0_13 = arith.constant 0 : index
      %c0_14 = arith.constant 0 : index
      %25 = vector.load %arg6[%c0_13, %c0_14] : memref<8x256xf32, #tpu.memory_space<vmem>>, vector<1x256xf32>
      %26 = math.log1p %24 : vector<1x256xf32>
      %27 = arith.mulf %26, %24 : vector<1x256xf32>
      %c2 = arith.constant 2 : index
      %c0_15 = arith.constant 0 : index
      %28 = vector.load %arg6[%c2, %c0_15] : memref<8x256xf32, #tpu.memory_space<vmem>>, vector<1x256xf32>
      %29 = arith.mulf %27, %28 : vector<1x256xf32>
      %30 = arith.addf %25, %29 : vector<1x256xf32>
      %c0_16 = arith.constant 0 : index
      %c0_17 = arith.constant 0 : index
      %31 = vector.load %arg8[%c0_16, %c0_17] : memref<8x256xf32, #tpu.memory_space<vmem>>, vector<8x256xf32>
      %32 = vector.broadcast %30 : vector<1x256xf32> to vector<8x256xf32>
      %33 = arith.addf %31, %32 : vector<8x256xf32>
      %c0_18 = arith.constant 0 : index
      %c0_19 = arith.constant 0 : index
      %34 = vector.load %arg7[%c0_18, %c0_19] : memref<8x256xf32, #tpu.memory_space<vmem>>, vector<8x256xf32>
      tpu.vector_store %arg7[%c0_18, %c0_19], %33 {strides = array<i32>} : memref<8x256xf32, #tpu.memory_space<vmem>>, vector<8x256xf32>,
    } else {
    }
    return
  }
  func.func @transform_0(%arg0: i32, %arg1: i32) -> (i32, i32) {
    %c0_i32 = arith.constant 0 : i32
    %c0_i32_0 = arith.constant 0 : i32
    %c0_i32_1 = arith.constant 0 : i32
    return %c0_i32, %c0_i32_0 : i32, i32
  }
  func.func @transform_1(%arg0: i32, %arg1: i32) -> (i32, i32) {
    %c0_i32 = arith.constant 0 : i32
    return %arg1, %arg0 : i32, i32
  }
  func.func @transform_2(%arg0: i32, %arg1: i32) -> (i32, i32) {
    %c0_i32 = arith.constant 0 : i32
    return %arg1, %arg0 : i32, i32
  }
  func.func @transform_3(%arg0: i32, %arg1: i32) -> (i32, i32) {
    %c0_i32 = arith.constant 0 : i32
    return %arg1, %arg0 : i32, i32
  }
  func.func @transform_4(%arg0: i32, %arg1: i32) -> (i32, i32) {
    %c0_i32 = arith.constant 0 : i32
    %c0_i32_0 = arith.constant 0 : i32
    return %c0_i32, %arg0 : i32, i32
  }
  func.func @transform_5(%arg0: i32, %arg1: i32) -> (i32, i32) {
    %c0_i32 = arith.constant 0 : i32
    %c0_i32_0 = arith.constant 0 : i32
    return %c0_i32, %arg0 : i32, i32
  }
}

</mosaic_0001>

<bundles_post_ra>
// kernel: bayesian_layer_forward.1
= control target key start
LH: loop header
LB: loop body
LE: loop exit
PB: predicated region body
PF: predicated region fallthrough
CT: control target
= control target key end

     0   :  { %s6324_s18 = smov 0   ;;  %s6326_s19 = smov 0   ;;  %s11267_s0 = inlined_call_operand.vmem [shape: f32[8,1536], index: 0, kind: input, shape index: {}]   ;;  %s11268_s1 = inlined_call_operand.vmem [shape: f32[1536,512], index: 1, kind: input, shape index: {}]   ;;  %s11269_s2 = inlined_call_operand.vmem [shape: f32[1536,512], index: 2, kind: input, shape index: {}]   ;;  %s11270_s3 = inlined_call_operand.vmem [shape: bf16[1536,512], index: 3, kind: input, shape index: {}]   ;;  %s11271_s4 = inlined_call_operand.vmem [shape: f32[8,512], index: 4, kind: input, shape index: {}]   ;;  %s11272_s5 = inlined_call_operand.vmem [shape: f32[8,512], index: 5, kind: output, shape index: {}]  }
   0x1   :  { %s6328_s20 = smov 0   ;;  %s6330_s21 = smov 0  }
   0x2   :  { %s6332_s22 = smov 0   ;;  %s6334_s23 = smov 0  }
   0x3   :  { %s6336_s24 = smov 0  }
   0x4 LB: > { %s24_s25 = sadd.s32 1, %s6283_s22  ;;  %s27_s26 = sadd.s32 1, %s6287_s23  ;;  %s6291_s24 = sphi %s6336_s24, %s15_s24   ;;  %s6287_s23 = sphi %s6334_s23, %s11852_s23   ;;  %s6283_s22 = sphi %s6332_s22, %s11851_s22   ;;  %s6279_s21 = sphi %s6330_s21, %s11850_s21   ;;  %s6275_s20 = sphi %s6328_s20, %s11849_s20   ;;  %s6271_s19 = sphi %s6326_s19, %s11848_s19   ;;  %s6267_s18 = sphi %s6324_s18, %s11847_s18  }
   0x5   : > { %p25_p0 = scmp.ge.s32.totalorder %s24_s25, 2  ;;  %p64_p1 = scmp.ne.s32.totalorder %s6271_s19, %s6267_s18 }
   0x6   : > { %p65_p2 = scmp.eq.s32.totalorder %s6291_s24, 0  ;;  %s57_s6 = sadd.s32 1, %s6271_s19 }
   0x7   : > { %s11854_s25 = smov (%p25_p0, %s24_s25), 0  ;;  %s11856_s26 = smov (!%p25_p0, %s27_s26), %s6287_s23 }
   0x8   : > { %p6367_p3 = por %p65_p2, %p64_p1  ;;  %p29_p4 = scmp.ge.s32.totalorder %s11856_s26, 2 }
   0x9   : > { %s52_s28 = ssub.s32 %s6283_s22, %s11854_s25  ;;  %p5334_p6 = scmp.ge.s32.totalorder %s6291_s24, 4 }
   0xa   : > { %s11858_s26 = smov (%p29_p4, %s11856_s26), 0 }
   0xb   : > { %s53_s29 = ssub.s32 %s6287_s23, %s11858_s26  ;;  %201 = sbr.rel (%p5334_p6) target bundleno = 520 (0x208), region = 20 }
   0xc   : > { %s54_s30 = sor.u32 %s53_s29, %s52_s28 }
   0xd   : > { %p55_p5 = scmp.eq.s32.totalorder %s54_s30, 0 }
   0xf   : > { %s6379_s7 = scalar_select %p55_p5, %s6271_s19, %s57_s6  }
  0x10   : > { %204 = sbr.rel (!%p6367_p3) target bundleno = 216 (0xd8), region = 24  ;;  %s206_s8 = sand.u32 (%p6367_p3), 1, %s6271_s19  }
  0x11   : > { %s5359_s9 = smul.u32 (%p6367_p3), 1536, %s206_s8  ;;  %s5335_s10 = sshll.u32 (%p6367_p3), %s6287_s23, 1 }
  0x12   : > { %s5356_s11 = smul.u32 (%p6367_p3), 384, %s6283_s22 }
  0x13   : > { %s6395_s17 = scalar_lea.vmem (%p6367_p3), [#allocation3], %s5359_s9 }
  0x14   : > { %s212_s12 = sadd.s32 (%p6367_p3), %s5356_s11, %s5335_s10 }
  0x15   : > { %s5337_s13 = sshll.u32 %s212_s12, 3 }
  0x16   : > { %s6390_s16 = scalar_lea.vmem %s11268_s1, %s5337_s13 }
  0x17   : > { %v227_v0 = vld [vmem:[%s6390_s16] sm:$0xff]  ;;  %v229_v1 = vld [vmem:[%s6390_s16 + $0x8] sm:$0xff] }
  0x18   : > { %v231_v2 = vld [vmem:[%s6390_s16 + $0x20] sm:$0xff]  ;;  %228 = vst [vmem:[%s6395_s17] sm:$0xff] %v227_v0  ;;  %v233_v3 = vld [vmem:[%s6390_s16 + $0x28] sm:$0xff] }
  0x19   : > { %230 = vst [vmem:[%s6395_s17 + $0x8] sm:$0xff] %v229_v1  ;;  %v235_v4 = vld [vmem:[%s6390_s16 + $0x40] sm:$0xff]  ;;  %v237_v5 = vld [vmem:[%s6390_s16 + $0x48] sm:$0xff] }
  0x1a   : > { %232 = vst [vmem:[%s6395_s17 + $0x10] sm:$0xff] %v231_v2  ;;  %v239_v6 = vld [vmem:[%s6390_s16 + $0x60] sm:$0xff]  ;;  %v241_v7 = vld [vmem:[%s6390_s16 + $0x68] sm:$0xff] }
  0x1b   : > { %234 = vst [vmem:[%s6395_s17 + $0x18] sm:$0xff] %v233_v3  ;;  %v243_v8 = vld [vmem:[%s6390_s16 + $0x80] sm:$0xff]  ;;  %v245_v9 = vld [vmem:[%s6390_s16 + $0x88] sm:$0xff] }
  0x1c   : > { %236 = vst [vmem:[%s6395_s17 + $0x20] sm:$0xff] %v235_v4  ;;  %v247_v10 = vld [vmem:[%s6390_s16 + $0xa0] sm:$0xff]  ;;  %v249_v11 = vld [vmem:[%s6390_s16 + $0xa8] sm:$0xff] }
  0x1d   : > { %238 = vst [vmem:[%s6395_s17 + $0x28] sm:$0xff] %v237_v5  ;;  %v251_v12 = vld [vmem:[%s6390_s16 + $0xc0] sm:$0xff]  ;;  %v253_v13 = vld [vmem:[%s6390_s16 + $0xc8] sm:$0xff] }
  0x1e   : > { %240 = vst [vmem:[%s6395_s17 + $0x30] sm:$0xff] %v239_v6  ;;  %v255_v14 = vld [vmem:[%s6390_s16 + $0xe0] sm:$0xff]  ;;  %v257_v15 = vld [vmem:[%s6390_s16 + $0xe8] sm:$0xff] }
  0x1f   : > { %242 = vst [vmem:[%s6395_s17 + $0x38] sm:$0xff] %v241_v7  ;;  %v259_v16 = vld [vmem:[%s6390_s16 + $0x100] sm:$0xff]  ;;  %v261_v17 = vld [vmem:[%s6390_s16 + $0x108] sm:$0xff] }
  0x20   : > { %244 = vst [vmem:[%s6395_s17 + $0x40] sm:$0xff] %v243_v8  ;;  %v263_v18 = vld [vmem:[%s6390_s16 + $0x120] sm:$0xff]  ;;  %v265_v19 = vld [vmem:[%s6390_s16 + $0x128] sm:$0xff] }
  0x21   : > { %246 = vst [vmem:[%s6395_s17 + $0x48] sm:$0xff] %v245_v9  ;;  %v267_v20 = vld [vmem:[%s6390_s16 + $0x140] sm:$0xff]  ;;  %v269_v21 = vld [vmem:[%s6390_s16 + $0x148] sm:$0xff] }
  0x22   : > { %248 = vst [vmem:[%s6395_s17 + $0x50] sm:$0xff] %v247_v10  ;;  %v271_v22 = vld [vmem:[%s6390_s16 + $0x160] sm:$0xff]  ;;  %v273_v23 = vld [vmem:[%s6390_s16 + $0x168] sm:$0xff] }
  0x23   : > { %250 = vst [vmem:[%s6395_s17 + $0x58] sm:$0xff] %v249_v11  ;;  %v275_v24 = vld [vmem:[%s6390_s16 + $0x180] sm:$0xff]  ;;  %v277_v25 = vld [vmem:[%s6390_s16 + $0x188] sm:$0xff] }
  0x24   : > { %252 = vst [vmem:[%s6395_s17 + $0x60] sm:$0xff] %v251_v12  ;;  %v279_v26 = vld [vmem:[%s6390_s16 + $0x1a0] sm:$0xff]  ;;  %v281_v27 = vld [vmem:[%s6390_s16 + $0x1a8] sm:$0xff] }
  0x25   : > { %254 = vst [vmem:[%s6395_s17 + $0x68] sm:$0xff] %v253_v13  ;;  %v283_v28 = vld [vmem:[%s6390_s16 + $0x1c0] sm:$0xff]  ;;  %v285_v29 = vld [vmem:[%s6390_s16 + $0x1c8] sm:$0xff] }
  0x26   : > { %256 = vst [vmem:[%s6395_s17 + $0x70] sm:$0xff] %v255_v14  ;;  %v287_v30 = vld [vmem:[%s6390_s16 + $0x1e0] sm:$0xff]  ;;  %v289_v31 = vld [vmem:[%s6390_s16 + $0x1e8] sm:$0xff] }
  0x27   : > { %258 = vst [vmem:[%s6395_s17 + $0x78] sm:$0xff] %v257_v15  ;;  %v291_v32 = vld [vmem:[%s6390_s16 + $0x200] sm:$0xff]  ;;  %v293_v33 = vld [vmem:[%s6390_s16 + $0x208] sm:$0xff] }
  0x28   : > { %260 = vst [vmem:[%s6395_s17 + $0x80] sm:$0xff] %v259_v16  ;;  %v295_v34 = vld [vmem:[%s6390_s16 + $0x220] sm:$0xff]  ;;  %v297_v35 = vld [vmem:[%s6390_s16 + $0x228] sm:$0xff] }
  0x29   : > { %262 = vst [vmem:[%s6395_s17 + $0x88] sm:$0xff] %v261_v17  ;;  %v299_v36 = vld [vmem:[%s6390_s16 + $0x240] sm:$0xff]  ;;  %v301_v37 = vld [vmem:[%s6390_s16 + $0x248] sm:$0xff] }
  0x2a   : > { %264 = vst [vmem:[%s6395_s17 + $0x90] sm:$0xff] %v263_v18  ;;  %v303_v38 = vld [vmem:[%s6390_s16 + $0x260] sm:$0xff]  ;;  %v305_v39 = vld [vmem:[%s6390_s16 + $0x268] sm:$0xff] }
  0x2b   : > { %266 = vst [vmem:[%s6395_s17 + $0x98] sm:$0xff] %v265_v19  ;;  %v307_v40 = vld [vmem:[%s6390_s16 + $0x280] sm:$0xff]  ;;  %v309_v41 = vld [vmem:[%s6390_s16 + $0x288] sm:$0xff] }
  0x2c   : > { %268 = vst [vmem:[%s6395_s17 + $0xa0] sm:$0xff] %v267_v20  ;;  %v311_v42 = vld [vmem:[%s6390_s16 + $0x2a0] sm:$0xff]  ;;  %v313_v43 = vld [vmem:[%s6390_s16 + $0x2a8] sm:$0xff] }
  0x2d   : > { %270 = vst [vmem:[%s6395_s17 + $0xa8] sm:$0xff] %v269_v21  ;;  %v315_v44 = vld [vmem:[%s6390_s16 + $0x2c0] sm:$0xff]  ;;  %v317_v45 = vld [vmem:[%s6390_s16 + $0x2c8] sm:$0xff] }
  0x2e   : > { %272 = vst [vmem:[%s6395_s17 + $0xb0] sm:$0xff] %v271_v22  ;;  %v319_v46 = vld [vmem:[%s6390_s16 + $0x2e0] sm:$0xff]  ;;  %v321_v47 = vld [vmem:[%s6390_s16 + $0x2e8] sm:$0xff] }
  0x2f   : > { %274 = vst [vmem:[%s6395_s17 + $0xb8] sm:$0xff] %v273_v23  ;;  %v323_v48 = vld [vmem:[%s6390_s16 + $0x300] sm:$0xff]  ;;  %v325_v49 = vld [vmem:[%s6390_s16 + $0x308] sm:$0xff] }
  0x30   : > { %276 = vst [vmem:[%s6395_s17 + $0xc0] sm:$0xff] %v275_v24  ;;  %v327_v50 = vld [vmem:[%s6390_s16 + $0x320] sm:$0xff]  ;;  %v329_v51 = vld [vmem:[%s6390_s16 + $0x328] sm:$0xff] }
  0x31   : > { %278 = vst [vmem:[%s6395_s17 + $0xc8] sm:$0xff] %v277_v25  ;;  %v331_v52 = vld [vmem:[%s6390_s16 + $0x340] sm:$0xff]  ;;  %v333_v53 = vld [vmem:[%s6390_s16 + $0x348] sm:$0xff] }
  0x32   : > { %280 = vst [vmem:[%s6395_s17 + $0xd0] sm:$0xff] %v279_v26  ;;  %v335_v54 = vld [vmem:[%s6390_s16 + $0x360] sm:$0xff]  ;;  %v337_v55 = vld [vmem:[%s6390_s16 + $0x368] sm:$0xff] }
  0x33   : > { %282 = vst [vmem:[%s6395_s17 + $0xd8] sm:$0xff] %v281_v27  ;;  %v339_v56 = vld [vmem:[%s6390_s16 + $0x380] sm:$0xff]  ;;  %v341_v57 = vld [vmem:[%s6390_s16 + $0x388] sm:$0xff] }
  0x34   : > { %284 = vst [vmem:[%s6395_s17 + $0xe0] sm:$0xff] %v283_v28  ;;  %v343_v58 = vld [vmem:[%s6390_s16 + $0x3a0] sm:$0xff]  ;;  %v345_v59 = vld [vmem:[%s6390_s16 + $0x3a8] sm:$0xff] }
  0x35   : > { %286 = vst [vmem:[%s6395_s17 + $0xe8] sm:$0xff] %v285_v29  ;;  %v347_v60 = vld [vmem:[%s6390_s16 + $0x3c0] sm:$0xff]  ;;  %v349_v61 = vld [vmem:[%s6390_s16 + $0x3c8] sm:$0xff] }
  0x36   : > { %288 = vst [vmem:[%s6395_s17 + $0xf0] sm:$0xff] %v287_v30  ;;  %v351_v62 = vld [vmem:[%s6390_s16 + $0x3e0] sm:$0xff]  ;;  %v353_v63 = vld [vmem:[%s6390_s16 + $0x3e8] sm:$0xff] }
  0x37   : > { %290 = vst [vmem:[%s6395_s17 + $0xf8] sm:$0xff] %v289_v31  ;;  %v355_v0 = vld [vmem:[%s6390_s16 + $0x400] sm:$0xff]  ;;  %v357_v1 = vld [vmem:[%s6390_s16 + $0x408] sm:$0xff] }
  0x38   : > { %292 = vst [vmem:[%s6395_s17 + $0x100] sm:$0xff] %v291_v32  ;;  %v359_v2 = vld [vmem:[%s6390_s16 + $0x420] sm:$0xff]  ;;  %v361_v3 = vld [vmem:[%s6390_s16 + $0x428] sm:$0xff] }
  0x39   : > { %294 = vst [vmem:[%s6395_s17 + $0x108] sm:$0xff] %v293_v33  ;;  %v363_v4 = vld [vmem:[%s6390_s16 + $0x440] sm:$0xff]  ;;  %v365_v5 = vld [vmem:[%s6390_s16 + $0x448] sm:$0xff] }
  0x3a   : > { %296 = vst [vmem:[%s6395_s17 + $0x110] sm:$0xff] %v295_v34  ;;  %v367_v6 = vld [vmem:[%s6390_s16 + $0x460] sm:$0xff]  ;;  %v369_v7 = vld [vmem:[%s6390_s16 + $0x468] sm:$0xff] }
  0x3b   : > { %298 = vst [vmem:[%s6395_s17 + $0x118] sm:$0xff] %v297_v35  ;;  %v371_v8 = vld [vmem:[%s6390_s16 + $0x480] sm:$0xff]  ;;  %v373_v9 = vld [vmem:[%s6390_s16 + $0x488] sm:$0xff] }
  0x3c   : > { %300 = vst [vmem:[%s6395_s17 + $0x120] sm:$0xff] %v299_v36  ;;  %v375_v10 = vld [vmem:[%s6390_s16 + $0x4a0] sm:$0xff]  ;;  %v377_v11 = vld [vmem:[%s6390_s16 + $0x4a8] sm:$0xff] }
  0x3d   : > { %302 = vst [vmem:[%s6395_s17 + $0x128] sm:$0xff] %v301_v37  ;;  %v379_v12 = vld [vmem:[%s6390_s16 + $0x4c0] sm:$0xff]  ;;  %v381_v13 = vld [vmem:[%s6390_s16 + $0x4c8] sm:$0xff] }
  0x3e   : > { %304 = vst [vmem:[%s6395_s17 + $0x130] sm:$0xff] %v303_v38  ;;  %v383_v14 = vld [vmem:[%s6390_s16 + $0x4e0] sm:$0xff]  ;;  %v385_v15 = vld [vmem:[%s6390_s16 + $0x4e8] sm:$0xff] }
  0x3f   : > { %306 = vst [vmem:[%s6395_s17 + $0x138] sm:$0xff] %v305_v39  ;;  %v387_v16 = vld [vmem:[%s6390_s16 + $0x500] sm:$0xff]  ;;  %v389_v17 = vld [vmem:[%s6390_s16 + $0x508] sm:$0xff] }
  0x40   : > { %308 = vst [vmem:[%s6395_s17 + $0x140] sm:$0xff] %v307_v40  ;;  %v391_v18 = vld [vmem:[%s6390_s16 + $0x520] sm:$0xff]  ;;  %v393_v19 = vld [vmem:[%s6390_s16 + $0x528] sm:$0xff] }
  0x41   : > { %310 = vst [vmem:[%s6395_s17 + $0x148] sm:$0xff] %v309_v41  ;;  %v395_v20 = vld [vmem:[%s6390_s16 + $0x540] sm:$0xff]  ;;  %v397_v21 = vld [vmem:[%s6390_s16 + $0x548] sm:$0xff] }
  0x42   : > { %312 = vst [vmem:[%s6395_s17 + $0x150] sm:$0xff] %v311_v42  ;;  %v399_v22 = vld [vmem:[%s6390_s16 + $0x560] sm:$0xff]  ;;  %v401_v23 = vld [vmem:[%s6390_s16 + $0x568] sm:$0xff] }
  0x43   : > { %314 = vst [vmem:[%s6395_s17 + $0x158] sm:$0xff] %v313_v43  ;;  %v403_v24 = vld [vmem:[%s6390_s16 + $0x580] sm:$0xff]  ;;  %v405_v25 = vld [vmem:[%s6390_s16 + $0x588] sm:$0xff] }
  0x44   : > { %316 = vst [vmem:[%s6395_s17 + $0x160] sm:$0xff] %v315_v44  ;;  %v407_v26 = vld [vmem:[%s6390_s16 + $0x5a0] sm:$0xff]  ;;  %v409_v27 = vld [vmem:[%s6390_s16 + $0x5a8] sm:$0xff] }
  0x45   : > { %318 = vst [vmem:[%s6395_s17 + $0x168] sm:$0xff] %v317_v45  ;;  %v411_v28 = vld [vmem:[%s6390_s16 + $0x5c0] sm:$0xff]  ;;  %v413_v29 = vld [vmem:[%s6390_s16 + $0x5c8] sm:$0xff] }
  0x46   : > { %320 = vst [vmem:[%s6395_s17 + $0x170] sm:$0xff] %v319_v46  ;;  %v415_v30 = vld [vmem:[%s6390_s16 + $0x5e0] sm:$0xff]  ;;  %v417_v31 = vld [vmem:[%s6390_s16 + $0x5e8] sm:$0xff] }
  0x47   : > { %322 = vst [vmem:[%s6395_s17 + $0x178] sm:$0xff] %v321_v47  ;;  %v419_v32 = vld [vmem:[%s6390_s16 + $0x600] sm:$0xff]  ;;  %v421_v33 = vld [vmem:[%s6390_s16 + $0x608] sm:$0xff] }
  0x48   : > { %324 = vst [vmem:[%s6395_s17 + $0x180] sm:$0xff] %v323_v48  ;;  %v423_v34 = vld [vmem:[%s6390_s16 + $0x620] sm:$0xff]  ;;  %v425_v35 = vld [vmem:[%s6390_s16 + $0x628] sm:$0xff] }
  0x49   : > { %326 = vst [vmem:[%s6395_s17 + $0x188] sm:$0xff] %v325_v49  ;;  %v427_v36 = vld [vmem:[%s6390_s16 + $0x640] sm:$0xff]  ;;  %v429_v37 = vld [vmem:[%s6390_s16 + $0x648] sm:$0xff] }
  0x4a   : > { %328 = vst [vmem:[%s6395_s17 + $0x190] sm:$0xff] %v327_v50  ;;  %v431_v38 = vld [vmem:[%s6390_s16 + $0x660] sm:$0xff]  ;;  %v433_v39 = vld [vmem:[%s6390_s16 + $0x668] sm:$0xff] }
  0x4b   : > { %330 = vst [vmem:[%s6395_s17 + $0x198] sm:$0xff] %v329_v51  ;;  %v435_v40 = vld [vmem:[%s6390_s16 + $0x680] sm:$0xff]  ;;  %v437_v41 = vld [vmem:[%s6390_s16 + $0x688] sm:$0xff] }
  0x4c   : > { %332 = vst [vmem:[%s6395_s17 + $0x1a0] sm:$0xff] %v331_v52  ;;  %v439_v42 = vld [vmem:[%s6390_s16 + $0x6a0] sm:$0xff]  ;;  %v441_v43 = vld [vmem:[%s6390_s16 + $0x6a8] sm:$0xff] }
  0x4d   : > { %334 = vst [vmem:[%s6395_s17 + $0x1a8] sm:$0xff] %v333_v53  ;;  %v443_v44 = vld [vmem:[%s6390_s16 + $0x6c0] sm:$0xff]  ;;  %v445_v45 = vld [vmem:[%s6390_s16 + $0x6c8] sm:$0xff] }
  0x4e   : > { %336 = vst [vmem:[%s6395_s17 + $0x1b0] sm:$0xff] %v335_v54  ;;  %v447_v46 = vld [vmem:[%s6390_s16 + $0x6e0] sm:$0xff]  ;;  %v449_v47 = vld [vmem:[%s6390_s16 + $0x6e8] sm:$0xff] }
  0x4f   : > { %338 = vst [vmem:[%s6395_s17 + $0x1b8] sm:$0xff] %v337_v55  ;;  %v451_v48 = vld [vmem:[%s6390_s16 + $0x700] sm:$0xff]  ;;  %v453_v49 = vld [vmem:[%s6390_s16 + $0x708] sm:$0xff] }
  0x50   : > { %340 = vst [vmem:[%s6395_s17 + $0x1c0] sm:$0xff] %v339_v56  ;;  %v455_v50 = vld [vmem:[%s6390_s16 + $0x720] sm:$0xff]  ;;  %v457_v51 = vld [vmem:[%s6390_s16 + $0x728] sm:$0xff] }
  0x51   : > { %342 = vst [vmem:[%s6395_s17 + $0x1c8] sm:$0xff] %v341_v57  ;;  %v459_v52 = vld [vmem:[%s6390_s16 + $0x740] sm:$0xff]  ;;  %v461_v53 = vld [vmem:[%s6390_s16 + $0x748] sm:$0xff] }
  0x52   : > { %344 = vst [vmem:[%s6395_s17 + $0x1d0] sm:$0xff] %v343_v58  ;;  %v463_v54 = vld [vmem:[%s6390_s16 + $0x760] sm:$0xff]  ;;  %v465_v55 = vld [vmem:[%s6390_s16 + $0x768] sm:$0xff] }
  0x53   : > { %346 = vst [vmem:[%s6395_s17 + $0x1d8] sm:$0xff] %v345_v59  ;;  %v467_v56 = vld [vmem:[%s6390_s16 + $0x780] sm:$0xff]  ;;  %v469_v57 = vld [vmem:[%s6390_s16 + $0x788] sm:$0xff] }
  0x54   : > { %348 = vst [vmem:[%s6395_s17 + $0x1e0] sm:$0xff] %v347_v60  ;;  %v471_v58 = vld [vmem:[%s6390_s16 + $0x7a0] sm:$0xff]  ;;  %v473_v59 = vld [vmem:[%s6390_s16 + $0x7a8] sm:$0xff] }
  0x55   : > { %350 = vst [vmem:[%s6395_s17 + $0x1e8] sm:$0xff] %v349_v61  ;;  %v475_v60 = vld [vmem:[%s6390_s16 + $0x7c0] sm:$0xff]  ;;  %v477_v61 = vld [vmem:[%s6390_s16 + $0x7c8] sm:$0xff] }
  0x56   : > { %352 = vst [vmem:[%s6395_s17 + $0x1f0] sm:$0xff] %v351_v62  ;;  %v479_v62 = vld [vmem:[%s6390_s16 + $0x7e0] sm:$0xff] }
  0x57   : > { %354 = vst [vmem:[%s6395_s17 + $0x1f8] sm:$0xff] %v353_v63  ;;  %v481_v63 = vld [vmem:[%s6390_s16 + $0x7e8] sm:$0xff] }
  0x58   : > { %356 = vst [vmem:[%s6395_s17 + $0x200] sm:$0xff] %v355_v0  ;;  %v483_v0 = vld [vmem:[%s6390_s16 + $0x800] sm:$0xff] }
  0x59   : > { %358 = vst [vmem:[%s6395_s17 + $0x208] sm:$0xff] %v357_v1  ;;  %v485_v1 = vld [vmem:[%s6390_s16 + $0x808] sm:$0xff] }
  0x5a   : > { %360 = vst [vmem:[%s6395_s17 + $0x210] sm:$0xff] %v359_v2  ;;  %v487_v2 = vld [vmem:[%s6390_s16 + $0x820] sm:$0xff] }
  0x5b   : > { %362 = vst [vmem:[%s6395_s17 + $0x218] sm:$0xff] %v361_v3  ;;  %v489_v3 = vld [vmem:[%s6390_s16 + $0x828] sm:$0xff] }
  0x5c   : > { %364 = vst [vmem:[%s6395_s17 + $0x220] sm:$0xff] %v363_v4  ;;  %v491_v4 = vld [vmem:[%s6390_s16 + $0x840] sm:$0xff] }
  0x5d   : > { %366 = vst [vmem:[%s6395_s17 + $0x228] sm:$0xff] %v365_v5  ;;  %v493_v5 = vld [vmem:[%s6390_s16 + $0x848] sm:$0xff] }
  0x5e   : > { %368 = vst [vmem:[%s6395_s17 + $0x230] sm:$0xff] %v367_v6  ;;  %v495_v6 = vld [vmem:[%s6390_s16 + $0x860] sm:$0xff] }
  0x5f   : > { %370 = vst [vmem:[%s6395_s17 + $0x238] sm:$0xff] %v369_v7  ;;  %v497_v7 = vld [vmem:[%s6390_s16 + $0x868] sm:$0xff] }
  0x60   : > { %372 = vst [vmem:[%s6395_s17 + $0x240] sm:$0xff] %v371_v8  ;;  %v499_v8 = vld [vmem:[%s6390_s16 + $0x880] sm:$0xff] }
  0x61   : > { %374 = vst [vmem:[%s6395_s17 + $0x248] sm:$0xff] %v373_v9  ;;  %v501_v9 = vld [vmem:[%s6390_s16 + $0x888] sm:$0xff] }
  0x62   : > { %376 = vst [vmem:[%s6395_s17 + $0x250] sm:$0xff] %v375_v10  ;;  %v503_v10 = vld [vmem:[%s6390_s16 + $0x8a0] sm:$0xff] }
  0x63   : > { %378 = vst [vmem:[%s6395_s17 + $0x258] sm:$0xff] %v377_v11  ;;  %v505_v11 = vld [vmem:[%s6390_s16 + $0x8a8] sm:$0xff] }
  0x64   : > { %380 = vst [vmem:[%s6395_s17 + $0x260] sm:$0xff] %v379_v12  ;;  %v507_v12 = vld [vmem:[%s6390_s16 + $0x8c0] sm:$0xff] }
  0x65   : > { %382 = vst [vmem:[%s6395_s17 + $0x268] sm:$0xff] %v381_v13  ;;  %v509_v13 = vld [vmem:[%s6390_s16 + $0x8c8] sm:$0xff] }
  0x66   : > { %384 = vst [vmem:[%s6395_s17 + $0x270] sm:$0xff] %v383_v14  ;;  %v511_v14 = vld [vmem:[%s6390_s16 + $0x8e0] sm:$0xff] }
  0x67   : > { %386 = vst [vmem:[%s6395_s17 + $0x278] sm:$0xff] %v385_v15  ;;  %v513_v15 = vld [vmem:[%s6390_s16 + $0x8e8] sm:$0xff] }
  0x68   : > { %388 = vst [vmem:[%s6395_s17 + $0x280] sm:$0xff] %v387_v16  ;;  %v515_v16 = vld [vmem:[%s6390_s16 + $0x900] sm:$0xff] }
  0x69   : > { %390 = vst [vmem:[%s6395_s17 + $0x288] sm:$0xff] %v389_v17  ;;  %v517_v17 = vld [vmem:[%s6390_s16 + $0x908] sm:$0xff] }
  0x6a   : > { %392 = vst [vmem:[%s6395_s17 + $0x290] sm:$0xff] %v391_v18  ;;  %v519_v18 = vld [vmem:[%s6390_s16 + $0x920] sm:$0xff] }
  0x6b   : > { %394 = vst [vmem:[%s6395_s17 + $0x298] sm:$0xff] %v393_v19  ;;  %v521_v19 = vld [vmem:[%s6390_s16 + $0x928] sm:$0xff] }
  0x6c   : > { %396 = vst [vmem:[%s6395_s17 + $0x2a0] sm:$0xff] %v395_v20  ;;  %v523_v20 = vld [vmem:[%s6390_s16 + $0x940] sm:$0xff] }
  0x6d   : > { %398 = vst [vmem:[%s6395_s17 + $0x2a8] sm:$0xff] %v397_v21  ;;  %v525_v21 = vld [vmem:[%s6390_s16 + $0x948] sm:$0xff] }
  0x6e   : > { %400 = vst [vmem:[%s6395_s17 + $0x2b0] sm:$0xff] %v399_v22  ;;  %v527_v22 = vld [vmem:[%s6390_s16 + $0x960] sm:$0xff] }
  0x6f   : > { %402 = vst [vmem:[%s6395_s17 + $0x2b8] sm:$0xff] %v401_v23  ;;  %v529_v23 = vld [vmem:[%s6390_s16 + $0x968] sm:$0xff] }
  0x70   : > { %404 = vst [vmem:[%s6395_s17 + $0x2c0] sm:$0xff] %v403_v24  ;;  %v531_v24 = vld [vmem:[%s6390_s16 + $0x980] sm:$0xff] }
  0x71   : > { %406 = vst [vmem:[%s6395_s17 + $0x2c8] sm:$0xff] %v405_v25  ;;  %v533_v25 = vld [vmem:[%s6390_s16 + $0x988] sm:$0xff] }
  0x72   : > { %408 = vst [vmem:[%s6395_s17 + $0x2d0] sm:$0xff] %v407_v26  ;;  %v535_v26 = vld [vmem:[%s6390_s16 + $0x9a0] sm:$0xff] }
  0x73   : > { %410 = vst [vmem:[%s6395_s17 + $0x2d8] sm:$0xff] %v409_v27  ;;  %v537_v27 = vld [vmem:[%s6390_s16 + $0x9a8] sm:$0xff] }
  0x74   : > { %412 = vst [vmem:[%s6395_s17 + $0x2e0] sm:$0xff] %v411_v28  ;;  %v539_v28 = vld [vmem:[%s6390_s16 + $0x9c0] sm:$0xff] }
  0x75   : > { %414 = vst [vmem:[%s6395_s17 + $0x2e8] sm:$0xff] %v413_v29  ;;  %v541_v29 = vld [vmem:[%s6390_s16 + $0x9c8] sm:$0xff] }
  0x76   : > { %416 = vst [vmem:[%s6395_s17 + $0x2f0] sm:$0xff] %v415_v30  ;;  %v543_v30 = vld [vmem:[%s6390_s16 + $0x9e0] sm:$0xff] }
  0x77   : > { %418 = vst [vmem:[%s6395_s17 + $0x2f8] sm:$0xff] %v417_v31  ;;  %v545_v31 = vld [vmem:[%s6390_s16 + $0x9e8] sm:$0xff] }
  0x78   : > { %420 = vst [vmem:[%s6395_s17 + $0x300] sm:$0xff] %v419_v32  ;;  %v547_v32 = vld [vmem:[%s6390_s16 + $0xa00] sm:$0xff] }
  0x79   : > { %422 = vst [vmem:[%s6395_s17 + $0x308] sm:$0xff] %v421_v33  ;;  %v549_v33 = vld [vmem:[%s6390_s16 + $0xa08] sm:$0xff] }
  0x7a   : > { %424 = vst [vmem:[%s6395_s17 + $0x310] sm:$0xff] %v423_v34  ;;  %v551_v34 = vld [vmem:[%s6390_s16 + $0xa20] sm:$0xff] }
  0x7b   : > { %426 = vst [vmem:[%s6395_s17 + $0x318] sm:$0xff] %v425_v35  ;;  %v553_v35 = vld [vmem:[%s6390_s16 + $0xa28] sm:$0xff] }
  0x7c   : > { %428 = vst [vmem:[%s6395_s17 + $0x320] sm:$0xff] %v427_v36  ;;  %v555_v36 = vld [vmem:[%s6390_s16 + $0xa40] sm:$0xff] }
  0x7d   : > { %430 = vst [vmem:[%s6395_s17 + $0x328] sm:$0xff] %v429_v37  ;;  %v557_v37 = vld [vmem:[%s6390_s16 + $0xa48] sm:$0xff] }
  0x7e   : > { %432 = vst [vmem:[%s6395_s17 + $0x330] sm:$0xff] %v431_v38  ;;  %v559_v38 = vld [vmem:[%s6390_s16 + $0xa60] sm:$0xff] }
  0x7f   : > { %434 = vst [vmem:[%s6395_s17 + $0x338] sm:$0xff] %v433_v39  ;;  %v561_v39 = vld [vmem:[%s6390_s16 + $0xa68] sm:$0xff] }
  0x80   : > { %436 = vst [vmem:[%s6395_s17 + $0x340] sm:$0xff] %v435_v40  ;;  %v563_v40 = vld [vmem:[%s6390_s16 + $0xa80] sm:$0xff] }
  0x81   : > { %438 = vst [vmem:[%s6395_s17 + $0x348] sm:$0xff] %v437_v41  ;;  %v565_v41 = vld [vmem:[%s6390_s16 + $0xa88] sm:$0xff] }
  0x82   : > { %440 = vst [vmem:[%s6395_s17 + $0x350] sm:$0xff] %v439_v42  ;;  %v567_v42 = vld [vmem:[%s6390_s16 + $0xaa0] sm:$0xff] }
  0x83   : > { %442 = vst [vmem:[%s6395_s17 + $0x358] sm:$0xff] %v441_v43  ;;  %v569_v43 = vld [vmem:[%s6390_s16 + $0xaa8] sm:$0xff] }
  0x84   : > { %444 = vst [vmem:[%s6395_s17 + $0x360] sm:$0xff] %v443_v44  ;;  %v571_v44 = vld [vmem:[%s6390_s16 + $0xac0] sm:$0xff] }
  0x85   : > { %446 = vst [vmem:[%s6395_s17 + $0x368] sm:$0xff] %v445_v45  ;;  %v573_v45 = vld [vmem:[%s6390_s16 + $0xac8] sm:$0xff] }
  0x86   : > { %448 = vst [vmem:[%s6395_s17 + $0x370] sm:$0xff] %v447_v46  ;;  %v575_v46 = vld [vmem:[%s6390_s16 + $0xae0] sm:$0xff] }
  0x87   : > { %450 = vst [vmem:[%s6395_s17 + $0x378] sm:$0xff] %v449_v47  ;;  %v577_v47 = vld [vmem:[%s6390_s16 + $0xae8] sm:$0xff] }
  0x88   : > { %452 = vst [vmem:[%s6395_s17 + $0x380] sm:$0xff] %v451_v48  ;;  %v579_v48 = vld [vmem:[%s6390_s16 + $0xb00] sm:$0xff] }
  0x89   : > { %454 = vst [vmem:[%s6395_s17 + $0x388] sm:$0xff] %v453_v49  ;;  %v581_v49 = vld [vmem:[%s6390_s16 + $0xb08] sm:$0xff] }
  0x8a   : > { %456 = vst [vmem:[%s6395_s17 + $0x390] sm:$0xff] %v455_v50  ;;  %v583_v50 = vld [vmem:[%s6390_s16 + $0xb20] sm:$0xff] }
  0x8b   : > { %458 = vst [vmem:[%s6395_s17 + $0x398] sm:$0xff] %v457_v51  ;;  %v585_v51 = vld [vmem:[%s6390_s16 + $0xb28] sm:$0xff] }
  0x8c   : > { %460 = vst [vmem:[%s6395_s17 + $0x3a0] sm:$0xff] %v459_v52  ;;  %v587_v52 = vld [vmem:[%s6390_s16 + $0xb40] sm:$0xff] }
  0x8d   : > { %462 = vst [vmem:[%s6395_s17 + $0x3a8] sm:$0xff] %v461_v53  ;;  %v589_v53 = vld [vmem:[%s6390_s16 + $0xb48] sm:$0xff] }
  0x8e   : > { %464 = vst [vmem:[%s6395_s17 + $0x3b0] sm:$0xff] %v463_v54  ;;  %v591_v54 = vld [vmem:[%s6390_s16 + $0xb60] sm:$0xff] }
  0x8f   : > { %466 = vst [vmem:[%s6395_s17 + $0x3b8] sm:$0xff] %v465_v55  ;;  %v593_v55 = vld [vmem:[%s6390_s16 + $0xb68] sm:$0xff] }
  0x90   : > { %468 = vst [vmem:[%s6395_s17 + $0x3c0] sm:$0xff] %v467_v56  ;;  %v595_v56 = vld [vmem:[%s6390_s16 + $0xb80] sm:$0xff] }
  0x91   : > { %470 = vst [vmem:[%s6395_s17 + $0x3c8] sm:$0xff] %v469_v57  ;;  %v597_v57 = vld [vmem:[%s6390_s16 + $0xb88] sm:$0xff] }
  0x92   : > { %472 = vst [vmem:[%s6395_s17 + $0x3d0] sm:$0xff] %v471_v58  ;;  %v599_v58 = vld [vmem:[%s6390_s16 + $0xba0] sm:$0xff] }
  0x93   : > { %474 = vst [vmem:[%s6395_s17 + $0x3d8] sm:$0xff] %v473_v59  ;;  %v601_v59 = vld [vmem:[%s6390_s16 + $0xba8] sm:$0xff] }
  0x94   : > { %476 = vst [vmem:[%s6395_s17 + $0x3e0] sm:$0xff] %v475_v60  ;;  %v603_v60 = vld [vmem:[%s6390_s16 + $0xbc0] sm:$0xff] }
  0x95   : > { %478 = vst [vmem:[%s6395_s17 + $0x3e8] sm:$0xff] %v477_v61  ;;  %v605_v61 = vld [vmem:[%s6390_s16 + $0xbc8] sm:$0xff] }
  0x96   : > { %480 = vst [vmem:[%s6395_s17 + $0x3f0] sm:$0xff] %v479_v62  ;;  %v607_v62 = vld [vmem:[%s6390_s16 + $0xbe0] sm:$0xff] }
  0x97   : > { %482 = vst [vmem:[%s6395_s17 + $0x3f8] sm:$0xff] %v481_v63  ;;  %v609_v63 = vld [vmem:[%s6390_s16 + $0xbe8] sm:$0xff] }
  0x98   : > { %484 = vst [vmem:[%s6395_s17 + $0x400] sm:$0xff] %v483_v0 }
  0x99   : > { %486 = vst [vmem:[%s6395_s17 + $0x408] sm:$0xff] %v485_v1 }
  0x9a   : > { %488 = vst [vmem:[%s6395_s17 + $0x410] sm:$0xff] %v487_v2 }
  0x9b   : > { %490 = vst [vmem:[%s6395_s17 + $0x418] sm:$0xff] %v489_v3 }
  0x9c   : > { %492 = vst [vmem:[%s6395_s17 + $0x420] sm:$0xff] %v491_v4 }
  0x9d   : > { %494 = vst [vmem:[%s6395_s17 + $0x428] sm:$0xff] %v493_v5 }
  0x9e   : > { %496 = vst [vmem:[%s6395_s17 + $0x430] sm:$0xff] %v495_v6 }
  0x9f   : > { %498 = vst [vmem:[%s6395_s17 + $0x438] sm:$0xff] %v497_v7 }
  0xa0   : > { %500 = vst [vmem:[%s6395_s17 + $0x440] sm:$0xff] %v499_v8 }
  0xa1   : > { %502 = vst [vmem:[%s6395_s17 + $0x448] sm:$0xff] %v501_v9 }
  0xa2   : > { %504 = vst [vmem:[%s6395_s17 + $0x450] sm:$0xff] %v503_v10 }
  0xa3   : > { %506 = vst [vmem:[%s6395_s17 + $0x458] sm:$0xff] %v505_v11 }
  0xa4   : > { %508 = vst [vmem:[%s6395_s17 + $0x460] sm:$0xff] %v507_v12 }
  0xa5   : > { %510 = vst [vmem:[%s6395_s17 + $0x468] sm:$0xff] %v509_v13 }
  0xa6   : > { %512 = vst [vmem:[%s6395_s17 + $0x470] sm:$0xff] %v511_v14 }
  0xa7   : > { %514 = vst [vmem:[%s6395_s17 + $0x478] sm:$0xff] %v513_v15 }
  0xa8   : > { %516 = vst [vmem:[%s6395_s17 + $0x480] sm:$0xff] %v515_v16 }
  0xa9   : > { %518 = vst [vmem:[%s6395_s17 + $0x488] sm:$0xff] %v517_v17 }
  0xaa   : > { %520 = vst [vmem:[%s6395_s17 + $0x490] sm:$0xff] %v519_v18 }
  0xab   : > { %522 = vst [vmem:[%s6395_s17 + $0x498] sm:$0xff] %v521_v19 }
  0xac   : > { %524 = vst [vmem:[%s6395_s17 + $0x4a0] sm:$0xff] %v523_v20 }
  0xad   : > { %526 = vst [vmem:[%s6395_s17 + $0x4a8] sm:$0xff] %v525_v21 }
  0xae   : > { %528 = vst [vmem:[%s6395_s17 + $0x4b0] sm:$0xff] %v527_v22 }
  0xaf   : > { %530 = vst [vmem:[%s6395_s17 + $0x4b8] sm:$0xff] %v529_v23 }
  0xb0   : > { %532 = vst [vmem:[%s6395_s17 + $0x4c0] sm:$0xff] %v531_v24 }
  0xb1   : > { %534 = vst [vmem:[%s6395_s17 + $0x4c8] sm:$0xff] %v533_v25 }
  0xb2   : > { %536 = vst [vmem:[%s6395_s17 + $0x4d0] sm:$0xff] %v535_v26 }
  0xb3   : > { %538 = vst [vmem:[%s6395_s17 + $0x4d8] sm:$0xff] %v537_v27 }
  0xb4   : > { %540 = vst [vmem:[%s6395_s17 + $0x4e0] sm:$0xff] %v539_v28 }
  0xb5   : > { %542 = vst [vmem:[%s6395_s17 + $0x4e8] sm:$0xff] %v541_v29 }
  0xb6   : > { %544 = vst [vmem:[%s6395_s17 + $0x4f0] sm:$0xff] %v543_v30 }
  0xb7   : > { %546 = vst [vmem:[%s6395_s17 + $0x4f8] sm:$0xff] %v545_v31 }
  0xb8   : > { %548 = vst [vmem:[%s6395_s17 + $0x500] sm:$0xff] %v547_v32 }
  0xb9   : > { %550 = vst [vmem:[%s6395_s17 + $0x508] sm:$0xff] %v549_v33 }
  0xba   : > { %552 = vst [vmem:[%s6395_s17 + $0x510] sm:$0xff] %v551_v34 }
  0xbb   : > { %554 = vst [vmem:[%s6395_s17 + $0x518] sm:$0xff] %v553_v35 }
  0xbc   : > { %556 = vst [vmem:[%s6395_s17 + $0x520] sm:$0xff] %v555_v36 }
  0xbd   : > { %558 = vst [vmem:[%s6395_s17 + $0x528] sm:$0xff] %v557_v37 }
  0xbe   : > { %560 = vst [vmem:[%s6395_s17 + $0x530] sm:$0xff] %v559_v38 }
  0xbf   : > { %562 = vst [vmem:[%s6395_s17 + $0x538] sm:$0xff] %v561_v39 }
  0xc0   : > { %564 = vst [vmem:[%s6395_s17 + $0x540] sm:$0xff] %v563_v40 }
  0xc1   : > { %566 = vst [vmem:[%s6395_s17 + $0x548] sm:$0xff] %v565_v41 }
  0xc2   : > { %568 = vst [vmem:[%s6395_s17 + $0x550] sm:$0xff] %v567_v42 }
  0xc3   : > { %570 = vst [vmem:[%s6395_s17 + $0x558] sm:$0xff] %v569_v43 }
  0xc4   : > { %572 = vst [vmem:[%s6395_s17 + $0x560] sm:$0xff] %v571_v44 }
  0xc5   : > { %574 = vst [vmem:[%s6395_s17 + $0x568] sm:$0xff] %v573_v45 }
  0xc6   : > { %576 = vst [vmem:[%s6395_s17 + $0x570] sm:$0xff] %v575_v46 }
  0xc7   : > { %578 = vst [vmem:[%s6395_s17 + $0x578] sm:$0xff] %v577_v47 }
  0xc8   : > { %580 = vst [vmem:[%s6395_s17 + $0x580] sm:$0xff] %v579_v48 }
  0xc9   : > { %582 = vst [vmem:[%s6395_s17 + $0x588] sm:$0xff] %v581_v49 }
  0xca   : > { %584 = vst [vmem:[%s6395_s17 + $0x590] sm:$0xff] %v583_v50 }
  0xcb   : > { %586 = vst [vmem:[%s6395_s17 + $0x598] sm:$0xff] %v585_v51 }
  0xcc   : > { %588 = vst [vmem:[%s6395_s17 + $0x5a0] sm:$0xff] %v587_v52 }
  0xcd   : > { %590 = vst [vmem:[%s6395_s17 + $0x5a8] sm:$0xff] %v589_v53 }
  0xce   : > { %592 = vst [vmem:[%s6395_s17 + $0x5b0] sm:$0xff] %v591_v54 }
  0xcf   : > { %594 = vst [vmem:[%s6395_s17 + $0x5b8] sm:$0xff] %v593_v55 }
  0xd0   : > { %596 = vst [vmem:[%s6395_s17 + $0x5c0] sm:$0xff] %v595_v56 }
  0xd1   : > { %598 = vst [vmem:[%s6395_s17 + $0x5c8] sm:$0xff] %v597_v57 }
  0xd2   : > { %600 = vst [vmem:[%s6395_s17 + $0x5d0] sm:$0xff] %v599_v58 }
  0xd3   : > { %602 = vst [vmem:[%s6395_s17 + $0x5d8] sm:$0xff] %v601_v59 }
  0xd4   : > { %604 = vst [vmem:[%s6395_s17 + $0x5e0] sm:$0xff] %v603_v60 }
  0xd5   : > { %606 = vst [vmem:[%s6395_s17 + $0x5e8] sm:$0xff] %v605_v61 }
  0xd6   : > { %608 = vst [vmem:[%s6395_s17 + $0x5f0] sm:$0xff] %v607_v62 }
  0xd7   : > { %610 = vst [vmem:[%s6395_s17 + $0x5f8] sm:$0xff] %v609_v63 }
  0xd8 PF: > { %616 = sbr.rel (!%p6367_p3) target bundleno = 416 (0x1a0), region = 47  ;;  %s618_s28 = sand.u32 (%p6367_p3), 1, %s6271_s19  }
  0xd9   : > { %s5360_s29 = smul.u32 (%p6367_p3), 1536, %s618_s28  ;;  %s5338_s30 = sshll.u32 (%p6367_p3), %s6287_s23, 1 }
  0xda   : > { %s5357_s6 = smul.u32 (%p6367_p3), 384, %s6283_s22 }
  0xdb   : > { %s6791_s13 = scalar_lea.vmem (%p6367_p3), [#allocation4], %s5360_s29 }
  0xdc   : > { %s624_s8 = sadd.s32 (%p6367_p3), %s5357_s6, %s5338_s30 }
  0xdd   : > { %s5340_s9 = sshll.u32 %s624_s8, 3 }
  0xde   : > { %s6786_s12 = scalar_lea.vmem %s11269_s2, %s5340_s9 }
  0xdf   : > { %v639_v0 = vld [vmem:[%s6786_s12] sm:$0xff]  ;;  %v641_v1 = vld [vmem:[%s6786_s12 + $0x8] sm:$0xff] }
  0xe0   : > { %v643_v2 = vld [vmem:[%s6786_s12 + $0x20] sm:$0xff]  ;;  %640 = vst [vmem:[%s6791_s13] sm:$0xff] %v639_v0  ;;  %v645_v3 = vld [vmem:[%s6786_s12 + $0x28] sm:$0xff] }
  0xe1   : > { %642 = vst [vmem:[%s6791_s13 + $0x8] sm:$0xff] %v641_v1  ;;  %v647_v4 = vld [vmem:[%s6786_s12 + $0x40] sm:$0xff]  ;;  %v649_v5 = vld [vmem:[%s6786_s12 + $0x48] sm:$0xff] }
  0xe2   : > { %644 = vst [vmem:[%s6791_s13 + $0x10] sm:$0xff] %v643_v2  ;;  %v651_v6 = vld [vmem:[%s6786_s12 + $0x60] sm:$0xff]  ;;  %v653_v7 = vld [vmem:[%s6786_s12 + $0x68] sm:$0xff] }
  0xe3   : > { %646 = vst [vmem:[%s6791_s13 + $0x18] sm:$0xff] %v645_v3  ;;  %v655_v8 = vld [vmem:[%s6786_s12 + $0x80] sm:$0xff]  ;;  %v657_v9 = vld [vmem:[%s6786_s12 + $0x88] sm:$0xff] }
  0xe4   : > { %648 = vst [vmem:[%s6791_s13 + $0x20] sm:$0xff] %v647_v4  ;;  %v659_v10 = vld [vmem:[%s6786_s12 + $0xa0] sm:$0xff]  ;;  %v661_v11 = vld [vmem:[%s6786_s12 + $0xa8] sm:$0xff] }
  0xe5   : > { %650 = vst [vmem:[%s6791_s13 + $0x28] sm:$0xff] %v649_v5  ;;  %v663_v12 = vld [vmem:[%s6786_s12 + $0xc0] sm:$0xff]  ;;  %v665_v13 = vld [vmem:[%s6786_s12 + $0xc8] sm:$0xff] }
  0xe6   : > { %652 = vst [vmem:[%s6791_s13 + $0x30] sm:$0xff] %v651_v6  ;;  %v667_v14 = vld [vmem:[%s6786_s12 + $0xe0] sm:$0xff]  ;;  %v669_v15 = vld [vmem:[%s6786_s12 + $0xe8] sm:$0xff] }
  0xe7   : > { %654 = vst [vmem:[%s6791_s13 + $0x38] sm:$0xff] %v653_v7  ;;  %v671_v16 = vld [vmem:[%s6786_s12 + $0x100] sm:$0xff]  ;;  %v673_v17 = vld [vmem:[%s6786_s12 + $0x108] sm:$0xff] }
  0xe8   : > { %656 = vst [vmem:[%s6791_s13 + $0x40] sm:$0xff] %v655_v8  ;;  %v675_v18 = vld [vmem:[%s6786_s12 + $0x120] sm:$0xff]  ;;  %v677_v19 = vld [vmem:[%s6786_s12 + $0x128] sm:$0xff] }
  0xe9   : > { %658 = vst [vmem:[%s6791_s13 + $0x48] sm:$0xff] %v657_v9  ;;  %v679_v20 = vld [vmem:[%s6786_s12 + $0x140] sm:$0xff]  ;;  %v681_v21 = vld [vmem:[%s6786_s12 + $0x148] sm:$0xff] }
  0xea   : > { %660 = vst [vmem:[%s6791_s13 + $0x50] sm:$0xff] %v659_v10  ;;  %v683_v22 = vld [vmem:[%s6786_s12 + $0x160] sm:$0xff]  ;;  %v685_v23 = vld [vmem:[%s6786_s12 + $0x168] sm:$0xff] }
  0xeb   : > { %662 = vst [vmem:[%s6791_s13 + $0x58] sm:$0xff] %v661_v11  ;;  %v687_v24 = vld [vmem:[%s6786_s12 + $0x180] sm:$0xff]  ;;  %v689_v25 = vld [vmem:[%s6786_s12 + $0x188] sm:$0xff] }
  0xec   : > { %664 = vst [vmem:[%s6791_s13 + $0x60] sm:$0xff] %v663_v12  ;;  %v691_v26 = vld [vmem:[%s6786_s12 + $0x1a0] sm:$0xff]  ;;  %v693_v27 = vld [vmem:[%s6786_s12 + $0x1a8] sm:$0xff] }
  0xed   : > { %666 = vst [vmem:[%s6791_s13 + $0x68] sm:$0xff] %v665_v13  ;;  %v695_v28 = vld [vmem:[%s6786_s12 + $0x1c0] sm:$0xff]  ;;  %v697_v29 = vld [vmem:[%s6786_s12 + $0x1c8] sm:$0xff] }
  0xee   : > { %668 = vst [vmem:[%s6791_s13 + $0x70] sm:$0xff] %v667_v14  ;;  %v699_v30 = vld [vmem:[%s6786_s12 + $0x1e0] sm:$0xff]  ;;  %v701_v31 = vld [vmem:[%s6786_s12 + $0x1e8] sm:$0xff] }
  0xef   : > { %670 = vst [vmem:[%s6791_s13 + $0x78] sm:$0xff] %v669_v15  ;;  %v703_v32 = vld [vmem:[%s6786_s12 + $0x200] sm:$0xff]  ;;  %v705_v33 = vld [vmem:[%s6786_s12 + $0x208] sm:$0xff] }
  0xf0   : > { %672 = vst [vmem:[%s6791_s13 + $0x80] sm:$0xff] %v671_v16  ;;  %v707_v34 = vld [vmem:[%s6786_s12 + $0x220] sm:$0xff]  ;;  %v709_v35 = vld [vmem:[%s6786_s12 + $0x228] sm:$0xff] }
  0xf1   : > { %674 = vst [vmem:[%s6791_s13 + $0x88] sm:$0xff] %v673_v17  ;;  %v711_v36 = vld [vmem:[%s6786_s12 + $0x240] sm:$0xff]  ;;  %v713_v37 = vld [vmem:[%s6786_s12 + $0x248] sm:$0xff] }
  0xf2   : > { %676 = vst [vmem:[%s6791_s13 + $0x90] sm:$0xff] %v675_v18  ;;  %v715_v38 = vld [vmem:[%s6786_s12 + $0x260] sm:$0xff]  ;;  %v717_v39 = vld [vmem:[%s6786_s12 + $0x268] sm:$0xff] }
  0xf3   : > { %678 = vst [vmem:[%s6791_s13 + $0x98] sm:$0xff] %v677_v19  ;;  %v719_v40 = vld [vmem:[%s6786_s12 + $0x280] sm:$0xff]  ;;  %v721_v41 = vld [vmem:[%s6786_s12 + $0x288] sm:$0xff] }
  0xf4   : > { %680 = vst [vmem:[%s6791_s13 + $0xa0] sm:$0xff] %v679_v20  ;;  %v723_v42 = vld [vmem:[%s6786_s12 + $0x2a0] sm:$0xff]  ;;  %v725_v43 = vld [vmem:[%s6786_s12 + $0x2a8] sm:$0xff] }
  0xf5   : > { %682 = vst [vmem:[%s6791_s13 + $0xa8] sm:$0xff] %v681_v21  ;;  %v727_v44 = vld [vmem:[%s6786_s12 + $0x2c0] sm:$0xff]  ;;  %v729_v45 = vld [vmem:[%s6786_s12 + $0x2c8] sm:$0xff] }
  0xf6   : > { %684 = vst [vmem:[%s6791_s13 + $0xb0] sm:$0xff] %v683_v22  ;;  %v731_v46 = vld [vmem:[%s6786_s12 + $0x2e0] sm:$0xff]  ;;  %v733_v47 = vld [vmem:[%s6786_s12 + $0x2e8] sm:$0xff] }
  0xf7   : > { %686 = vst [vmem:[%s6791_s13 + $0xb8] sm:$0xff] %v685_v23  ;;  %v735_v48 = vld [vmem:[%s6786_s12 + $0x300] sm:$0xff]  ;;  %v737_v49 = vld [vmem:[%s6786_s12 + $0x308] sm:$0xff] }
  0xf8   : > { %688 = vst [vmem:[%s6791_s13 + $0xc0] sm:$0xff] %v687_v24  ;;  %v739_v50 = vld [vmem:[%s6786_s12 + $0x320] sm:$0xff]  ;;  %v741_v51 = vld [vmem:[%s6786_s12 + $0x328] sm:$0xff] }
  0xf9   : > { %690 = vst [vmem:[%s6791_s13 + $0xc8] sm:$0xff] %v689_v25  ;;  %v743_v52 = vld [vmem:[%s6786_s12 + $0x340] sm:$0xff]  ;;  %v745_v53 = vld [vmem:[%s6786_s12 + $0x348] sm:$0xff] }
  0xfa   : > { %692 = vst [vmem:[%s6791_s13 + $0xd0] sm:$0xff] %v691_v26  ;;  %v747_v54 = vld [vmem:[%s6786_s12 + $0x360] sm:$0xff]  ;;  %v749_v55 = vld [vmem:[%s6786_s12 + $0x368] sm:$0xff] }
  0xfb   : > { %694 = vst [vmem:[%s6791_s13 + $0xd8] sm:$0xff] %v693_v27  ;;  %v751_v56 = vld [vmem:[%s6786_s12 + $0x380] sm:$0xff]  ;;  %v753_v57 = vld [vmem:[%s6786_s12 + $0x388] sm:$0xff] }
  0xfc   : > { %696 = vst [vmem:[%s6791_s13 + $0xe0] sm:$0xff] %v695_v28  ;;  %v755_v58 = vld [vmem:[%s6786_s12 + $0x3a0] sm:$0xff]  ;;  %v757_v59 = vld [vmem:[%s6786_s12 + $0x3a8] sm:$0xff] }
  0xfd   : > { %698 = vst [vmem:[%s6791_s13 + $0xe8] sm:$0xff] %v697_v29  ;;  %v759_v60 = vld [vmem:[%s6786_s12 + $0x3c0] sm:$0xff]  ;;  %v761_v61 = vld [vmem:[%s6786_s12 + $0x3c8] sm:$0xff] }
  0xfe   : > { %700 = vst [vmem:[%s6791_s13 + $0xf0] sm:$0xff] %v699_v30  ;;  %v763_v62 = vld [vmem:[%s6786_s12 + $0x3e0] sm:$0xff]  ;;  %v765_v63 = vld [vmem:[%s6786_s12 + $0x3e8] sm:$0xff] }
  0xff   : > { %702 = vst [vmem:[%s6791_s13 + $0xf8] sm:$0xff] %v701_v31  ;;  %v767_v0 = vld [vmem:[%s6786_s12 + $0x400] sm:$0xff]  ;;  %v769_v1 = vld [vmem:[%s6786_s12 + $0x408] sm:$0xff] }
 0x100   : > { %704 = vst [vmem:[%s6791_s13 + $0x100] sm:$0xff] %v703_v32  ;;  %v771_v2 = vld [vmem:[%s6786_s12 + $0x420] sm:$0xff]  ;;  %v773_v3 = vld [vmem:[%s6786_s12 + $0x428] sm:$0xff] }
 0x101   : > { %706 = vst [vmem:[%s6791_s13 + $0x108] sm:$0xff] %v705_v33  ;;  %v775_v4 = vld [vmem:[%s6786_s12 + $0x440] sm:$0xff]  ;;  %v777_v5 = vld [vmem:[%s6786_s12 + $0x448] sm:$0xff] }
 0x102   : > { %708 = vst [vmem:[%s6791_s13 + $0x110] sm:$0xff] %v707_v34  ;;  %v779_v6 = vld [vmem:[%s6786_s12 + $0x460] sm:$0xff]  ;;  %v781_v7 = vld [vmem:[%s6786_s12 + $0x468] sm:$0xff] }
 0x103   : > { %710 = vst [vmem:[%s6791_s13 + $0x118] sm:$0xff] %v709_v35  ;;  %v783_v8 = vld [vmem:[%s6786_s12 + $0x480] sm:$0xff]  ;;  %v785_v9 = vld [vmem:[%s6786_s12 + $0x488] sm:$0xff] }
 0x104   : > { %712 = vst [vmem:[%s6791_s13 + $0x120] sm:$0xff] %v711_v36  ;;  %v787_v10 = vld [vmem:[%s6786_s12 + $0x4a0] sm:$0xff]  ;;  %v789_v11 = vld [vmem:[%s6786_s12 + $0x4a8] sm:$0xff] }
 0x105   : > { %714 = vst [vmem:[%s6791_s13 + $0x128] sm:$0xff] %v713_v37  ;;  %v791_v12 = vld [vmem:[%s6786_s12 + $0x4c0] sm:$0xff]  ;;  %v793_v13 = vld [vmem:[%s6786_s12 + $0x4c8] sm:$0xff] }
 0x106   : > { %716 = vst [vmem:[%s6791_s13 + $0x130] sm:$0xff] %v715_v38  ;;  %v795_v14 = vld [vmem:[%s6786_s12 + $0x4e0] sm:$0xff]  ;;  %v797_v15 = vld [vmem:[%s6786_s12 + $0x4e8] sm:$0xff] }
 0x107   : > { %718 = vst [vmem:[%s6791_s13 + $0x138] sm:$0xff] %v717_v39  ;;  %v799_v16 = vld [vmem:[%s6786_s12 + $0x500] sm:$0xff]  ;;  %v801_v17 = vld [vmem:[%s6786_s12 + $0x508] sm:$0xff] }
 0x108   : > { %720 = vst [vmem:[%s6791_s13 + $0x140] sm:$0xff] %v719_v40  ;;  %v803_v18 = vld [vmem:[%s6786_s12 + $0x520] sm:$0xff]  ;;  %v805_v19 = vld [vmem:[%s6786_s12 + $0x528] sm:$0xff] }
 0x109   : > { %722 = vst [vmem:[%s6791_s13 + $0x148] sm:$0xff] %v721_v41  ;;  %v807_v20 = vld [vmem:[%s6786_s12 + $0x540] sm:$0xff]  ;;  %v809_v21 = vld [vmem:[%s6786_s12 + $0x548] sm:$0xff] }
 0x10a   : > { %724 = vst [vmem:[%s6791_s13 + $0x150] sm:$0xff] %v723_v42  ;;  %v811_v22 = vld [vmem:[%s6786_s12 + $0x560] sm:$0xff]  ;;  %v813_v23 = vld [vmem:[%s6786_s12 + $0x568] sm:$0xff] }
 0x10b   : > { %726 = vst [vmem:[%s6791_s13 + $0x158] sm:$0xff] %v725_v43  ;;  %v815_v24 = vld [vmem:[%s6786_s12 + $0x580] sm:$0xff]  ;;  %v817_v25 = vld [vmem:[%s6786_s12 + $0x588] sm:$0xff] }
 0x10c   : > { %728 = vst [vmem:[%s6791_s13 + $0x160] sm:$0xff] %v727_v44  ;;  %v819_v26 = vld [vmem:[%s6786_s12 + $0x5a0] sm:$0xff]  ;;  %v821_v27 = vld [vmem:[%s6786_s12 + $0x5a8] sm:$0xff] }
 0x10d   : > { %730 = vst [vmem:[%s6791_s13 + $0x168] sm:$0xff] %v729_v45  ;;  %v823_v28 = vld [vmem:[%s6786_s12 + $0x5c0] sm:$0xff]  ;;  %v825_v29 = vld [vmem:[%s6786_s12 + $0x5c8] sm:$0xff] }
 0x10e   : > { %732 = vst [vmem:[%s6791_s13 + $0x170] sm:$0xff] %v731_v46  ;;  %v827_v30 = vld [vmem:[%s6786_s12 + $0x5e0] sm:$0xff]  ;;  %v829_v31 = vld [vmem:[%s6786_s12 + $0x5e8] sm:$0xff] }
 0x10f   : > { %734 = vst [vmem:[%s6791_s13 + $0x178] sm:$0xff] %v733_v47  ;;  %v831_v32 = vld [vmem:[%s6786_s12 + $0x600] sm:$0xff]  ;;  %v833_v33 = vld [vmem:[%s6786_s12 + $0x608] sm:$0xff] }
 0x110   : > { %736 = vst [vmem:[%s6791_s13 + $0x180] sm:$0xff] %v735_v48  ;;  %v835_v34 = vld [vmem:[%s6786_s12 + $0x620] sm:$0xff]  ;;  %v837_v35 = vld [vmem:[%s6786_s12 + $0x628] sm:$0xff] }
 0x111   : > { %738 = vst [vmem:[%s6791_s13 + $0x188] sm:$0xff] %v737_v49  ;;  %v839_v36 = vld [vmem:[%s6786_s12 + $0x640] sm:$0xff]  ;;  %v841_v37 = vld [vmem:[%s6786_s12 + $0x648] sm:$0xff] }
 0x112   : > { %740 = vst [vmem:[%s6791_s13 + $0x190] sm:$0xff] %v739_v50  ;;  %v843_v38 = vld [vmem:[%s6786_s12 + $0x660] sm:$0xff]  ;;  %v845_v39 = vld [vmem:[%s6786_s12 + $0x668] sm:$0xff] }
 0x113   : > { %742 = vst [vmem:[%s6791_s13 + $0x198] sm:$0xff] %v741_v51  ;;  %v847_v40 = vld [vmem:[%s6786_s12 + $0x680] sm:$0xff]  ;;  %v849_v41 = vld [vmem:[%s6786_s12 + $0x688] sm:$0xff] }
 0x114   : > { %744 = vst [vmem:[%s6791_s13 + $0x1a0] sm:$0xff] %v743_v52  ;;  %v851_v42 = vld [vmem:[%s6786_s12 + $0x6a0] sm:$0xff]  ;;  %v853_v43 = vld [vmem:[%s6786_s12 + $0x6a8] sm:$0xff] }
 0x115   : > { %746 = vst [vmem:[%s6791_s13 + $0x1a8] sm:$0xff] %v745_v53  ;;  %v855_v44 = vld [vmem:[%s6786_s12 + $0x6c0] sm:$0xff]  ;;  %v857_v45 = vld [vmem:[%s6786_s12 + $0x6c8] sm:$0xff] }
 0x116   : > { %748 = vst [vmem:[%s6791_s13 + $0x1b0] sm:$0xff] %v747_v54  ;;  %v859_v46 = vld [vmem:[%s6786_s12 + $0x6e0] sm:$0xff]  ;;  %v861_v47 = vld [vmem:[%s6786_s12 + $0x6e8] sm:$0xff] }
 0x117   : > { %750 = vst [vmem:[%s6791_s13 + $0x1b8] sm:$0xff] %v749_v55  ;;  %v863_v48 = vld [vmem:[%s6786_s12 + $0x700] sm:$0xff]  ;;  %v865_v49 = vld [vmem:[%s6786_s12 + $0x708] sm:$0xff] }
 0x118   : > { %752 = vst [vmem:[%s6791_s13 + $0x1c0] sm:$0xff] %v751_v56  ;;  %v867_v50 = vld [vmem:[%s6786_s12 + $0x720] sm:$0xff]  ;;  %v869_v51 = vld [vmem:[%s6786_s12 + $0x728] sm:$0xff] }
 0x119   : > { %754 = vst [vmem:[%s6791_s13 + $0x1c8] sm:$0xff] %v753_v57  ;;  %v871_v52 = vld [vmem:[%s6786_s12 + $0x740] sm:$0xff]  ;;  %v873_v53 = vld [vmem:[%s6786_s12 + $0x748] sm:$0xff] }
 0x11a   : > { %756 = vst [vmem:[%s6791_s13 + $0x1d0] sm:$0xff] %v755_v58  ;;  %v875_v54 = vld [vmem:[%s6786_s12 + $0x760] sm:$0xff]  ;;  %v877_v55 = vld [vmem:[%s6786_s12 + $0x768] sm:$0xff] }
 0x11b   : > { %758 = vst [vmem:[%s6791_s13 + $0x1d8] sm:$0xff] %v757_v59  ;;  %v879_v56 = vld [vmem:[%s6786_s12 + $0x780] sm:$0xff]  ;;  %v881_v57 = vld [vmem:[%s6786_s12 + $0x788] sm:$0xff] }
 0x11c   : > { %760 = vst [vmem:[%s6791_s13 + $0x1e0] sm:$0xff] %v759_v60  ;;  %v883_v58 = vld [vmem:[%s6786_s12 + $0x7a0] sm:$0xff]  ;;  %v885_v59 = vld [vmem:[%s6786_s12 + $0x7a8] sm:$0xff] }
 0x11d   : > { %762 = vst [vmem:[%s6791_s13 + $0x1e8] sm:$0xff] %v761_v61  ;;  %v887_v60 = vld [vmem:[%s6786_s12 + $0x7c0] sm:$0xff]  ;;  %v889_v61 = vld [vmem:[%s6786_s12 + $0x7c8] sm:$0xff] }
 0x11e   : > { %764 = vst [vmem:[%s6791_s13 + $0x1f0] sm:$0xff] %v763_v62  ;;  %v891_v62 = vld [vmem:[%s6786_s12 + $0x7e0] sm:$0xff] }
 0x11f   : > { %766 = vst [vmem:[%s6791_s13 + $0x1f8] sm:$0xff] %v765_v63  ;;  %v893_v63 = vld [vmem:[%s6786_s12 + $0x7e8] sm:$0xff] }
 0x120   : > { %768 = vst [vmem:[%s6791_s13 + $0x200] sm:$0xff] %v767_v0  ;;  %v895_v0 = vld [vmem:[%s6786_s12 + $0x800] sm:$0xff] }
 0x121   : > { %770 = vst [vmem:[%s6791_s13 + $0x208] sm:$0xff] %v769_v1  ;;  %v897_v1 = vld [vmem:[%s6786_s12 + $0x808] sm:$0xff] }
 0x122   : > { %772 = vst [vmem:[%s6791_s13 + $0x210] sm:$0xff] %v771_v2  ;;  %v899_v2 = vld [vmem:[%s6786_s12 + $0x820] sm:$0xff] }
 0x123   : > { %774 = vst [vmem:[%s6791_s13 + $0x218] sm:$0xff] %v773_v3  ;;  %v901_v3 = vld [vmem:[%s6786_s12 + $0x828] sm:$0xff] }
 0x124   : > { %776 = vst [vmem:[%s6791_s13 + $0x220] sm:$0xff] %v775_v4  ;;  %v903_v4 = vld [vmem:[%s6786_s12 + $0x840] sm:$0xff] }
 0x125   : > { %778 = vst [vmem:[%s6791_s13 + $0x228] sm:$0xff] %v777_v5  ;;  %v905_v5 = vld [vmem:[%s6786_s12 + $0x848] sm:$0xff] }
 0x126   : > { %780 = vst [vmem:[%s6791_s13 + $0x230] sm:$0xff] %v779_v6  ;;  %v907_v6 = vld [vmem:[%s6786_s12 + $0x860] sm:$0xff] }
 0x127   : > { %782 = vst [vmem:[%s6791_s13 + $0x238] sm:$0xff] %v781_v7  ;;  %v909_v7 = vld [vmem:[%s6786_s12 + $0x868] sm:$0xff] }
 0x128   : > { %784 = vst [vmem:[%s6791_s13 + $0x240] sm:$0xff] %v783_v8  ;;  %v911_v8 = vld [vmem:[%s6786_s12 + $0x880] sm:$0xff] }
 0x129   : > { %786 = vst [vmem:[%s6791_s13 + $0x248] sm:$0xff] %v785_v9  ;;  %v913_v9 = vld [vmem:[%s6786_s12 + $0x888] sm:$0xff] }
 0x12a   : > { %788 = vst [vmem:[%s6791_s13 + $0x250] sm:$0xff] %v787_v10  ;;  %v915_v10 = vld [vmem:[%s6786_s12 + $0x8a0] sm:$0xff] }
 0x12b   : > { %790 = vst [vmem:[%s6791_s13 + $0x258] sm:$0xff] %v789_v11  ;;  %v917_v11 = vld [vmem:[%s6786_s12 + $0x8a8] sm:$0xff] }
 0x12c   : > { %792 = vst [vmem:[%s6791_s13 + $0x260] sm:$0xff] %v791_v12  ;;  %v919_v12 = vld [vmem:[%s6786_s12 + $0x8c0] sm:$0xff] }
 0x12d   : > { %794 = vst [vmem:[%s6791_s13 + $0x268] sm:$0xff] %v793_v13  ;;  %v921_v13 = vld [vmem:[%s6786_s12 + $0x8c8] sm:$0xff] }
 0x12e   : > { %796 = vst [vmem:[%s6791_s13 + $0x270] sm:$0xff] %v795_v14  ;;  %v923_v14 = vld [vmem:[%s6786_s12 + $0x8e0] sm:$0xff] }
 0x12f   : > { %798 = vst [vmem:[%s6791_s13 + $0x278] sm:$0xff] %v797_v15  ;;  %v925_v15 = vld [vmem:[%s6786_s12 + $0x8e8] sm:$0xff] }
 0x130   : > { %800 = vst [vmem:[%s6791_s13 + $0x280] sm:$0xff] %v799_v16  ;;  %v927_v16 = vld [vmem:[%s6786_s12 + $0x900] sm:$0xff] }
 0x131   : > { %802 = vst [vmem:[%s6791_s13 + $0x288] sm:$0xff] %v801_v17  ;;  %v929_v17 = vld [vmem:[%s6786_s12 + $0x908] sm:$0xff] }
 0x132   : > { %804 = vst [vmem:[%s6791_s13 + $0x290] sm:$0xff] %v803_v18  ;;  %v931_v18 = vld [vmem:[%s6786_s12 + $0x920] sm:$0xff] }
 0x133   : > { %806 = vst [vmem:[%s6791_s13 + $0x298] sm:$0xff] %v805_v19  ;;  %v933_v19 = vld [vmem:[%s6786_s12 + $0x928] sm:$0xff] }
 0x134   : > { %808 = vst [vmem:[%s6791_s13 + $0x2a0] sm:$0xff] %v807_v20  ;;  %v935_v20 = vld [vmem:[%s6786_s12 + $0x940] sm:$0xff] }
 0x135   : > { %810 = vst [vmem:[%s6791_s13 + $0x2a8] sm:$0xff] %v809_v21  ;;  %v937_v21 = vld [vmem:[%s6786_s12 + $0x948] sm:$0xff] }
 0x136   : > { %812 = vst [vmem:[%s6791_s13 + $0x2b0] sm:$0xff] %v811_v22  ;;  %v939_v22 = vld [vmem:[%s6786_s12 + $0x960] sm:$0xff] }
 0x137   : > { %814 = vst [vmem:[%s6791_s13 + $0x2b8] sm:$0xff] %v813_v23  ;;  %v941_v23 = vld [vmem:[%s6786_s12 + $0x968] sm:$0xff] }
 0x138   : > { %816 = vst [vmem:[%s6791_s13 + $0x2c0] sm:$0xff] %v815_v24  ;;  %v943_v24 = vld [vmem:[%s6786_s12 + $0x980] sm:$0xff] }
 0x139   : > { %818 = vst [vmem:[%s6791_s13 + $0x2c8] sm:$0xff] %v817_v25  ;;  %v945_v25 = vld [vmem:[%s6786_s12 + $0x988] sm:$0xff] }
 0x13a   : > { %820 = vst [vmem:[%s6791_s13 + $0x2d0] sm:$0xff] %v819_v26  ;;  %v947_v26 = vld [vmem:[%s6786_s12 + $0x9a0] sm:$0xff] }
 0x13b   : > { %822 = vst [vmem:[%s6791_s13 + $0x2d8] sm:$0xff] %v821_v27  ;;  %v949_v27 = vld [vmem:[%s6786_s12 + $0x9a8] sm:$0xff] }
 0x13c   : > { %824 = vst [vmem:[%s6791_s13 + $0x2e0] sm:$0xff] %v823_v28  ;;  %v951_v28 = vld [vmem:[%s6786_s12 + $0x9c0] sm:$0xff] }
 0x13d   : > { %826 = vst [vmem:[%s6791_s13 + $0x2e8] sm:$0xff] %v825_v29  ;;  %v953_v29 = vld [vmem:[%s6786_s12 + $0x9c8] sm:$0xff] }
 0x13e   : > { %828 = vst [vmem:[%s6791_s13 + $0x2f0] sm:$0xff] %v827_v30  ;;  %v955_v30 = vld [vmem:[%s6786_s12 + $0x9e0] sm:$0xff] }
 0x13f   : > { %830 = vst [vmem:[%s6791_s13 + $0x2f8] sm:$0xff] %v829_v31  ;;  %v957_v31 = vld [vmem:[%s6786_s12 + $0x9e8] sm:$0xff] }
 0x140   : > { %832 = vst [vmem:[%s6791_s13 + $0x300] sm:$0xff] %v831_v32  ;;  %v959_v32 = vld [vmem:[%s6786_s12 + $0xa00] sm:$0xff] }
 0x141   : > { %834 = vst [vmem:[%s6791_s13 + $0x308] sm:$0xff] %v833_v33  ;;  %v961_v33 = vld [vmem:[%s6786_s12 + $0xa08] sm:$0xff] }
 0x142   : > { %836 = vst [vmem:[%s6791_s13 + $0x310] sm:$0xff] %v835_v34  ;;  %v963_v34 = vld [vmem:[%s6786_s12 + $0xa20] sm:$0xff] }
 0x143   : > { %838 = vst [vmem:[%s6791_s13 + $0x318] sm:$0xff] %v837_v35  ;;  %v965_v35 = vld [vmem:[%s6786_s12 + $0xa28] sm:$0xff] }
 0x144   : > { %840 = vst [vmem:[%s6791_s13 + $0x320] sm:$0xff] %v839_v36  ;;  %v967_v36 = vld [vmem:[%s6786_s12 + $0xa40] sm:$0xff] }
 0x145   : > { %842 = vst [vmem:[%s6791_s13 + $0x328] sm:$0xff] %v841_v37  ;;  %v969_v37 = vld [vmem:[%s6786_s12 + $0xa48] sm:$0xff] }
 0x146   : > { %844 = vst [vmem:[%s6791_s13 + $0x330] sm:$0xff] %v843_v38  ;;  %v971_v38 = vld [vmem:[%s6786_s12 + $0xa60] sm:$0xff] }
 0x147   : > { %846 = vst [vmem:[%s6791_s13 + $0x338] sm:$0xff] %v845_v39  ;;  %v973_v39 = vld [vmem:[%s6786_s12 + $0xa68] sm:$0xff] }
 0x148   : > { %848 = vst [vmem:[%s6791_s13 + $0x340] sm:$0xff] %v847_v40  ;;  %v975_v40 = vld [vmem:[%s6786_s12 + $0xa80] sm:$0xff] }
 0x149   : > { %850 = vst [vmem:[%s6791_s13 + $0x348] sm:$0xff] %v849_v41  ;;  %v977_v41 = vld [vmem:[%s6786_s12 + $0xa88] sm:$0xff] }
 0x14a   : > { %852 = vst [vmem:[%s6791_s13 + $0x350] sm:$0xff] %v851_v42  ;;  %v979_v42 = vld [vmem:[%s6786_s12 + $0xaa0] sm:$0xff] }
 0x14b   : > { %854 = vst [vmem:[%s6791_s13 + $0x358] sm:$0xff] %v853_v43  ;;  %v981_v43 = vld [vmem:[%s6786_s12 + $0xaa8] sm:$0xff] }
 0x14c   : > { %856 = vst [vmem:[%s6791_s13 + $0x360] sm:$0xff] %v855_v44  ;;  %v983_v44 = vld [vmem:[%s6786_s12 + $0xac0] sm:$0xff] }
 0x14d   : > { %858 = vst [vmem:[%s6791_s13 + $0x368] sm:$0xff] %v857_v45  ;;  %v985_v45 = vld [vmem:[%s6786_s12 + $0xac8] sm:$0xff] }
 0x14e   : > { %860 = vst [vmem:[%s6791_s13 + $0x370] sm:$0xff] %v859_v46  ;;  %v987_v46 = vld [vmem:[%s6786_s12 + $0xae0] sm:$0xff] }
 0x14f   : > { %862 = vst [vmem:[%s6791_s13 + $0x378] sm:$0xff] %v861_v47  ;;  %v989_v47 = vld [vmem:[%s6786_s12 + $0xae8] sm:$0xff] }
 0x150   : > { %864 = vst [vmem:[%s6791_s13 + $0x380] sm:$0xff] %v863_v48  ;;  %v991_v48 = vld [vmem:[%s6786_s12 + $0xb00] sm:$0xff] }
 0x151   : > { %866 = vst [vmem:[%s6791_s13 + $0x388] sm:$0xff] %v865_v49  ;;  %v993_v49 = vld [vmem:[%s6786_s12 + $0xb08] sm:$0xff] }
 0x152   : > { %868 = vst [vmem:[%s6791_s13 + $0x390] sm:$0xff] %v867_v50  ;;  %v995_v50 = vld [vmem:[%s6786_s12 + $0xb20] sm:$0xff] }
 0x153   : > { %870 = vst [vmem:[%s6791_s13 + $0x398] sm:$0xff] %v869_v51  ;;  %v997_v51 = vld [vmem:[%s6786_s12 + $0xb28] sm:$0xff] }
 0x154   : > { %872 = vst [vmem:[%s6791_s13 + $0x3a0] sm:$0xff] %v871_v52  ;;  %v999_v52 = vld [vmem:[%s6786_s12 + $0xb40] sm:$0xff] }
 0x155   : > { %874 = vst [vmem:[%s6791_s13 + $0x3a8] sm:$0xff] %v873_v53  ;;  %v1001_v53 = vld [vmem:[%s6786_s12 + $0xb48] sm:$0xff] }
 0x156   : > { %876 = vst [vmem:[%s6791_s13 + $0x3b0] sm:$0xff] %v875_v54  ;;  %v1003_v54 = vld [vmem:[%s6786_s12 + $0xb60] sm:$0xff] }
 0x157   : > { %878 = vst [vmem:[%s6791_s13 + $0x3b8] sm:$0xff] %v877_v55  ;;  %v1005_v55 = vld [vmem:[%s6786_s12 + $0xb68] sm:$0xff] }
 0x158   : > { %880 = vst [vmem:[%s6791_s13 + $0x3c0] sm:$0xff] %v879_v56  ;;  %v1007_v56 = vld [vmem:[%s6786_s12 + $0xb80] sm:$0xff] }
 0x159   : > { %882 = vst [vmem:[%s6791_s13 + $0x3c8] sm:$0xff] %v881_v57  ;;  %v1009_v57 = vld [vmem:[%s6786_s12 + $0xb88] sm:$0xff] }
 0x15a   : > { %884 = vst [vmem:[%s6791_s13 + $0x3d0] sm:$0xff] %v883_v58  ;;  %v1011_v58 = vld [vmem:[%s6786_s12 + $0xba0] sm:$0xff] }
 0x15b   : > { %886 = vst [vmem:[%s6791_s13 + $0x3d8] sm:$0xff] %v885_v59  ;;  %v1013_v59 = vld [vmem:[%s6786_s12 + $0xba8] sm:$0xff] }
 0x15c   : > { %888 = vst [vmem:[%s6791_s13 + $0x3e0] sm:$0xff] %v887_v60  ;;  %v1015_v60 = vld [vmem:[%s6786_s12 + $0xbc0] sm:$0xff] }
 0x15d   : > { %890 = vst [vmem:[%s6791_s13 + $0x3e8] sm:$0xff] %v889_v61  ;;  %v1017_v61 = vld [vmem:[%s6786_s12 + $0xbc8] sm:$0xff] }
 0x15e   : > { %892 = vst [vmem:[%s6791_s13 + $0x3f0] sm:$0xff] %v891_v62  ;;  %v1019_v62 = vld [vmem:[%s6786_s12 + $0xbe0] sm:$0xff] }
 0x15f   : > { %894 = vst [vmem:[%s6791_s13 + $0x3f8] sm:$0xff] %v893_v63  ;;  %v1021_v63 = vld [vmem:[%s6786_s12 + $0xbe8] sm:$0xff] }
 0x160   : > { %896 = vst [vmem:[%s6791_s13 + $0x400] sm:$0xff] %v895_v0 }
 0x161   : > { %898 = vst [vmem:[%s6791_s13 + $0x408] sm:$0xff] %v897_v1 }
 0x162   : > { %900 = vst [vmem:[%s6791_s13 + $0x410] sm:$0xff] %v899_v2 }
 0x163   : > { %902 = vst [vmem:[%s6791_s13 + $0x418] sm:$0xff] %v901_v3 }
 0x164   : > { %904 = vst [vmem:[%s6791_s13 + $0x420] sm:$0xff] %v903_v4 }
 0x165   : > { %906 = vst [vmem:[%s6791_s13 + $0x428] sm:$0xff] %v905_v5 }
 0x166   : > { %908 = vst [vmem:[%s6791_s13 + $0x430] sm:$0xff] %v907_v6 }
 0x167   : > { %910 = vst [vmem:[%s6791_s13 + $0x438] sm:$0xff] %v909_v7 }
 0x168   : > { %912 = vst [vmem:[%s6791_s13 + $0x440] sm:$0xff] %v911_v8 }
 0x169   : > { %914 = vst [vmem:[%s6791_s13 + $0x448] sm:$0xff] %v913_v9 }
 0x16a   : > { %916 = vst [vmem:[%s6791_s13 + $0x450] sm:$0xff] %v915_v10 }
 0x16b   : > { %918 = vst [vmem:[%s6791_s13 + $0x458] sm:$0xff] %v917_v11 }
 0x16c   : > { %920 = vst [vmem:[%s6791_s13 + $0x460] sm:$0xff] %v919_v12 }
 0x16d   : > { %922 = vst [vmem:[%s6791_s13 + $0x468] sm:$0xff] %v921_v13 }
 0x16e   : > { %924 = vst [vmem:[%s6791_s13 + $0x470] sm:$0xff] %v923_v14 }
 0x16f   : > { %926 = vst [vmem:[%s6791_s13 + $0x478] sm:$0xff] %v925_v15 }
 0x170   : > { %928 = vst [vmem:[%s6791_s13 + $0x480] sm:$0xff] %v927_v16 }
 0x171   : > { %930 = vst [vmem:[%s6791_s13 + $0x488] sm:$0xff] %v929_v17 }
 0x172   : > { %932 = vst [vmem:[%s6791_s13 + $0x490] sm:$0xff] %v931_v18 }
 0x173   : > { %934 = vst [vmem:[%s6791_s13 + $0x498] sm:$0xff] %v933_v19 }
 0x174   : > { %936 = vst [vmem:[%s6791_s13 + $0x4a0] sm:$0xff] %v935_v20 }
 0x175   : > { %938 = vst [vmem:[%s6791_s13 + $0x4a8] sm:$0xff] %v937_v21 }
 0x176   : > { %940 = vst [vmem:[%s6791_s13 + $0x4b0] sm:$0xff] %v939_v22 }
 0x177   : > { %942 = vst [vmem:[%s6791_s13 + $0x4b8] sm:$0xff] %v941_v23 }
 0x178   : > { %944 = vst [vmem:[%s6791_s13 + $0x4c0] sm:$0xff] %v943_v24 }
 0x179   : > { %946 = vst [vmem:[%s6791_s13 + $0x4c8] sm:$0xff] %v945_v25 }
 0x17a   : > { %948 = vst [vmem:[%s6791_s13 + $0x4d0] sm:$0xff] %v947_v26 }
 0x17b   : > { %950 = vst [vmem:[%s6791_s13 + $0x4d8] sm:$0xff] %v949_v27 }
 0x17c   : > { %952 = vst [vmem:[%s6791_s13 + $0x4e0] sm:$0xff] %v951_v28 }
 0x17d   : > { %954 = vst [vmem:[%s6791_s13 + $0x4e8] sm:$0xff] %v953_v29 }
 0x17e   : > { %956 = vst [vmem:[%s6791_s13 + $0x4f0] sm:$0xff] %v955_v30 }
 0x17f   : > { %958 = vst [vmem:[%s6791_s13 + $0x4f8] sm:$0xff] %v957_v31 }
 0x180   : > { %960 = vst [vmem:[%s6791_s13 + $0x500] sm:$0xff] %v959_v32 }
 0x181   : > { %962 = vst [vmem:[%s6791_s13 + $0x508] sm:$0xff] %v961_v33 }
 0x182   : > { %964 = vst [vmem:[%s6791_s13 + $0x510] sm:$0xff] %v963_v34 }
 0x183   : > { %966 = vst [vmem:[%s6791_s13 + $0x518] sm:$0xff] %v965_v35 }
 0x184   : > { %968 = vst [vmem:[%s6791_s13 + $0x520] sm:$0xff] %v967_v36 }
 0x185   : > { %970 = vst [vmem:[%s6791_s13 + $0x528] sm:$0xff] %v969_v37 }
 0x186   : > { %972 = vst [vmem:[%s6791_s13 + $0x530] sm:$0xff] %v971_v38 }
 0x187   : > { %974 = vst [vmem:[%s6791_s13 + $0x538] sm:$0xff] %v973_v39 }
 0x188   : > { %976 = vst [vmem:[%s6791_s13 + $0x540] sm:$0xff] %v975_v40 }
 0x189   : > { %978 = vst [vmem:[%s6791_s13 + $0x548] sm:$0xff] %v977_v41 }
 0x18a   : > { %980 = vst [vmem:[%s6791_s13 + $0x550] sm:$0xff] %v979_v42 }
 0x18b   : > { %982 = vst [vmem:[%s6791_s13 + $0x558] sm:$0xff] %v981_v43 }
 0x18c   : > { %984 = vst [vmem:[%s6791_s13 + $0x560] sm:$0xff] %v983_v44 }
 0x18d   : > { %986 = vst [vmem:[%s6791_s13 + $0x568] sm:$0xff] %v985_v45 }
 0x18e   : > { %988 = vst [vmem:[%s6791_s13 + $0x570] sm:$0xff] %v987_v46 }
 0x18f   : > { %990 = vst [vmem:[%s6791_s13 + $0x578] sm:$0xff] %v989_v47 }
 0x190   : > { %992 = vst [vmem:[%s6791_s13 + $0x580] sm:$0xff] %v991_v48 }
 0x191   : > { %994 = vst [vmem:[%s6791_s13 + $0x588] sm:$0xff] %v993_v49 }
 0x192   : > { %996 = vst [vmem:[%s6791_s13 + $0x590] sm:$0xff] %v995_v50 }
 0x193   : > { %998 = vst [vmem:[%s6791_s13 + $0x598] sm:$0xff] %v997_v51 }
 0x194   : > { %1000 = vst [vmem:[%s6791_s13 + $0x5a0] sm:$0xff] %v999_v52 }
 0x195   : > { %1002 = vst [vmem:[%s6791_s13 + $0x5a8] sm:$0xff] %v1001_v53 }
 0x196   : > { %1004 = vst [vmem:[%s6791_s13 + $0x5b0] sm:$0xff] %v1003_v54 }
 0x197   : > { %1006 = vst [vmem:[%s6791_s13 + $0x5b8] sm:$0xff] %v1005_v55 }
 0x198   : > { %1008 = vst [vmem:[%s6791_s13 + $0x5c0] sm:$0xff] %v1007_v56 }
 0x199   : > { %1010 = vst [vmem:[%s6791_s13 + $0x5c8] sm:$0xff] %v1009_v57 }
 0x19a   : > { %1012 = vst [vmem:[%s6791_s13 + $0x5d0] sm:$0xff] %v1011_v58 }
 0x19b   : > { %1014 = vst [vmem:[%s6791_s13 + $0x5d8] sm:$0xff] %v1013_v59 }
 0x19c   : > { %1016 = vst [vmem:[%s6791_s13 + $0x5e0] sm:$0xff] %v1015_v60 }
 0x19d   : > { %1018 = vst [vmem:[%s6791_s13 + $0x5e8] sm:$0xff] %v1017_v61 }
 0x19e   : > { %1020 = vst [vmem:[%s6791_s13 + $0x5f0] sm:$0xff] %v1019_v62 }
 0x19f   : > { %1022 = vst [vmem:[%s6791_s13 + $0x5f8] sm:$0xff] %v1021_v63 }
 0x1a0 PF: > { %1028 = sbr.rel (!%p6367_p3) target bundleno = 520 (0x208), region = 70  ;;  %s1030_s14 = sand.u32 (%p6367_p3), 1, %s6271_s19  }
 0x1a1   : > { %s5361_s15 = smul.u32 (%p6367_p3), 768, %s1030_s14  ;;  %s5341_s16 = sshll.u32 (%p6367_p3), %s6287_s23, 1 }
 0x1a2   : > { %s5358_s17 = smul.u32 (%p6367_p3), 384, %s6283_s22 }
 0x1a3   : > { %s7187_s27 = scalar_lea.vmem (%p6367_p3), [#allocation5], %s5361_s15 }
 0x1a4   : > { %s1036_s28 = sadd.s32 (%p6367_p3), %s5358_s17, %s5341_s16 }
 0x1a5   : > { %s5343_s29 = sshll.u32 %s1036_s28, 2 }
 0x1a6   : > { %s7182_s8 = scalar_lea.vmem %s11270_s3, %s5343_s29 }
 0x1a7   : > { %v1257_v0 = vld [vmem:[%s7182_s8] sm:$0xff]  ;;  %v1259_v1 = vld [vmem:[%s7182_s8 + $0x10] sm:$0xff] }
 0x1a8   : > { %v1261_v2 = vld [vmem:[%s7182_s8 + $0x20] sm:$0xff]  ;;  %1258 = vst [vmem:[%s7187_s27] sm:$0xff] %v1257_v0  ;;  %v1263_v3 = vld [vmem:[%s7182_s8 + $0x30] sm:$0xff] }
 0x1a9   : > { %1260 = vst [vmem:[%s7187_s27 + $0x8] sm:$0xff] %v1259_v1  ;;  %v1265_v4 = vld [vmem:[%s7182_s8 + $0x40] sm:$0xff]  ;;  %v1267_v5 = vld [vmem:[%s7182_s8 + $0x50] sm:$0xff] }
 0x1aa   : > { %1262 = vst [vmem:[%s7187_s27 + $0x10] sm:$0xff] %v1261_v2  ;;  %v1269_v6 = vld [vmem:[%s7182_s8 + $0x60] sm:$0xff]  ;;  %v1271_v7 = vld [vmem:[%s7182_s8 + $0x70] sm:$0xff] }
 0x1ab   : > { %1264 = vst [vmem:[%s7187_s27 + $0x18] sm:$0xff] %v1263_v3  ;;  %v1273_v8 = vld [vmem:[%s7182_s8 + $0x80] sm:$0xff]  ;;  %v1275_v9 = vld [vmem:[%s7182_s8 + $0x90] sm:$0xff] }
 0x1ac   : > { %1266 = vst [vmem:[%s7187_s27 + $0x20] sm:$0xff] %v1265_v4  ;;  %v1277_v10 = vld [vmem:[%s7182_s8 + $0xa0] sm:$0xff]  ;;  %v1279_v11 = vld [vmem:[%s7182_s8 + $0xb0] sm:$0xff] }
 0x1ad   : > { %1268 = vst [vmem:[%s7187_s27 + $0x28] sm:$0xff] %v1267_v5  ;;  %v1281_v12 = vld [vmem:[%s7182_s8 + $0xc0] sm:$0xff]  ;;  %v1283_v13 = vld [vmem:[%s7182_s8 + $0xd0] sm:$0xff] }
 0x1ae   : > { %1270 = vst [vmem:[%s7187_s27 + $0x30] sm:$0xff] %v1269_v6  ;;  %v1285_v14 = vld [vmem:[%s7182_s8 + $0xe0] sm:$0xff]  ;;  %v1287_v15 = vld [vmem:[%s7182_s8 + $0xf0] sm:$0xff] }
 0x1af   : > { %1272 = vst [vmem:[%s7187_s27 + $0x38] sm:$0xff] %v1271_v7  ;;  %v1289_v16 = vld [vmem:[%s7182_s8 + $0x100] sm:$0xff]  ;;  %v1291_v17 = vld [vmem:[%s7182_s8 + $0x110] sm:$0xff] }
 0x1b0   : > { %1274 = vst [vmem:[%s7187_s27 + $0x40] sm:$0xff] %v1273_v8  ;;  %v1293_v18 = vld [vmem:[%s7182_s8 + $0x120] sm:$0xff]  ;;  %v1295_v19 = vld [vmem:[%s7182_s8 + $0x130] sm:$0xff] }
 0x1b1   : > { %1276 = vst [vmem:[%s7187_s27 + $0x48] sm:$0xff] %v1275_v9  ;;  %v1297_v20 = vld [vmem:[%s7182_s8 + $0x140] sm:$0xff]  ;;  %v1299_v21 = vld [vmem:[%s7182_s8 + $0x150] sm:$0xff] }
 0x1b2   : > { %1278 = vst [vmem:[%s7187_s27 + $0x50] sm:$0xff] %v1277_v10  ;;  %v1301_v22 = vld [vmem:[%s7182_s8 + $0x160] sm:$0xff]  ;;  %v1303_v23 = vld [vmem:[%s7182_s8 + $0x170] sm:$0xff] }
 0x1b3   : > { %1280 = vst [vmem:[%s7187_s27 + $0x58] sm:$0xff] %v1279_v11  ;;  %v1305_v24 = vld [vmem:[%s7182_s8 + $0x180] sm:$0xff]  ;;  %v1307_v25 = vld [vmem:[%s7182_s8 + $0x190] sm:$0xff] }
 0x1b4   : > { %1282 = vst [vmem:[%s7187_s27 + $0x60] sm:$0xff] %v1281_v12  ;;  %v1309_v26 = vld [vmem:[%s7182_s8 + $0x1a0] sm:$0xff]  ;;  %v1311_v27 = vld [vmem:[%s7182_s8 + $0x1b0] sm:$0xff] }
 0x1b5   : > { %1284 = vst [vmem:[%s7187_s27 + $0x68] sm:$0xff] %v1283_v13  ;;  %v1313_v28 = vld [vmem:[%s7182_s8 + $0x1c0] sm:$0xff]  ;;  %v1315_v29 = vld [vmem:[%s7182_s8 + $0x1d0] sm:$0xff] }
 0x1b6   : > { %1286 = vst [vmem:[%s7187_s27 + $0x70] sm:$0xff] %v1285_v14  ;;  %v1317_v30 = vld [vmem:[%s7182_s8 + $0x1e0] sm:$0xff]  ;;  %v1319_v31 = vld [vmem:[%s7182_s8 + $0x1f0] sm:$0xff] }
 0x1b7   : > { %1288 = vst [vmem:[%s7187_s27 + $0x78] sm:$0xff] %v1287_v15  ;;  %v1321_v32 = vld [vmem:[%s7182_s8 + $0x200] sm:$0xff]  ;;  %v1323_v33 = vld [vmem:[%s7182_s8 + $0x210] sm:$0xff] }
 0x1b8   : > { %1290 = vst [vmem:[%s7187_s27 + $0x80] sm:$0xff] %v1289_v16  ;;  %v1325_v34 = vld [vmem:[%s7182_s8 + $0x220] sm:$0xff]  ;;  %v1327_v35 = vld [vmem:[%s7182_s8 + $0x230] sm:$0xff] }
 0x1b9   : > { %1292 = vst [vmem:[%s7187_s27 + $0x88] sm:$0xff] %v1291_v17  ;;  %v1329_v36 = vld [vmem:[%s7182_s8 + $0x240] sm:$0xff]  ;;  %v1331_v37 = vld [vmem:[%s7182_s8 + $0x250] sm:$0xff] }
 0x1ba   : > { %1294 = vst [vmem:[%s7187_s27 + $0x90] sm:$0xff] %v1293_v18  ;;  %v1333_v38 = vld [vmem:[%s7182_s8 + $0x260] sm:$0xff]  ;;  %v1335_v39 = vld [vmem:[%s7182_s8 + $0x270] sm:$0xff] }
 0x1bb   : > { %1296 = vst [vmem:[%s7187_s27 + $0x98] sm:$0xff] %v1295_v19  ;;  %v1337_v40 = vld [vmem:[%s7182_s8 + $0x280] sm:$0xff]  ;;  %v1339_v41 = vld [vmem:[%s7182_s8 + $0x290] sm:$0xff] }
 0x1bc   : > { %1298 = vst [vmem:[%s7187_s27 + $0xa0] sm:$0xff] %v1297_v20  ;;  %v1341_v42 = vld [vmem:[%s7182_s8 + $0x2a0] sm:$0xff]  ;;  %v1343_v43 = vld [vmem:[%s7182_s8 + $0x2b0] sm:$0xff] }
 0x1bd   : > { %1300 = vst [vmem:[%s7187_s27 + $0xa8] sm:$0xff] %v1299_v21  ;;  %v1345_v44 = vld [vmem:[%s7182_s8 + $0x2c0] sm:$0xff]  ;;  %v1347_v45 = vld [vmem:[%s7182_s8 + $0x2d0] sm:$0xff] }
 0x1be   : > { %1302 = vst [vmem:[%s7187_s27 + $0xb0] sm:$0xff] %v1301_v22  ;;  %v1349_v46 = vld [vmem:[%s7182_s8 + $0x2e0] sm:$0xff]  ;;  %v1351_v47 = vld [vmem:[%s7182_s8 + $0x2f0] sm:$0xff] }
 0x1bf   : > { %1304 = vst [vmem:[%s7187_s27 + $0xb8] sm:$0xff] %v1303_v23  ;;  %v1353_v48 = vld [vmem:[%s7182_s8 + $0x300] sm:$0xff]  ;;  %v1355_v49 = vld [vmem:[%s7182_s8 + $0x310] sm:$0xff] }
 0x1c0   : > { %1306 = vst [vmem:[%s7187_s27 + $0xc0] sm:$0xff] %v1305_v24  ;;  %v1357_v50 = vld [vmem:[%s7182_s8 + $0x320] sm:$0xff]  ;;  %v1359_v51 = vld [vmem:[%s7182_s8 + $0x330] sm:$0xff] }
 0x1c1   : > { %1308 = vst [vmem:[%s7187_s27 + $0xc8] sm:$0xff] %v1307_v25  ;;  %v1361_v52 = vld [vmem:[%s7182_s8 + $0x340] sm:$0xff]  ;;  %v1363_v53 = vld [vmem:[%s7182_s8 + $0x350] sm:$0xff] }
 0x1c2   : > { %1310 = vst [vmem:[%s7187_s27 + $0xd0] sm:$0xff] %v1309_v26  ;;  %v1365_v54 = vld [vmem:[%s7182_s8 + $0x360] sm:$0xff]  ;;  %v1367_v55 = vld [vmem:[%s7182_s8 + $0x370] sm:$0xff] }
 0x1c3   : > { %1312 = vst [vmem:[%s7187_s27 + $0xd8] sm:$0xff] %v1311_v27  ;;  %v1369_v56 = vld [vmem:[%s7182_s8 + $0x380] sm:$0xff]  ;;  %v1371_v57 = vld [vmem:[%s7182_s8 + $0x390] sm:$0xff] }
 0x1c4   : > { %1314 = vst [vmem:[%s7187_s27 + $0xe0] sm:$0xff] %v1313_v28  ;;  %v1373_v58 = vld [vmem:[%s7182_s8 + $0x3a0] sm:$0xff]  ;;  %v1375_v59 = vld [vmem:[%s7182_s8 + $0x3b0] sm:$0xff] }
 0x1c5   : > { %1316 = vst [vmem:[%s7187_s27 + $0xe8] sm:$0xff] %v1315_v29  ;;  %v1377_v60 = vld [vmem:[%s7182_s8 + $0x3c0] sm:$0xff]  ;;  %v1379_v61 = vld [vmem:[%s7182_s8 + $0x3d0] sm:$0xff] }
 0x1c6   : > { %1318 = vst [vmem:[%s7187_s27 + $0xf0] sm:$0xff] %v1317_v30  ;;  %v1381_v62 = vld [vmem:[%s7182_s8 + $0x3e0] sm:$0xff]  ;;  %v1383_v63 = vld [vmem:[%s7182_s8 + $0x3f0] sm:$0xff] }
 0x1c7   : > { %1320 = vst [vmem:[%s7187_s27 + $0xf8] sm:$0xff] %v1319_v31  ;;  %v1385_v0 = vld [vmem:[%s7182_s8 + $0x400] sm:$0xff]  ;;  %v1387_v1 = vld [vmem:[%s7182_s8 + $0x410] sm:$0xff] }
 0x1c8   : > { %1322 = vst [vmem:[%s7187_s27 + $0x100] sm:$0xff] %v1321_v32  ;;  %v1389_v2 = vld [vmem:[%s7182_s8 + $0x420] sm:$0xff]  ;;  %v1391_v3 = vld [vmem:[%s7182_s8 + $0x430] sm:$0xff] }
 0x1c9   : > { %1324 = vst [vmem:[%s7187_s27 + $0x108] sm:$0xff] %v1323_v33  ;;  %v1393_v4 = vld [vmem:[%s7182_s8 + $0x440] sm:$0xff]  ;;  %v1395_v5 = vld [vmem:[%s7182_s8 + $0x450] sm:$0xff] }
 0x1ca   : > { %1326 = vst [vmem:[%s7187_s27 + $0x110] sm:$0xff] %v1325_v34  ;;  %v1397_v6 = vld [vmem:[%s7182_s8 + $0x460] sm:$0xff]  ;;  %v1399_v7 = vld [vmem:[%s7182_s8 + $0x470] sm:$0xff] }
 0x1cb   : > { %1328 = vst [vmem:[%s7187_s27 + $0x118] sm:$0xff] %v1327_v35  ;;  %v1401_v8 = vld [vmem:[%s7182_s8 + $0x480] sm:$0xff]  ;;  %v1403_v9 = vld [vmem:[%s7182_s8 + $0x490] sm:$0xff] }
 0x1cc   : > { %1330 = vst [vmem:[%s7187_s27 + $0x120] sm:$0xff] %v1329_v36  ;;  %v1405_v10 = vld [vmem:[%s7182_s8 + $0x4a0] sm:$0xff]  ;;  %v1407_v11 = vld [vmem:[%s7182_s8 + $0x4b0] sm:$0xff] }
 0x1cd   : > { %1332 = vst [vmem:[%s7187_s27 + $0x128] sm:$0xff] %v1331_v37  ;;  %v1409_v12 = vld [vmem:[%s7182_s8 + $0x4c0] sm:$0xff]  ;;  %v1411_v13 = vld [vmem:[%s7182_s8 + $0x4d0] sm:$0xff] }
 0x1ce   : > { %1334 = vst [vmem:[%s7187_s27 + $0x130] sm:$0xff] %v1333_v38  ;;  %v1413_v14 = vld [vmem:[%s7182_s8 + $0x4e0] sm:$0xff]  ;;  %v1415_v15 = vld [vmem:[%s7182_s8 + $0x4f0] sm:$0xff] }
 0x1cf   : > { %1336 = vst [vmem:[%s7187_s27 + $0x138] sm:$0xff] %v1335_v39  ;;  %v1417_v16 = vld [vmem:[%s7182_s8 + $0x500] sm:$0xff]  ;;  %v1419_v17 = vld [vmem:[%s7182_s8 + $0x510] sm:$0xff] }
 0x1d0   : > { %1338 = vst [vmem:[%s7187_s27 + $0x140] sm:$0xff] %v1337_v40  ;;  %v1421_v18 = vld [vmem:[%s7182_s8 + $0x520] sm:$0xff]  ;;  %v1423_v19 = vld [vmem:[%s7182_s8 + $0x530] sm:$0xff] }
 0x1d1   : > { %1340 = vst [vmem:[%s7187_s27 + $0x148] sm:$0xff] %v1339_v41  ;;  %v1425_v20 = vld [vmem:[%s7182_s8 + $0x540] sm:$0xff]  ;;  %v1427_v21 = vld [vmem:[%s7182_s8 + $0x550] sm:$0xff] }
 0x1d2   : > { %1342 = vst [vmem:[%s7187_s27 + $0x150] sm:$0xff] %v1341_v42  ;;  %v1429_v22 = vld [vmem:[%s7182_s8 + $0x560] sm:$0xff]  ;;  %v1431_v23 = vld [vmem:[%s7182_s8 + $0x570] sm:$0xff] }
 0x1d3   : > { %1344 = vst [vmem:[%s7187_s27 + $0x158] sm:$0xff] %v1343_v43  ;;  %v1433_v24 = vld [vmem:[%s7182_s8 + $0x580] sm:$0xff]  ;;  %v1435_v25 = vld [vmem:[%s7182_s8 + $0x590] sm:$0xff] }
 0x1d4   : > { %1346 = vst [vmem:[%s7187_s27 + $0x160] sm:$0xff] %v1345_v44  ;;  %v1437_v26 = vld [vmem:[%s7182_s8 + $0x5a0] sm:$0xff]  ;;  %v1439_v27 = vld [vmem:[%s7182_s8 + $0x5b0] sm:$0xff] }
 0x1d5   : > { %1348 = vst [vmem:[%s7187_s27 + $0x168] sm:$0xff] %v1347_v45  ;;  %v1441_v28 = vld [vmem:[%s7182_s8 + $0x5c0] sm:$0xff]  ;;  %v1443_v29 = vld [vmem:[%s7182_s8 + $0x5d0] sm:$0xff] }
 0x1d6   : > { %1350 = vst [vmem:[%s7187_s27 + $0x170] sm:$0xff] %v1349_v46  ;;  %v1445_v30 = vld [vmem:[%s7182_s8 + $0x5e0] sm:$0xff]  ;;  %v1447_v31 = vld [vmem:[%s7182_s8 + $0x5f0] sm:$0xff] }
 0x1d7   : > { %1352 = vst [vmem:[%s7187_s27 + $0x178] sm:$0xff] %v1351_v47 }
 0x1d8   : > { %1354 = vst [vmem:[%s7187_s27 + $0x180] sm:$0xff] %v1353_v48 }
 0x1d9   : > { %1356 = vst [vmem:[%s7187_s27 + $0x188] sm:$0xff] %v1355_v49 }
 0x1da   : > { %1358 = vst [vmem:[%s7187_s27 + $0x190] sm:$0xff] %v1357_v50 }
 0x1db   : > { %1360 = vst [vmem:[%s7187_s27 + $0x198] sm:$0xff] %v1359_v51 }
 0x1dc   : > { %1362 = vst [vmem:[%s7187_s27 + $0x1a0] sm:$0xff] %v1361_v52 }
 0x1dd   : > { %1364 = vst [vmem:[%s7187_s27 + $0x1a8] sm:$0xff] %v1363_v53 }
 0x1de   : > { %1366 = vst [vmem:[%s7187_s27 + $0x1b0] sm:$0xff] %v1365_v54 }
 0x1df   : > { %1368 = vst [vmem:[%s7187_s27 + $0x1b8] sm:$0xff] %v1367_v55 }
 0x1e0   : > { %1370 = vst [vmem:[%s7187_s27 + $0x1c0] sm:$0xff] %v1369_v56 }
 0x1e1   : > { %1372 = vst [vmem:[%s7187_s27 + $0x1c8] sm:$0xff] %v1371_v57 }
 0x1e2   : > { %1374 = vst [vmem:[%s7187_s27 + $0x1d0] sm:$0xff] %v1373_v58 }
 0x1e3   : > { %1376 = vst [vmem:[%s7187_s27 + $0x1d8] sm:$0xff] %v1375_v59 }
 0x1e4   : > { %1378 = vst [vmem:[%s7187_s27 + $0x1e0] sm:$0xff] %v1377_v60 }
 0x1e5   : > { %1380 = vst [vmem:[%s7187_s27 + $0x1e8] sm:$0xff] %v1379_v61 }
 0x1e6   : > { %1382 = vst [vmem:[%s7187_s27 + $0x1f0] sm:$0xff] %v1381_v62 }
 0x1e7   : > { %1384 = vst [vmem:[%s7187_s27 + $0x1f8] sm:$0xff] %v1383_v63 }
 0x1e8   : > { %1386 = vst [vmem:[%s7187_s27 + $0x200] sm:$0xff] %v1385_v0 }
 0x1e9   : > { %1388 = vst [vmem:[%s7187_s27 + $0x208] sm:$0xff] %v1387_v1 }
 0x1ea   : > { %1390 = vst [vmem:[%s7187_s27 + $0x210] sm:$0xff] %v1389_v2 }
 0x1eb   : > { %1392 = vst [vmem:[%s7187_s27 + $0x218] sm:$0xff] %v1391_v3 }
 0x1ec   : > { %1394 = vst [vmem:[%s7187_s27 + $0x220] sm:$0xff] %v1393_v4 }
 0x1ed   : > { %1396 = vst [vmem:[%s7187_s27 + $0x228] sm:$0xff] %v1395_v5 }
 0x1ee   : > { %1398 = vst [vmem:[%s7187_s27 + $0x230] sm:$0xff] %v1397_v6 }
 0x1ef   : > { %1400 = vst [vmem:[%s7187_s27 + $0x238] sm:$0xff] %v1399_v7 }
 0x1f0   : > { %1402 = vst [vmem:[%s7187_s27 + $0x240] sm:$0xff] %v1401_v8 }
 0x1f1   : > { %1404 = vst [vmem:[%s7187_s27 + $0x248] sm:$0xff] %v1403_v9 }
 0x1f2   : > { %1406 = vst [vmem:[%s7187_s27 + $0x250] sm:$0xff] %v1405_v10 }
 0x1f3   : > { %1408 = vst [vmem:[%s7187_s27 + $0x258] sm:$0xff] %v1407_v11 }
 0x1f4   : > { %1410 = vst [vmem:[%s7187_s27 + $0x260] sm:$0xff] %v1409_v12 }
 0x1f5   : > { %1412 = vst [vmem:[%s7187_s27 + $0x268] sm:$0xff] %v1411_v13 }
 0x1f6   : > { %1414 = vst [vmem:[%s7187_s27 + $0x270] sm:$0xff] %v1413_v14 }
 0x1f7   : > { %1416 = vst [vmem:[%s7187_s27 + $0x278] sm:$0xff] %v1415_v15 }
 0x1f8   : > { %1418 = vst [vmem:[%s7187_s27 + $0x280] sm:$0xff] %v1417_v16 }
 0x1f9   : > { %1420 = vst [vmem:[%s7187_s27 + $0x288] sm:$0xff] %v1419_v17 }
 0x1fa   : > { %1422 = vst [vmem:[%s7187_s27 + $0x290] sm:$0xff] %v1421_v18 }
 0x1fb   : > { %1424 = vst [vmem:[%s7187_s27 + $0x298] sm:$0xff] %v1423_v19 }
 0x1fc   : > { %1426 = vst [vmem:[%s7187_s27 + $0x2a0] sm:$0xff] %v1425_v20 }
 0x1fd   : > { %1428 = vst [vmem:[%s7187_s27 + $0x2a8] sm:$0xff] %v1427_v21 }
 0x1fe   : > { %1430 = vst [vmem:[%s7187_s27 + $0x2b0] sm:$0xff] %v1429_v22 }
 0x1ff   : > { %1432 = vst [vmem:[%s7187_s27 + $0x2b8] sm:$0xff] %v1431_v23 }
 0x200   : > { %1434 = vst [vmem:[%s7187_s27 + $0x2c0] sm:$0xff] %v1433_v24 }
 0x201   : > { %1436 = vst [vmem:[%s7187_s27 + $0x2c8] sm:$0xff] %v1435_v25 }
 0x202   : > { %1438 = vst [vmem:[%s7187_s27 + $0x2d0] sm:$0xff] %v1437_v26 }
 0x203   : > { %1440 = vst [vmem:[%s7187_s27 + $0x2d8] sm:$0xff] %v1439_v27 }
 0x204   : > { %1442 = vst [vmem:[%s7187_s27 + $0x2e0] sm:$0xff] %v1441_v28 }
 0x205   : > { %1444 = vst [vmem:[%s7187_s27 + $0x2e8] sm:$0xff] %v1443_v29 }
 0x206   : > { %1446 = vst [vmem:[%s7187_s27 + $0x2f0] sm:$0xff] %v1445_v30 }
 0x207   : > { %1448 = vst [vmem:[%s7187_s27 + $0x2f8] sm:$0xff] %v1447_v31 }
 0x208 PF: > { %p5344_p7 = scmp.ge.s32.totalorder %s6291_s24, 1  ;;  %p1462_p8 = scmp.lt.s32.totalorder %s6291_s24, 5 }
 0x20a   : > { %p1463_p9 = pnand %p5344_p7, %p1462_p8 }
 0x20c   : > { %1466 = sbr.rel (%p1463_p9) target bundleno = 1463 (0x5b7), region = 112 }
 0x211   : > { %s1469_s9 = sand.u32 1, %s6267_s18   ;;  %s5345_s10 = sshll.u32 %s6279_s21, 1 }
 0x212   : > { %s5362_s11 = smul.u32 1536, %s1469_s9  ;;  %p1530_p10 = scmp.lt.s32.totalorder %s5345_s10, 3 }
 0x213   : > { %s5363_s12 = smul.u32 768, %s1469_s9  ;;  %p5349_p11 = scmp.ne.s32.totalorder %s6275_s20, 0 }
 0x214   : > { %s11860_s10 = smov (!%p1530_p10, %s5345_s10), 3  ;;  %s7392_s30 = scalar_lea.vmem [#allocation3], %s5362_s11 }
 0x215   : > { %s5346_s13 = sshll.u32 %s11860_s10, 3  ;;  %s7394_s6 = scalar_lea.vmem [#allocation4], %s5362_s11 }
 0x216   : > { %s7385_s16 = scalar_lea.vmem %s11271_s4, %s5346_s13  ;;  %s7390_s29 = scalar_lea.vmem %s11272_s5, %s5346_s13 }
 0x217   : > { %s7396_s18 = scalar_lea.vmem [#allocation5], %s5363_s12  ;;  %1544 = sbr.rel (%p5349_p11) target bundleno = 543 (0x21f), region = 128 }
 0x21c   : > { %v6293_v32 = vmov 0.0  }
 0x21d   : > { %1545 = vst [vmem:[#allocation2] sm:$0xff] %v6293_v32 }
 0x21e   : > { %1546 = vst [vmem:[#allocation2 + $0x8] sm:$0xff] %v6293_v32 }
 0x21f PF: > { %v1577_v33 = vld [vmem:[%s7394_s6 + $0xf0] sm:$0xff]  ;;  %v1642_v36 = vld [vmem:[%s7394_s6 + $0x2f8] sm:$0xff]  ;;  %v1575_v39 = vld [vmem:[%s7394_s6 + $0xe0] sm:$0xff]  ;;  %s4907_s21 = smul.u32 768, %s6275_s20  ;;  %p5351_p12 = scmp.ne.s32.totalorder %s6275_s20, 1 }
 0x220   : > { %v1799_v34 = vmul.f32 1.442695, %v1577_v33  ;;  %v1641_v35 = vld [vmem:[%s7394_s6 + $0x2f0] sm:$0xff]  ;;  %v1929_v38 = vmul.f32 1.442695, %v1642_v36  ;;  %v1639_v43 = vld [vmem:[%s7394_s6 + $0x2e0] sm:$0xff] }
 0x221   : > { %v1927_v37 = vmul.f32 1.442695, %v1641_v35  ;;  %v1795_v40 = vmul.f32 1.442695, %v1575_v39  ;;  %v1609_v41 = vld [vmem:[%s7394_s6 + $0x1f0] sm:$0xff]  ;;  %v7406_v44 = vld [vmem:[%s7396_s18 + $0x78] sm:$0xff] }
 0x222   : > { %5421 = vpow2.f32 %v1799_v34  ;;  %v1863_v42 = vmul.f32 1.442695, %v1609_v41  ;;  %v7409_v45 = vld [vmem:[%s7396_s18 + $0x178] sm:$0xff]  ;;  %v1923_v46 = vmul.f32 1.442695, %v1639_v43  ;;  %v1673_v47 = vld [vmem:[%s7394_s6 + $0x3f0] sm:$0xff]  ;;  %v4361_v55 = vunpack.c.l.bf16 %v7406_v44 }
 0x223   : > { %5423 = vpow2.f32 %v1927_v37  ;;  %v7413_v48 = vld [vmem:[%s7396_s18 + $0x70] sm:$0xff]  ;;  %v7416_v49 = vld [vmem:[%s7396_s18 + $0xf8] sm:$0xff]  ;;  %v1991_v51 = vmul.f32 1.442695, %v1673_v47  ;;  %v4425_v56 = vunpack.c.l.bf16 %v7409_v45  ;;  %v4426_v59 = vunpack.c.h.bf16 %v7409_v45  ;;  %v1607_v62 = vld [vmem:[%s7394_s6 + $0x1e0] sm:$0xff]  ;;  %s9791_s8 = sshra.s32 %s4907_s21, 7 }
 0x224   : > { %5425 = vpow2.f32 %v1929_v38  ;;  %v1674_v50 = vld [vmem:[%s7394_s6 + $0x3f8] sm:$0xff]  ;;  %v7420_v52 = vld [vmem:[%s7396_s18 + $0x170] sm:$0xff]  ;;  %v4359_v60 = vunpack.c.l.bf16 %v7413_v48  ;;  %v4393_v61 = vunpack.c.l.bf16 %v7416_v49  ;;  %v7446_v11 = vmul.f32 1.442695, %v1607_v62  ;;  %s5350_s27 = sshll.u32 %s9791_s8, 3 }
 0x225   : > { %5427 = vpow2.f32 %v1795_v40  ;;  %v1993_v53 = vmul.f32 1.442695, %v1674_v50  ;;  %v1573_v54 = vld [vmem:[%s7394_s6 + $0xd0] sm:$0xff]  ;;  %v4423_v2 = vunpack.c.l.bf16 %v7420_v52  ;;  %v7534_v35 = vld [vmem:[%s7396_s18 + $0x1f8] sm:$0xff]  ;;  %s9837_s11 = scalar_lea.vmem %s11267_s0, %s5350_s27 }
 0x226   : > { %5429 = vpow2.f32 %v1863_v42  ;;  %v1791_v57 = vmul.f32 1.442695, %v1573_v54  ;;  %v1637_v7 = vld [vmem:[%s7394_s6 + $0x2d0] sm:$0xff] }
 0x227   : > { %5431 = vpow2.f32 %v1923_v46  ;;  %v7455_v19 = vmul.f32 1.442695, %v1637_v7 }
 0x228   : > { %v7425_v58 = vpop.eup %5421  ;;  %5433 = vpow2.f32 %v1991_v51 }
 0x229   : > { %v7431_v63 = vpop.eup %5423  ;;  %v2585_v0 = vadd.f32 1.0, %v7425_v58  ;;  %v2588_v1 = vmul.f32 -0.5, %v7425_v58  ;;  %5435 = vpow2.f32 %v1993_v53  ;;  %v2591_v4 = vand.u32 2147483647, %v7425_v58 }
 0x22a   : > { %v7436_v3 = vpop.eup %5425  ;;  %v3161_v5 = vadd.f32 1.0, %v7431_v63  ;;  %v3164_v6 = vmul.f32 -0.5, %v7431_v63  ;;  %5437 = vpow2.f32 %v1791_v57  ;;  %v3167_v9 = vand.u32 2147483647, %v7431_v63 }
 0x22b   : > { %v7442_v8 = vpop.eup %5427  ;;  %5439 = vlog2.f32 %v2585_v0  ;;  %v3170_v10 = vadd.f32 1.0, %v7436_v3  ;;  %v2589_v13 = vadd.f32 1.0, %v2588_v1  ;;  %v3173_v15 = vmul.f32 -0.5, %v7436_v3 }
 0x22c   : > { %v7448_v12 = vpop.eup %5429  ;;  %5441 = vlog2.f32 %v3161_v5  ;;  %v3165_v14 = vadd.f32 1.0, %v3164_v6  ;;  %v3176_v17 = vand.u32 2147483647, %v7436_v3  ;;  %v2567_v18 = vadd.f32 1.0, %v7442_v8  ;;  %v2153_v6 = vld [vmem:[%s7392_s30 + $0xf0] sm:$0xff] }
 0x22d   : > { %v7451_v16 = vpop.eup %5431  ;;  %5443 = vlog2.f32 %v3170_v10  ;;  %vm7459_vm0 = vcmp.lt.f32.partialorder %v2591_v4, 0.0004427343  ;;  %v3174_v22 = vadd.f32 1.0, %v3173_v15  ;;  %v2570_v23 = vmul.f32 -0.5, %v7442_v8  ;;  %v2217_v15 = vld [vmem:[%s7392_s30 + $0x2f0] sm:$0xff] }
 0x22e   : > { %v7457_v20 = vpop.eup %5433  ;;  %v2573_v24 = vand.u32 2147483647, %v7442_v8  ;;  %vm7467_vm1 = vcmp.lt.f32.partialorder %v3167_v9, 0.0004427343  ;;  %5445 = vlog2.f32 %v2567_v18  ;;  %v2873_v27 = vadd.f32 1.0, %v7448_v12 }
 0x22f   : > { %v7465_v25 = vpop.eup %5435  ;;  %v2876_v28 = vmul.f32 -0.5, %v7448_v12  ;;  %v2590_v30 = vmul.f32 %v7425_v58, %v2589_v13  ;;  %v3166_v31 = vmul.f32 %v7431_v63, %v3165_v14  ;;  %v2571_v32 = vadd.f32 1.0, %v2570_v23 }
 0x230   : > { %v7473_v29 = vpop.eup %5437  ;;  %v2879_v33 = vand.u32 2147483647, %v7448_v12  ;;  %vm7478_vm2 = vcmp.lt.f32.partialorder %v3176_v17, 0.0004427343  ;;  %5447 = vlog2.f32 %v2873_v27  ;;  %v3143_v36 = vadd.f32 1.0, %v7451_v16 }
 0x231   : > { %v5440_v34 = vpop.eup %5439  ;;  %v3146_v37 = vmul.f32 -0.5, %v7451_v16  ;;  %v7485_v40 = vmul.f32 %v7436_v3, %v3174_v22  ;;  %vm7487_vm3 = vcmp.lt.f32.partialorder %v2573_v24, 0.0004427343  ;;  %v2877_v42 = vadd.f32 1.0, %v2876_v28  ;;  %v2151_v28 = vld [vmem:[%s7392_s30 + $0xe0] sm:$0xff] }
 0x232   : > { %v5442_v38 = vpop.eup %5441  ;;  %v2587_v39 = vmul.f32 0.6931472, %v5440_v34  ;;  %v2572_v47 = vmul.f32 %v7442_v8, %v2571_v32  ;;  %5449 = vlog2.f32 %v3143_v36  ;;  %vm7494_vm4 = vcmp.lt.f32.partialorder %v2879_v33, 0.0004427343 }
 0x233   : > { %v5444_v43 = vpop.eup %5443  ;;  %v3163_v46 = vmul.f32 0.6931472, %v5442_v38  ;;  %v3147_v50 = vadd.f32 1.0, %v3146_v37  ;;  %v3149_v54 = vand.u32 2147483647, %v7451_v16  ;;  %v3449_v57 = vadd.f32 1.0, %v7457_v20 }
 0x234   : > { %v2593_v51 = vsel %vm7459_vm0, %v2590_v30, %v2587_v39  ;;  %v5446_v62 = vpop.eup %5445  ;;  %v3172_v4 = vmul.f32 0.6931472, %v5444_v43  ;;  %v3452_v5 = vmul.f32 -0.5, %v7457_v20  ;;  %v2878_v10 = vmul.f32 %v7448_v12, %v2877_v42  ;;  %v2185_v37 = vld [vmem:[%s7392_s30 + $0x1f0] sm:$0xff]  ;;  %v2215_v43 = vld [vmem:[%s7392_s30 + $0x2e0] sm:$0xff] }
 0x235   : > { %v4073_v0 = vmul.f32 %v7425_v58, %v2593_v51  ;;  %v3169_v1 = vsel %vm7467_vm1, %v3166_v31, %v3163_v46  ;;  %v2569_v9 = vmul.f32 0.6931472, %v5446_v62  ;;  %5451 = vlog2.f32 %v3449_v57  ;;  %v1671_v62 = vld [vmem:[%s7394_s6 + $0x3e0] sm:$0xff] }
 0x236   : > { %v4137_v7 = vmul.f32 %v7431_v63, %v3169_v1  ;;  %v5448_v13 = vpop.eup %5447  ;;  %v3148_v58 = vmul.f32 %v7451_v16, %v3147_v50  ;;  %v3453_v17 = vadd.f32 1.0, %v3452_v5  ;;  %v3455_v18 = vand.u32 2147483647, %v7457_v20  ;;  %v2249_v5 = vld [vmem:[%s7392_s30 + $0x3f0] sm:$0xff]  ;;  %v1635_v39 = vld [vmem:[%s7394_s6 + $0x2c0] sm:$0xff] }
 0x237   : > { %v4553_v14 = vmul.f32 %v4361_v55, %v4073_v0  ;;  %v2575_v63 = vsel %vm7487_vm3, %v2572_v47, %v2569_v9  ;;  %v2875_v22 = vmul.f32 0.6931472, %v5448_v13  ;;  %v3458_v23 = vadd.f32 1.0, %v7465_v25  ;;  %v1571_v0 = vld [vmem:[%s7394_s6 + $0xc0] sm:$0xff]  ;;  %v7574_v13 = vld [vmem:[%s7396_s18 + $0x1f0] sm:$0xff] }
 0x238   : > { %v4617_v21 = vmul.f32 %v4425_v56, %v4137_v7  ;;  %v5450_v24 = vpop.eup %5449  ;;  %v3178_v55 = vsel %vm7478_vm2, %v7485_v40, %v3172_v4  ;;  %v4071_v26 = vmul.f32 %v7442_v8, %v2575_v63  ;;  %vm7521_vm5 = vcmp.lt.f32.partialorder %v3149_v54, 0.0004427343 }
 0x239   : > { %v4745_v44 = vadd.f32 %v4553_v14, %v2153_v6  ;;  %v2881_v30 = vsel %vm7494_vm4, %v2878_v10, %v2875_v22  ;;  %v3145_v31 = vmul.f32 0.6931472, %v5450_v24  ;;  %v3454_v32 = vmul.f32 %v7457_v20, %v3453_v17  ;;  %v4248_v6 = vld [vmem:[%s7396_s18 + $0x68] sm:$0xff] }
 0x23a   : > { %v4809_v56 = vadd.f32 %v4617_v21, %v2217_v15  ;;  %v4551_v33 = vmul.f32 %v4359_v60, %v4071_v26  ;;  %v4105_v34 = vmul.f32 %v7448_v12, %v2881_v30  ;;  %5453 = vlog2.f32 %v3458_v23  ;;  %v7571_v10 = vld [vmem:[%s7396_s18 + $0x168] sm:$0xff]  ;;  %v1605_v23 = vld [vmem:[%s7394_s6 + $0x1d0] sm:$0xff] }
 0x23b   : > { %4920 = vmatpush.msra.mxu0 %v4745_v44  ;;  %v3461_v8 = vmul.f32 -0.5, %v7465_v25  ;;  %v5452_v36 = vpop.eup %5451  ;;  %v3151_v38 = vsel %vm7521_vm5, %v3148_v58, %v3145_v31  ;;  %vm7539_vm6 = vcmp.lt.f32.partialorder %v3455_v18, 0.0004427343  ;;  %v2549_v48 = vadd.f32 1.0, %v7473_v29 }
 0x23c   : > { %4960 = vmatpush.msra.mxu2 %v4809_v56  ;;  %v2552_v60 = vmul.f32 -0.5, %v7473_v29  ;;  %v4743_v12 = vadd.f32 %v4551_v33, %v2151_v28  ;;  %v4585_v40 = vmul.f32 %v4393_v61, %v4105_v34  ;;  %v4135_v41 = vmul.f32 %v7451_v16, %v3151_v38  ;;  %v7599_v56 = vld [vmem:[%s7396_s18 + $0x60] sm:$0xff]  ;;  %v7612_v38 = vld [vmem:[%s7396_s18 + $0xe8] sm:$0xff] }
 0x23d   : > { %v3451_v42 = vmul.f32 0.6931472, %v5452_v36  ;;  %v3462_v46 = vadd.f32 1.0, %v3461_v8  ;;  %v3464_v47 = vand.u32 2147483647, %v7465_v25  ;;  %v4457_v50 = vunpack.c.l.bf16 %v7534_v35 }
 0x23e   : > { %5455 = vlog2.f32 %v2549_v48  ;;  %4921 = vmatpush.msra.mxu0 %v4743_v12  ;;  %v4777_v51 = vadd.f32 %v4585_v40, %v2185_v37  ;;  %v4615_v49 = vmul.f32 %v4423_v2, %v4135_v41  ;;  %v2553_v16 = vadd.f32 1.0, %v2552_v60  ;;  %v2149_v60 = vld [vmem:[%s7392_s30 + $0xd0] sm:$0xff] }
 0x23f   : > { %v3457_v61 = vsel %vm7539_vm6, %v3454_v32, %v3451_v42  ;;  %v4138_v53 = vmul.f32 %v7436_v3, %v3178_v55  ;;  %v2555_v57 = vand.u32 2147483647, %v7473_v29  ;;  %5457 = vpow2.f32 %v7446_v11  ;;  %v7568_v11 = vld [vmem:[%s7396_s18 + $0xf0] sm:$0xff] }
 0x240   : > { %v4169_v54 = vmul.f32 %v7457_v20, %v3457_v61  ;;  %v5454_v1 = vpop.eup %5453  ;;  %4940 = vmatpush.msra.mxu1 %v4777_v51  ;;  %v4807_v4 = vadd.f32 %v4615_v49, %v2215_v43  ;;  %5459 = vpow2.f32 %v7455_v19  ;;  %v3463_v20 = vmul.f32 %v7465_v25, %v3462_v46  ;;  %v1669_v46 = vld [vmem:[%s7394_s6 + $0x3d0] sm:$0xff] }
 0x241   : > { %v3460_v3 = vmul.f32 0.6931472, %v5454_v1  ;;  %v4458_v7 = vunpack.c.h.bf16 %v7534_v35  ;;  %vm7576_vm7 = vcmp.lt.f32.partialorder %v3464_v47, 0.0004427343  ;;  %v2554_v19 = vmul.f32 %v7473_v29, %v2553_v16  ;;  %v2221_v37 = vld [vmem:[%s7392_s30 + $0x310] sm:$0xff] }
 0x242   : > { %v4649_v9 = vmul.f32 %v4457_v50, %v4169_v54  ;;  %4961 = vmatpush.msra.mxu2 %v4807_v4  ;;  %v1987_v15 = vmul.f32 1.442695, %v1671_v62  ;;  %v1787_v58 = vmul.f32 1.442695, %v1571_v0  ;;  %v7583_v18 = vmul.f32 %v4426_v59, %v4138_v53 }
 0x243   : > { %vm7585_vm8 = vcmp.lt.f32.partialorder %v2555_v57, 0.0004427343  ;;  %v4357_v22 = vunpack.c.l.bf16 %v4248_v6  ;;  %v4391_v44 = vunpack.c.l.bf16 %v7568_v11  ;;  %v4421_v55 = vunpack.c.l.bf16 %v7571_v10  ;;  %v1569_v57 = vld [vmem:[%s7394_s6 + $0xb0] sm:$0xff]  ;;  %v2247_v6 = vld [vmem:[%s7392_s30 + $0x3e0] sm:$0xff] }
 0x244   : > { %v5456_v17 = vpop.eup %5455  ;;  %v4841_v21 = vadd.f32 %v4649_v9, %v2249_v5  ;;  %5461 = vpow2.f32 %v1987_v15  ;;  %v3466_v45 = vsel %vm7576_vm7, %v3463_v20, %v3460_v3  ;;  %v4455_v27 = vunpack.c.l.bf16 %v7574_v13  ;;  %v1603_v20 = vld [vmem:[%s7394_s6 + $0x1c0] sm:$0xff] }
 0x245   : > { %v2551_v24 = vmul.f32 0.6931472, %v5456_v17  ;;  %v7592_v26 = vpop.eup %5457  ;;  %5463 = vpow2.f32 %v1787_v58  ;;  %v1855_v33 = vmul.f32 1.442695, %v1605_v23  ;;  %v7616_v48 = vmul.f32 %v7465_v25, %v3466_v45 }
 0x246   : > { %4980 = vmatpush.msra.mxu3 %v4841_v21  ;;  %v7601_v28 = vpop.eup %5459  ;;  %v2855_v31 = vadd.f32 1.0, %v7592_v26  ;;  %v2858_v32 = vmul.f32 -0.5, %v7592_v26  ;;  %v2861_v12 = vand.u32 2147483647, %v7592_v26  ;;  %v4355_v40 = vunpack.c.l.bf16 %v7599_v56  ;;  %v2181_v56 = vld [vmem:[%s7392_s30 + $0x1d0] sm:$0xff] }
 0x247   : > { %v2557_v30 = vsel %vm7585_vm8, %v2554_v19, %v2551_v24  ;;  %v3125_v8 = vadd.f32 1.0, %v7601_v28  ;;  %v3128_v36 = vmul.f32 -0.5, %v7601_v28  ;;  %v3131_v43 = vand.u32 2147483647, %v7601_v28 }
 0x248   : > { %v4069_v34 = vmul.f32 %v7473_v29, %v2557_v30  ;;  %5465 = vlog2.f32 %v2855_v31  ;;  %v7622_v29 = vld [vmem:[%s7396_s18 + $0x160] sm:$0xff]  ;;  %v2859_v42 = vadd.f32 1.0, %v2858_v32  ;;  %v4389_v25 = vunpack.c.l.bf16 %v7612_v38 }
 0x249   : > { %5467 = vlog2.f32 %v3125_v8  ;;  %v3129_v50 = vadd.f32 1.0, %v3128_v36  ;;  %v1915_v51 = vmul.f32 1.442695, %v1635_v39  ;;  %v4419_v54 = vunpack.c.l.bf16 %v7622_v29 }
 0x24a   : > { %v4549_v41 = vmul.f32 %v4357_v22, %v4069_v34  ;;  %v7626_v47 = vpop.eup %5461  ;;  %5469 = vpow2.f32 %v1855_v33  ;;  %vm7635_vm9 = vcmp.lt.f32.partialorder %v2861_v12, 0.0004427343  ;;  %v1983_v4 = vmul.f32 1.442695, %v1669_v46  ;;  %v2213_v46 = vld [vmem:[%s7392_s30 + $0x2d0] sm:$0xff] }
 0x24b   : > { %v7629_v49 = vpop.eup %5463  ;;  %v3431_v16 = vadd.f32 1.0, %v7626_v47  ;;  %v3434_v53 = vmul.f32 -0.5, %v7626_v47  ;;  %v2860_v5 = vmul.f32 %v7592_v26, %v2859_v42  ;;  %vm7642_vm10 = vcmp.lt.f32.partialorder %v3131_v43, 0.0004427343  ;;  %v2145_v42 = vld [vmem:[%s7392_s30 + $0xb0] sm:$0xff] }
 0x24c   : > { %v4741_v61 = vadd.f32 %v4549_v41, %v2149_v60  ;;  %v2531_v0 = vadd.f32 1.0, %v7629_v49  ;;  %v2534_v1 = vmul.f32 -0.5, %v7629_v49  ;;  %v3437_v3 = vand.u32 2147483647, %v7626_v47  ;;  %v2183_v60 = vld [vmem:[%s7392_s30 + $0x1e0] sm:$0xff] }
 0x24d   : > { %5471 = vlog2.f32 %v3431_v16  ;;  %v3130_v14 = vmul.f32 %v7601_v28, %v3129_v50  ;;  %v3435_v19 = vadd.f32 1.0, %v3434_v53  ;;  %v1783_v15 = vmul.f32 1.442695, %v1569_v57 }
 0x24e   : > { %4922 = vmatpush.msra.mxu0 %v4741_v61  ;;  %v5466_v9 = vpop.eup %5465  ;;  %5473 = vlog2.f32 %v2531_v0  ;;  %v2535_v21 = vadd.f32 1.0, %v2534_v1  ;;  %v2537_v63 = vand.u32 2147483647, %v7629_v49  ;;  %v1851_v45 = vmul.f32 1.442695, %v1603_v20  ;;  %v7676_v61 = vld [vmem:[%s7396_s18 + $0x1e8] sm:$0xff] }
 0x24f   : > { %v5468_v58 = vpop.eup %5467  ;;  %v2857_v17 = vmul.f32 0.6931472, %v5466_v9  ;;  %5475 = vpow2.f32 %v1915_v51  ;;  %vm7655_vm11 = vcmp.lt.f32.partialorder %v3437_v3, 0.0004427343  ;;  %v3436_v36 = vmul.f32 %v7626_v47, %v3435_v19 }
 0x250   : > { %v7650_v22 = vpop.eup %5469  ;;  %v3127_v23 = vmul.f32 0.6931472, %v5468_v58  ;;  %5477 = vpow2.f32 %v1983_v4  ;;  %v2536_v41 = vmul.f32 %v7629_v49, %v2535_v21  ;;  %vm7668_vm12 = vcmp.lt.f32.partialorder %v2537_v63, 0.0004427343 }
 0x251   : > { %v2863_v30 = vsel %vm7635_vm9, %v2860_v5, %v2857_v17  ;;  %v2837_v32 = vadd.f32 1.0, %v7650_v22  ;;  %v2840_v33 = vmul.f32 -0.5, %v7650_v22  ;;  %5479 = vpow2.f32 %v1783_v15  ;;  %v2147_v15 = vld [vmem:[%s7392_s30 + $0xc0] sm:$0xff] }
 0x252   : > { %v4103_v34 = vmul.f32 %v7592_v26, %v2863_v30  ;;  %v3133_v8 = vsel %vm7642_vm10, %v3130_v14, %v3127_v23  ;;  %v2843_v11 = vand.u32 2147483647, %v7650_v22  ;;  %v4453_v4 = vunpack.c.l.bf16 %v7676_v61  ;;  %v1633_v14 = vld [vmem:[%s7394_s6 + $0x2b0] sm:$0xff] }
 0x253   : > { %v5472_v39 = vpop.eup %5471  ;;  %v4133_v12 = vmul.f32 %v7601_v28, %v3133_v8  ;;  %5481 = vlog2.f32 %v2837_v32  ;;  %v2841_v51 = vadd.f32 1.0, %v2840_v33  ;;  %v7683_v28 = vmul.f32 %v4458_v7, %v7616_v48 }
 0x254   : > { %v5474_v43 = vpop.eup %5473  ;;  %v4583_v26 = vmul.f32 %v4391_v44, %v4103_v34  ;;  %v3433_v50 = vmul.f32 0.6931472, %v5472_v39  ;;  %5483 = vpow2.f32 %v1851_v45  ;;  %vm7708_vm13 = vcmp.lt.f32.partialorder %v2843_v11, 0.0004427343 }
 0x255   : > { %v7678_v16 = vpop.eup %5475  ;;  %v4613_v53 = vmul.f32 %v4421_v55, %v4133_v12  ;;  %v2533_v57 = vmul.f32 0.6931472, %v5474_v43  ;;  %v2842_v20 = vmul.f32 %v7650_v22, %v2841_v51  ;;  %v1911_v32 = vmul.f32 1.442695, %v1633_v14  ;;  %v1667_v12 = vld [vmem:[%s7394_s6 + $0x3c0] sm:$0xff] }
 0x256   : > { %v7688_v44 = vpop.eup %5477  ;;  %v4775_v62 = vadd.f32 %v4583_v26, %v2183_v60  ;;  %v3439_v0 = vsel %vm7655_vm11, %v3436_v36, %v3433_v50  ;;  %v3107_v1 = vadd.f32 1.0, %v7678_v16  ;;  %v3110_v35 = vmul.f32 -0.5, %v7678_v16 }
 0x257   : > { %v4805_v7 = vadd.f32 %v4613_v53, %v2213_v46  ;;  %v4167_v48 = vmul.f32 %v7626_v47, %v3439_v0  ;;  %v2539_v55 = vsel %vm7668_vm12, %v2536_v41, %v2533_v57  ;;  %v7698_v5 = vpop.eup %5479  ;;  %v3413_v9 = vadd.f32 1.0, %v7688_v44  ;;  %v1567_v0 = vld [vmem:[%s7394_s6 + $0xa0] sm:$0xff] }
 0x258   : > { %4941 = vmatpush.msra.mxu1 %v4775_v62  ;;  %v4067_v3 = vmul.f32 %v7629_v49, %v2539_v55  ;;  %5485 = vlog2.f32 %v3107_v1  ;;  %v3111_v17 = vadd.f32 1.0, %v3110_v35  ;;  %v3416_v49 = vmul.f32 -0.5, %v7688_v44 }
 0x259   : > { %v5482_v19 = vpop.eup %5481  ;;  %4962 = vmatpush.msra.mxu2 %v4805_v7  ;;  %v4647_v47 = vmul.f32 %v4455_v27, %v4167_v48  ;;  %v3113_v45 = vand.u32 2147483647, %v7678_v16  ;;  %5487 = vlog2.f32 %v3413_v9  ;;  %v2513_v31 = vadd.f32 1.0, %v7698_v5  ;;  %v1601_v7 = vld [vmem:[%s7394_s6 + $0x1b0] sm:$0xff]  ;;  %v4263_v9 = vld [vmem:[%s7396_s18 + $0xe0] sm:$0xff] }
 0x25a   : > { %v7713_v21 = vpop.eup %5483  ;;  %v4547_v63 = vmul.f32 %v4355_v40, %v4067_v3  ;;  %v2839_v23 = vmul.f32 0.6931472, %v5482_v19  ;;  %v3417_v30 = vadd.f32 1.0, %v3416_v49  ;;  %v3419_v8 = vand.u32 2147483647, %v7688_v44  ;;  %v2211_v19 = vld [vmem:[%s7392_s30 + $0x2c0] sm:$0xff] }
 0x25b   : > { %v4839_v27 = vadd.f32 %v4647_v47, %v2247_v6  ;;  %v2516_v36 = vmul.f32 -0.5, %v7698_v5  ;;  %v3112_v39 = vmul.f32 %v7678_v16, %v3111_v17  ;;  %5489 = vlog2.f32 %v2513_v31 }
 0x25c   : > { %v4739_v33 = vadd.f32 %v4547_v63, %v2147_v15  ;;  %v2845_v34 = vsel %vm7708_vm13, %v2842_v20, %v2839_v23  ;;  %v2819_v60 = vadd.f32 1.0, %v7713_v21  ;;  %vm7728_vm14 = vcmp.lt.f32.partialorder %v3113_v45, 0.0004427343  ;;  %v4246_v20 = vld [vmem:[%s7396_s18 + $0x58] sm:$0xff]  ;;  %v1631_v23 = vld [vmem:[%s7394_s6 + $0x2a0] sm:$0xff] }
 0x25d   : > { %4981 = vmatpush.msra.mxu3 %v4839_v27  ;;  %v4101_v40 = vmul.f32 %v7650_v22, %v2845_v34  ;;  %v2517_v43 = vadd.f32 1.0, %v2516_v36  ;;  %v2519_v26 = vand.u32 2147483647, %v7698_v5  ;;  %v2822_v46 = vmul.f32 -0.5, %v7713_v21  ;;  %v2245_v27 = vld [vmem:[%s7392_s30 + $0x3d0] sm:$0xff] }
 0x25e   : > { %v5486_v41 = vpop.eup %5485  ;;  %4923 = vmatpush.msra.mxu0 %v4739_v33  ;;  %v3418_v51 = vmul.f32 %v7688_v44, %v3417_v30  ;;  %5491 = vlog2.f32 %v2819_v60  ;;  %vm7737_vm15 = vcmp.lt.f32.partialorder %v3419_v8, 0.0004427343  ;;  %v2825_v62 = vand.u32 2147483647, %v7713_v21  ;;  %v7769_v33 = vld [vmem:[%s7396_s18 + $0x158] sm:$0xff]  ;;  %v7781_v60 = vld [vmem:[%s7396_s18 + $0x1e0] sm:$0xff] }
 0x25f   : > { %v4581_v22 = vmul.f32 %v4389_v25, %v4101_v40  ;;  %v3109_v50 = vmul.f32 0.6931472, %v5486_v41  ;;  %v5488_v53 = vpop.eup %5487  ;;  %v2823_v11 = vadd.f32 1.0, %v2822_v46  ;;  %5493 = vpow2.f32 %v1911_v32 }
 0x260   : > { %v3415_v25 = vmul.f32 0.6931472, %v5488_v53  ;;  %v1979_v35 = vmul.f32 1.442695, %v1667_v12  ;;  %v2518_v6 = vmul.f32 %v7698_v5, %v2517_v43  ;;  %vm7749_vm0 = vcmp.lt.f32.partialorder %v2519_v26, 0.0004427343 }
 0x261   : > { %v4773_v1 = vadd.f32 %v4581_v22, %v2181_v56  ;;  %v3115_v38 = vsel %vm7728_vm14, %v3112_v39, %v3109_v50  ;;  %v5490_v14 = vpop.eup %5489  ;;  %v1779_v15 = vmul.f32 1.442695, %v1567_v0  ;;  %v1847_v63 = vmul.f32 1.442695, %v1601_v7  ;;  %v2179_v50 = vld [vmem:[%s7392_s30 + $0x1c0] sm:$0xff] }
 0x262   : > { %v4131_v48 = vmul.f32 %v7678_v16, %v3115_v38  ;;  %v3421_v47 = vsel %vm7737_vm15, %v3418_v51, %v3415_v25  ;;  %v2824_v16 = vmul.f32 %v7713_v21, %v2823_v11  ;;  %5495 = vpow2.f32 %v1979_v35  ;;  %v7803_v35 = vld [vmem:[%s7396_s18 + $0xd8] sm:$0xff]  ;;  %v2223_v22 = vld [vmem:[%s7392_s30 + $0x320] sm:$0xff] }
 0x263   : > { %4942 = vmatpush.msra.mxu1 %v4773_v1  ;;  %v4165_v17 = vmul.f32 %v7688_v44, %v3421_v47  ;;  %v2515_v49 = vmul.f32 0.6931472, %v5490_v14  ;;  %v4353_v30 = vunpack.c.l.bf16 %v4246_v20  ;;  %vm7764_vm1 = vcmp.lt.f32.partialorder %v2825_v62, 0.0004427343  ;;  %v1665_v62 = vld [vmem:[%s7394_s6 + $0x3b0] sm:$0xff] }
 0x264   : > { %v4611_v58 = vmul.f32 %v4419_v54, %v4131_v48  ;;  %v5492_v45 = vpop.eup %5491  ;;  %v4387_v32 = vunpack.c.l.bf16 %v4263_v9  ;;  %5497 = vpow2.f32 %v1779_v15  ;;  %v1907_v12 = vmul.f32 1.442695, %v1631_v23  ;;  %v1581_v48 = vld [vmem:[%s7394_s6 + $0x110] sm:$0xff] }
 0x265   : > { %v7771_v34 = vpop.eup %5493  ;;  %v4645_v44 = vmul.f32 %v4453_v4, %v4165_v17  ;;  %v2521_v8 = vsel %vm7749_vm0, %v2518_v6, %v2515_v49  ;;  %v2821_v36 = vmul.f32 0.6931472, %v5492_v45  ;;  %v4417_v43 = vunpack.c.l.bf16 %v7769_v33 }
 0x266   : > { %v4803_v54 = vadd.f32 %v4611_v58, %v2211_v19  ;;  %v4065_v56 = vmul.f32 %v7698_v5, %v2521_v8  ;;  %v3089_v40 = vadd.f32 1.0, %v7771_v34  ;;  %v3092_v39 = vmul.f32 -0.5, %v7771_v34  ;;  %v1565_v58 = vld [vmem:[%s7394_s6 + $0x90] sm:$0xff] }
 0x267   : > { %v4837_v41 = vadd.f32 %v4645_v44, %v2245_v27  ;;  %v2827_v4 = vsel %vm7764_vm1, %v2824_v16, %v2821_v36  ;;  %5499 = vpow2.f32 %v1847_v63  ;;  %v4451_v11 = vunpack.c.l.bf16 %v7781_v60  ;;  %v7822_v27 = vld [vmem:[%s7396_s18 + $0x150] sm:$0xff] }
 0x268   : > { %4963 = vmatpush.msra.mxu2 %v4803_v54  ;;  %v7787_v26 = vpop.eup %5495  ;;  %v4545_v5 = vmul.f32 %v4353_v30, %v4065_v56  ;;  %v4099_v46 = vmul.f32 %v7713_v21, %v2827_v4  ;;  %5501 = vlog2.f32 %v3089_v40  ;;  %v3093_v51 = vadd.f32 1.0, %v3092_v39  ;;  %v7800_v21 = vld [vmem:[%s7396_s18 + $0x50] sm:$0xff] }
 0x269   : > { %4982 = vmatpush.msra.mxu3 %v4837_v41  ;;  %v3395_v53 = vadd.f32 1.0, %v7787_v26  ;;  %v3398_v57 = vmul.f32 -0.5, %v7787_v26  ;;  %v3095_v25 = vand.u32 2147483647, %v7771_v34  ;;  %5503 = vpow2.f32 %v1907_v12 }
 0x26a   : > { %v7796_v0 = vpop.eup %5497  ;;  %v4737_v1 = vadd.f32 %v4545_v5, %v2145_v42  ;;  %v4579_v38 = vmul.f32 %v4387_v32, %v4099_v46  ;;  %v3401_v7 = vand.u32 2147483647, %v7787_v26  ;;  %v1975_v14 = vmul.f32 1.442695, %v1665_v62  ;;  %v2209_v42 = vld [vmem:[%s7392_s30 + $0x2b0] sm:$0xff] }
 0x26b   : > { %5505 = vlog2.f32 %v3395_v53  ;;  %v2495_v6 = vadd.f32 1.0, %v7796_v0  ;;  %v3399_v20 = vadd.f32 1.0, %v3398_v57  ;;  %v2498_v9 = vmul.f32 -0.5, %v7796_v0 }
 0x26c   : > { %4924 = vmatpush.msra.mxu0 %v4737_v1  ;;  %v4771_v3 = vadd.f32 %v4579_v38, %v2179_v50  ;;  %v3094_v47 = vmul.f32 %v7771_v34, %v3093_v51  ;;  %v4351_v16 = vunpack.c.l.bf16 %v7800_v21  ;;  %v4385_v15 = vunpack.c.l.bf16 %v7803_v35  ;;  %v1599_v51 = vld [vmem:[%s7394_s6 + $0x1a0] sm:$0xff]  ;;  %v7906_v35 = vld [vmem:[%s7396_s18 + $0x148] sm:$0xff] }
 0x26d   : > { %v7809_v19 = vpop.eup %5499  ;;  %5507 = vlog2.f32 %v2495_v6  ;;  %vm7815_vm2 = vcmp.lt.f32.partialorder %v3095_v25, 0.0004427343  ;;  %v2499_v63 = vadd.f32 1.0, %v2498_v9  ;;  %v2501_v31 = vand.u32 2147483647, %v7796_v0  ;;  %v1629_v6 = vld [vmem:[%s7394_s6 + $0x290] sm:$0xff] }
 0x26e   : > { %v5502_v17 = vpop.eup %5501  ;;  %4943 = vmatpush.msra.mxu1 %v4771_v3  ;;  %v2801_v23 = vadd.f32 1.0, %v7809_v19  ;;  %v2804_v45 = vmul.f32 -0.5, %v7809_v19  ;;  %v2807_v32 = vand.u32 2147483647, %v7809_v19  ;;  %5509 = vpow2.f32 %v1975_v14 }
 0x26f   : > { %v3091_v30 = vmul.f32 0.6931472, %v5502_v17  ;;  %v7826_v54 = vpop.eup %5503  ;;  %v3400_v44 = vmul.f32 %v7787_v26, %v3399_v20  ;;  %vm7829_vm3 = vcmp.lt.f32.partialorder %v3401_v7, 0.0004427343  ;;  %v1775_v36 = vmul.f32 1.442695, %v1565_v58 }
 0x270   : > { %5511 = vlog2.f32 %v2801_v23  ;;  %v2805_v39 = vadd.f32 1.0, %v2804_v45  ;;  %v3071_v12 = vadd.f32 1.0, %v7826_v54  ;;  %v3074_v41 = vmul.f32 -0.5, %v7826_v54 }
 0x271   : > { %v5506_v56 = vpop.eup %5505  ;;  %v3097_v40 = vsel %vm7815_vm2, %v3094_v47, %v3091_v30  ;;  %v2500_v46 = vmul.f32 %v7796_v0, %v2499_v63  ;;  %v4415_v50 = vunpack.c.l.bf16 %v7822_v27  ;;  %vm7842_vm4 = vcmp.lt.f32.partialorder %v2501_v31, 0.0004427343  ;;  %v2143_v31 = vld [vmem:[%s7392_s30 + $0xa0] sm:$0xff] }
 0x272   : > { %v4129_v4 = vmul.f32 %v7771_v34, %v3097_v40  ;;  %v3397_v5 = vmul.f32 0.6931472, %v5506_v56  ;;  %vm7846_vm5 = vcmp.lt.f32.partialorder %v2807_v32, 0.0004427343  ;;  %5513 = vlog2.f32 %v3071_v12  ;;  %v1663_v56 = vld [vmem:[%s7394_s6 + $0x3a0] sm:$0xff] }
 0x273   : > { %v5508_v53 = vpop.eup %5507  ;;  %v3077_v1 = vand.u32 2147483647, %v7826_v54  ;;  %v3075_v7 = vadd.f32 1.0, %v3074_v41  ;;  %v2806_v9 = vmul.f32 %v7809_v19, %v2805_v39  ;;  %5515 = vpow2.f32 %v1775_v36  ;;  %v7876_v36 = vld [vmem:[%s7396_s18 + $0x1d8] sm:$0xff] }
 0x274   : > { %v4609_v34 = vmul.f32 %v4417_v43, %v4129_v4  ;;  %v3403_v38 = vsel %vm7829_vm3, %v3400_v44, %v3397_v5  ;;  %v2497_v25 = vmul.f32 0.6931472, %v5508_v53  ;;  %v7856_v3 = vpop.eup %5509  ;;  %v1843_v14 = vmul.f32 1.442695, %v1599_v51  ;;  %v2243_v43 = vld [vmem:[%s7392_s30 + $0x3c0] sm:$0xff]  ;;  %v2177_v51 = vld [vmem:[%s7392_s30 + $0x1b0] sm:$0xff] }
 0x275   : > { %v4163_v20 = vmul.f32 %v7787_v26, %v3403_v38  ;;  %v3377_v49 = vadd.f32 1.0, %v7856_v3  ;;  %v3380_v63 = vmul.f32 -0.5, %v7856_v3  ;;  %v1903_v30 = vmul.f32 1.442695, %v1629_v6  ;;  %v1563_v53 = vld [vmem:[%s7394_s6 + $0x80] sm:$0xff]  ;;  %v7903_v6 = vld [vmem:[%s7396_s18 + $0xd0] sm:$0xff] }
 0x276   : > { %v5512_v47 = vpop.eup %5511  ;;  %v4801_v58 = vadd.f32 %v4609_v34, %v2209_v42  ;;  %v2503_v17 = vsel %vm7842_vm4, %v2500_v46, %v2497_v25  ;;  %v3076_v32 = vmul.f32 %v7826_v54, %v3075_v7  ;;  %vm7870_vm6 = vcmp.lt.f32.partialorder %v3077_v1, 0.0004427343  ;;  %v7897_v34 = vld [vmem:[%s7396_s18 + $0x48] sm:$0xff] }
 0x277   : > { %v4643_v23 = vmul.f32 %v4451_v11, %v4163_v20  ;;  %v4063_v26 = vmul.f32 %v7796_v0, %v2503_v17  ;;  %v2803_v45 = vmul.f32 0.6931472, %v5512_v47  ;;  %5517 = vlog2.f32 %v3377_v49 }
 0x278   : > { %4964 = vmatpush.msra.mxu2 %v4801_v58  ;;  %v5514_v11 = vpop.eup %5513  ;;  %v3381_v12 = vadd.f32 1.0, %v3380_v63  ;;  %v3383_v4 = vand.u32 2147483647, %v7856_v3  ;;  %5519 = vpow2.f32 %v1843_v14  ;;  %v4449_v21 = vunpack.c.l.bf16 %v7876_v36 }
 0x279   : > { %v4835_v0 = vadd.f32 %v4643_v23, %v2243_v43  ;;  %v4543_v40 = vmul.f32 %v4351_v16, %v4063_v26  ;;  %v2809_v39 = vsel %vm7846_vm5, %v2806_v9, %v2803_v45  ;;  %v3073_v42 = vmul.f32 0.6931472, %v5514_v11  ;;  %v7885_v5 = vpop.eup %5515  ;;  %v2207_v9 = vld [vmem:[%s7392_s30 + $0x2a0] sm:$0xff]  ;;  %v7922_v45 = vld [vmem:[%s7396_s18 + $0x1d0] sm:$0xff] }
 0x27a   : > { %v4097_v41 = vmul.f32 %v7809_v19, %v2809_v39  ;;  %5521 = vpow2.f32 %v1903_v30  ;;  %v1971_v16 = vmul.f32 1.442695, %v1663_v56  ;;  %v2477_v62 = vadd.f32 1.0, %v7885_v5 }
 0x27b   : > { %4983 = vmatpush.msra.mxu3 %v4835_v0  ;;  %v4735_v46 = vadd.f32 %v4543_v40, %v2143_v31  ;;  %v3079_v57 = vsel %vm7870_vm6, %v3076_v32, %v3073_v42  ;;  %v2480_v1 = vmul.f32 -0.5, %v7885_v5  ;;  %v3382_v25 = vmul.f32 %v7856_v3, %v3381_v12  ;;  %v2241_v12 = vld [vmem:[%s7392_s30 + $0x3b0] sm:$0xff] }
 0x27c   : > { %v4577_v19 = vmul.f32 %v4385_v15, %v4097_v41  ;;  %v4127_v38 = vmul.f32 %v7826_v54, %v3079_v57  ;;  %5523 = vpow2.f32 %v1971_v16  ;;  %vm7909_vm7 = vcmp.lt.f32.partialorder %v3383_v4, 0.0004427343  ;;  %v1653_v4 = vld [vmem:[%s7394_s6 + $0x350] sm:$0xff] }
 0x27d   : > { %4925 = vmatpush.msra.mxu0 %v4735_v46  ;;  %v5518_v15 = vpop.eup %5517  ;;  %5525 = vlog2.f32 %v2477_v62  ;;  %v1771_v47 = vmul.f32 1.442695, %v1563_v53  ;;  %v2481_v43 = vadd.f32 1.0, %v2480_v1  ;;  %v4349_v17 = vunpack.c.l.bf16 %v7897_v34  ;;  %v1597_v46 = vld [vmem:[%s7394_s6 + $0x190] sm:$0xff] }
 0x27e   : > { %v4769_v20 = vadd.f32 %v4577_v19, %v2177_v51  ;;  %v4607_v54 = vmul.f32 %v4415_v50, %v4127_v38  ;;  %v3379_v58 = vmul.f32 0.6931472, %v5518_v15  ;;  %v7916_v49 = vpop.eup %5519  ;;  %v2483_v63 = vand.u32 2147483647, %v7885_v5  ;;  %v1627_v19 = vld [vmem:[%s7394_s6 + $0x280] sm:$0xff]  ;;  %v2233_v40 = vld [vmem:[%s7392_s30 + $0x370] sm:$0xff] }
 0x27f   : > { %v4383_v23 = vunpack.c.l.bf16 %v7903_v6  ;;  %v4413_v26 = vunpack.c.l.bf16 %v7906_v35  ;;  %5527 = vpow2.f32 %v1771_v47  ;;  %v2783_v32 = vadd.f32 1.0, %v7916_v49 }
 0x280   : > { %4944 = vmatpush.msra.mxu1 %v4769_v20  ;;  %v7924_v30 = vpop.eup %5521  ;;  %v4799_v50 = vadd.f32 %v4607_v54, %v2207_v9  ;;  %v3385_v31 = vsel %vm7909_vm7, %v3382_v25, %v3379_v58  ;;  %v2786_v44 = vmul.f32 -0.5, %v7916_v49  ;;  %v2482_v41 = vmul.f32 %v7885_v5, %v2481_v43 }
 0x281   : > { %v4161_v56 = vmul.f32 %v7856_v3, %v3385_v31  ;;  %v3053_v11 = vadd.f32 1.0, %v7924_v30  ;;  %v3056_v0 = vmul.f32 -0.5, %v7924_v30  ;;  %5529 = vlog2.f32 %v2783_v32  ;;  %v2141_v32 = vld [vmem:[%s7392_s30 + $0x90] sm:$0xff] }
 0x282   : > { %v7934_v39 = vpop.eup %5523  ;;  %4965 = vmatpush.msra.mxu2 %v4799_v50  ;;  %v4447_v42 = vunpack.c.l.bf16 %v7922_v45  ;;  %vm7941_vm8 = vcmp.lt.f32.partialorder %v2483_v63, 0.0004427343  ;;  %v2787_v53 = vadd.f32 1.0, %v2786_v44  ;;  %v2789_v62 = vand.u32 2147483647, %v7916_v49  ;;  %v1661_v50 = vld [vmem:[%s7394_s6 + $0x390] sm:$0xff] }
 0x283   : > { %v5526_v3 = vpop.eup %5525  ;;  %v4641_v51 = vmul.f32 %v4449_v21, %v4161_v56  ;;  %5531 = vlog2.f32 %v3053_v11  ;;  %v3057_v1 = vadd.f32 1.0, %v3056_v0  ;;  %v3359_v34 = vadd.f32 1.0, %v7934_v39 }
 0x284   : > { %v2479_v57 = vmul.f32 0.6931472, %v5526_v3  ;;  %v3059_v21 = vand.u32 2147483647, %v7924_v30  ;;  %v3362_v15 = vmul.f32 -0.5, %v7934_v39  ;;  %v2788_v58 = vmul.f32 %v7916_v49, %v2787_v53  ;;  %v1561_v3 = vld [vmem:[%s7394_s6 + $0x70] sm:$0xff] }
 0x285   : > { %v7948_v38 = vpop.eup %5527  ;;  %v4833_v25 = vadd.f32 %v4641_v51, %v2241_v12  ;;  %v1839_v20 = vmul.f32 1.442695, %v1597_v46  ;;  %5533 = vlog2.f32 %v3359_v34  ;;  %v1899_v63 = vmul.f32 1.442695, %v1627_v19 }
 0x286   : > { %v2485_v9 = vsel %vm7941_vm8, %v2482_v41, %v2479_v57  ;;  %v2459_v14 = vadd.f32 1.0, %v7948_v38  ;;  %v2462_v47 = vmul.f32 -0.5, %v7948_v38  ;;  %v3363_v43 = vadd.f32 1.0, %v3362_v15 }
 0x287   : > { %4984 = vmatpush.msra.mxu3 %v4833_v25  ;;  %v4061_v54 = vmul.f32 %v7885_v5, %v2485_v9  ;;  %v5530_v31 = vpop.eup %5529  ;;  %vm7960_vm9 = vcmp.lt.f32.partialorder %v2789_v62, 0.0004427343  ;;  %v3058_v56 = vmul.f32 %v7924_v30, %v3057_v1  ;;  %v3365_v11 = vand.u32 2147483647, %v7934_v39  ;;  %v4243_v62 = vld [vmem:[%s7396_s18 + $0x40] sm:$0xff] }
 0x288   : > { %5535 = vlog2.f32 %v2459_v14  ;;  %v2785_v12 = vmul.f32 0.6931472, %v5530_v31  ;;  %vm7966_vm10 = vcmp.lt.f32.partialorder %v3059_v21, 0.0004427343  ;;  %v2463_v46 = vadd.f32 1.0, %v2462_v47  ;;  %v1595_v1 = vld [vmem:[%s7394_s6 + $0x180] sm:$0xff] }
 0x289   : > { %v5532_v5 = vpop.eup %5531  ;;  %v4541_v0 = vmul.f32 %v4349_v17, %v4061_v54  ;;  %v2465_v16 = vand.u32 2147483647, %v7948_v38  ;;  %5537 = vpow2.f32 %v1839_v20  ;;  %v1967_v53 = vmul.f32 1.442695, %v1661_v50  ;;  %v2175_v20 = vld [vmem:[%s7392_s30 + $0x1a0] sm:$0xff]  ;;  %v7988_v54 = vld [vmem:[%s7396_s18 + $0xc8] sm:$0xff] }
 0x28a   : > { %v3055_v51 = vmul.f32 0.6931472, %v5532_v5  ;;  %v2791_v57 = vsel %vm7960_vm9, %v2788_v58, %v2785_v12  ;;  %v3364_v17 = vmul.f32 %v7934_v39, %v3363_v43  ;;  %5539 = vpow2.f32 %v1899_v63  ;;  %v2205_v63 = vld [vmem:[%s7392_s30 + $0x290] sm:$0xff]  ;;  %v8009_v12 = vld [vmem:[%s7396_s18 + $0x1c8] sm:$0xff] }
 0x28b   : > { %v4733_v19 = vadd.f32 %v4541_v0, %v2141_v32  ;;  %v5534_v34 = vpop.eup %5533  ;;  %v4095_v25 = vmul.f32 %v7916_v49, %v2791_v57  ;;  %vm7980_vm11 = vcmp.lt.f32.partialorder %v3365_v11, 0.0004427343  ;;  %5541 = vpow2.f32 %v1967_v53  ;;  %v8002_v11 = vld [vmem:[%s7396_s18 + $0x140] sm:$0xff]  ;;  %11361 = vst [vmem:[#allocation6_spill] sm:$0xff] %v8009_v12 }
 0x28c   : > { %v3061_v21 = vsel %vm7966_vm10, %v3058_v56, %v3055_v51  ;;  %v3361_v14 = vmul.f32 0.6931472, %v5534_v34  ;;  %v2464_v47 = vmul.f32 %v7948_v38, %v2463_v46  ;;  %v1767_v58 = vmul.f32 1.442695, %v1561_v3  ;;  %v2239_v46 = vld [vmem:[%s7392_s30 + $0x3a0] sm:$0xff] }
 0x28d   : > { %4926 = vmatpush.msra.mxu0 %v4733_v19  ;;  %v4125_v9 = vmul.f32 %v7924_v30, %v3061_v21  ;;  %v4575_v43 = vmul.f32 %v4383_v23, %v4095_v25  ;;  %vm7993_vm12 = vcmp.lt.f32.partialorder %v2465_v16, 0.0004427343  ;;  %v4347_v31 = vunpack.c.l.bf16 %v4243_v62  ;;  %v8026_v62 = vld [vmem:[%s7396_s18 + $0x38] sm:$0xff] }
 0x28e   : > { %v5536_v49 = vpop.eup %5535  ;;  %v1835_v32 = vmul.f32 1.442695, %v1595_v1  ;;  %v3367_v44 = vsel %vm7980_vm11, %v3364_v17, %v3361_v14  ;;  %5543 = vpow2.f32 %v1767_v58  ;;  %v4381_v0 = vunpack.c.l.bf16 %v7988_v54  ;;  %v2139_v1 = vld [vmem:[%s7392_s30 + $0x80] sm:$0xff] }
 0x28f   : > { %v4605_v30 = vmul.f32 %v4413_v26, %v4125_v9  ;;  %v2461_v56 = vmul.f32 0.6931472, %v5536_v49  ;;  %v8004_v6 = vpop.eup %5537  ;;  %v4767_v23 = vadd.f32 %v4575_v43, %v2175_v20  ;;  %v4159_v5 = vmul.f32 %v7934_v39, %v3367_v44 }
 0x290   : > { %5545 = vpow2.f32 %v1835_v32  ;;  %v8011_v26 = vpop.eup %5539  ;;  %v2765_v51 = vadd.f32 1.0, %v8004_v6  ;;  %v2768_v16 = vmul.f32 -0.5, %v8004_v6  ;;  %v4411_v17 = vunpack.c.l.bf16 %v8002_v11 }
 0x291   : > { %v4797_v41 = vadd.f32 %v4605_v30, %v2205_v63  ;;  %v2467_v3 = vsel %vm7993_vm12, %v2464_v47, %v2461_v56  ;;  %v8018_v53 = vpop.eup %5541  ;;  %4945 = vmatpush.msra.mxu1 %v4767_v23  ;;  %v4639_v39 = vmul.f32 %v4447_v42, %v4159_v5  ;;  %v3035_v57 = vadd.f32 1.0, %v8011_v26 }
 0x292   : > { %v4059_v19 = vmul.f32 %v7948_v38, %v2467_v3  ;;  %5547 = vlog2.f32 %v2765_v51  ;;  %v2771_v34 = vand.u32 2147483647, %v8004_v6  ;;  %v3038_v25 = vmul.f32 -0.5, %v8011_v26  ;;  %v1625_v38 = vld [vmem:[%s7394_s6 + $0x270] sm:$0xff] }
 0x293   : > { %4966 = vmatpush.msra.mxu2 %v4797_v41  ;;  %v4445_v21 = vunpack.c.l.bf16 %v8009_v12  ;;  %v4831_v15 = vadd.f32 %v4639_v39, %v2239_v46  ;;  %v2769_v42 = vadd.f32 1.0, %v2768_v16  ;;  %5549 = vlog2.f32 %v3035_v57  ;;  %v8051_v46 = vld [vmem:[%s7396_s18 + $0xc0] sm:$0xff] }
 0x294   : > { %v4539_v20 = vmul.f32 %v4347_v31, %v4059_v19  ;;  %v8033_v9 = vpop.eup %5543  ;;  %v3039_v14 = vadd.f32 1.0, %v3038_v25  ;;  %v3041_v47 = vand.u32 2147483647, %v8011_v26  ;;  %v3341_v58 = vadd.f32 1.0, %v8018_v53  ;;  %v1659_v57 = vld [vmem:[%s7394_s6 + $0x380] sm:$0xff] }
 0x295   : > { %v4345_v49 = vunpack.c.l.bf16 %v8026_v62  ;;  %4985 = vmatpush.msra.mxu3 %v4831_v15  ;;  %v3344_v50 = vmul.f32 -0.5, %v8018_v53  ;;  %v3347_v31 = vand.u32 2147483647, %v8018_v53  ;;  %v2441_v32 = vadd.f32 1.0, %v8033_v9 }
 0x296   : > { %v8038_v43 = vpop.eup %5545  ;;  %v4731_v63 = vadd.f32 %v4539_v20, %v2139_v1  ;;  %vm8043_vm13 = vcmp.lt.f32.partialorder %v2771_v34, 0.0004427343  ;;  %5551 = vlog2.f32 %v3341_v58  ;;  %v2444_v44 = vmul.f32 -0.5, %v8033_v9  ;;  %v1559_v58 = vld [vmem:[%s7394_s6 + $0x60] sm:$0xff] }
 0x297   : > { %v1895_v56 = vmul.f32 1.442695, %v1625_v38  ;;  %v2770_v23 = vmul.f32 %v8004_v6, %v2769_v42  ;;  %v3345_v5 = vadd.f32 1.0, %v3344_v50  ;;  %5553 = vlog2.f32 %v2441_v32 }
 0x298   : > { %4927 = vmatpush.msra.mxu0 %v4731_v63  ;;  %v2747_v41 = vadd.f32 1.0, %v8038_v43  ;;  %v5548_v3 = vpop.eup %5547  ;;  %v3040_v51 = vmul.f32 %v8011_v26, %v3039_v14  ;;  %v2445_v16 = vadd.f32 1.0, %v2444_v44  ;;  %v2447_v39 = vand.u32 2147483647, %v8033_v9 }
 0x299   : > { %v2750_v19 = vmul.f32 -0.5, %v8038_v43  ;;  %v5550_v1 = vpop.eup %5549  ;;  %v2767_v34 = vmul.f32 0.6931472, %v5548_v3  ;;  %vm8057_vm14 = vcmp.lt.f32.partialorder %v3041_v47, 0.0004427343  ;;  %v4379_v14 = vunpack.c.l.bf16 %v8051_v46 }
 0x29a   : > { %vm8061_vm15 = vcmp.lt.f32.partialorder %v3347_v31, 0.0004427343  ;;  %5555 = vlog2.f32 %v2747_v41  ;;  %v3037_v20 = vmul.f32 0.6931472, %v5550_v1  ;;  %v2753_v38 = vand.u32 2147483647, %v8038_v43 }
 0x29b   : > { %v2751_v42 = vadd.f32 1.0, %v2750_v19  ;;  %v2773_v63 = vsel %vm8043_vm13, %v2770_v23, %v2767_v34  ;;  %v3346_v47 = vmul.f32 %v8018_v53, %v3345_v5  ;;  %5557 = vpow2.f32 %v1895_v56  ;;  %v1593_v31 = vld [vmem:[%s7394_s6 + $0x170] sm:$0xff] }
 0x29c   : > { %v1963_v50 = vmul.f32 1.442695, %v1659_v57  ;;  %v5552_v32 = vpop.eup %5551  ;;  %v4093_v44 = vmul.f32 %v8004_v6, %v2773_v63  ;;  %v3043_v41 = vsel %vm8057_vm14, %v3040_v51, %v3037_v20  ;;  %v2446_v3 = vmul.f32 %v8033_v9, %v2445_v16  ;;  %v2173_v23 = vld [vmem:[%s7392_s30 + $0x190] sm:$0xff]  ;;  %v2203_v6 = vld [vmem:[%s7392_s30 + $0x280] sm:$0xff] }
 0x29d   : > { %vm8076_vm0 = vcmp.lt.f32.partialorder %v2447_v39, 0.0004427343  ;;  %v5554_v30 = vpop.eup %5553  ;;  %v4123_v5 = vmul.f32 %v8011_v26, %v3043_v41  ;;  %v3343_v56 = vmul.f32 0.6931472, %v5552_v32  ;;  %v1763_v19 = vmul.f32 1.442695, %v1559_v58 }
 0x29e   : > { %5559 = vpow2.f32 %v1963_v50  ;;  %v4573_v57 = vmul.f32 %v4381_v0, %v4093_v44  ;;  %v2443_v1 = vmul.f32 0.6931472, %v5554_v30  ;;  %v2752_v51 = vmul.f32 %v8038_v43, %v2751_v42  ;;  %v1623_v39 = vld [vmem:[%s7394_s6 + $0x260] sm:$0xff] }
 0x29f   : > { %v1831_v16 = vmul.f32 1.442695, %v1593_v31  ;;  %v4603_v25 = vmul.f32 %v4411_v17, %v4123_v5  ;;  %v3349_v26 = vsel %vm8061_vm15, %v3346_v47, %v3343_v56  ;;  %vm8091_vm1 = vcmp.lt.f32.partialorder %v2753_v38, 0.0004427343  ;;  %v2237_v17 = vld [vmem:[%s7392_s30 + $0x390] sm:$0xff] }
 0x2a0   : > { %v5556_v34 = vpop.eup %5555  ;;  %5561 = vpow2.f32 %v1763_v19  ;;  %v4765_v54 = vadd.f32 %v4573_v57, %v2173_v23  ;;  %v4157_v0 = vmul.f32 %v8018_v53, %v3349_v26  ;;  %v2449_v42 = vsel %vm8076_vm0, %v2446_v3, %v2443_v1  ;;  %v2137_v31 = vld [vmem:[%s7392_s30 + $0x70] sm:$0xff]  ;;  %v2171_v23 = vld [vmem:[%s7392_s30 + $0x180] sm:$0xff] }
 0x2a1   : > { %v2749_v58 = vmul.f32 0.6931472, %v5556_v34  ;;  %v8098_v63 = vpop.eup %5557  ;;  %v4795_v50 = vadd.f32 %v4603_v25, %v2203_v6  ;;  %v4057_v15 = vmul.f32 %v8033_v9, %v2449_v42  ;;  %5563 = vpow2.f32 %v1831_v16  ;;  %v8122_v19 = vld [vmem:[%s7396_s18 + $0x1c0] sm:$0xff] }
 0x2a2   : > { %v1891_v38 = vmul.f32 1.442695, %v1623_v39  ;;  %4946 = vmatpush.msra.mxu1 %v4765_v54  ;;  %v4637_v47 = vmul.f32 %v4445_v21, %v4157_v0  ;;  %v3017_v32 = vadd.f32 1.0, %v8098_v63  ;;  %v3020_v44 = vmul.f32 -0.5, %v8098_v63  ;;  %v8116_v21 = vld [vmem:[%s7396_s18 + $0x138] sm:$0xff]  ;;  %11373 = vst [vmem:[#allocation8_spill] sm:$0xff] %v8122_v19 }
 0x2a3   : > { %v2755_v53 = vsel %vm8091_vm1, %v2752_v51, %v2749_v58  ;;  %4967 = vmatpush.msra.mxu2 %v4795_v50  ;;  %v4537_v3 = vmul.f32 %v4345_v49, %v4057_v15  ;;  %11372 = vst [vmem:[#allocation7_spill] sm:$0xff] %v8116_v21  ;;  %v3023_v5 = vand.u32 2147483647, %v8098_v63  ;;  %v4409_v51 = vunpack.c.l.bf16 %v8116_v21  ;;  %v8136_v54 = vld [vmem:[%s7396_s18 + $0x30] sm:$0xff] }
 0x2a4   : > { %v8109_v41 = vpop.eup %5559  ;;  %v4091_v46 = vmul.f32 %v8038_v43, %v2755_v53  ;;  %5565 = vpow2.f32 %v1891_v38  ;;  %v4829_v30 = vadd.f32 %v4637_v47, %v2237_v17  ;;  %v3021_v62 = vadd.f32 1.0, %v3020_v44  ;;  %v8149_v47 = vld [vmem:[%s7396_s18 + $0xb8] sm:$0xff] }
 0x2a5   : > { %5567 = vlog2.f32 %v3017_v32  ;;  %v3323_v56 = vadd.f32 1.0, %v8109_v41  ;;  %v4729_v6 = vadd.f32 %v4537_v3, %v2137_v31  ;;  %v3326_v49 = vmul.f32 -0.5, %v8109_v41 }
 0x2a6   : > { %v8124_v57 = vpop.eup %5561  ;;  %v4571_v1 = vmul.f32 %v4379_v14, %v4091_v46  ;;  %4986 = vmatpush.msra.mxu3 %v4829_v30  ;;  %v4443_v14 = vunpack.c.l.bf16 %v8122_v19  ;;  %v3329_v20 = vand.u32 2147483647, %v8109_v41  ;;  %v3022_v50 = vmul.f32 %v8098_v63, %v3021_v62  ;;  %v1721_v19 = vld [vmem:[%s7394_s6 + $0x570] sm:$0xff] }
 0x2a7   : > { %5569 = vlog2.f32 %v3323_v56  ;;  %v2423_v16 = vadd.f32 1.0, %v8124_v57  ;;  %v8130_v39 = vpop.eup %5563  ;;  %4928 = vmatpush.msra.mxu0 %v4729_v6  ;;  %v3327_v25 = vadd.f32 1.0, %v3326_v49  ;;  %v2426_v26 = vmul.f32 -0.5, %v8124_v57  ;;  %v1557_v49 = vld [vmem:[%s7394_s6 + $0x50] sm:$0xff] }
 0x2a8   : > { %v4763_v34 = vadd.f32 %v4571_v1, %v2171_v23  ;;  %v2729_v0 = vadd.f32 1.0, %v8130_v39  ;;  %v2732_v42 = vmul.f32 -0.5, %v8130_v39  ;;  %vm8143_vm2 = vcmp.lt.f32.partialorder %v3023_v5, 0.0004427343  ;;  %v1657_v5 = vld [vmem:[%s7394_s6 + $0x370] sm:$0xff] }
 0x2a9   : > { %5571 = vlog2.f32 %v2423_v16  ;;  %v2427_v15 = vadd.f32 1.0, %v2426_v26  ;;  %v2429_v38 = vand.u32 2147483647, %v8124_v57  ;;  %v2735_v53 = vand.u32 2147483647, %v8130_v39 }
 0x2aa   : > { %v8140_v58 = vpop.eup %5565  ;;  %4947 = vmatpush.msra.mxu1 %v4763_v34  ;;  %5573 = vlog2.f32 %v2729_v0  ;;  %v3328_v46 = vmul.f32 %v8109_v41, %v3327_v25  ;;  %v4343_v30 = vunpack.c.l.bf16 %v8136_v54  ;;  %v2733_v23 = vadd.f32 1.0, %v2732_v42  ;;  %v1591_v54 = vld [vmem:[%s7394_s6 + $0x160] sm:$0xff] }
 0x2ab   : > { %v5568_v31 = vpop.eup %5567  ;;  %v2999_v32 = vadd.f32 1.0, %v8140_v58  ;;  %v3002_v44 = vmul.f32 -0.5, %v8140_v58  ;;  %vm8157_vm3 = vcmp.lt.f32.partialorder %v3329_v20, 0.0004427343  ;;  %v4377_v1 = vunpack.c.l.bf16 %v8149_v47  ;;  %v2201_v47 = vld [vmem:[%s7392_s30 + $0x270] sm:$0xff] }
 0x2ac   : > { %v3019_v3 = vmul.f32 0.6931472, %v5568_v31  ;;  %v2428_v25 = vmul.f32 %v8124_v57, %v2427_v15  ;;  %vm8166_vm4 = vcmp.lt.f32.partialorder %v2429_v38, 0.0004427343  ;;  %vm8172_vm5 = vcmp.lt.f32.partialorder %v2735_v53, 0.0004427343 }
 0x2ad   : > { %v5570_v56 = vpop.eup %5569  ;;  %5575 = vlog2.f32 %v2999_v32  ;;  %v3003_v62 = vadd.f32 1.0, %v3002_v44  ;;  %v3005_v17 = vand.u32 2147483647, %v8140_v58  ;;  %v2734_v31 = vmul.f32 %v8130_v39, %v2733_v23 }
 0x2ae   : > { %v3025_v16 = vsel %vm8143_vm2, %v3022_v50, %v3019_v3  ;;  %v3325_v34 = vmul.f32 0.6931472, %v5570_v56  ;;  %v1959_v50 = vmul.f32 1.442695, %v1657_v5  ;;  %v1759_v32 = vmul.f32 1.442695, %v1557_v49 }
 0x2af   : > { %v5572_v20 = vpop.eup %5571  ;;  %v4121_v0 = vmul.f32 %v8098_v63, %v3025_v16  ;;  %v3004_v53 = vmul.f32 %v8140_v58, %v3003_v62  ;;  %v1621_v56 = vld [vmem:[%s7394_s6 + $0x250] sm:$0xff]  ;;  %v2235_v16 = vld [vmem:[%s7392_s30 + $0x380] sm:$0xff]  ;;  %v1827_v23 = vmul.f32 1.442695, %v1591_v54  ;;  %vm8191_vm6 = vcmp.lt.f32.partialorder %v3005_v17, 0.0004427343 }
 0x2b0   : > { %v3331_v15 = vsel %vm8157_vm3, %v3328_v46, %v3325_v34  ;;  %v2425_v38 = vmul.f32 0.6931472, %v5572_v20  ;;  %v5574_v44 = vpop.eup %5573  ;;  %5577 = vpow2.f32 %v1959_v50  ;;  %v8188_v46 = vld [vmem:[%s7396_s18 + $0x130] sm:$0xff]  ;;  %v1655_v62 = vld [vmem:[%s7394_s6 + $0x360] sm:$0xff]  ;;  %v1887_v50 = vmul.f32 1.442695, %v1621_v56 }
 0x2b1   : > { %v4601_v3 = vmul.f32 %v4409_v51, %v4121_v0  ;;  %v4155_v63 = vmul.f32 %v8109_v41, %v3331_v15  ;;  %v2731_v6 = vmul.f32 0.6931472, %v5574_v44  ;;  %11382 = vst [vmem:[#allocation9_spill] sm:$0xff] %v8188_v46  ;;  %5579 = vpow2.f32 %v1759_v32  ;;  %v2135_v0 = vld [vmem:[%s7392_s30 + $0x60] sm:$0xff]  ;;  %v2169_v15 = vld [vmem:[%s7392_s30 + $0x170] sm:$0xff] }
 0x2b2   : > { %v2431_v5 = vsel %vm8166_vm4, %v2428_v25, %v2425_v38  ;;  %5581 = vpow2.f32 %v1827_v23  ;;  %v1955_v38 = vmul.f32 1.442695, %v1655_v62  ;;  %v2199_v56 = vld [vmem:[%s7392_s30 + $0x260] sm:$0xff]  ;;  %v8228_v62 = vld [vmem:[%s7396_s18 + $0xb0] sm:$0xff] }
 0x2b3   : > { %v5576_v49 = vpop.eup %5575  ;;  %v4793_v34 = vadd.f32 %v4601_v3, %v2201_v47  ;;  %v4635_v51 = vmul.f32 %v4443_v14, %v4155_v63  ;;  %v4055_v41 = vmul.f32 %v8124_v57, %v2431_v5  ;;  %v2737_v25 = vsel %vm8172_vm5, %v2734_v31, %v2731_v6  ;;  %v8210_v3 = vld [vmem:[%s7396_s18 + $0x1b8] sm:$0xff]  ;;  %v8219_v6 = vld [vmem:[%s7396_s18 + $0x28] sm:$0xff]  ;;  %v1619_v17 = vld [vmem:[%s7394_s6 + $0x240] sm:$0xff] }
 0x2b4   : > { %v3001_v26 = vmul.f32 0.6931472, %v5576_v49  ;;  %v4089_v14 = vmul.f32 %v8130_v39, %v2737_v25  ;;  %v4407_v57 = vunpack.c.l.bf16 %v8188_v46  ;;  %5583 = vpow2.f32 %v1887_v50  ;;  %11385 = vst [vmem:[#allocation10_spill] sm:$0xff] %v8210_v3  ;;  %v8233_v50 = vld [vmem:[%s7396_s18 + $0x128] sm:$0xff] }
 0x2b5   : > { %4968 = vmatpush.msra.mxu2 %v4793_v34  ;;  %v4827_v54 = vadd.f32 %v4635_v51, %v2235_v16  ;;  %v4535_v47 = vmul.f32 %v4343_v30, %v4055_v41  ;;  %5585 = vpow2.f32 %v1955_v38  ;;  %v4441_v41 = vunpack.c.l.bf16 %v8210_v3  ;;  %11386 = vst [vmem:[#allocation11_spill] sm:$0xff] %v8233_v50 }
 0x2b6   : > { %v3007_v42 = vsel %vm8191_vm6, %v3004_v53, %v3001_v26  ;;  %v8205_v31 = vpop.eup %5577  ;;  %v4569_v44 = vmul.f32 %v4377_v1, %v4089_v14  ;;  %v4341_v25 = vunpack.c.l.bf16 %v8219_v6  ;;  %v4405_v6 = vunpack.c.l.bf16 %v8233_v50 }
 0x2b7   : > { %4987 = vmatpush.msra.mxu3 %v4827_v54  ;;  %v4727_v30 = vadd.f32 %v4535_v47, %v2135_v0  ;;  %v4119_v39 = vmul.f32 %v8140_v58, %v3007_v42  ;;  %v8212_v63 = vpop.eup %5579  ;;  %v3305_v53 = vadd.f32 1.0, %v8205_v31  ;;  %v3308_v5 = vmul.f32 -0.5, %v8205_v31 }
 0x2b8   : > { %v4761_v1 = vadd.f32 %v4569_v44, %v2169_v15  ;;  %v2405_v58 = vadd.f32 1.0, %v8212_v63  ;;  %v2408_v49 = vmul.f32 -0.5, %v8212_v63  ;;  %v8223_v34 = vpop.eup %5581  ;;  %v3311_v47 = vand.u32 2147483647, %v8205_v31  ;;  %v1555_v44 = vld [vmem:[%s7394_s6 + $0x40] sm:$0xff] }
 0x2b9   : > { %4929 = vmatpush.msra.mxu0 %v4727_v30  ;;  %v4599_v23 = vmul.f32 %v4407_v57, %v4119_v39  ;;  %5587 = vlog2.f32 %v3305_v53  ;;  %v3309_v51 = vadd.f32 1.0, %v3308_v5  ;;  %v2711_v26 = vadd.f32 1.0, %v8223_v34 }
 0x2ba   : > { %4948 = vmatpush.msra.mxu1 %v4761_v1  ;;  %5589 = vlog2.f32 %v2405_v58  ;;  %v8235_v54 = vpop.eup %5583  ;;  %v2409_v14 = vadd.f32 1.0, %v2408_v49  ;;  %v2411_v57 = vand.u32 2147483647, %v8212_v63  ;;  %v2714_v15 = vmul.f32 -0.5, %v8223_v34  ;;  %v1589_v49 = vld [vmem:[%s7394_s6 + $0x150] sm:$0xff] }
 0x2bb   : > { %v4791_v0 = vadd.f32 %v4599_v23, %v2199_v56  ;;  %5591 = vlog2.f32 %v2711_v26  ;;  %v4375_v42 = vunpack.c.l.bf16 %v8228_v62  ;;  %v2981_v38 = vadd.f32 1.0, %v8235_v54  ;;  %v8244_v39 = vpop.eup %5585  ;;  %v2133_v26 = vld [vmem:[%s7392_s30 + $0x50] sm:$0xff] }
 0x2bc   : > { %v2984_v30 = vmul.f32 -0.5, %v8235_v54  ;;  %v3310_v56 = vmul.f32 %v8205_v31, %v3309_v51  ;;  %v2715_v53 = vadd.f32 1.0, %v2714_v15  ;;  %v2717_v5 = vand.u32 2147483647, %v8223_v34 }
 0x2bd   : > { %4969 = vmatpush.msra.mxu2 %v4791_v0  ;;  %5593 = vlog2.f32 %v2981_v38  ;;  %v3287_v23 = vadd.f32 1.0, %v8244_v39  ;;  %v3290_v58 = vmul.f32 -0.5, %v8244_v39  ;;  %vm8252_vm7 = vcmp.lt.f32.partialorder %v3311_v47, 0.0004427343 }
 0x2be   : > { %v2985_v1 = vadd.f32 1.0, %v2984_v30  ;;  %v2410_v51 = vmul.f32 %v8212_v63, %v2409_v14  ;;  %vm8257_vm8 = vcmp.lt.f32.partialorder %v2411_v57, 0.0004427343  ;;  %v1755_v20 = vmul.f32 1.442695, %v1555_v44 }
 0x2bf   : > { %v5588_v0 = vpop.eup %5587  ;;  %v2987_v30 = vand.u32 2147483647, %v8235_v54  ;;  %5595 = vlog2.f32 %v3287_v23  ;;  %v3291_v32 = vadd.f32 1.0, %v3290_v58  ;;  %v2716_v43 = vmul.f32 %v8223_v34, %v2715_v53 }
 0x2c0   : > { %v5590_v16 = vpop.eup %5589  ;;  %v3307_v38 = vmul.f32 0.6931472, %v5588_v0  ;;  %vm8264_vm9 = vcmp.lt.f32.partialorder %v2717_v5, 0.0004427343  ;;  %5597 = vpow2.f32 %v1755_v20  ;;  %v2986_v44 = vmul.f32 %v8235_v54, %v2985_v1 }
 0x2c1   : > { %v2407_v47 = vmul.f32 0.6931472, %v5590_v16  ;;  %v5592_v14 = vpop.eup %5591  ;;  %v3293_v23 = vand.u32 2147483647, %v8244_v39  ;;  %v1823_v58 = vmul.f32 1.442695, %v1589_v49  ;;  %v3292_v1 = vmul.f32 %v8244_v39, %v3291_v32 }
 0x2c2   : > { %v3313_v57 = vsel %vm8252_vm7, %v3310_v56, %v3307_v38  ;;  %v2713_v5 = vmul.f32 0.6931472, %v5592_v14  ;;  %v1883_v0 = vmul.f32 1.442695, %v1619_v17  ;;  %vm8278_vm10 = vcmp.lt.f32.partialorder %v2987_v30, 0.0004427343 }
 0x2c3   : > { %v4153_v16 = vmul.f32 %v8205_v31, %v3313_v57  ;;  %v2413_v53 = vsel %vm8257_vm8, %v2410_v51, %v2407_v47  ;;  %v5594_v20 = vpop.eup %5593  ;;  %v8284_v49 = vld [vmem:[%s7396_s18 + $0x1b0] sm:$0xff]  ;;  %5599 = vpow2.f32 %v1823_v58  ;;  %vm8290_vm11 = vcmp.lt.f32.partialorder %v3293_v23, 0.0004427343 }
 0x2c4   : > { %v4053_v7 = vmul.f32 %v8212_v63, %v2413_v53  ;;  %11395 = vst [vmem:[#allocation12_spill] sm:$0xff] %v8284_v49  ;;  %v2719_v17 = vsel %vm8264_vm9, %v2716_v43, %v2713_v5  ;;  %v2983_v51 = vmul.f32 0.6931472, %v5594_v20  ;;  %5601 = vpow2.f32 %v1883_v0  ;;  %v8315_v53 = vld [vmem:[%s7396_s18 + $0x20] sm:$0xff] }
 0x2c5   : > { %v4633_v31 = vmul.f32 %v4441_v41, %v4153_v16  ;;  %v5596_v15 = vpop.eup %5595  ;;  %v4087_v38 = vmul.f32 %v8223_v34, %v2719_v17  ;;  %v1951_v32 = vmul.f32 1.442695, %v1653_v4  ;;  %v2167_v41 = vld [vmem:[%s7392_s30 + $0x160] sm:$0xff]  ;;  %v4439_v57 = vunpack.c.l.bf16 %v8284_v49 }
 0x2c6   : > { %v4533_v63 = vmul.f32 %v4341_v25, %v4053_v7  ;;  %v8294_v47 = vpop.eup %5597  ;;  %v2989_v9 = vsel %vm8278_vm10, %v2986_v44, %v2983_v51  ;;  %v3289_v43 = vmul.f32 0.6931472, %v5596_v15  ;;  %v2197_v25 = vld [vmem:[%s7392_s30 + $0x250] sm:$0xff]  ;;  %v2231_v0 = vld [vmem:[%s7392_s30 + $0x360] sm:$0xff] }
 0x2c7   : > { %v4825_v14 = vadd.f32 %v4633_v31, %v2233_v40  ;;  %v4567_v7 = vmul.f32 %v4375_v42, %v4087_v38  ;;  %v4117_v34 = vmul.f32 %v8235_v54, %v2989_v9  ;;  %v2387_v4 = vadd.f32 1.0, %v8294_v47  ;;  %v8329_v15 = vld [vmem:[%s7396_s18 + $0x120] sm:$0xff] }
 0x2c8   : > { %v4725_v58 = vadd.f32 %v4533_v63, %v2133_v26  ;;  %v3295_v44 = vsel %vm8290_vm11, %v3292_v1, %v3289_v43  ;;  %v2390_v23 = vmul.f32 -0.5, %v8294_v47  ;;  %5603 = vpow2.f32 %v1951_v32  ;;  %v8324_v26 = vld [vmem:[%s7396_s18 + $0xa8] sm:$0xff]  ;;  %11398 = vst [vmem:[#allocation13_spill] sm:$0xff] %v8329_v15  ;;  %v1553_v63 = vld [vmem:[%s7394_s6 + $0x30] sm:$0xff]  ;;  %v1587_v43 = vld [vmem:[%s7394_s6 + $0x140] sm:$0xff] }
 0x2c9   : > { %4988 = vmatpush.msra.mxu3 %v4825_v14  ;;  %v8309_v16 = vpop.eup %5599  ;;  %v4759_v62 = vadd.f32 %v4567_v7, %v2167_v41  ;;  %v4597_v54 = vmul.f32 %v4405_v6, %v4117_v34  ;;  %v4151_v42 = vmul.f32 %v8244_v39, %v3295_v44  ;;  %5605 = vlog2.f32 %v2387_v4 }
 0x2ca   : > { %4930 = vmatpush.msra.mxu0 %v4725_v58  ;;  %v8317_v5 = vpop.eup %5601  ;;  %v2391_v56 = vadd.f32 1.0, %v2390_v23  ;;  %v2693_v1 = vadd.f32 1.0, %v8309_v16  ;;  %v2696_v31 = vmul.f32 -0.5, %v8309_v16  ;;  %v2393_v17 = vand.u32 2147483647, %v8294_v47 }
 0x2cb   : > { %4949 = vmatpush.msra.mxu1 %v4759_v62  ;;  %v4789_v6 = vadd.f32 %v4597_v54, %v2197_v25  ;;  %v4631_v39 = vmul.f32 %v4439_v57, %v4151_v42  ;;  %v2963_v51 = vadd.f32 1.0, %v8317_v5  ;;  %v4339_v38 = vunpack.c.l.bf16 %v8315_v53  ;;  %v1617_v25 = vld [vmem:[%s7394_s6 + $0x230] sm:$0xff] }
 0x2cc   : > { %5607 = vlog2.f32 %v2693_v1  ;;  %v2699_v30 = vand.u32 2147483647, %v8309_v16  ;;  %v2966_v32 = vmul.f32 -0.5, %v8317_v5  ;;  %v2697_v41 = vadd.f32 1.0, %v2696_v31 }
 0x2cd   : > { %4970 = vmatpush.msra.mxu2 %v4789_v6  ;;  %v4823_v14 = vadd.f32 %v4631_v39, %v2231_v0  ;;  %v4373_v9 = vunpack.c.l.bf16 %v8324_v26  ;;  %5609 = vlog2.f32 %v2963_v51  ;;  %v2392_v58 = vmul.f32 %v8294_v47, %v2391_v56  ;;  %v8357_v6 = vld [vmem:[%s7396_s18 + $0x1a8] sm:$0xff]  ;;  %v1651_v39 = vld [vmem:[%s7394_s6 + $0x340] sm:$0xff] }
 0x2ce   : > { %v8337_v57 = vpop.eup %5603  ;;  %v2967_v7 = vadd.f32 1.0, %v2966_v32  ;;  %v4403_v34 = vunpack.c.l.bf16 %v8329_v15  ;;  %v1751_v4 = vmul.f32 1.442695, %v1553_v63  ;;  %vm8342_vm12 = vcmp.lt.f32.partialorder %v2393_v17, 0.0004427343  ;;  %11403 = vst [vmem:[#allocation14_spill] sm:$0xff] %v8357_v6 }
 0x2cf   : > { %v5606_v44 = vpop.eup %5605  ;;  %4989 = vmatpush.msra.mxu3 %v4823_v14  ;;  %v2969_v62 = vand.u32 2147483647, %v8317_v5  ;;  %v3269_v54 = vadd.f32 1.0, %v8337_v57  ;;  %v3272_v42 = vmul.f32 -0.5, %v8337_v57  ;;  %vm8349_vm13 = vcmp.lt.f32.partialorder %v2699_v30, 0.0004427343 }
 0x2d0   : > { %v2389_v53 = vmul.f32 0.6931472, %v5606_v44  ;;  %5611 = vpow2.f32 %v1751_v4  ;;  %v1819_v56 = vmul.f32 1.442695, %v1587_v43  ;;  %v2698_v1 = vmul.f32 %v8309_v16, %v2697_v41  ;;  %v1551_v32 = vld [vmem:[%s7394_s6 + $0x20] sm:$0xff] }
 0x2d1   : > { %v2968_v31 = vmul.f32 %v8317_v5, %v2967_v7  ;;  %5613 = vlog2.f32 %v3269_v54  ;;  %v3275_v26 = vand.u32 2147483647, %v8337_v57  ;;  %v3273_v63 = vadd.f32 1.0, %v3272_v42  ;;  %v2131_v44 = vld [vmem:[%s7392_s30 + $0x40] sm:$0xff] }
 0x2d2   : > { %v5608_v17 = vpop.eup %5607  ;;  %v2395_v51 = vsel %vm8342_vm12, %v2392_v58, %v2389_v53  ;;  %5615 = vpow2.f32 %v1819_v56  ;;  %v1879_v30 = vmul.f32 1.442695, %v1617_v25  ;;  %vm8364_vm14 = vcmp.lt.f32.partialorder %v2969_v62, 0.0004427343 }
 0x2d3   : > { %v5610_v14 = vpop.eup %5609  ;;  %v4051_v41 = vmul.f32 %v8294_v47, %v2395_v51  ;;  %v2695_v43 = vmul.f32 0.6931472, %v5608_v17  ;;  %v4437_v23 = vunpack.c.l.bf16 %v8357_v6  ;;  %v1947_v58 = vmul.f32 1.442695, %v1651_v39 }
 0x2d4   : > { %v2965_v54 = vmul.f32 0.6931472, %v5610_v14  ;;  %5617 = vpow2.f32 %v1879_v30  ;;  %vm8373_vm15 = vcmp.lt.f32.partialorder %v3275_v26, 0.0004427343  ;;  %v1747_v62 = vmul.f32 1.442695, %v1551_v32 }
 0x2d5   : > { %v4531_v42 = vmul.f32 %v4339_v38, %v4051_v41  ;;  %v2701_v25 = vsel %vm8349_vm13, %v2698_v1, %v2695_v43  ;;  %v3274_v39 = vmul.f32 %v8337_v57, %v3273_v63  ;;  %5619 = vpow2.f32 %v1947_v58  ;;  %v2165_v1 = vld [vmem:[%s7392_s30 + $0x150] sm:$0xff]  ;;  %v8392_v43 = vld [vmem:[%s7396_s18 + $0x18] sm:$0xff] }
 0x2d6   : > { %v8377_v53 = vpop.eup %5611  ;;  %v4085_v56 = vmul.f32 %v8309_v16, %v2701_v25  ;;  %v2971_v17 = vsel %vm8364_vm14, %v2968_v31, %v2965_v54  ;;  %v2195_v16 = vld [vmem:[%s7392_s30 + $0x240] sm:$0xff]  ;;  %5621 = vpow2.f32 %v1747_v62 }
 0x2d7   : > { %v5614_v38 = vpop.eup %5613  ;;  %v4723_v0 = vadd.f32 %v4531_v42, %v2131_v44  ;;  %v4115_v26 = vmul.f32 %v8317_v5, %v2971_v17  ;;  %v2369_v51 = vadd.f32 1.0, %v8377_v53  ;;  %v2372_v30 = vmul.f32 -0.5, %v8377_v53  ;;  %v8402_v25 = vld [vmem:[%s7396_s18 + $0xa0] sm:$0xff] }
 0x2d8   : > { %v8387_v32 = vpop.eup %5615  ;;  %v4565_v14 = vmul.f32 %v4373_v9, %v4085_v56  ;;  %v3271_v41 = vmul.f32 0.6931472, %v5614_v38  ;;  %v2375_v5 = vand.u32 2147483647, %v8377_v53  ;;  %v4337_v56 = vunpack.c.l.bf16 %v8392_v43  ;;  %v2229_v38 = vld [vmem:[%s7392_s30 + $0x350] sm:$0xff]  ;;  %v8446_v31 = vld [vmem:[%s7396_s18 + $0x1a0] sm:$0xff] }
 0x2d9   : > { %4931 = vmatpush.msra.mxu0 %v4723_v0  ;;  %v4595_v63 = vmul.f32 %v4403_v34, %v4115_v26  ;;  %5623 = vlog2.f32 %v2369_v51  ;;  %v2675_v7 = vadd.f32 1.0, %v8387_v32  ;;  %v2373_v58 = vadd.f32 1.0, %v2372_v30  ;;  %11415 = vst [vmem:[#allocation16_spill] sm:$0xff] %v8446_v31 }
 0x2da   : > { %v8396_v44 = vpop.eup %5617  ;;  %v4757_v54 = vadd.f32 %v4565_v14, %v2165_v1  ;;  %v3277_v9 = vsel %vm8373_vm15, %v3274_v39, %v3271_v41  ;;  %v2678_v42 = vmul.f32 -0.5, %v8387_v32  ;;  %v2681_v47 = vand.u32 2147483647, %v8387_v32  ;;  %v2129_v41 = vld [vmem:[%s7392_s30 + $0x30] sm:$0xff] }
 0x2db   : > { %v4787_v62 = vadd.f32 %v4595_v63, %v2195_v16  ;;  %v4149_v34 = vmul.f32 %v8337_v57, %v3277_v9  ;;  %5625 = vlog2.f32 %v2675_v7  ;;  %v8406_v17 = vpop.eup %5619  ;;  %v2945_v39 = vadd.f32 1.0, %v8396_v44  ;;  %v8424_v63 = vld [vmem:[%s7396_s18 + $0x118] sm:$0xff] }
 0x2dc   : > { %4950 = vmatpush.msra.mxu1 %v4757_v54  ;;  %v2679_v0 = vadd.f32 1.0, %v2678_v42  ;;  %v2948_v1 = vmul.f32 -0.5, %v8396_v44  ;;  %v4371_v57 = vunpack.c.l.bf16 %v8402_v25  ;;  %v3251_v51 = vadd.f32 1.0, %v8406_v17  ;;  %v8415_v14 = vpop.eup %5621  ;;  %11410 = vst [vmem:[#allocation15_spill] sm:$0xff] %v8424_v63 }
 0x2dd   : > { %4971 = vmatpush.msra.mxu2 %v4787_v62  ;;  %v4629_v26 = vmul.f32 %v4437_v23, %v4149_v34  ;;  %v3254_v30 = vmul.f32 -0.5, %v8406_v17  ;;  %v2374_v16 = vmul.f32 %v8377_v53, %v2373_v58  ;;  %vm8418_vm0 = vcmp.lt.f32.partialorder %v2375_v5, 0.0004427343  ;;  %v1585_v23 = vld [vmem:[%s7394_s6 + $0x130] sm:$0xff] }
 0x2de   : > { %5627 = vlog2.f32 %v2945_v39  ;;  %v2951_v43 = vand.u32 2147483647, %v8396_v44  ;;  %v2680_v9 = vmul.f32 %v8387_v32, %v2679_v0  ;;  %v2949_v42 = vadd.f32 1.0, %v2948_v1 }
 0x2df   : > { %v5624_v7 = vpop.eup %5623  ;;  %v4821_v54 = vadd.f32 %v4629_v26, %v2229_v38  ;;  %5629 = vlog2.f32 %v3251_v51  ;;  %vm8428_vm1 = vcmp.lt.f32.partialorder %v2681_v47, 0.0004427343  ;;  %v3255_v5 = vadd.f32 1.0, %v3254_v30  ;;  %v1615_v26 = vld [vmem:[%s7394_s6 + $0x220] sm:$0xff]  ;;  %v2193_v30 = vld [vmem:[%s7392_s30 + $0x230] sm:$0xff] }
 0x2e0   : > { %v2371_v25 = vmul.f32 0.6931472, %v5624_v7  ;;  %v2351_v62 = vadd.f32 1.0, %v8415_v14  ;;  %v4401_v39 = vunpack.c.l.bf16 %v8424_v63  ;;  %v3257_v38 = vand.u32 2147483647, %v8406_v17 }
 0x2e1   : > { %v5626_v34 = vpop.eup %5625  ;;  %4990 = vmatpush.msra.mxu3 %v4821_v54  ;;  %v2354_v0 = vmul.f32 -0.5, %v8415_v14  ;;  %v1815_v1 = vmul.f32 1.442695, %v1585_v23  ;;  %vm8439_vm2 = vcmp.lt.f32.partialorder %v2951_v43, 0.0004427343  ;;  %v2950_v54 = vmul.f32 %v8396_v44, %v2949_v42  ;;  %v1649_v23 = vld [vmem:[%s7394_s6 + $0x330] sm:$0xff] }
 0x2e2   : > { %v2377_v47 = vsel %vm8418_vm0, %v2374_v16, %v2371_v25  ;;  %v2677_v51 = vmul.f32 0.6931472, %v5626_v34  ;;  %5631 = vlog2.f32 %v2351_v62  ;;  %v3256_v43 = vmul.f32 %v8406_v17, %v3255_v5  ;;  %v1549_v5 = vld [vmem:[%s7394_s6 + $0x10] sm:$0xff] }
 0x2e3   : > { %v4049_v7 = vmul.f32 %v8377_v53, %v2377_v47  ;;  %v2355_v4 = vadd.f32 1.0, %v2354_v0  ;;  %5633 = vpow2.f32 %v1815_v1  ;;  %v2357_v25 = vand.u32 2147483647, %v8415_v14  ;;  %v2163_v1 = vld [vmem:[%s7392_s30 + $0x140] sm:$0xff]  ;;  %v8484_v0 = vld [vmem:[%s7396_s18 + $0x98] sm:$0xff] }
 0x2e4   : > { %v5628_v20 = vpop.eup %5627  ;;  %v2683_v16 = vsel %vm8428_vm1, %v2680_v9, %v2677_v51  ;;  %v1875_v62 = vmul.f32 1.442695, %v1615_v26  ;;  %vm8455_vm3 = vcmp.lt.f32.partialorder %v3257_v38, 0.0004427343  ;;  %v4435_v58 = vunpack.c.l.bf16 %v8446_v31 }
 0x2e5   : > { %v5630_v53 = vpop.eup %5629  ;;  %v4529_v42 = vmul.f32 %v4337_v56, %v4049_v7  ;;  %v4083_v34 = vmul.f32 %v8387_v32, %v2683_v16  ;;  %v2947_v47 = vmul.f32 0.6931472, %v5628_v20  ;;  %v1943_v9 = vmul.f32 1.442695, %v1649_v23  ;;  %v4237_v32 = vld [vmem:[%s7396_s18 + $0x10] sm:$0xff] }
 0x2e6   : > { %v3253_v40 = vmul.f32 0.6931472, %v5630_v53  ;;  %5635 = vpow2.f32 %v1875_v62  ;;  %v2356_v20 = vmul.f32 %v8415_v14, %v2355_v4  ;;  %vm8469_vm4 = vcmp.lt.f32.partialorder %v2357_v25, 0.0004427343  ;;  %v2227_v53 = vld [vmem:[%s7392_s30 + $0x340] sm:$0xff] }
 0x2e7   : > { %v4721_v51 = vadd.f32 %v4529_v42, %v2129_v41  ;;  %v4563_v26 = vmul.f32 %v4371_v57, %v4083_v34  ;;  %v2953_v56 = vsel %vm8439_vm2, %v2950_v54, %v2947_v47  ;;  %5637 = vpow2.f32 %v1943_v9 }
 0x2e8   : > { %v5632_v38 = vpop.eup %5631  ;;  %v4113_v7 = vmul.f32 %v8396_v44, %v2953_v56  ;;  %v3259_v16 = vsel %vm8455_vm3, %v3256_v43, %v3253_v40  ;;  %v1743_v41 = vmul.f32 1.442695, %v1549_v5  ;;  %v4335_v40 = vunpack.c.l.bf16 %v4237_v32  ;;  %v2127_v56 = vld [vmem:[%s7392_s30 + $0x20] sm:$0xff] }
 0x2e9   : > { %v8473_v23 = vpop.eup %5633  ;;  %4932 = vmatpush.msra.mxu0 %v4721_v51  ;;  %v4755_v57 = vadd.f32 %v4563_v26, %v2163_v1  ;;  %v4147_v4 = vmul.f32 %v8406_v17, %v3259_v16  ;;  %v2353_v54 = vmul.f32 0.6931472, %v5632_v38  ;;  %v1583_v17 = vld [vmem:[%s7394_s6 + $0x120] sm:$0xff]  ;;  %v8492_v51 = vld [vmem:[%s7396_s18 + $0x110] sm:$0xff]  ;;  %v4369_v16 = vunpack.c.l.bf16 %v8484_v0 }
 0x2ea   : > { %v4593_v44 = vmul.f32 %v4401_v39, %v4113_v7  ;;  %v2657_v43 = vadd.f32 1.0, %v8473_v23  ;;  %v2660_v25 = vmul.f32 -0.5, %v8473_v23  ;;  %5639 = vpow2.f32 %v1743_v41  ;;  %11420 = vst [vmem:[#allocation17_spill] sm:$0xff] %v8492_v51  ;;  %v1547_v7 = vld [vmem:[%s7394_s6] sm:$0xff] }
 0x2eb   : > { %4951 = vmatpush.msra.mxu1 %v4755_v57  ;;  %v4627_v34 = vmul.f32 %v4435_v58, %v4147_v4  ;;  %v2359_v47 = vsel %vm8469_vm4, %v2356_v20, %v2353_v54  ;;  %v2663_v5 = vand.u32 2147483647, %v8473_v23  ;;  %v1811_v62 = vmul.f32 1.442695, %v1583_v17 }
 0x2ec   : > { %v8487_v39 = vpop.eup %5635  ;;  %v4785_v1 = vadd.f32 %v4593_v44, %v2193_v30  ;;  %v4047_v9 = vmul.f32 %v8415_v14, %v2359_v47  ;;  %5641 = vlog2.f32 %v2657_v43  ;;  %v2661_v58 = vadd.f32 1.0, %v2660_v25 }
 0x2ed   : > { %v4819_v26 = vadd.f32 %v4627_v34, %v2227_v53  ;;  %v2927_v32 = vadd.f32 1.0, %v8487_v39  ;;  %v2930_v20 = vmul.f32 -0.5, %v8487_v39  ;;  %v8497_v38 = vpop.eup %5637  ;;  %v4399_v57 = vunpack.c.l.bf16 %v8492_v51  ;;  %v8506_v53 = vld [vmem:[%s7396_s18 + $0x198] sm:$0xff]  ;;  %v1693_v51 = vld [vmem:[%s7394_s6 + $0x490] sm:$0xff] }
 0x2ee   : > { %4972 = vmatpush.msra.mxu2 %v4785_v1  ;;  %v4527_v14 = vmul.f32 %v4335_v40, %v4047_v9  ;;  %v3233_v30 = vadd.f32 1.0, %v8497_v38  ;;  %v3236_v4 = vmul.f32 -0.5, %v8497_v38  ;;  %v2933_v44 = vand.u32 2147483647, %v8487_v39  ;;  %11421 = vst [vmem:[#allocation18_spill] sm:$0xff] %v8506_v53  ;;  %v1613_v40 = vld [vmem:[%s7394_s6 + $0x210] sm:$0xff] }
 0x2ef   : > { %4991 = vmatpush.msra.mxu3 %v4819_v26  ;;  %5643 = vlog2.f32 %v2927_v32  ;;  %v2931_v41 = vadd.f32 1.0, %v2930_v20  ;;  %v2662_v25 = vmul.f32 %v8473_v23, %v2661_v58  ;;  %vm8512_vm5 = vcmp.lt.f32.partialorder %v2663_v5, 0.0004427343 }
 0x2f0   : > { %v4719_v54 = vadd.f32 %v4527_v14, %v2127_v56  ;;  %5645 = vpow2.f32 %v1811_v62  ;;  %v8509_v43 = vpop.eup %5639  ;;  %v3237_v17 = vadd.f32 1.0, %v3236_v4  ;;  %v3239_v1 = vand.u32 2147483647, %v8497_v38  ;;  %v1647_v56 = vld [vmem:[%s7394_s6 + $0x320] sm:$0xff] }
 0x2f1   : > { %5647 = vlog2.f32 %v3233_v30  ;;  %v2333_v9 = vadd.f32 1.0, %v8509_v43  ;;  %v2336_v26 = vmul.f32 -0.5, %v8509_v43  ;;  %v4433_v5 = vunpack.c.l.bf16 %v8506_v53  ;;  %v8554_v30 = vld [vmem:[%s7396_s18 + $0x90] sm:$0xff] }
 0x2f2   : > { %v5642_v0 = vpop.eup %5641  ;;  %4933 = vmatpush.msra.mxu0 %v4719_v54  ;;  %v2339_v58 = vand.u32 2147483647, %v8509_v43  ;;  %v1871_v20 = vmul.f32 1.442695, %v1613_v40  ;;  %v2932_v14 = vmul.f32 %v8487_v39, %v2931_v41  ;;  %vm8524_vm6 = vcmp.lt.f32.partialorder %v2933_v44, 0.0004427343 }
 0x2f3   : > { %v2659_v32 = vmul.f32 0.6931472, %v5642_v0  ;;  %5649 = vlog2.f32 %v2333_v9  ;;  %v2337_v0 = vadd.f32 1.0, %v2336_v26  ;;  %v1939_v47 = vmul.f32 1.442695, %v1647_v56 }
 0x2f4   : > { %5651 = vpow2.f32 %v1871_v20  ;;  %v3238_v42 = vmul.f32 %v8497_v38, %v3237_v17  ;;  %vm8536_vm7 = vcmp.lt.f32.partialorder %v3239_v1, 0.0004427343  ;;  %vm8541_vm8 = vcmp.lt.f32.partialorder %v2339_v58, 0.0004427343 }
 0x2f5   : > { %v5644_v4 = vpop.eup %5643  ;;  %v2665_v54 = vsel %vm8512_vm5, %v2662_v25, %v2659_v32  ;;  %v2161_v25 = vld [vmem:[%s7392_s30 + $0x130] sm:$0xff]  ;;  %5653 = vpow2.f32 %v1939_v47  ;;  %v4236_v32 = vld [vmem:[%s7396_s18 + $0x8] sm:$0xff]  ;;  %v1739_v20 = vmul.f32 1.442695, %v1547_v7  ;;  %v2338_v58 = vmul.f32 %v8509_v43, %v2337_v0 }
 0x2f6   : > { %v8532_v40 = vpop.eup %5645  ;;  %v4081_v41 = vmul.f32 %v8473_v23, %v2665_v54  ;;  %v2929_v44 = vmul.f32 0.6931472, %v5644_v4 }
 0x2f7   : > { %v5648_v9 = vpop.eup %5647  ;;  %v2639_v26 = vadd.f32 1.0, %v8532_v40  ;;  %v2642_v23 = vmul.f32 -0.5, %v8532_v40  ;;  %v2645_v54 = vand.u32 2147483647, %v8532_v40 }
 0x2f8   : > { %v4561_v56 = vmul.f32 %v4369_v16, %v4081_v41  ;;  %v2935_v17 = vsel %vm8524_vm6, %v2932_v14, %v2929_v44  ;;  %v3235_v1 = vmul.f32 0.6931472, %v5648_v9  ;;  %v2191_v41 = vld [vmem:[%s7392_s30 + $0x220] sm:$0xff]  ;;  %v8561_v44 = vld [vmem:[%s7396_s18 + $0x108] sm:$0xff] }
 0x2f9   : > { %v4111_v4 = vmul.f32 %v8487_v39, %v2935_v17  ;;  %5655 = vlog2.f32 %v2639_v26  ;;  %v5650_v47 = vpop.eup %5649  ;;  %v2643_v62 = vadd.f32 1.0, %v2642_v23  ;;  %11430 = vst [vmem:[#allocation19_spill] sm:$0xff] %v8561_v44  ;;  %v4333_v26 = vunpack.c.l.bf16 %v4236_v32  ;;  %v2225_v17 = vld [vmem:[%s7392_s30 + $0x330] sm:$0xff] }
 0x2fa   : > { %v4753_v16 = vadd.f32 %v4561_v56, %v2161_v25  ;;  %v3241_v14 = vsel %vm8536_vm7, %v3238_v42, %v3235_v1  ;;  %5657 = vpow2.f32 %v1739_v20  ;;  %v8563_v39 = vpop.eup %5651  ;;  %v2335_v9 = vmul.f32 0.6931472, %v5650_v47 }
 0x2fb   : > { %v4591_v7 = vmul.f32 %v4399_v57, %v4111_v4  ;;  %v4145_v0 = vmul.f32 %v8497_v38, %v3241_v14  ;;  %v4367_v25 = vunpack.c.l.bf16 %v8554_v30  ;;  %v2909_v8 = vadd.f32 1.0, %v8563_v39  ;;  %v8572_v56 = vpop.eup %5653 }
 0x2fc   : > { %4952 = vmatpush.msra.mxu1 %v4753_v16  ;;  %v2912_v42 = vmul.f32 -0.5, %v8563_v39  ;;  %v1807_v23 = vmul.f32 1.442695, %v1581_v48  ;;  %v2341_v57 = vsel %vm8541_vm8, %v2338_v58, %v2335_v9  ;;  %v4397_v38 = vunpack.c.l.bf16 %v8561_v44  ;;  %v8593_v9 = vld [vmem:[%s7396_s18 + $0x190] sm:$0xff]  ;;  %v1731_v44 = vld [vmem:[%s7394_s6 + $0x5c0] sm:$0xff] }
 0x2fd   : > { %v4783_v1 = vadd.f32 %v4591_v7, %v2191_v41  ;;  %v4625_v20 = vmul.f32 %v4433_v5, %v4145_v0  ;;  %v4045_v32 = vmul.f32 %v8509_v43, %v2341_v57  ;;  %v2644_v30 = vmul.f32 %v8532_v40, %v2643_v62  ;;  %v2125_v5 = vld [vmem:[%s7392_s30 + $0x10] sm:$0xff]  ;;  %v1611_v62 = vld [vmem:[%s7394_s6 + $0x200] sm:$0xff]  ;;  %11433 = vst [vmem:[#allocation20_spill] sm:$0xff] %v8593_v9  ;;  %v8626_v7 = vld [vmem:[%s7396_s18 + $0x88] sm:$0xff] }
 0x2fe   : > { %vm8579_vm9 = vcmp.lt.f32.partialorder %v2645_v54, 0.0004427343  ;;  %5659 = vlog2.f32 %v2909_v8  ;;  %v2913_v16 = vadd.f32 1.0, %v2912_v42  ;;  %v3215_v34 = vadd.f32 1.0, %v8572_v56 }
 0x2ff   : > { %v5656_v48 = vpop.eup %5655  ;;  %4973 = vmatpush.msra.mxu2 %v4783_v1  ;;  %v4817_v47 = vadd.f32 %v4625_v20, %v2225_v17  ;;  %v3218_v58 = vmul.f32 -0.5, %v8572_v56  ;;  %v4525_v43 = vmul.f32 %v4333_v26, %v4045_v32  ;;  %v2915_v54 = vand.u32 2147483647, %v8563_v39  ;;  %v1645_v1 = vld [vmem:[%s7394_s6 + $0x310] sm:$0xff] }
 0x300   : > { %v8586_v41 = vpop.eup %5657  ;;  %v2641_v14 = vmul.f32 0.6931472, %v5656_v48  ;;  %5661 = vpow2.f32 %v1807_v23  ;;  %v3221_v0 = vand.u32 2147483647, %v8572_v56  ;;  %v2914_v57 = vmul.f32 %v8563_v39, %v2913_v16  ;;  %v1705_v48 = vld [vmem:[%s7394_s6 + $0x4f0] sm:$0xff] }
 0x301   : > { %4992 = vmatpush.msra.mxu3 %v4817_v47  ;;  %5663 = vlog2.f32 %v3215_v34  ;;  %v2315_v17 = vadd.f32 1.0, %v8586_v41  ;;  %v4717_v8 = vadd.f32 %v4525_v43, %v2125_v5  ;;  %v3219_v42 = vadd.f32 1.0, %v3218_v58  ;;  %v2159_v34 = vld [vmem:[%s7392_s30 + $0x120] sm:$0xff] }
 0x302   : > { %v2647_v26 = vsel %vm8579_vm9, %v2644_v30, %v2641_v14  ;;  %v2318_v23 = vmul.f32 -0.5, %v8586_v41  ;;  %v1867_v32 = vmul.f32 1.442695, %v1611_v62  ;;  %vm8604_vm10 = vcmp.lt.f32.partialorder %v2915_v54, 0.0004427343 }
 0x303   : > { %v4079_v20 = vmul.f32 %v8532_v40, %v2647_v26  ;;  %5665 = vlog2.f32 %v2315_v17  ;;  %4934 = vmatpush.msra.mxu0 %v4717_v8  ;;  %v4431_v30 = vunpack.c.l.bf16 %v8593_v9  ;;  %v2321_v58 = vand.u32 2147483647, %v8586_v41  ;;  %v4235_v8 = vld [vmem:[%s7396_s18] sm:$0xff]  ;;  %v1578_v17 = vld [vmem:[%s7394_s6 + $0xf8] sm:$0xff] }
 0x304   : > { %v5660_v47 = vpop.eup %5659  ;;  %v2319_v4 = vadd.f32 1.0, %v2318_v23  ;;  %5667 = vpow2.f32 %v1867_v32  ;;  %v1935_v16 = vmul.f32 1.442695, %v1645_v1  ;;  %v3220_v62 = vmul.f32 %v8572_v56, %v3219_v42 }
 0x305   : > { %v4559_v43 = vmul.f32 %v4367_v25, %v4079_v20  ;;  %v2911_v40 = vmul.f32 0.6931472, %v5660_v47  ;;  %vm8613_vm11 = vcmp.lt.f32.partialorder %v3221_v0, 0.0004427343  ;;  %v2055_v26 = vmul.f32 1.442695, %v1705_v48 }
 0x306   : > { %v8610_v14 = vpop.eup %5661  ;;  %v2320_v47 = vmul.f32 %v8586_v41, %v2319_v4  ;;  %5669 = vpow2.f32 %v1935_v16  ;;  %vm8630_vm12 = vcmp.lt.f32.partialorder %v2321_v58, 0.0004427343  ;;  %v4331_v5 = vunpack.c.l.bf16 %v4235_v8 }
 0x307   : > { %v5664_v23 = vpop.eup %5663  ;;  %v4751_v25 = vadd.f32 %v4559_v43, %v2159_v34  ;;  %v2917_v20 = vsel %vm8604_vm10, %v2914_v57, %v2911_v40  ;;  %v2621_v1 = vadd.f32 1.0, %v8610_v14  ;;  %v2624_v32 = vmul.f32 -0.5, %v8610_v14  ;;  %v2189_v34 = vld [vmem:[%s7392_s30 + $0x210] sm:$0xff] }
 0x308   : > { %v4109_v42 = vmul.f32 %v8563_v39, %v2917_v20  ;;  %v3217_v0 = vmul.f32 0.6931472, %v5664_v23  ;;  %v2627_v39 = vand.u32 2147483647, %v8610_v14  ;;  %v8640_v23 = vld [vmem:[%s7396_s18 + $0x100] sm:$0xff]  ;;  %v4365_v8 = vunpack.c.l.bf16 %v8626_v7 }
 0x309   : > { %v5666_v48 = vpop.eup %5665  ;;  %4953 = vmatpush.msra.mxu1 %v4751_v25  ;;  %5671 = vlog2.f32 %v2621_v1  ;;  %v2625_v16 = vadd.f32 1.0, %v2624_v32  ;;  %11440 = vst [vmem:[#allocation21_spill] sm:$0xff] %v8640_v23  ;;  %v1801_v20 = vmul.f32 1.442695, %v1578_v17  ;;  %v1579_v32 = vld [vmem:[%s7394_s6 + $0x100] sm:$0xff] }
 0x30a   : > { %v4589_v4 = vmul.f32 %v4397_v38, %v4109_v42  ;;  %v3223_v43 = vsel %vm8613_vm11, %v3220_v62, %v3217_v0  ;;  %v2317_v40 = vmul.f32 0.6931472, %v5666_v48  ;;  %v8642_v25 = vpop.eup %5667  ;;  %5673 = vpow2.f32 %v2055_v26  ;;  %v2123_v17 = vld [vmem:[%s7392_s30] sm:$0xff] }
 0x30b   : > { %v4143_v58 = vmul.f32 %v8572_v56, %v3223_v43  ;;  %v2891_v62 = vadd.f32 1.0, %v8642_v25  ;;  %v2894_v54 = vmul.f32 -0.5, %v8642_v25  ;;  %v4395_v56 = vunpack.c.l.bf16 %v8640_v23 }
 0x30c   : > { %v4781_v1 = vadd.f32 %v4589_v4, %v2189_v34  ;;  %v2323_v38 = vsel %vm8630_vm12, %v2320_v47, %v2317_v40  ;;  %5675 = vpow2.f32 %v1801_v20  ;;  %v8654_v7 = vpop.eup %5669  ;;  %v2626_v26 = vmul.f32 %v8610_v14, %v2625_v16  ;;  %v8663_v34 = vld [vmem:[%s7396_s18 + $0x188] sm:$0xff]  ;;  %v1643_v16 = vld [vmem:[%s7394_s6 + $0x300] sm:$0xff]  ;;  %v2157_v47 = vld [vmem:[%s7392_s30 + $0x110] sm:$0xff] }
 0x30d   : > { %v4623_v42 = vmul.f32 %v4431_v30, %v4143_v58  ;;  %v4043_v0 = vmul.f32 %v8586_v41, %v2323_v38  ;;  %vm8658_vm13 = vcmp.lt.f32.partialorder %v2627_v39, 0.0004427343  ;;  %5677 = vlog2.f32 %v2891_v62 }
 0x30e   : > { %4974 = vmatpush.msra.mxu2 %v4781_v1  ;;  %v2895_v48 = vadd.f32 1.0, %v2894_v54  ;;  %v3197_v4 = vadd.f32 1.0, %v8654_v7  ;;  %v1803_v43 = vmul.f32 1.442695, %v1579_v32  ;;  %v2897_v58 = vand.u32 2147483647, %v8642_v25 }
 0x30f   : > { %v5672_v30 = vpop.eup %5671  ;;  %v4815_v41 = vadd.f32 %v4623_v42, %v2223_v22  ;;  %v4523_v57 = vmul.f32 %v4331_v5, %v4043_v0  ;;  %v3200_v39 = vmul.f32 -0.5, %v8654_v7  ;;  %v4429_v5 = vunpack.c.l.bf16 %v8663_v34 }
 0x310   : > { %v2623_v40 = vmul.f32 0.6931472, %v5672_v30  ;;  %v8670_v1 = vpop.eup %5673  ;;  %v2896_v22 = vmul.f32 %v8642_v25, %v2895_v48  ;;  %5679 = vlog2.f32 %v3197_v4  ;;  %v3203_v32 = vand.u32 2147483647, %v8654_v7 }
 0x311   : > { %4993 = vmatpush.msra.mxu3 %v4815_v41  ;;  %v4715_v38 = vadd.f32 %v4523_v57, %v2123_v17  ;;  %v3201_v54 = vadd.f32 1.0, %v3200_v39  ;;  %v3737_v42 = vadd.f32 1.0, %v8670_v1  ;;  %v3740_v17 = vmul.f32 -0.5, %v8670_v1  ;;  %v8683_v41 = vld [vmem:[%s7396_s18 + $0x278] sm:$0xff] }
 0x312   : > { %v2629_v62 = vsel %vm8658_vm13, %v2626_v26, %v2623_v40  ;;  %v8678_v0 = vpop.eup %5675  ;;  %5681 = vpow2.f32 %v1803_v43  ;;  %v1931_v48 = vmul.f32 1.442695, %v1643_v16  ;;  %vm8686_vm14 = vcmp.lt.f32.partialorder %v2897_v58, 0.0004427343 }
 0x313   : > { %4935 = vmatpush.msra.mxu0 %v4715_v38  ;;  %v4077_v30 = vmul.f32 %v8610_v14, %v2629_v62  ;;  %v5678_v34 = vpop.eup %5677  ;;  %5683 = vlog2.f32 %v3737_v42  ;;  %v2594_v57 = vadd.f32 1.0, %v8678_v0  ;;  %v2597_v4 = vmul.f32 -0.5, %v8678_v0  ;;  %v1703_v62 = vld [vmem:[%s7394_s6 + $0x4e0] sm:$0xff] }
 0x314   : > { %v2893_v14 = vmul.f32 0.6931472, %v5678_v34  ;;  %v3741_v39 = vadd.f32 1.0, %v3740_v17  ;;  %v3743_v38 = vand.u32 2147483647, %v8670_v1  ;;  %v3202_v43 = vmul.f32 %v8654_v7, %v3201_v54 }
 0x315   : > { %v4557_v40 = vmul.f32 %v4365_v8, %v4077_v30  ;;  %vm8694_vm15 = vcmp.lt.f32.partialorder %v3203_v32, 0.0004427343  ;;  %v4489_v58 = vunpack.c.l.bf16 %v8683_v41  ;;  %5685 = vlog2.f32 %v2594_v57  ;;  %v2187_v57 = vld [vmem:[%s7392_s30 + $0x200] sm:$0xff] }
 0x316   : > { %v5680_v42 = vpop.eup %5679  ;;  %v2899_v8 = vsel %vm8686_vm14, %v2896_v22, %v2893_v14  ;;  %v2598_v30 = vadd.f32 1.0, %v2597_v4  ;;  %5687 = vpow2.f32 %v1931_v48  ;;  %v2600_v34 = vand.u32 2147483647, %v8678_v0  ;;  %v6189_v22 = vld [vmem:[%s7396_s18 + $0x78] sm:$0xff] }
 0x317   : > { %v4749_v20 = vadd.f32 %v4557_v40, %v2157_v47  ;;  %v4107_v54 = vmul.f32 %v8642_v25, %v2899_v8  ;;  %v3199_v17 = vmul.f32 0.6931472, %v5680_v42  ;;  %v3742_v24 = vmul.f32 %v8670_v1, %v3741_v39  ;;  %v1737_v25 = vld [vmem:[%s7394_s6 + $0x5f0] sm:$0xff] }
 0x318   : > { %v8705_v55 = vpop.eup %5681  ;;  %vm8709_vm0 = vcmp.lt.f32.partialorder %v3743_v38, 0.0004427343  ;;  %v4362_v48 = vunpack.c.h.bf16 %v6189_v22  ;;  %v2051_v26 = vmul.f32 1.442695, %v1703_v62  ;;  %v2599_v8 = vmul.f32 %v8678_v0, %v2598_v30  ;;  %v2281_v47 = vld [vmem:[%s7392_s30 + $0x4f0] sm:$0xff] }
 0x319   : > { %4954 = vmatpush.msra.mxu1 %v4749_v20  ;;  %v5684_v4 = vpop.eup %5683  ;;  %v4587_v40 = vmul.f32 %v4395_v56, %v4107_v54  ;;  %v3205_v20 = vsel %vm8694_vm15, %v3202_v43, %v3199_v17  ;;  %v2603_v14 = vadd.f32 1.0, %v8705_v55  ;;  %v2606_v39 = vmul.f32 -0.5, %v8705_v55  ;;  %v8729_v43 = vld [vmem:[%s7396_s18 + $0x80] sm:$0xff] }
 0x31a   : > { %v4141_v38 = vmul.f32 %v8654_v7, %v3205_v20  ;;  %v3739_v42 = vmul.f32 0.6931472, %v5684_v4  ;;  %5689 = vpow2.f32 %v2051_v26  ;;  %vm8724_vm1 = vcmp.lt.f32.partialorder %v2600_v34, 0.0004427343 }
 0x31b   : > { %v5686_v62 = vpop.eup %5685  ;;  %v4779_v22 = vadd.f32 %v4587_v40, %v2187_v57  ;;  %5691 = vlog2.f32 %v2603_v14  ;;  %v2119_v16 = vmul.f32 1.442695, %v1737_v25  ;;  %v2607_v26 = vadd.f32 1.0, %v2606_v39  ;;  %v8736_v57 = vld [vmem:[%s7396_s18 + $0x180] sm:$0xff] }
 0x31c   : > { %v8731_v54 = vpop.eup %5687  ;;  %v4621_v7 = vmul.f32 %v4429_v5, %v4141_v38  ;;  %v3745_v30 = vsel %vm8709_vm0, %v3742_v24, %v3739_v42  ;;  %v2596_v17 = vmul.f32 0.6931472, %v5686_v62  ;;  %v2609_v4 = vand.u32 2147483647, %v8705_v55  ;;  %v1576_v5 = vld [vmem:[%s7394_s6 + $0xe8] sm:$0xff]  ;;  %v8750_v42 = vld [vmem:[%s7396_s18 + $0x270] sm:$0xff] }
 0x31d   : > { %4975 = vmatpush.msra.mxu2 %v4779_v22  ;;  %v4201_v34 = vmul.f32 %v8670_v1, %v3745_v30  ;;  %v3179_v40 = vadd.f32 1.0, %v8731_v54  ;;  %v3182_v25 = vmul.f32 -0.5, %v8731_v54  ;;  %v4363_v14 = vunpack.c.l.bf16 %v8729_v43  ;;  %v1610_v62 = vld [vmem:[%s7394_s6 + $0x1f8] sm:$0xff]  ;;  %v2155_v30 = vld [vmem:[%s7392_s30 + $0x100] sm:$0xff] }
 0x31e   : > { %v4813_v20 = vadd.f32 %v4621_v7, %v2221_v37  ;;  %v2602_v24 = vsel %vm8724_vm1, %v2599_v8, %v2596_v17  ;;  %5693 = vpow2.f32 %v2119_v16  ;;  %v4427_v1 = vunpack.c.l.bf16 %v8736_v57  ;;  %v2154_v37 = vld [vmem:[%s7392_s30 + $0xf8] sm:$0xff] }
 0x31f   : > { %v4681_v39 = vmul.f32 %v4489_v58, %v4201_v34  ;;  %v4074_v38 = vmul.f32 %v8678_v0, %v2602_v24  ;;  %5695 = vlog2.f32 %v3179_v40  ;;  %v2608_v7 = vmul.f32 %v8705_v55, %v2607_v26 }
 0x320   : > { %v8753_v22 = vpop.eup %5689  ;;  %4994 = vmatpush.msra.mxu3 %v4813_v20  ;;  %v3183_v56 = vadd.f32 1.0, %v3182_v25  ;;  %v3185_v8 = vand.u32 2147483647, %v8731_v54  ;;  %v1797_v43 = vmul.f32 1.442695, %v1576_v5  ;;  %v4487_v26 = vunpack.c.l.bf16 %v8750_v42  ;;  %v8767_v20 = vld [vmem:[%s7396_s18 + $0x2f8] sm:$0xff] }
 0x321   : > { %v5692_v58 = vpop.eup %5691  ;;  %v4873_v0 = vadd.f32 %v4681_v39, %v2281_v47  ;;  %v4554_v16 = vmul.f32 %v4362_v48, %v4074_v38  ;;  %vm8758_vm2 = vcmp.lt.f32.partialorder %v2609_v4, 0.0004427343  ;;  %v3719_v17 = vadd.f32 1.0, %v8753_v22  ;;  %v1701_v4 = vld [vmem:[%s7394_s6 + $0x4d0] sm:$0xff]  ;;  %v2219_v38 = vld [vmem:[%s7392_s30 + $0x300] sm:$0xff] }
 0x322   : > { %v2605_v34 = vmul.f32 0.6931472, %v5692_v58  ;;  %v3722_v40 = vmul.f32 -0.5, %v8753_v22  ;;  %5697 = vpow2.f32 %v1797_v43  ;;  %v1865_v48 = vmul.f32 1.442695, %v1610_v62 }
 0x323   : > { %5000 = vmatpush.msrb.mxu0 %v4873_v0  ;;  %v4746_v25 = vadd.f32 %v4554_v16, %v2154_v37  ;;  %5699 = vlog2.f32 %v3719_v17  ;;  %v3184_v39 = vmul.f32 %v8731_v54, %v3183_v56  ;;  %vm8775_vm3 = vcmp.lt.f32.partialorder %v3185_v8, 0.0004427343 }
 0x324   : > { %v8770_v47 = vpop.eup %5693  ;;  %v2611_v24 = vsel %vm8758_vm2, %v2608_v7, %v2605_v34  ;;  %v3723_v37 = vadd.f32 1.0, %v3722_v40  ;;  %v3725_v0 = vand.u32 2147483647, %v8753_v22  ;;  %v4521_v56 = vunpack.c.l.bf16 %v8767_v20 }
 0x325   : > { %v5696_v43 = vpop.eup %5695  ;;  %5040 = vmatpush.msrb.mxu2 %v4746_v25  ;;  %v4075_v58 = vmul.f32 %v8705_v55, %v2611_v24  ;;  %v4025_v62 = vadd.f32 1.0, %v8770_v47  ;;  %v4028_v16 = vmul.f32 -0.5, %v8770_v47  ;;  %5701 = vpow2.f32 %v1865_v48  ;;  %v1735_v48 = vld [vmem:[%s7394_s6 + $0x5e0] sm:$0xff] }
 0x326   : > { %v3181_v7 = vmul.f32 0.6931472, %v5696_v43  ;;  %v2047_v8 = vmul.f32 1.442695, %v1701_v4  ;;  %v4031_v34 = vand.u32 2147483647, %v8770_v47  ;;  %v3724_v24 = vmul.f32 %v8753_v22, %v3723_v37 }
 0x327   : > { %v4555_v17 = vmul.f32 %v4363_v14, %v4075_v58  ;;  %5703 = vlog2.f32 %v4025_v62  ;;  %v4029_v43 = vadd.f32 1.0, %v4028_v16  ;;  %vm8794_vm4 = vcmp.lt.f32.partialorder %v3725_v0, 0.0004427343  ;;  %v8802_v37 = vld [vmem:[%s7396_s18 + $0x70] sm:$0xff] }
 0x328   : > { %v8787_v40 = vpop.eup %5697  ;;  %v3187_v25 = vsel %vm8775_vm3, %v3184_v39, %v3181_v7  ;;  %5705 = vpow2.f32 %v2047_v8  ;;  %v8806_v7 = vld [vmem:[%s7396_s18 + $0xf8] sm:$0xff]  ;;  %vm8811_vm5 = vcmp.lt.f32.partialorder %v4031_v34, 0.0004427343  ;;  %v8816_v8 = vld [vmem:[%s7396_s18 + $0x268] sm:$0xff]  ;;  %v2313_v0 = vld [vmem:[%s7392_s30 + $0x5f0] sm:$0xff] }
 0x329   : > { %v5700_v4 = vpop.eup %5699  ;;  %v4747_v14 = vadd.f32 %v4555_v17, %v2155_v30  ;;  %v4139_v58 = vmul.f32 %v8731_v54, %v3187_v25  ;;  %v2576_v59 = vadd.f32 1.0, %v8787_v40  ;;  %v2579_v39 = vmul.f32 -0.5, %v8787_v40  ;;  %v1574_v25 = vld [vmem:[%s7394_s6 + $0xd8] sm:$0xff]  ;;  %v2279_v30 = vld [vmem:[%s7392_s30 + $0x4e0] sm:$0xff] }
 0x32a   : > { %v3721_v55 = vmul.f32 0.6931472, %v5700_v4  ;;  %v2115_v17 = vmul.f32 1.442695, %v1735_v48  ;;  %v2582_v57 = vand.u32 2147483647, %v8787_v40 }
 0x32b   : > { %4955 = vmatpush.msra.mxu1 %v4747_v14  ;;  %v4619_v54 = vmul.f32 %v4427_v1, %v4139_v58  ;;  %5707 = vlog2.f32 %v2576_v59  ;;  %v8819_v4 = vpop.eup %5701  ;;  %v4030_v14 = vmul.f32 %v8770_v47, %v4029_v43  ;;  %v2580_v2 = vadd.f32 1.0, %v2579_v39 }
 0x32c   : > { %v3727_v5 = vsel %vm8794_vm4, %v3724_v24, %v3721_v55  ;;  %v2882_v59 = vadd.f32 1.0, %v8819_v4  ;;  %v2885_v32 = vmul.f32 -0.5, %v8819_v4  ;;  %5709 = vpow2.f32 %v2115_v17 }
 0x32d   : > { %v5704_v1 = vpop.eup %5703  ;;  %v4811_v34 = vadd.f32 %v4619_v54, %v2219_v38  ;;  %v4199_v58 = vmul.f32 %v8753_v22, %v3727_v5  ;;  %v1793_v24 = vmul.f32 1.442695, %v1574_v25  ;;  %v2581_v22 = vmul.f32 %v8787_v40, %v2580_v2  ;;  %v8841_v25 = vld [vmem:[%s7396_s18 + $0x2f0] sm:$0xff] }
 0x32e   : > { %v8828_v48 = vpop.eup %5705  ;;  %v4027_v62 = vmul.f32 0.6931472, %v5704_v1  ;;  %5711 = vlog2.f32 %v2882_v59  ;;  %v2886_v39 = vadd.f32 1.0, %v2885_v32  ;;  %v2888_v54 = vand.u32 2147483647, %v8819_v4  ;;  %v1608_v1 = vld [vmem:[%s7394_s6 + $0x1e8] sm:$0xff] }
 0x32f   : > { %4995 = vmatpush.msra.mxu3 %v4811_v34  ;;  %v4679_v43 = vmul.f32 %v4487_v26, %v4199_v58  ;;  %v3701_v5 = vadd.f32 1.0, %v8828_v48  ;;  %v3704_v17 = vmul.f32 -0.5, %v8828_v48  ;;  %vm8845_vm6 = vcmp.lt.f32.partialorder %v2582_v57, 0.0004427343  ;;  %v1699_v58 = vld [vmem:[%s7394_s6 + $0x4c0] sm:$0xff]  ;;  %v2152_v57 = vld [vmem:[%s7392_s30 + $0xe8] sm:$0xff] }
 0x330   : > { %v4033_v38 = vsel %vm8811_vm5, %v4030_v14, %v4027_v62  ;;  %v3707_v59 = vand.u32 2147483647, %v8828_v48  ;;  %v1861_v62 = vmul.f32 1.442695, %v1608_v1  ;;  %vm8861_vm7 = vcmp.lt.f32.partialorder %v2888_v54, 0.0004427343 }
 0x331   : > { %v5708_v34 = vpop.eup %5707  ;;  %v4871_v55 = vadd.f32 %v4679_v43, %v2279_v30  ;;  %v4233_v26 = vmul.f32 %v8770_v47, %v4033_v38  ;;  %5713 = vlog2.f32 %v3701_v5  ;;  %v3705_v14 = vadd.f32 1.0, %v3704_v17 }
 0x332   : > { %v2578_v32 = vmul.f32 0.6931472, %v5708_v34  ;;  %5715 = vpow2.f32 %v1793_v24  ;;  %v8856_v43 = vpop.eup %5709  ;;  %v2887_v38 = vmul.f32 %v8819_v4, %v2886_v39  ;;  %v1733_v24 = vld [vmem:[%s7394_s6 + $0x5d0] sm:$0xff]  ;;  %vm8871_vm8 = vcmp.lt.f32.partialorder %v3707_v59, 0.0004427343 }
 0x333   : > { %5001 = vmatpush.msrb.mxu0 %v4871_v55  ;;  %v4713_v30 = vmul.f32 %v4521_v56, %v4233_v26  ;;  %v2043_v55 = vmul.f32 1.442695, %v1699_v58  ;;  %v4007_v47 = vadd.f32 1.0, %v8856_v43  ;;  %v4010_v1 = vmul.f32 -0.5, %v8856_v43  ;;  %v2277_v39 = vld [vmem:[%s7392_s30 + $0x4d0] sm:$0xff] }
 0x334   : > { %v2584_v5 = vsel %vm8845_vm6, %v2581_v22, %v2578_v32  ;;  %v5712_v34 = vpop.eup %5711  ;;  %v3706_v22 = vmul.f32 %v8828_v48, %v3705_v14  ;;  %5717 = vpow2.f32 %v1861_v62  ;;  %v11465_v2 = vunpack.c.h.bf16 %v8802_v37 }
 0x335   : > { %v4905_v56 = vadd.f32 %v4713_v30, %v2313_v0  ;;  %v4072_v26 = vmul.f32 %v8787_v40, %v2584_v5  ;;  %v2884_v16 = vmul.f32 0.6931472, %v5712_v34  ;;  %5719 = vlog2.f32 %v4007_v47  ;;  %v1572_v34 = vld [vmem:[%s7394_s6 + $0xc8] sm:$0xff] }
 0x336   : > { %v4013_v58 = vand.u32 2147483647, %v8856_v43  ;;  %v2111_v0 = vmul.f32 1.442695, %v1733_v24  ;;  %v4011_v30 = vadd.f32 1.0, %v4010_v1  ;;  %5721 = vpow2.f32 %v2043_v55  ;;  %v8902_v1 = vld [vmem:[%s7396_s18 + $0x260] sm:$0xff] }
 0x337   : > { %v5714_v54 = vpop.eup %5713  ;;  %5020 = vmatpush.msrb.mxu1 %v4905_v56  ;;  %v4552_v40 = vmul.f32 %v11465_v2, %v4072_v26  ;;  %v2890_v14 = vsel %vm8861_vm7, %v2887_v38, %v2884_v16  ;;  %v2186_v56 = vld [vmem:[%s7392_s30 + $0x1f8] sm:$0xff]  ;;  %v8891_v16 = vld [vmem:[%s7396_s18 + $0x68] sm:$0xff]  ;;  %v1697_v38 = vld [vmem:[%s7394_s6 + $0x4b0] sm:$0xff] }
 0x338   : > { %v8878_v32 = vpop.eup %5715  ;;  %v3703_v59 = vmul.f32 0.6931472, %v5714_v54  ;;  %v4106_v5 = vmul.f32 %v8819_v4, %v2890_v14  ;;  %5723 = vpow2.f32 %v2111_v0  ;;  %v11466_v4 = vunpack.c.h.bf16 %v8806_v7  ;;  %v1606_v26 = vld [vmem:[%s7394_s6 + $0x1d8] sm:$0xff] }
 0x339   : > { %v4744_v62 = vadd.f32 %v4552_v40, %v2152_v57  ;;  %v2558_v47 = vadd.f32 1.0, %v8878_v32  ;;  %v2561_v17 = vmul.f32 -0.5, %v8878_v32  ;;  %vm8897_vm9 = vcmp.lt.f32.partialorder %v4013_v58, 0.0004427343 }
 0x33a   : > { %v3709_v24 = vsel %vm8871_vm8, %v3706_v22, %v3703_v59  ;;  %v4586_v57 = vmul.f32 %v11466_v4, %v4106_v5  ;;  %v8904_v22 = vpop.eup %5717  ;;  %v4012_v54 = vmul.f32 %v8856_v43, %v4011_v30  ;;  %v2564_v40 = vand.u32 2147483647, %v8878_v32 }
 0x33b   : > { %5041 = vmatpush.msrb.mxu2 %v4744_v62  ;;  %v4197_v55 = vmul.f32 %v8828_v48, %v3709_v24  ;;  %5725 = vlog2.f32 %v2558_v47  ;;  %v2562_v2 = vadd.f32 1.0, %v2561_v17  ;;  %v1789_v7 = vmul.f32 1.442695, %v1572_v34  ;;  %v5720_v0 = vpop.eup %5719  ;;  %v8916_v24 = vld [vmem:[%s7396_s18 + $0xf0] sm:$0xff] }
 0x33c   : > { %v4778_v14 = vadd.f32 %v4586_v57, %v2186_v56  ;;  %v11469_v48 = vunpack.c.l.bf16 %v8816_v8  ;;  %v2864_v59 = vadd.f32 1.0, %v8904_v22  ;;  %v2867_v62 = vmul.f32 -0.5, %v8904_v22  ;;  %v8913_v5 = vpop.eup %5721 }
 0x33d   : > { %v4009_v47 = vmul.f32 0.6931472, %v5720_v0  ;;  %5727 = vpow2.f32 %v1789_v7  ;;  %v2870_v56 = vand.u32 2147483647, %v8904_v22  ;;  %v3683_v4 = vadd.f32 1.0, %v8913_v5  ;;  %v2311_v7 = vld [vmem:[%s7392_s30 + $0x5e0] sm:$0xff] }
 0x33e   : > { %v4677_v58 = vmul.f32 %v11469_v48, %v4197_v55  ;;  %5060 = vmatpush.msrb.mxu3 %v4778_v14  ;;  %5729 = vlog2.f32 %v2864_v59  ;;  %v8922_v57 = vpop.eup %5723  ;;  %v2563_v0 = vmul.f32 %v8878_v32, %v2562_v2  ;;  %v2868_v48 = vadd.f32 1.0, %v2867_v62 }
 0x33f   : > { %v4015_v55 = vsel %vm8897_vm9, %v4012_v54, %v4009_v47  ;;  %v3686_v37 = vmul.f32 -0.5, %v8913_v5  ;;  %vm8930_vm10 = vcmp.lt.f32.partialorder %v2564_v40, 0.0004427343  ;;  %5731 = vlog2.f32 %v3683_v4 }
 0x340   : > { %v4869_v34 = vadd.f32 %v4677_v58, %v2277_v39  ;;  %v4231_v39 = vmul.f32 %v8856_v43, %v4015_v55  ;;  %v3989_v58 = vadd.f32 1.0, %v8922_v57  ;;  %v3689_v2 = vand.u32 2147483647, %v8913_v5 }
 0x341   : > { %v5726_v17 = vpop.eup %5725  ;;  %v3687_v59 = vadd.f32 1.0, %v3686_v37  ;;  %v3992_v62 = vmul.f32 -0.5, %v8922_v57  ;;  %v11472_v47 = vunpack.c.l.bf16 %v8841_v25  ;;  %vm8940_vm11 = vcmp.lt.f32.partialorder %v2870_v56, 0.0004427343 }
 0x342   : > { %5002 = vmatpush.msrb.mxu0 %v4869_v34  ;;  %v2560_v54 = vmul.f32 0.6931472, %v5726_v17  ;;  %5733 = vlog2.f32 %v3989_v58  ;;  %v2869_v17 = vmul.f32 %v8904_v22, %v2868_v48  ;;  %v3995_v30 = vand.u32 2147483647, %v8922_v57  ;;  %v2150_v58 = vld [vmem:[%s7392_s30 + $0xd8] sm:$0xff] }
 0x343   : > { %v4711_v34 = vmul.f32 %v11472_v47, %v4231_v39  ;;  %v8945_v4 = vpop.eup %5727  ;;  %v3993_v55 = vadd.f32 1.0, %v3992_v62  ;;  %v1857_v40 = vmul.f32 1.442695, %v1606_v26  ;;  %v3688_v14 = vmul.f32 %v8913_v5, %v3687_v59  ;;  %v8965_v62 = vld [vmem:[%s7396_s18 + $0x2e8] sm:$0xff] }
 0x344   : > { %v2566_v37 = vsel %vm8930_vm10, %v2563_v0, %v2560_v54  ;;  %v5730_v39 = vpop.eup %5729  ;;  %v2540_v23 = vadd.f32 1.0, %v8945_v4  ;;  %vm8956_vm12 = vcmp.lt.f32.partialorder %v3689_v2, 0.0004427343  ;;  %v2543_v48 = vmul.f32 -0.5, %v8945_v4 }
 0x345   : > { %v4903_v56 = vadd.f32 %v4711_v34, %v2311_v7  ;;  %v4070_v47 = vmul.f32 %v8878_v32, %v2566_v37  ;;  %v2866_v9 = vmul.f32 0.6931472, %v5730_v39  ;;  %v5732_v54 = vpop.eup %5731  ;;  %v11477_v7 = vunpack.c.h.bf16 %v8891_v16 }
 0x346   : > { %v3994_v26 = vmul.f32 %v8922_v57, %v3993_v55  ;;  %5735 = vlog2.f32 %v2540_v23  ;;  %v2039_v34 = vmul.f32 1.442695, %v1697_v38  ;;  %v3685_v2 = vmul.f32 0.6931472, %v5732_v54  ;;  %v1570_v23 = vld [vmem:[%s7394_s6 + $0xb8] sm:$0xff]  ;;  %v2184_v38 = vld [vmem:[%s7392_s30 + $0x1e8] sm:$0xff] }
 0x347   : > { %5021 = vmatpush.msrb.mxu1 %v4903_v56  ;;  %v4550_v32 = vmul.f32 %v11477_v7, %v4070_v47  ;;  %v2872_v59 = vsel %vm8940_vm11, %v2869_v17, %v2866_v9  ;;  %v2544_v37 = vadd.f32 1.0, %v2543_v48  ;;  %v2546_v39 = vand.u32 2147483647, %v8945_v4  ;;  %v2275_v48 = vld [vmem:[%s7392_s30 + $0x4c0] sm:$0xff] }
 0x348   : > { %v5734_v56 = vpop.eup %5733  ;;  %v4104_v47 = vmul.f32 %v8904_v22, %v2872_v59  ;;  %vm8972_vm13 = vcmp.lt.f32.partialorder %v3995_v30, 0.0004427343  ;;  %5737 = vpow2.f32 %v1857_v40  ;;  %v3691_v9 = vsel %vm8956_vm12, %v3688_v14, %v3685_v2 }
 0x349   : > { %v4742_v16 = vadd.f32 %v4550_v32, %v2150_v58  ;;  %v3991_v43 = vmul.f32 0.6931472, %v5734_v56  ;;  %v4517_v17 = vunpack.c.l.bf16 %v8965_v62  ;;  %5739 = vpow2.f32 %v2039_v34  ;;  %v9000_v56 = vld [vmem:[%s7396_s18 + $0x2e0] sm:$0xff] }
 0x34a   : > { %v11480_v55 = vunpack.c.h.bf16 %v8916_v24  ;;  %v4195_v30 = vmul.f32 %v8913_v5, %v3691_v9  ;;  %v2107_v58 = vmul.f32 1.442695, %v1731_v44  ;;  %v2545_v0 = vmul.f32 %v8945_v4, %v2544_v37  ;;  %v8994_v24 = vld [vmem:[%s7396_s18 + $0x258] sm:$0xff]  ;;  %v6194_v37 = vld [vmem:[%s7396_s18 + $0x60] sm:$0xff] }
 0x34b   : > { %5042 = vmatpush.msrb.mxu2 %v4742_v16  ;;  %v3997_v14 = vsel %vm8972_vm13, %v3994_v26, %v3991_v43  ;;  %vm8989_vm14 = vcmp.lt.f32.partialorder %v2546_v39, 0.0004427343  ;;  %v1785_v32 = vmul.f32 1.442695, %v1570_v23  ;;  %v11483_v59 = vunpack.c.l.bf16 %v8902_v1  ;;  %v2309_v26 = vld [vmem:[%s7392_s30 + $0x5d0] sm:$0xff]  ;;  %v9038_v43 = vld [vmem:[%s7396_s18 + $0xe0] sm:$0xff] }
 0x34c   : > { %v4584_v22 = vmul.f32 %v11480_v55, %v4104_v47  ;;  %v5736_v34 = vpop.eup %5735  ;;  %v4229_v44 = vmul.f32 %v8922_v57, %v3997_v14  ;;  %5741 = vpow2.f32 %v2107_v58  ;;  %v4356_v39 = vunpack.c.h.bf16 %v6194_v37  ;;  %v9005_v47 = vld [vmem:[%s7396_s18 + $0xe8] sm:$0xff] }
 0x34d   : > { %v4675_v2 = vmul.f32 %v11483_v59, %v4195_v30  ;;  %v2542_v16 = vmul.f32 0.6931472, %v5736_v34  ;;  %5743 = vpow2.f32 %v1785_v32  ;;  %v1604_v32 = vld [vmem:[%s7394_s6 + $0x1c8] sm:$0xff]  ;;  %v11504_v15 = vunpack.c.h.bf16 %v9038_v43 }
 0x34e   : > { %v4776_v5 = vadd.f32 %v4584_v22, %v2184_v38  ;;  %v9008_v23 = vpop.eup %5737  ;;  %v4709_v9 = vmul.f32 %v4517_v17, %v4229_v44  ;;  %v2148_v59 = vld [vmem:[%s7392_s30 + $0xc8] sm:$0xff]  ;;  %v1729_v44 = vld [vmem:[%s7394_s6 + $0x5b0] sm:$0xff] }
 0x34f   : > { %v4867_v38 = vadd.f32 %v4675_v2, %v2275_v48  ;;  %v9012_v55 = vpop.eup %5739  ;;  %v2548_v22 = vsel %vm8989_vm14, %v2545_v0, %v2542_v16  ;;  %v2846_v30 = vadd.f32 1.0, %v9008_v23  ;;  %v2849_v58 = vmul.f32 -0.5, %v9008_v23  ;;  %v9027_v2 = vld [vmem:[%s7396_s18 + $0x58] sm:$0xff]  ;;  %v1695_v16 = vld [vmem:[%s7394_s6 + $0x4a0] sm:$0xff] }
 0x350   : > { %5061 = vmatpush.msrb.mxu3 %v4776_v5  ;;  %v4901_v17 = vadd.f32 %v4709_v9, %v2309_v26  ;;  %v4068_v48 = vmul.f32 %v8945_v4, %v2548_v22  ;;  %v3665_v34 = vadd.f32 1.0, %v9012_v55  ;;  %v3668_v5 = vmul.f32 -0.5, %v9012_v55 }
 0x351   : > { %5003 = vmatpush.msrb.mxu0 %v4867_v38  ;;  %5745 = vlog2.f32 %v2846_v30  ;;  %v2852_v0 = vand.u32 2147483647, %v9008_v23  ;;  %v2850_v37 = vadd.f32 1.0, %v2849_v58  ;;  %v1853_v38 = vmul.f32 1.442695, %v1604_v32  ;;  %v9045_v32 = vld [vmem:[%s7396_s18 + $0x250] sm:$0xff] }
 0x352   : > { %v9031_v26 = vpop.eup %5741  ;;  %5022 = vmatpush.msrb.mxu1 %v4901_v17  ;;  %v4548_v4 = vmul.f32 %v4356_v39, %v4068_v48  ;;  %5747 = vlog2.f32 %v3665_v34  ;;  %v3669_v22 = vadd.f32 1.0, %v3668_v5  ;;  %v3671_v17 = vand.u32 2147483647, %v9012_v55  ;;  %v2182_v48 = vld [vmem:[%s7392_s30 + $0x1d8] sm:$0xff] }
 0x353   : > { %v9033_v9 = vpop.eup %5743  ;;  %v3971_v30 = vadd.f32 1.0, %v9031_v26  ;;  %v3974_v54 = vmul.f32 -0.5, %v9031_v26  ;;  %v2035_v58 = vmul.f32 1.442695, %v1695_v16  ;;  %vm9047_vm15 = vcmp.lt.f32.partialorder %v2852_v0, 0.0004427343 }
 0x354   : > { %v4740_v14 = vadd.f32 %v4548_v4, %v2148_v59  ;;  %v2522_v39 = vadd.f32 1.0, %v9033_v9  ;;  %v3977_v34 = vand.u32 2147483647, %v9031_v26  ;;  %v2525_v5 = vmul.f32 -0.5, %v9033_v9  ;;  %v1568_v16 = vld [vmem:[%s7394_s6 + $0xa8] sm:$0xff] }
 0x355   : > { %5749 = vlog2.f32 %v3971_v30  ;;  %v2851_v59 = vmul.f32 %v9008_v23, %v2850_v37  ;;  %v3975_v4 = vadd.f32 1.0, %v3974_v54  ;;  %v2103_v40 = vmul.f32 1.442695, %v1729_v44  ;;  %v1602_v30 = vld [vmem:[%s7394_s6 + $0x1b8] sm:$0xff] }
 0x356   : > { %5043 = vmatpush.msrb.mxu2 %v4740_v14  ;;  %5751 = vlog2.f32 %v2522_v39  ;;  %v3670_v7 = vmul.f32 %v9012_v55, %v3669_v22  ;;  %v2526_v0 = vadd.f32 1.0, %v2525_v5  ;;  %vm9059_vm0 = vcmp.lt.f32.partialorder %v3671_v17, 0.0004427343  ;;  %v9073_v39 = vld [vmem:[%s7396_s18 + $0x2d8] sm:$0xff] }
 0x357   : > { %v5746_v57 = vpop.eup %5745  ;;  %5753 = vpow2.f32 %v1853_v38  ;;  %v2528_v54 = vand.u32 2147483647, %v9033_v9  ;;  %vm9064_vm1 = vcmp.lt.f32.partialorder %v3977_v34, 0.0004427343  ;;  %v1781_v38 = vmul.f32 1.442695, %v1568_v16 }
 0x358   : > { %v5748_v31 = vpop.eup %5747  ;;  %v2848_v63 = vmul.f32 0.6931472, %v5746_v57  ;;  %5755 = vpow2.f32 %v2035_v58  ;;  %v3976_v57 = vmul.f32 %v9031_v26, %v3975_v4  ;;  %v1849_v5 = vmul.f32 1.442695, %v1602_v30 }
 0x359   : > { %v3667_v44 = vmul.f32 0.6931472, %v5748_v31  ;;  %5757 = vpow2.f32 %v2103_v40  ;;  %v2527_v40 = vmul.f32 %v9033_v9, %v2526_v0  ;;  %v2031_v16 = vmul.f32 1.442695, %v1693_v51 }
 0x35a   : > { %v2854_v22 = vsel %vm9047_vm15, %v2851_v59, %v2848_v63  ;;  %vm9081_vm2 = vcmp.lt.f32.partialorder %v2528_v54, 0.0004427343  ;;  %5759 = vpow2.f32 %v1781_v38  ;;  %v11495_v4 = vunpack.c.h.bf16 %v9027_v2 }
 0x35b   : > { %v5750_v58 = vpop.eup %5749  ;;  %v4102_v31 = vmul.f32 %v9008_v23, %v2854_v22  ;;  %v3673_v34 = vsel %vm9059_vm0, %v3670_v7, %v3667_v44  ;;  %v11492_v23 = vunpack.c.h.bf16 %v9005_v47  ;;  %v2273_v7 = vld [vmem:[%s7392_s30 + $0x4b0] sm:$0xff]  ;;  %5761 = vpow2.f32 %v1849_v5 }
 0x35c   : > { %v5752_v53 = vpop.eup %5751  ;;  %v4193_v63 = vmul.f32 %v9012_v55, %v3673_v34  ;;  %v3973_v59 = vmul.f32 0.6931472, %v5750_v58  ;;  %v11493_v55 = vunpack.c.l.bf16 %v8994_v24  ;;  %5763 = vpow2.f32 %v2031_v16 }
 0x35d   : > { %v9085_v30 = vpop.eup %5753  ;;  %v4582_v22 = vmul.f32 %v11492_v23, %v4102_v31  ;;  %v2524_v14 = vmul.f32 0.6931472, %v5752_v53 }
 0x35e   : > { %v9091_v0 = vpop.eup %5755  ;;  %v4673_v54 = vmul.f32 %v11493_v55, %v4193_v63  ;;  %v3979_v44 = vsel %vm9064_vm1, %v3976_v57, %v3973_v59  ;;  %v2828_v38 = vadd.f32 1.0, %v9085_v30  ;;  %v2831_v47 = vmul.f32 -0.5, %v9085_v30  ;;  %v2307_v63 = vld [vmem:[%s7392_s30 + $0x5c0] sm:$0xff] }
 0x35f   : > { %v9099_v58 = vpop.eup %5757  ;;  %v4774_v31 = vadd.f32 %v4582_v22, %v2182_v48  ;;  %v4227_v53 = vmul.f32 %v9031_v26, %v3979_v44  ;;  %v2530_v5 = vsel %vm9081_vm2, %v2527_v40, %v2524_v14  ;;  %v2834_v57 = vand.u32 2147483647, %v9085_v30  ;;  %v2146_v48 = vld [vmem:[%s7392_s30 + $0xb8] sm:$0xff]  ;;  %v9118_v14 = vld [vmem:[%s7396_s18 + $0x50] sm:$0xff] }
 0x360   : > { %v4865_v34 = vadd.f32 %v4673_v54, %v2273_v7  ;;  %v4066_v37 = vmul.f32 %v9033_v9, %v2530_v5  ;;  %5765 = vlog2.f32 %v2828_v38  ;;  %v11494_v59 = vunpack.c.l.bf16 %v9000_v56  ;;  %v9112_v16 = vpop.eup %5759  ;;  %v9122_v54 = vld [vmem:[%s7396_s18 + $0xd8] sm:$0xff]  ;;  %v2180_v5 = vld [vmem:[%s7392_s30 + $0x1c8] sm:$0xff] }
 0x361   : > { %5062 = vmatpush.msrb.mxu3 %v4774_v31  ;;  %v2832_v22 = vadd.f32 1.0, %v2831_v47  ;;  %v3647_v26 = vadd.f32 1.0, %v9091_v0  ;;  %v3650_v40 = vmul.f32 -0.5, %v9091_v0  ;;  %v3953_v9 = vadd.f32 1.0, %v9099_v58  ;;  %v9125_v38 = vpop.eup %5761 }
 0x362   : > { %v4707_v23 = vmul.f32 %v11494_v59, %v4227_v53  ;;  %5004 = vmatpush.msrb.mxu0 %v4865_v34  ;;  %v4546_v7 = vmul.f32 %v11495_v4, %v4066_v37  ;;  %v3653_v31 = vand.u32 2147483647, %v9091_v0  ;;  %v3956_v53 = vmul.f32 -0.5, %v9099_v58  ;;  %v9133_v37 = vpop.eup %5763 }
 0x363   : > { %5767 = vlog2.f32 %v3647_v26  ;;  %vm9129_vm3 = vcmp.lt.f32.partialorder %v2834_v57, 0.0004427343  ;;  %v3651_v34 = vadd.f32 1.0, %v3650_v40  ;;  %v2833_v59 = vmul.f32 %v9085_v30, %v2832_v22 }
 0x364   : > { %v4899_v47 = vadd.f32 %v4707_v23, %v2307_v63  ;;  %v4738_v2 = vadd.f32 %v4546_v7, %v2146_v48  ;;  %5769 = vlog2.f32 %v3953_v9  ;;  %v3957_v4 = vadd.f32 1.0, %v3956_v53 }
 0x365   : > { %v2504_v63 = vadd.f32 1.0, %v9112_v16  ;;  %v2507_v23 = vmul.f32 -0.5, %v9112_v16  ;;  %v3959_v48 = vand.u32 2147483647, %v9099_v58  ;;  %v2510_v57 = vand.u32 2147483647, %v9112_v16 }
 0x366   : > { %5023 = vmatpush.msrb.mxu1 %v4899_v47  ;;  %v5766_v26 = vpop.eup %5765  ;;  %5044 = vmatpush.msrb.mxu2 %v4738_v2  ;;  %v2810_v40 = vadd.f32 1.0, %v9125_v38  ;;  %v2813_v7 = vmul.f32 -0.5, %v9125_v38  ;;  %vm9142_vm4 = vcmp.lt.f32.partialorder %v3653_v31, 0.0004427343  ;;  %v3652_v53 = vmul.f32 %v9091_v0, %v3651_v34  ;;  %v2271_v47 = vld [vmem:[%s7392_s30 + $0x4a0] sm:$0xff] }
 0x367   : > { %v2830_v9 = vmul.f32 0.6931472, %v5766_v26  ;;  %5771 = vlog2.f32 %v2504_v63  ;;  %v2508_v22 = vadd.f32 1.0, %v2507_v23  ;;  %v3958_v2 = vmul.f32 %v9099_v58, %v3957_v4  ;;  %v1727_v63 = vld [vmem:[%s7394_s6 + $0x5a0] sm:$0xff] }
 0x368   : > { %5773 = vlog2.f32 %v2810_v40  ;;  %v2814_v17 = vadd.f32 1.0, %v2813_v7  ;;  %v2816_v51 = vand.u32 2147483647, %v9125_v38  ;;  %v3629_v31 = vadd.f32 1.0, %v9133_v37 }
 0x369   : > { %v5768_v44 = vpop.eup %5767  ;;  %v2836_v55 = vsel %vm9129_vm3, %v2833_v59, %v2830_v9  ;;  %v3632_v26 = vmul.f32 -0.5, %v9133_v37  ;;  %vm9155_vm5 = vcmp.lt.f32.partialorder %v3959_v48, 0.0004427343  ;;  %vm9159_vm6 = vcmp.lt.f32.partialorder %v2510_v57, 0.0004427343  ;;  %v1566_v57 = vld [vmem:[%s7394_s6 + $0x98] sm:$0xff] }
 0x36a   : > { %v5770_v23 = vpop.eup %5769  ;;  %v4100_v6 = vmul.f32 %v9085_v30, %v2836_v55  ;;  %v3649_v34 = vmul.f32 0.6931472, %v5768_v44  ;;  %v2509_v7 = vmul.f32 %v9112_v16, %v2508_v22  ;;  %5775 = vlog2.f32 %v3629_v31 }
 0x36b   : > { %v3955_v59 = vmul.f32 0.6931472, %v5770_v23  ;;  %v3633_v9 = vadd.f32 1.0, %v3632_v26  ;;  %v3635_v44 = vand.u32 2147483647, %v9133_v37  ;;  %v2815_v31 = vmul.f32 %v9125_v38, %v2814_v17 }
 0x36c   : > { %v4580_v30 = vmul.f32 %v11504_v15, %v4100_v6  ;;  %v3655_v55 = vsel %vm9142_vm4, %v3652_v53, %v3649_v34  ;;  %v2099_v48 = vmul.f32 1.442695, %v1727_v63  ;;  %vm9175_vm7 = vcmp.lt.f32.partialorder %v2816_v51, 0.0004427343  ;;  %v1600_v15 = vld [vmem:[%s7394_s6 + $0x1a8] sm:$0xff] }
 0x36d   : > { %v5772_v49 = vpop.eup %5771  ;;  %v4191_v50 = vmul.f32 %v9091_v0, %v3655_v55  ;;  %v3961_v22 = vsel %vm9155_vm5, %v3958_v2, %v3955_v59  ;;  %v11507_v0 = vunpack.c.l.bf16 %v9045_v32  ;;  %v2305_v2 = vld [vmem:[%s7392_s30 + $0x5b0] sm:$0xff]  ;;  %v3634_v51 = vmul.f32 %v9133_v37, %v3633_v9 }
 0x36e   : > { %v5774_v6 = vpop.eup %5773  ;;  %v4772_v43 = vadd.f32 %v4580_v30, %v2180_v5  ;;  %v4225_v53 = vmul.f32 %v9099_v58, %v3961_v22  ;;  %v2506_v63 = vmul.f32 0.6931472, %v5772_v49  ;;  %5777 = vpow2.f32 %v2099_v48  ;;  %v9195_v58 = vld [vmem:[%s7396_s18 + $0x248] sm:$0xff]  ;;  %v1691_v30 = vld [vmem:[%s7394_s6 + $0x480] sm:$0xff]  ;;  %v9202_v22 = vld [vmem:[%s7396_s18 + $0x2d0] sm:$0xff] }
 0x36f   : > { %v4671_v23 = vmul.f32 %v11507_v0, %v4191_v50  ;;  %v2812_v17 = vmul.f32 0.6931472, %v5774_v6  ;;  %v1777_v34 = vmul.f32 1.442695, %v1566_v57  ;;  %v11508_v4 = vunpack.c.l.bf16 %v9073_v39  ;;  %v9229_v49 = vld [vmem:[%s7396_s18 + $0x48] sm:$0xff] }
 0x370   : > { %5063 = vmatpush.msrb.mxu3 %v4772_v43  ;;  %v2512_v59 = vsel %vm9159_vm6, %v2509_v7, %v2506_v63  ;;  %vm9190_vm8 = vcmp.lt.f32.partialorder %v3635_v44, 0.0004427343  ;;  %v1845_v50 = vmul.f32 1.442695, %v1600_v15  ;;  %v5776_v55 = vpop.eup %5775  ;;  %v2144_v7 = vld [vmem:[%s7392_s30 + $0xa8] sm:$0xff]  ;;  %v11511_v43 = vunpack.c.h.bf16 %v9118_v14  ;;  %v1723_v15 = vld [vmem:[%s7394_s6 + $0x580] sm:$0xff] }
 0x371   : > { %v4705_v5 = vmul.f32 %v11508_v4, %v4225_v53  ;;  %v4863_v9 = vadd.f32 %v4671_v23, %v2271_v47  ;;  %v4064_v48 = vmul.f32 %v9112_v16, %v2512_v59  ;;  %v2818_v57 = vsel %vm9175_vm7, %v2815_v31, %v2812_v17  ;;  %v2178_v47 = vld [vmem:[%s7392_s30 + $0x1b8] sm:$0xff] }
 0x372   : > { %5779 = vpow2.f32 %v1777_v34  ;;  %v4098_v44 = vmul.f32 %v9125_v38, %v2818_v57  ;;  %v3631_v6 = vmul.f32 0.6931472, %v5776_v55  ;;  %v4477_v31 = vunpack.c.l.bf16 %v9195_v58 }
 0x373   : > { %v4897_v40 = vadd.f32 %v4705_v5, %v2305_v2  ;;  %5781 = vpow2.f32 %v1845_v50  ;;  %5005 = vmatpush.msrb.mxu0 %v4863_v9  ;;  %v4544_v16 = vmul.f32 %v11511_v43, %v4064_v48  ;;  %v2027_v26 = vmul.f32 1.442695, %v1691_v30  ;;  %v9220_v2 = vld [vmem:[%s7396_s18 + $0x240] sm:$0xff]  ;;  %v2269_v50 = vld [vmem:[%s7392_s30 + $0x490] sm:$0xff] }
 0x374   : > { %v9211_v53 = vpop.eup %5777  ;;  %v11512_v38 = vunpack.c.h.bf16 %v9122_v54  ;;  %v3637_v0 = vsel %vm9190_vm8, %v3634_v51, %v3631_v6  ;;  %v4511_v14 = vunpack.c.l.bf16 %v9202_v22  ;;  %11513 = vst [vmem:[#allocation22_spill] sm:$0xff] %v9220_v2  ;;  %v1725_v54 = vld [vmem:[%s7394_s6 + $0x590] sm:$0xff]  ;;  %v11524_v3 = vunpack.c.h.bf16 %v9229_v49 }
 0x375   : > { %5024 = vmatpush.msrb.mxu1 %v4897_v40  ;;  %v4736_v17 = vadd.f32 %v4544_v16, %v2144_v7  ;;  %v4189_v34 = vmul.f32 %v9133_v37, %v3637_v0  ;;  %v3935_v4 = vadd.f32 1.0, %v9211_v53  ;;  %v3938_v5 = vmul.f32 -0.5, %v9211_v53  ;;  %v9235_v9 = vld [vmem:[%s7396_s18 + $0xd0] sm:$0xff]  ;;  %v9240_v40 = vld [vmem:[%s7396_s18 + $0x2c8] sm:$0xff]  ;;  %v1598_v0 = vld [vmem:[%s7394_s6 + $0x198] sm:$0xff] }
 0x376   : > { %v4578_v63 = vmul.f32 %v11512_v38, %v4098_v44  ;;  %5783 = vpow2.f32 %v2027_v26  ;;  %11514 = vst [vmem:[#allocation23_spill] sm:$0xff] %v9240_v40  ;;  %v2095_v16 = vmul.f32 1.442695, %v1725_v54  ;;  %v3941_v26 = vand.u32 2147483647, %v9211_v53 }
 0x377   : > { %5045 = vmatpush.msrb.mxu2 %v4736_v17  ;;  %v4669_v37 = vmul.f32 %v4477_v31, %v4189_v34  ;;  %5785 = vlog2.f32 %v3935_v4  ;;  %v3939_v44 = vadd.f32 1.0, %v3938_v5 }
 0x378   : > { %v4770_v59 = vadd.f32 %v4578_v63, %v2178_v47  ;;  %v9232_v55 = vpop.eup %5779  ;;  %v1564_v47 = vld [vmem:[%s7394_s6 + $0x88] sm:$0xff]  ;;  %vm9260_vm9 = vcmp.lt.f32.partialorder %v3941_v26, 0.0004427343 }
 0x379   : > { %v9242_v7 = vpop.eup %5781  ;;  %v2486_v6 = vadd.f32 1.0, %v9232_v55  ;;  %v2489_v43 = vmul.f32 -0.5, %v9232_v55  ;;  %v4861_v31 = vadd.f32 %v4669_v37, %v2269_v50  ;;  %v2492_v17 = vand.u32 2147483647, %v9232_v55  ;;  %v1689_v50 = vld [vmem:[%s7394_s6 + $0x470] sm:$0xff] }
 0x37a   : > { %5064 = vmatpush.msrb.mxu3 %v4770_v59  ;;  %v2792_v38 = vadd.f32 1.0, %v9242_v7  ;;  %v2795_v63 = vmul.f32 -0.5, %v9242_v7  ;;  %v1773_v59 = vmul.f32 1.442695, %v1564_v47  ;;  %v3940_v51 = vmul.f32 %v9211_v53, %v3939_v44 }
 0x37b   : > { %5787 = vlog2.f32 %v2486_v6  ;;  %5006 = vmatpush.msrb.mxu0 %v4861_v31  ;;  %v2490_v5 = vadd.f32 1.0, %v2489_v43  ;;  %v1841_v6 = vmul.f32 1.442695, %v1598_v0  ;;  %v2798_v43 = vand.u32 2147483647, %v9242_v7 }
 0x37c   : > { %5789 = vlog2.f32 %v2792_v38  ;;  %v2796_v54 = vadd.f32 1.0, %v2795_v63  ;;  %v9255_v37 = vpop.eup %5783  ;;  %v2023_v44 = vmul.f32 1.442695, %v1689_v50  ;;  %vm9269_vm10 = vcmp.lt.f32.partialorder %v2492_v17, 0.0004427343 }
 0x37d   : > { %5791 = vpow2.f32 %v2095_v16  ;;  %v5786_v57 = vpop.eup %5785  ;;  %v3611_v31 = vadd.f32 1.0, %v9255_v37  ;;  %v3614_v47 = vmul.f32 -0.5, %v9255_v37  ;;  %v3617_v63 = vand.u32 2147483647, %v9255_v37 }
 0x37e   : > { %v3937_v38 = vmul.f32 0.6931472, %v5786_v57  ;;  %5793 = vpow2.f32 %v1773_v59  ;;  %v2491_v16 = vmul.f32 %v9232_v55, %v2490_v5  ;;  %v2797_v26 = vmul.f32 %v9242_v7, %v2796_v54 }
 0x37f   : > { %5795 = vlog2.f32 %v3611_v31  ;;  %v3615_v4 = vadd.f32 1.0, %v3614_v47  ;;  %v2091_v59 = vmul.f32 1.442695, %v1723_v15  ;;  %vm9277_vm11 = vcmp.lt.f32.partialorder %v2798_v43, 0.0004427343  ;;  %v2303_v31 = vld [vmem:[%s7392_s30 + $0x5a0] sm:$0xff] }
 0x380   : > { %v3943_v57 = vsel %vm9260_vm9, %v3940_v51, %v3937_v38  ;;  %5797 = vpow2.f32 %v1841_v6  ;;  %vm9284_vm12 = vcmp.lt.f32.partialorder %v3617_v63, 0.0004427343  ;;  %v9289_v51 = vld [vmem:[%s7396_s18 + $0x40] sm:$0xff]  ;;  %v9303_v63 = vld [vmem:[%s7396_s18 + $0x238] sm:$0xff] }
 0x381   : > { %v5788_v23 = vpop.eup %5787  ;;  %v4223_v48 = vmul.f32 %v9211_v53, %v3943_v57  ;;  %5799 = vpow2.f32 %v2023_v44  ;;  %v9293_v53 = vld [vmem:[%s7396_s18 + $0xc8] sm:$0xff]  ;;  %11523 = vst [vmem:[#allocation24_spill] sm:$0xff] %v9303_v63 }
 0x382   : > { %v5790_v50 = vpop.eup %5789  ;;  %v2488_v17 = vmul.f32 0.6931472, %v5788_v23  ;;  %v3616_v23 = vmul.f32 %v9255_v37, %v3615_v4  ;;  %5801 = vpow2.f32 %v2091_v59  ;;  %v11525_v59 = vunpack.c.h.bf16 %v9235_v9  ;;  %v1685_v4 = vld [vmem:[%s7394_s6 + $0x450] sm:$0xff] }
 0x383   : > { %v9281_v54 = vpop.eup %5791  ;;  %v2794_v30 = vmul.f32 0.6931472, %v5790_v50  ;;  %v4703_v6 = vmul.f32 %v4511_v14, %v4223_v48 }
 0x384   : > { %v2494_v43 = vsel %vm9269_vm10, %v2491_v16, %v2488_v17  ;;  %v3917_v47 = vadd.f32 1.0, %v9281_v54  ;;  %v3920_v38 = vmul.f32 -0.5, %v9281_v54  ;;  %v9305_v44 = vpop.eup %5793  ;;  %v2142_v16 = vld [vmem:[%s7392_s30 + $0x98] sm:$0xff]  ;;  %v3923_v5 = vand.u32 2147483647, %v9281_v54 }
 0x385   : > { %v4062_v57 = vmul.f32 %v9232_v55, %v2494_v43  ;;  %v2800_v50 = vsel %vm9277_vm11, %v2797_v26, %v2794_v30  ;;  %v5796_v14 = vpop.eup %5795  ;;  %v4895_v48 = vadd.f32 %v4703_v6, %v2303_v31  ;;  %v2176_v55 = vld [vmem:[%s7392_s30 + $0x1a8] sm:$0xff]  ;;  %v2468_v30 = vadd.f32 1.0, %v9305_v44 }
 0x386   : > { %v4096_v0 = vmul.f32 %v9242_v7, %v2800_v50  ;;  %5803 = vlog2.f32 %v3917_v47  ;;  %v3921_v17 = vadd.f32 1.0, %v3920_v38  ;;  %v9313_v15 = vpop.eup %5797  ;;  %v3613_v43 = vmul.f32 0.6931472, %v5796_v14  ;;  %v1562_v38 = vld [vmem:[%s7394_s6 + $0x78] sm:$0xff] }
 0x387   : > { %v4542_v46 = vmul.f32 %v11524_v3, %v4062_v57  ;;  %v9320_v26 = vpop.eup %5799  ;;  %5025 = vmatpush.msrb.mxu1 %v4895_v48  ;;  %v2471_v31 = vmul.f32 -0.5, %v9305_v44  ;;  %v2474_v49 = vand.u32 2147483647, %v9305_v44  ;;  %5805 = vlog2.f32 %v2468_v30 }
 0x388   : > { %v4576_v7 = vmul.f32 %v11525_v59, %v4096_v0  ;;  %v3619_v6 = vsel %vm9284_vm12, %v3616_v23, %v3613_v43  ;;  %v2774_v47 = vadd.f32 1.0, %v9313_v15  ;;  %v3922_v9 = vmul.f32 %v9281_v54, %v3921_v17  ;;  %v9333_v48 = vpop.eup %5801  ;;  %v2267_v0 = vld [vmem:[%s7392_s30 + $0x480] sm:$0xff] }
 0x389   : > { %v4734_v3 = vadd.f32 %v4542_v46, %v2142_v16  ;;  %v4187_v50 = vmul.f32 %v9255_v37, %v3619_v6  ;;  %v2472_v14 = vadd.f32 1.0, %v2471_v31  ;;  %v2777_v46 = vmul.f32 -0.5, %v9313_v15 }
 0x38a   : > { %v4768_v57 = vadd.f32 %v4576_v7, %v2176_v55  ;;  %5807 = vlog2.f32 %v2774_v47  ;;  %v2780_v34 = vand.u32 2147483647, %v9313_v15  ;;  %v3593_v23 = vadd.f32 1.0, %v9320_v26 }
 0x38b   : > { %5046 = vmatpush.msrb.mxu2 %v4734_v3  ;;  %v11526_v55 = vunpack.c.l.bf16 %v9220_v2  ;;  %vm9341_vm13 = vcmp.lt.f32.partialorder %v3923_v5, 0.0004427343  ;;  %v3596_v17 = vmul.f32 -0.5, %v9320_v26  ;;  %v1769_v30 = vmul.f32 1.442695, %v1562_v38  ;;  %v1709_v2 = vld [vmem:[%s7394_s6 + $0x510] sm:$0xff] }
 0x38c   : > { %v5804_v16 = vpop.eup %5803  ;;  %5065 = vmatpush.msrb.mxu3 %v4768_v57  ;;  %vm9346_vm14 = vcmp.lt.f32.partialorder %v2474_v49, 0.0004427343  ;;  %v2778_v31 = vadd.f32 1.0, %v2777_v46  ;;  %5809 = vlog2.f32 %v3593_v23  ;;  %v2473_v6 = vmul.f32 %v9305_v44, %v2472_v14  ;;  %v1596_v23 = vld [vmem:[%s7394_s6 + $0x188] sm:$0xff] }
 0x38d   : > { %v4667_v43 = vmul.f32 %v11526_v55, %v4187_v50  ;;  %v3919_v59 = vmul.f32 0.6931472, %v5804_v16  ;;  %v3597_v5 = vadd.f32 1.0, %v3596_v17  ;;  %v3899_v47 = vadd.f32 1.0, %v9333_v48  ;;  %v5806_v57 = vpop.eup %5805  ;;  %v1687_v55 = vld [vmem:[%s7394_s6 + $0x460] sm:$0xff] }
 0x38e   : > { %vm9354_vm15 = vcmp.lt.f32.partialorder %v2780_v34, 0.0004427343  ;;  %v3599_v49 = vand.u32 2147483647, %v9320_v26  ;;  %v3902_v46 = vmul.f32 -0.5, %v9333_v48  ;;  %v2779_v16 = vmul.f32 %v9313_v15, %v2778_v31 }
 0x38f   : > { %v4859_v3 = vadd.f32 %v4667_v43, %v2267_v0  ;;  %v3925_v50 = vsel %vm9341_vm13, %v3922_v9, %v3919_v59  ;;  %v2470_v0 = vmul.f32 0.6931472, %v5806_v57  ;;  %5811 = vlog2.f32 %v3899_v47  ;;  %v2301_v9 = vld [vmem:[%s7392_s30 + $0x590] sm:$0xff] }
 0x390   : > { %v4221_v14 = vmul.f32 %v9281_v54, %v3925_v50  ;;  %v5808_v43 = vpop.eup %5807  ;;  %v3598_v34 = vmul.f32 %v9320_v26, %v3597_v5  ;;  %v3903_v37 = vadd.f32 1.0, %v3902_v46  ;;  %v3905_v17 = vand.u32 2147483647, %v9333_v48  ;;  %v9378_v46 = vld [vmem:[%s7396_s18 + $0x2c0] sm:$0xff] }
 0x391   : > { %5007 = vmatpush.msrb.mxu0 %v4859_v3  ;;  %5813 = vpow2.f32 %v1769_v30  ;;  %v11533_v59 = vunpack.c.l.bf16 %v9240_v40  ;;  %v2476_v54 = vsel %vm9346_vm14, %v2473_v6, %v2470_v0  ;;  %v2776_v31 = vmul.f32 0.6931472, %v5808_v43  ;;  %11536 = vst [vmem:[#allocation25_spill] sm:$0xff] %v9378_v46 }
 0x392   : > { %v1837_v47 = vmul.f32 1.442695, %v1596_v23  ;;  %v5810_v57 = vpop.eup %5809  ;;  %v4060_v50 = vmul.f32 %v9305_v44, %v2476_v54  ;;  %vm9372_vm0 = vcmp.lt.f32.partialorder %v3599_v49, 0.0004427343  ;;  %v2019_v30 = vmul.f32 1.442695, %v1687_v55 }
 0x393   : > { %v4701_v3 = vmul.f32 %v11533_v59, %v4221_v14  ;;  %v2140_v59 = vld [vmem:[%s7392_s30 + $0x88] sm:$0xff]  ;;  %v2782_v7 = vsel %vm9354_vm15, %v2779_v16, %v2776_v31  ;;  %v3595_v6 = vmul.f32 0.6931472, %v5810_v57  ;;  %v11537_v44 = vunpack.c.h.bf16 %v9289_v51  ;;  %v2174_v55 = vld [vmem:[%s7392_s30 + $0x198] sm:$0xff]  ;;  %v2265_v57 = vld [vmem:[%s7392_s30 + $0x470] sm:$0xff] }
 0x394   : > { %5815 = vpow2.f32 %v1837_v47  ;;  %v4094_v23 = vmul.f32 %v9313_v15, %v2782_v7  ;;  %v3904_v0 = vmul.f32 %v9333_v48, %v3903_v37  ;;  %vm9391_vm1 = vcmp.lt.f32.partialorder %v3905_v17, 0.0004427343 }
 0x395   : > { %v4893_v14 = vadd.f32 %v4701_v3, %v2301_v9  ;;  %v4540_v49 = vmul.f32 %v11537_v44, %v4060_v50  ;;  %5817 = vpow2.f32 %v2019_v30  ;;  %v5812_v43 = vpop.eup %5811  ;;  %v3601_v9 = vsel %vm9372_vm0, %v3598_v34, %v3595_v6  ;;  %v9406_v50 = vld [vmem:[%s7396_s18 + $0x230] sm:$0xff] }
 0x396   : > { %v4507_v51 = vunpack.c.l.bf16 %v9378_v46  ;;  %v2087_v16 = vmul.f32 1.442695, %v1721_v19  ;;  %v11540_v37 = vunpack.c.h.bf16 %v9293_v53  ;;  %v4185_v31 = vmul.f32 %v9320_v26, %v3601_v9  ;;  %11541 = vst [vmem:[#allocation26_spill] sm:$0xff] %v9406_v50 }
 0x397   : > { %5026 = vmatpush.msrb.mxu1 %v4893_v14  ;;  %v9396_v3 = vpop.eup %5813  ;;  %v4732_v15 = vadd.f32 %v4540_v49, %v2140_v59  ;;  %v3901_v47 = vmul.f32 0.6931472, %v5812_v43  ;;  %v11542_v53 = vunpack.c.l.bf16 %v9303_v63  ;;  %v9413_v14 = vld [vmem:[%s7396_s18 + $0x38] sm:$0xff]  ;;  %v9420_v49 = vld [vmem:[%s7396_s18 + $0xc0] sm:$0xff]  ;;  %v9521_v59 = vld [vmem:[%s7396_s18 + $0x2b0] sm:$0xff] }
 0x398   : > { %v4574_v54 = vmul.f32 %v11540_v37, %v4094_v23  ;;  %v2450_v34 = vadd.f32 1.0, %v9396_v3  ;;  %v2453_v17 = vmul.f32 -0.5, %v9396_v3  ;;  %5819 = vpow2.f32 %v2087_v16  ;;  %11556 = vst [vmem:[#allocation29_spill] sm:$0xff] %v9521_v59 }
 0x399   : > { %5047 = vmatpush.msrb.mxu2 %v4732_v15  ;;  %v4665_v30 = vmul.f32 %v11542_v53, %v4185_v31  ;;  %v3907_v26 = vsel %vm9391_vm1, %v3904_v0, %v3901_v47  ;;  %v1560_v15 = vld [vmem:[%s7394_s6 + $0x68] sm:$0xff]  ;;  %v2456_v37 = vand.u32 2147483647, %v9396_v3  ;;  %v2015_v23 = vmul.f32 1.442695, %v1685_v4  ;;  %v2138_v4 = vld [vmem:[%s7392_s30 + $0x78] sm:$0xff] }
 0x39a   : > { %v4766_v19 = vadd.f32 %v4574_v54, %v2174_v55  ;;  %v9416_v7 = vpop.eup %5815  ;;  %v4219_v6 = vmul.f32 %v9333_v48, %v3907_v26  ;;  %5821 = vlog2.f32 %v2450_v34  ;;  %v2454_v44 = vadd.f32 1.0, %v2453_v17  ;;  %v2299_v55 = vld [vmem:[%s7392_s30 + $0x580] sm:$0xff]  ;;  %v9437_v17 = vld [vmem:[%s7396_s18 + $0x2b8] sm:$0xff] }
 0x39b   : > { %v9423_v43 = vpop.eup %5817  ;;  %v4857_v0 = vadd.f32 %v4665_v30, %v2265_v57  ;;  %v2756_v9 = vadd.f32 1.0, %v9416_v7  ;;  %v2759_v38 = vmul.f32 -0.5, %v9416_v7  ;;  %v2762_v57 = vand.u32 2147483647, %v9416_v7  ;;  %11543 = vst [vmem:[#allocation27_spill] sm:$0xff] %v9437_v17  ;;  %v1594_v26 = vld [vmem:[%s7394_s6 + $0x178] sm:$0xff] }
 0x39c   : > { %5066 = vmatpush.msrb.mxu3 %v4766_v19  ;;  %v4699_v48 = vmul.f32 %v4507_v51, %v4219_v6  ;;  %v3575_v54 = vadd.f32 1.0, %v9423_v43  ;;  %v3578_v31 = vmul.f32 -0.5, %v9423_v43  ;;  %v2455_v47 = vmul.f32 %v9396_v3, %v2454_v44 }
 0x39d   : > { %5008 = vmatpush.msrb.mxu0 %v4857_v0  ;;  %5823 = vlog2.f32 %v2756_v9  ;;  %v2760_v53 = vadd.f32 1.0, %v2759_v38  ;;  %v1765_v30 = vmul.f32 1.442695, %v1560_v15  ;;  %v3581_v0 = vand.u32 2147483647, %v9423_v43  ;;  %v1719_v15 = vld [vmem:[%s7394_s6 + $0x560] sm:$0xff] }
 0x39e   : > { %v9439_v19 = vpop.eup %5819  ;;  %v4891_v51 = vadd.f32 %v4699_v48, %v2299_v55  ;;  %5825 = vlog2.f32 %v3575_v54  ;;  %v3579_v6 = vadd.f32 1.0, %v3578_v31  ;;  %vm9446_vm2 = vcmp.lt.f32.partialorder %v2456_v37, 0.0004427343 }
 0x39f   : > { %v3881_v44 = vadd.f32 1.0, %v9439_v19  ;;  %v3884_v9 = vmul.f32 -0.5, %v9439_v19  ;;  %5827 = vpow2.f32 %v1765_v30  ;;  %v3887_v54 = vand.u32 2147483647, %v9439_v19 }
 0x3a0   : > { %v5822_v5 = vpop.eup %5821  ;;  %5027 = vmatpush.msrb.mxu1 %v4891_v51  ;;  %v1833_v31 = vmul.f32 1.442695, %v1594_v26  ;;  %v2761_v16 = vmul.f32 %v9416_v7, %v2760_v53  ;;  %vm9455_vm3 = vcmp.lt.f32.partialorder %v2762_v57, 0.0004427343  ;;  %vm9462_vm4 = vcmp.lt.f32.partialorder %v3581_v0, 0.0004427343 }
 0x3a1   : > { %v2452_v48 = vmul.f32 0.6931472, %v5822_v5  ;;  %5829 = vlog2.f32 %v3881_v44  ;;  %v3885_v37 = vadd.f32 1.0, %v3884_v9  ;;  %v3580_v5 = vmul.f32 %v9423_v43, %v3579_v6  ;;  %v9477_v6 = vld [vmem:[%s7396_s18 + $0xb8] sm:$0xff]  ;;  %v2263_v44 = vld [vmem:[%s7392_s30 + $0x460] sm:$0xff] }
 0x3a2   : > { %5831 = vpow2.f32 %v1833_v31  ;;  %v2083_v9 = vmul.f32 1.442695, %v1719_v15  ;;  %vm9468_vm5 = vcmp.lt.f32.partialorder %v3887_v54, 0.0004427343 }
 0x3a3   : > { %v5824_v55 = vpop.eup %5823  ;;  %v2458_v30 = vsel %vm9446_vm2, %v2455_v47, %v2452_v48  ;;  %5833 = vpow2.f32 %v2015_v23  ;;  %v9473_v47 = vld [vmem:[%s7396_s18 + $0x30] sm:$0xff]  ;;  %v3886_v54 = vmul.f32 %v9439_v19, %v3885_v37 }
 0x3a4   : > { %v5826_v57 = vpop.eup %5825  ;;  %v4058_v53 = vmul.f32 %v9396_v3, %v2458_v30  ;;  %v2758_v26 = vmul.f32 0.6931472, %v5824_v55  ;;  %v9481_v3 = vld [vmem:[%s7396_s18 + $0x228] sm:$0xff]  ;;  %v11553_v55 = vunpack.c.h.bf16 %v9413_v14  ;;  %5835 = vpow2.f32 %v2083_v9  ;;  %v1558_v14 = vld [vmem:[%s7394_s6 + $0x58] sm:$0xff] }
 0x3a5   : > { %v3577_v38 = vmul.f32 0.6931472, %v5826_v57  ;;  %11552 = vst [vmem:[#allocation28_spill] sm:$0xff] %v9481_v3  ;;  %v9483_v23 = vpop.eup %5827 }
 0x3a6   : > { %v4538_v15 = vmul.f32 %v11553_v55, %v4058_v53  ;;  %v2764_v48 = vsel %vm9455_vm3, %v2761_v16, %v2758_v26  ;;  %v2432_v0 = vadd.f32 1.0, %v9483_v23  ;;  %v2435_v34 = vmul.f32 -0.5, %v9483_v23  ;;  %v2172_v55 = vld [vmem:[%s7392_s30 + $0x188] sm:$0xff] }
 0x3a7   : > { %v5830_v31 = vpop.eup %5829  ;;  %v4092_v30 = vmul.f32 %v9416_v7, %v2764_v48  ;;  %v3583_v57 = vsel %vm9462_vm4, %v3580_v5, %v3577_v38  ;;  %v11554_v7 = vunpack.c.h.bf16 %v9420_v49  ;;  %v1592_v48 = vld [vmem:[%s7394_s6 + $0x168] sm:$0xff] }
 0x3a8   : > { %v4730_v53 = vadd.f32 %v4538_v15, %v2138_v4  ;;  %v4183_v16 = vmul.f32 %v9423_v43, %v3583_v57  ;;  %v3883_v51 = vmul.f32 0.6931472, %v5830_v31  ;;  %v9499_v26 = vpop.eup %5831  ;;  %5837 = vlog2.f32 %v2432_v0 }
 0x3a9   : > { %v4572_v9 = vmul.f32 %v11554_v7, %v4092_v30  ;;  %v2436_v38 = vadd.f32 1.0, %v2435_v34  ;;  %v9506_v4 = vpop.eup %5833  ;;  %v11555_v43 = vunpack.c.l.bf16 %v9406_v50  ;;  %v2738_v49 = vadd.f32 1.0, %v9499_v26  ;;  %v9570_v50 = vld [vmem:[%s7396_s18 + $0xb0] sm:$0xff] }
 0x3aa   : > { %5048 = vmatpush.msrb.mxu2 %v4730_v53  ;;  %v3889_v31 = vsel %vm9468_vm5, %v3886_v54, %v3883_v51  ;;  %v1761_v30 = vmul.f32 1.442695, %v1558_v14  ;;  %v2438_v34 = vand.u32 2147483647, %v9483_v23  ;;  %v2741_v7 = vmul.f32 -0.5, %v9499_v26  ;;  %v9516_v5 = vpop.eup %5835  ;;  %v2297_v53 = vld [vmem:[%s7392_s30 + $0x570] sm:$0xff] }
 0x3ab   : > { %v4663_v15 = vmul.f32 %v11555_v43, %v4183_v16  ;;  %v4764_v57 = vadd.f32 %v4572_v9, %v2172_v55  ;;  %v4217_v0 = vmul.f32 %v9439_v19, %v3889_v31  ;;  %5839 = vlog2.f32 %v2738_v49  ;;  %v1683_v31 = vld [vmem:[%s7394_s6 + $0x440] sm:$0xff] }
 0x3ac   : > { %v3557_v16 = vadd.f32 1.0, %v9506_v4  ;;  %v1829_v54 = vmul.f32 1.442695, %v1592_v48  ;;  %v11557_v14 = vunpack.c.l.bf16 %v9437_v17  ;;  %v2437_v19 = vmul.f32 %v9483_v23, %v2436_v38  ;;  %v2136_v17 = vld [vmem:[%s7392_s30 + $0x68] sm:$0xff] }
 0x3ad   : > { %v4855_v37 = vadd.f32 %v4663_v15, %v2263_v44  ;;  %5067 = vmatpush.msrb.mxu3 %v4764_v57  ;;  %v2742_v51 = vadd.f32 1.0, %v2741_v7  ;;  %v3560_v9 = vmul.f32 -0.5, %v9506_v4  ;;  %v2744_v44 = vand.u32 2147483647, %v9499_v26 }
 0x3ae   : > { %v4697_v55 = vmul.f32 %v11557_v14, %v4217_v0  ;;  %5841 = vlog2.f32 %v3557_v16  ;;  %v3863_v43 = vadd.f32 1.0, %v9516_v5  ;;  %v3866_v15 = vmul.f32 -0.5, %v9516_v5  ;;  %v5838_v48 = vpop.eup %5837 }
 0x3af   : > { %5009 = vmatpush.msrb.mxu0 %v4855_v37  ;;  %vm9531_vm6 = vcmp.lt.f32.partialorder %v2438_v34, 0.0004427343  ;;  %v3561_v38 = vadd.f32 1.0, %v3560_v9  ;;  %v2434_v37 = vmul.f32 0.6931472, %v5838_v48  ;;  %v2743_v14 = vmul.f32 %v9499_v26, %v2742_v51 }
 0x3b0   : > { %v4889_v49 = vadd.f32 %v4697_v55, %v2297_v53  ;;  %v3563_v7 = vand.u32 2147483647, %v9506_v4  ;;  %5843 = vlog2.f32 %v3863_v43  ;;  %v3867_v16 = vadd.f32 1.0, %v3866_v15  ;;  %v1717_v53 = vld [vmem:[%s7394_s6 + $0x550] sm:$0xff]  ;;  %v1556_v15 = vld [vmem:[%s7394_s6 + $0x48] sm:$0xff] }
 0x3b1   : > { %5845 = vpow2.f32 %v1761_v30  ;;  %v2011_v34 = vmul.f32 1.442695, %v1683_v31  ;;  %v5840_v55 = vpop.eup %5839  ;;  %v2440_v9 = vsel %vm9531_vm6, %v2437_v19, %v2434_v37  ;;  %vm9542_vm7 = vcmp.lt.f32.partialorder %v2744_v44, 0.0004427343  ;;  %v9557_v44 = vld [vmem:[%s7396_s18 + $0x28] sm:$0xff] }
 0x3b2   : > { %5028 = vmatpush.msrb.mxu1 %v4889_v49  ;;  %v3869_v43 = vand.u32 2147483647, %v9516_v5  ;;  %5847 = vpow2.f32 %v1829_v54  ;;  %v4056_v51 = vmul.f32 %v9483_v23, %v2440_v9  ;;  %v2740_v49 = vmul.f32 0.6931472, %v5840_v55 }
 0x3b3   : > { %v3562_v30 = vmul.f32 %v9506_v4, %v3561_v38  ;;  %5849 = vpow2.f32 %v2011_v34  ;;  %vm9551_vm8 = vcmp.lt.f32.partialorder %v3563_v7, 0.0004427343  ;;  %v3868_v19 = vmul.f32 %v9516_v5, %v3867_v16 }
 0x3b4   : > { %v5842_v31 = vpop.eup %5841  ;;  %v2079_v37 = vmul.f32 1.442695, %v1717_v53  ;;  %v11564_v23 = vunpack.c.h.bf16 %v9473_v47  ;;  %v2746_v38 = vsel %vm9542_vm7, %v2743_v14, %v2740_v49  ;;  %v1757_v9 = vmul.f32 1.442695, %v1556_v15  ;;  %v2170_v14 = vld [vmem:[%s7392_s30 + $0x178] sm:$0xff] }
 0x3b5   : > { %v3559_v34 = vmul.f32 0.6931472, %v5842_v31  ;;  %v4090_v0 = vmul.f32 %v9499_v26, %v2746_v38  ;;  %vm9565_vm9 = vcmp.lt.f32.partialorder %v3869_v43, 0.0004427343  ;;  %v11567_v43 = vunpack.c.h.bf16 %v9477_v6 }
 0x3b6   : > { %v4536_v55 = vmul.f32 %v11564_v23, %v4056_v51  ;;  %v5844_v7 = vpop.eup %5843  ;;  %5851 = vpow2.f32 %v2079_v37 }
 0x3b7   : > { %v9573_v47 = vpop.eup %5845  ;;  %v3565_v15 = vsel %vm9551_vm8, %v3562_v30, %v3559_v34  ;;  %v3865_v51 = vmul.f32 0.6931472, %v5844_v7  ;;  %5853 = vpow2.f32 %v1757_v9  ;;  %v4570_v49 = vmul.f32 %v11567_v43, %v4090_v0  ;;  %v2261_v30 = vld [vmem:[%s7392_s30 + $0x450] sm:$0xff]  ;;  %v2295_v43 = vld [vmem:[%s7392_s30 + $0x560] sm:$0xff] }
 0x3b8   : > { %v4728_v48 = vadd.f32 %v4536_v55, %v2136_v17  ;;  %v9578_v26 = vpop.eup %5847  ;;  %v4181_v31 = vmul.f32 %v9506_v4, %v3565_v15  ;;  %v2414_v37 = vadd.f32 1.0, %v9573_v47  ;;  %v2417_v23 = vmul.f32 -0.5, %v9573_v47  ;;  %v9586_v17 = vld [vmem:[%s7396_s18 + $0x220] sm:$0xff]  ;;  %v1590_v15 = vld [vmem:[%s7394_s6 + $0x158] sm:$0xff] }
 0x3b9   : > { %11568 = vst [vmem:[#allocation30_spill] sm:$0xff] %v9586_v17  ;;  %v9588_v55 = vpop.eup %5849  ;;  %v3871_v57 = vsel %vm9565_vm9, %v3868_v19, %v3865_v51  ;;  %v2420_v6 = vand.u32 2147483647, %v9573_v47  ;;  %v2720_v0 = vadd.f32 1.0, %v9578_v26  ;;  %v2723_v4 = vmul.f32 -0.5, %v9578_v26 }
 0x3ba   : > { %5049 = vmatpush.msrb.mxu2 %v4728_v48  ;;  %v4762_v38 = vadd.f32 %v4570_v49, %v2170_v14  ;;  %v11569_v34 = vunpack.c.l.bf16 %v9481_v3  ;;  %v4215_v7 = vmul.f32 %v9516_v5, %v3871_v57  ;;  %5855 = vlog2.f32 %v2414_v37 }
 0x3bb   : > { %v2418_v48 = vadd.f32 1.0, %v2417_v23  ;;  %5857 = vlog2.f32 %v2720_v0  ;;  %v2724_v53 = vadd.f32 1.0, %v2723_v4  ;;  %v11570_v14 = vunpack.c.l.bf16 %v9521_v59  ;;  %v1681_v0 = vld [vmem:[%s7394_s6 + $0x430] sm:$0xff]  ;;  %v2134_v23 = vld [vmem:[%s7392_s30 + $0x58] sm:$0xff] }
 0x3bc   : > { %v4661_v9 = vmul.f32 %v11569_v34, %v4181_v31  ;;  %v9602_v16 = vpop.eup %5851  ;;  %5068 = vmatpush.msrb.mxu3 %v4762_v38  ;;  %v2726_v31 = vand.u32 2147483647, %v9578_v26  ;;  %v3539_v5 = vadd.f32 1.0, %v9588_v55  ;;  %vm9610_vm10 = vcmp.lt.f32.partialorder %v2420_v6, 0.0004427343 }
 0x3bd   : > { %v4695_v49 = vmul.f32 %v11570_v14, %v4215_v7  ;;  %v9608_v37 = vpop.eup %5853  ;;  %v3542_v57 = vmul.f32 -0.5, %v9588_v55  ;;  %v1825_v4 = vmul.f32 1.442695, %v1590_v15  ;;  %v2419_v38 = vmul.f32 %v9573_v47, %v2418_v48 }
 0x3be   : > { %v4853_v51 = vadd.f32 %v4661_v9, %v2261_v30  ;;  %5859 = vlog2.f32 %v3539_v5  ;;  %v3845_v34 = vadd.f32 1.0, %v9602_v16  ;;  %v9619_v9 = vld [vmem:[%s7396_s18 + $0x2a8] sm:$0xff]  ;;  %v2725_v6 = vmul.f32 %v9578_v26, %v2724_v53 }
 0x3bf   : > { %v4887_v30 = vadd.f32 %v4695_v49, %v2295_v43  ;;  %11573 = vst [vmem:[#allocation31_spill] sm:$0xff] %v9619_v9  ;;  %v3543_v7 = vadd.f32 1.0, %v3542_v57  ;;  %v3545_v14 = vand.u32 2147483647, %v9588_v55  ;;  %v3848_v19 = vmul.f32 -0.5, %v9602_v16 }
 0x3c0   : > { %5010 = vmatpush.msrb.mxu0 %v4853_v51  ;;  %v5856_v54 = vpop.eup %5855  ;;  %vm9624_vm11 = vcmp.lt.f32.partialorder %v2726_v31, 0.0004427343  ;;  %5861 = vlog2.f32 %v3845_v34  ;;  %v2396_v43 = vadd.f32 1.0, %v9608_v37  ;;  %v2399_v48 = vmul.f32 -0.5, %v9608_v37 }
 0x3c1   : > { %5029 = vmatpush.msrb.mxu1 %v4887_v30  ;;  %v5858_v51 = vpop.eup %5857  ;;  %v2416_v49 = vmul.f32 0.6931472, %v5856_v54  ;;  %v3849_v53 = vadd.f32 1.0, %v3848_v19  ;;  %v3851_v5 = vand.u32 2147483647, %v9602_v16  ;;  %v4501_v57 = vunpack.c.l.bf16 %v9619_v9  ;;  %v1715_v19 = vld [vmem:[%s7394_s6 + $0x540] sm:$0xff] }
 0x3c2   : > { %v2722_v30 = vmul.f32 0.6931472, %v5858_v51  ;;  %5863 = vlog2.f32 %v2396_v43  ;;  %v2402_v34 = vand.u32 2147483647, %v9608_v37  ;;  %v3544_v3 = vmul.f32 %v9588_v55, %v3543_v7 }
 0x3c3   : > { %v2422_v59 = vsel %vm9610_vm10, %v2419_v38, %v2416_v49  ;;  %v2400_v54 = vadd.f32 1.0, %v2399_v48  ;;  %5865 = vpow2.f32 %v1825_v4  ;;  %vm9642_vm12 = vcmp.lt.f32.partialorder %v3545_v14, 0.0004427343  ;;  %v1554_v48 = vld [vmem:[%s7394_s6 + $0x38] sm:$0xff]  ;;  %v2168_v14 = vld [vmem:[%s7392_s30 + $0x168] sm:$0xff]  ;;  %v2293_v4 = vld [vmem:[%s7392_s30 + $0x550] sm:$0xff] }
 0x3c4   : > { %v5860_v46 = vpop.eup %5859  ;;  %v4054_v63 = vmul.f32 %v9573_v47, %v2422_v59  ;;  %v2728_v51 = vsel %vm9624_vm11, %v2725_v6, %v2722_v30  ;;  %v2007_v31 = vmul.f32 1.442695, %v1681_v0  ;;  %v3850_v7 = vmul.f32 %v9602_v16, %v3849_v53 }
 0x3c5   : > { %v4088_v38 = vmul.f32 %v9578_v26, %v2728_v51  ;;  %v3541_v49 = vmul.f32 0.6931472, %v5860_v46  ;;  %vm9649_vm13 = vcmp.lt.f32.partialorder %v3851_v5, 0.0004427343  ;;  %v11580_v47 = vunpack.c.h.bf16 %v9557_v44 }
 0x3c6   : > { %v5862_v59 = vpop.eup %5861  ;;  %vm9657_vm14 = vcmp.lt.f32.partialorder %v2402_v34, 0.0004427343  ;;  %5867 = vpow2.f32 %v2007_v31  ;;  %v2075_v46 = vmul.f32 1.442695, %v1715_v19  ;;  %v11583_v26 = vunpack.c.h.bf16 %v9570_v50  ;;  %v1588_v31 = vld [vmem:[%s7394_s6 + $0x148] sm:$0xff] }
 0x3c7   : > { %v4534_v6 = vmul.f32 %v11580_v47, %v4054_v63  ;;  %v3547_v53 = vsel %vm9642_vm12, %v3544_v3, %v3541_v49  ;;  %v3847_v5 = vmul.f32 0.6931472, %v5862_v59  ;;  %v2401_v30 = vmul.f32 %v9608_v37, %v2400_v54  ;;  %v6210_v49 = vld [vmem:[%s7396_s18 + $0x20] sm:$0xff] }
 0x3c8   : > { %v4568_v15 = vmul.f32 %v11583_v26, %v4088_v38  ;;  %v5864_v44 = vpop.eup %5863  ;;  %v4179_v51 = vmul.f32 %v9588_v55, %v3547_v53  ;;  %5869 = vpow2.f32 %v2075_v46  ;;  %v1753_v34 = vmul.f32 1.442695, %v1554_v48  ;;  %v2259_v38 = vld [vmem:[%s7392_s30 + $0x440] sm:$0xff] }
 0x3c9   : > { %v4726_v63 = vadd.f32 %v4534_v6, %v2134_v23  ;;  %v9668_v19 = vpop.eup %5865  ;;  %v3853_v3 = vsel %vm9649_vm13, %v3850_v7, %v3847_v5  ;;  %v2398_v43 = vmul.f32 0.6931472, %v5864_v44  ;;  %v4340_v54 = vunpack.c.h.bf16 %v6210_v49  ;;  %v9680_v6 = vld [vmem:[%s7396_s18 + $0x218] sm:$0xff]  ;;  %v9693_v44 = vld [vmem:[%s7396_s18 + $0x2a0] sm:$0xff] }
 0x3ca   : > { %v4760_v50 = vadd.f32 %v4568_v15, %v2168_v14  ;;  %v11584_v23 = vunpack.c.l.bf16 %v9586_v17  ;;  %v4213_v59 = vmul.f32 %v9602_v16, %v3853_v3  ;;  %v2702_v48 = vadd.f32 1.0, %v9668_v19  ;;  %11585 = vst [vmem:[#allocation32_spill] sm:$0xff] %v9680_v6  ;;  %v9686_v14 = vld [vmem:[%s7396_s18 + $0xa8] sm:$0xff] }
 0x3cb   : > { %5050 = vmatpush.msrb.mxu2 %v4726_v63  ;;  %v2705_v47 = vmul.f32 -0.5, %v9668_v19  ;;  %v2404_v7 = vsel %vm9657_vm14, %v2401_v30, %v2398_v43  ;;  %5871 = vpow2.f32 %v1753_v34  ;;  %v1821_v26 = vmul.f32 1.442695, %v1588_v31  ;;  %11586 = vst [vmem:[#allocation33_spill] sm:$0xff] %v9693_v44  ;;  %v2132_v63 = vld [vmem:[%s7392_s30 + $0x48] sm:$0xff] }
 0x3cc   : > { %v4659_v55 = vmul.f32 %v11584_v23, %v4179_v51  ;;  %5069 = vmatpush.msrb.mxu3 %v4760_v50  ;;  %v9689_v16 = vpop.eup %5867  ;;  %v4693_v53 = vmul.f32 %v4501_v57, %v4213_v59  ;;  %v4052_v5 = vmul.f32 %v9608_v37, %v2404_v7  ;;  %5873 = vlog2.f32 %v2702_v48  ;;  %v1679_v37 = vld [vmem:[%s7394_s6 + $0x420] sm:$0xff]  ;;  %v9753_v50 = vld [vmem:[%s7396_s18 + $0x210] sm:$0xff] }
 0x3cd   : > { %v2706_v51 = vadd.f32 1.0, %v2705_v47  ;;  %v3521_v0 = vadd.f32 1.0, %v9689_v16  ;;  %v3524_v30 = vmul.f32 -0.5, %v9689_v16  ;;  %v2708_v57 = vand.u32 2147483647, %v9668_v19  ;;  %11594 = vst [vmem:[#allocation34_spill] sm:$0xff] %v9753_v50 }
 0x3ce   : > { %v4851_v15 = vadd.f32 %v4659_v55, %v2259_v38  ;;  %v9699_v34 = vpop.eup %5869  ;;  %v4885_v31 = vadd.f32 %v4693_v53, %v2293_v4  ;;  %v4532_v38 = vmul.f32 %v4340_v54, %v4052_v5  ;;  %5875 = vpow2.f32 %v1821_v26 }
 0x3cf   : > { %5877 = vlog2.f32 %v3521_v0  ;;  %v3827_v43 = vadd.f32 1.0, %v9699_v34  ;;  %v3525_v55 = vadd.f32 1.0, %v3524_v30  ;;  %v3527_v59 = vand.u32 2147483647, %v9689_v16  ;;  %v9720_v30 = vld [vmem:[%s7396_s18 + $0x18] sm:$0xff] }
 0x3d0   : > { %5011 = vmatpush.msrb.mxu0 %v4851_v15  ;;  %5030 = vmatpush.msrb.mxu1 %v4885_v31  ;;  %v4724_v23 = vadd.f32 %v4532_v38, %v2132_v63  ;;  %v3830_v48 = vmul.f32 -0.5, %v9699_v34  ;;  %v2707_v47 = vmul.f32 %v9668_v19, %v2706_v51  ;;  %v2003_v7 = vmul.f32 1.442695, %v1679_v37  ;;  %v2166_v31 = vld [vmem:[%s7392_s30 + $0x158] sm:$0xff] }
 0x3d1   : > { %v9708_v54 = vpop.eup %5871  ;;  %5879 = vlog2.f32 %v3827_v43  ;;  %vm9712_vm15 = vcmp.lt.f32.partialorder %v2708_v57, 0.0004427343  ;;  %v3833_v51 = vand.u32 2147483647, %v9699_v34  ;;  %v3526_v57 = vmul.f32 %v9689_v16, %v3525_v55 }
 0x3d2   : > { %v5874_v26 = vpop.eup %5873  ;;  %5051 = vmatpush.msrb.mxu2 %v4724_v23  ;;  %v3831_v53 = vadd.f32 1.0, %v3830_v48  ;;  %v2378_v5 = vadd.f32 1.0, %v9708_v54  ;;  %v2381_v63 = vmul.f32 -0.5, %v9708_v54  ;;  %5881 = vpow2.f32 %v2003_v7  ;;  %v1713_v23 = vld [vmem:[%s7394_s6 + $0x530] sm:$0xff] }
 0x3d3   : > { %v2704_v0 = vmul.f32 0.6931472, %v5874_v26  ;;  %vm9726_vm0 = vcmp.lt.f32.partialorder %v3527_v59, 0.0004427343  ;;  %v2384_v43 = vand.u32 2147483647, %v9708_v54 }
 0x3d4   : > { %v9723_v38 = vpop.eup %5875  ;;  %5883 = vlog2.f32 %v2378_v5  ;;  %v2382_v4 = vadd.f32 1.0, %v2381_v63  ;;  %v3832_v49 = vmul.f32 %v9699_v34, %v3831_v53  ;;  %v9740_v5 = vld [vmem:[%s7396_s18 + $0xa0] sm:$0xff]  ;;  %vm9743_vm1 = vcmp.lt.f32.partialorder %v3833_v51, 0.0004427343 }
 0x3d5   : > { %v5878_v48 = vpop.eup %5877  ;;  %v2710_v26 = vsel %vm9712_vm15, %v2707_v47, %v2704_v0  ;;  %v2684_v7 = vadd.f32 1.0, %v9723_v38  ;;  %v2687_v3 = vmul.f32 -0.5, %v9723_v38  ;;  %v2690_v15 = vand.u32 2147483647, %v9723_v38 }
 0x3d6   : > { %v4086_v55 = vmul.f32 %v9668_v19, %v2710_v26  ;;  %v3523_v59 = vmul.f32 0.6931472, %v5878_v48  ;;  %v2071_v63 = vmul.f32 1.442695, %v1713_v23  ;;  %v11593_v19 = vunpack.c.h.bf16 %v9686_v14  ;;  %v1552_v14 = vld [vmem:[%s7394_s6 + $0x28] sm:$0xff]  ;;  %v2130_v23 = vld [vmem:[%s7392_s30 + $0x38] sm:$0xff] }
 0x3d7   : > { %v5880_v46 = vpop.eup %5879  ;;  %5885 = vlog2.f32 %v2684_v7  ;;  %v2688_v26 = vadd.f32 1.0, %v2687_v3  ;;  %v2383_v7 = vmul.f32 %v9708_v54, %v2382_v4  ;;  %vm9759_vm2 = vcmp.lt.f32.partialorder %v2384_v43, 0.0004427343 }
 0x3d8   : > { %v4566_v0 = vmul.f32 %v11593_v19, %v4086_v55  ;;  %v3529_v53 = vsel %vm9726_vm0, %v3526_v57, %v3523_v59  ;;  %v3829_v48 = vmul.f32 0.6931472, %v5880_v46  ;;  %v9755_v51 = vpop.eup %5881  ;;  %5887 = vpow2.f32 %v2071_v63  ;;  %v2257_v46 = vld [vmem:[%s7392_s30 + $0x430] sm:$0xff] }
 0x3d9   : > { %v4177_v9 = vmul.f32 %v9689_v16, %v3529_v53  ;;  %v3503_v55 = vadd.f32 1.0, %v9755_v51  ;;  %v3506_v16 = vmul.f32 -0.5, %v9755_v51  ;;  %v11597_v4 = vunpack.c.l.bf16 %v9680_v6  ;;  %v1586_v53 = vld [vmem:[%s7394_s6 + $0x138] sm:$0xff] }
 0x3da   : > { %v5884_v57 = vpop.eup %5883  ;;  %v4758_v37 = vadd.f32 %v4566_v0, %v2166_v31  ;;  %v3835_v3 = vsel %vm9743_vm1, %v3832_v49, %v3829_v48  ;;  %v2291_v31 = vld [vmem:[%s7392_s30 + $0x540] sm:$0xff]  ;;  %v2689_v47 = vmul.f32 %v9723_v38, %v2688_v26  ;;  %vm9777_vm3 = vcmp.lt.f32.partialorder %v2690_v15, 0.0004427343  ;;  %v1677_v48 = vld [vmem:[%s7394_s6 + $0x410] sm:$0xff]  ;;  %v9789_v6 = vld [vmem:[%s7396_s18 + $0x298] sm:$0xff] }
 0x3db   : > { %v4657_v43 = vmul.f32 %v11597_v4, %v4177_v9  ;;  %v4211_v59 = vmul.f32 %v9699_v34, %v3835_v3  ;;  %v2380_v19 = vmul.f32 0.6931472, %v5884_v57  ;;  %5889 = vlog2.f32 %v3503_v55  ;;  %v2164_v49 = vld [vmem:[%s7392_s30 + $0x148] sm:$0xff] }
 0x3dc   : > { %5070 = vmatpush.msrb.mxu3 %v4758_v37  ;;  %v1749_v0 = vmul.f32 1.442695, %v1552_v14  ;;  %v11600_v34 = vunpack.c.l.bf16 %v9693_v44  ;;  %v3507_v37 = vadd.f32 1.0, %v3506_v16  ;;  %v3509_v15 = vand.u32 2147483647, %v9755_v51 }
 0x3dd   : > { %v5886_v9 = vpop.eup %5885  ;;  %v4849_v4 = vadd.f32 %v4657_v43, %v2257_v46  ;;  %v2386_v3 = vsel %vm9759_vm2, %v2383_v7, %v2380_v19  ;;  %v1817_v55 = vmul.f32 1.442695, %v1586_v53  ;;  %v11601_v16 = vunpack.c.h.bf16 %v9720_v30  ;;  %v1711_v30 = vld [vmem:[%s7394_s6 + $0x520] sm:$0xff] }
 0x3de   : > { %v4691_v57 = vmul.f32 %v11600_v34, %v4211_v59  ;;  %v4050_v63 = vmul.f32 %v9708_v54, %v2386_v3  ;;  %v2686_v26 = vmul.f32 0.6931472, %v5886_v9  ;;  %5891 = vpow2.f32 %v1749_v0  ;;  %v9793_v14 = vpop.eup %5887 }
 0x3df   : > { %5012 = vmatpush.msrb.mxu0 %v4849_v4  ;;  %v1999_v54 = vmul.f32 1.442695, %v1677_v48  ;;  %v3809_v19 = vadd.f32 1.0, %v9793_v14  ;;  %v3812_v0 = vmul.f32 -0.5, %v9793_v14  ;;  %v3508_v9 = vmul.f32 %v9755_v51, %v3507_v37  ;;  %v9807_v48 = vld [vmem:[%s7396_s18 + $0x208] sm:$0xff] }
 0x3e0   : > { %v4883_v46 = vadd.f32 %v4691_v57, %v2291_v31  ;;  %v4530_v43 = vmul.f32 %v11601_v16, %v4050_v63  ;;  %v2692_v59 = vsel %vm9777_vm3, %v2689_v47, %v2686_v26  ;;  %5893 = vpow2.f32 %v1817_v55  ;;  %v1550_v26 = vld [vmem:[%s7394_s6 + $0x18] sm:$0xff]  ;;  %v2289_v16 = vld [vmem:[%s7392_s30 + $0x530] sm:$0xff] }
 0x3e1   : > { %v4084_v31 = vmul.f32 %v9723_v38, %v2692_v59  ;;  %v5890_v63 = vpop.eup %5889  ;;  %vm9812_vm4 = vcmp.lt.f32.partialorder %v3509_v15, 0.0004427343  ;;  %5895 = vlog2.f32 %v3809_v19  ;;  %v3815_v38 = vand.u32 2147483647, %v9793_v14  ;;  %v9827_v55 = vld [vmem:[%s7396_s18 + $0x98] sm:$0xff]  ;;  %v9832_v59 = vld [vmem:[%s7396_s18 + $0x290] sm:$0xff] }
 0x3e2   : > { %5031 = vmatpush.msrb.mxu1 %v4883_v46  ;;  %v4722_v47 = vadd.f32 %v4530_v43, %v2130_v23  ;;  %v11604_v34 = vunpack.c.h.bf16 %v9740_v5  ;;  %v3505_v3 = vmul.f32 0.6931472, %v5890_v63  ;;  %v3813_v37 = vadd.f32 1.0, %v3812_v0  ;;  %v9823_v23 = vld [vmem:[%s7396_s18 + $0x10] sm:$0xff] }
 0x3e3   : > { %5897 = vpow2.f32 %v1999_v54  ;;  %v2067_v5 = vmul.f32 1.442695, %v1711_v30  ;;  %vm9844_vm5 = vcmp.lt.f32.partialorder %v3815_v38, 0.0004427343 }
 0x3e4   : > { %v4564_v57 = vmul.f32 %v11604_v34, %v4084_v31  ;;  %v9820_v46 = vpop.eup %5891  ;;  %5052 = vmatpush.msrb.mxu2 %v4722_v47  ;;  %v3511_v19 = vsel %vm9812_vm4, %v3508_v9, %v3505_v3  ;;  %v1745_v47 = vmul.f32 1.442695, %v1550_v26  ;;  %v3814_v4 = vmul.f32 %v9793_v14, %v3813_v37  ;;  %v1584_v3 = vld [vmem:[%s7394_s6 + $0x128] sm:$0xff] }
 0x3e5   : > { %v2360_v0 = vadd.f32 1.0, %v9820_v46  ;;  %v2363_v31 = vmul.f32 -0.5, %v9820_v46  ;;  %v4175_v63 = vmul.f32 %v9755_v51, %v3511_v19  ;;  %5899 = vpow2.f32 %v2067_v5  ;;  %v4914_v51 = vld [vmem:[%s9837_s11 + $0x10] sm:$0xff] }
 0x3e6   : > { %v4756_v54 = vadd.f32 %v4564_v57, %v2164_v49  ;;  %v9848_v34 = vpop.eup %5893  ;;  %v2255_v49 = vld [vmem:[%s7392_s30 + $0x420] sm:$0xff]  ;;  %v2366_v9 = vand.u32 2147483647, %v9820_v46  ;;  %v11607_v19 = vunpack.c.l.bf16 %v9753_v50  ;;  %4976 = vmatmul.f32.vlgmr.msra.gmra.mxu2 %v4914_v51  ;;  %v9864_v57 = vld [vmem:[%s7396_s18 + $0x8] sm:$0xff]  ;;  %v9895_v50 = vld [vmem:[%s7396_s18 + $0x90] sm:$0xff] }
 0x3e7   : > { %5901 = vlog2.f32 %v2360_v0  ;;  %v5896_v38 = vpop.eup %5895  ;;  %v2364_v5 = vadd.f32 1.0, %v2363_v31  ;;  %v2666_v26 = vadd.f32 1.0, %v9848_v34  ;;  %v2672_v0 = vand.u32 2147483647, %v9848_v34 }
 0x3e8   : > { %5071 = vmatpush.msrb.mxu3 %v4756_v54  ;;  %v4655_v7 = vmul.f32 %v11607_v19, %v4175_v63  ;;  %v2669_v54 = vmul.f32 -0.5, %v9848_v34  ;;  %v3811_v37 = vmul.f32 0.6931472, %v5896_v38  ;;  %5903 = vpow2.f32 %v1745_v47 }
 0x3e9   : > { %v9860_v43 = vpop.eup %5897  ;;  %5905 = vlog2.f32 %v2666_v26  ;;  %v1813_v63 = vmul.f32 1.442695, %v1584_v3  ;;  %vm9870_vm6 = vcmp.lt.f32.partialorder %v2366_v9, 0.0004427343  ;;  %vm9880_vm7 = vcmp.lt.f32.partialorder %v2672_v0, 0.0004427343 }
 0x3ea   : > { %v4847_v15 = vadd.f32 %v4655_v7, %v2255_v49  ;;  %v3485_v31 = vadd.f32 1.0, %v9860_v43  ;;  %v3817_v19 = vsel %vm9844_vm5, %v3814_v4, %v3811_v37  ;;  %v2670_v38 = vadd.f32 1.0, %v2669_v54 }
 0x3eb   : > { %v3488_v47 = vmul.f32 -0.5, %v9860_v43  ;;  %v9875_v53 = vpop.eup %5899  ;;  %v4209_v7 = vmul.f32 %v9793_v14, %v3817_v19  ;;  %v2365_v49 = vmul.f32 %v9820_v46, %v2364_v5  ;;  %v3491_v9 = vand.u32 2147483647, %v9860_v43 }
 0x3ec   : > { %5013 = vmatpush.msrb.mxu0 %v4847_v15  ;;  %5907 = vlog2.f32 %v3485_v31  ;;  %v3791_v26 = vadd.f32 1.0, %v9875_v53  ;;  %v3794_v54 = vmul.f32 -0.5, %v9875_v53  ;;  %v1675_v15 = vld [vmem:[%s7394_s6 + $0x400] sm:$0xff]  ;;  %v11612_v37 = vunpack.c.l.bf16 %v9789_v6 }
 0x3ed   : > { %v5902_v30 = vpop.eup %5901  ;;  %v3489_v4 = vadd.f32 1.0, %v3488_v47  ;;  %v3797_v0 = vand.u32 2147483647, %v9875_v53  ;;  %5909 = vpow2.f32 %v1813_v63  ;;  %v2671_v31 = vmul.f32 %v9848_v34, %v2670_v38 }
 0x3ee   : > { %v4689_v14 = vmul.f32 %v11612_v37, %v4209_v7  ;;  %v2362_v5 = vmul.f32 0.6931472, %v5902_v30  ;;  %v9891_v19 = vpop.eup %5903  ;;  %5911 = vlog2.f32 %v3791_v26  ;;  %v3795_v47 = vadd.f32 1.0, %v3794_v54  ;;  %v2128_v37 = vld [vmem:[%s7392_s30 + $0x28] sm:$0xff]  ;;  %v9906_v54 = vld [vmem:[%s7396_s18 + $0x200] sm:$0xff] }
 0x3ef   : > { %v5906_v17 = vpop.eup %5905  ;;  %v2342_v30 = vadd.f32 1.0, %v9891_v19  ;;  %v1995_v63 = vmul.f32 1.442695, %v1675_v15  ;;  %v3490_v38 = vmul.f32 %v9860_v43, %v3489_v4  ;;  %v2345_v26 = vmul.f32 -0.5, %v9891_v19 }
 0x3f0   : > { %v4881_v6 = vadd.f32 %v4689_v14, %v2289_v16  ;;  %v2368_v7 = vsel %vm9870_vm6, %v2365_v49, %v2362_v5  ;;  %v2668_v40 = vmul.f32 0.6931472, %v5906_v17  ;;  %vm9909_vm8 = vcmp.lt.f32.partialorder %v3491_v9, 0.0004427343 }
 0x3f1   : > { %v4048_v21 = vmul.f32 %v9820_v46, %v2368_v7  ;;  %vm9913_vm9 = vcmp.lt.f32.partialorder %v3797_v0, 0.0004427343  ;;  %5913 = vlog2.f32 %v2342_v30  ;;  %v2348_v17 = vand.u32 2147483647, %v9891_v19  ;;  %v2253_v30 = vld [vmem:[%s7392_s30 + $0x410] sm:$0xff] }
 0x3f2   : > { %v5908_v44 = vpop.eup %5907  ;;  %5032 = vmatpush.msrb.mxu1 %v4881_v6  ;;  %v11617_v46 = vunpack.c.h.bf16 %v9823_v23  ;;  %v2674_v4 = vsel %vm9880_vm7, %v2671_v31, %v2668_v40  ;;  %v2346_v14 = vadd.f32 1.0, %v2345_v26  ;;  %v3796_v0 = vmul.f32 %v9875_v53, %v3795_v47 }
 0x3f3   : > { %v3487_v15 = vmul.f32 0.6931472, %v5908_v44  ;;  %v9922_v9 = vpop.eup %5909  ;;  %v4082_v5 = vmul.f32 %v9848_v34, %v2674_v4  ;;  %5915 = vpow2.f32 %v1995_v63  ;;  %v4459_v6 = vunpack.c.l.bf16 %v9906_v54 }
 0x3f4   : > { %v4528_v49 = vmul.f32 %v11617_v46, %v4048_v21  ;;  %v5912_v7 = vpop.eup %5911  ;;  %v2162_v21 = vld [vmem:[%s7392_s30 + $0x138] sm:$0xff]  ;;  %v2648_v44 = vadd.f32 1.0, %v9922_v9  ;;  %v2063_v3 = vmul.f32 1.442695, %v1709_v2  ;;  %v11618_v31 = vunpack.c.h.bf16 %v9827_v55  ;;  %v9937_v46 = vld [vmem:[%s7396_s18 + $0x288] sm:$0xff]  ;;  %v9947_v55 = vld [vmem:[%s9837_s11] sm:$0xff] }
 0x3f5   : > { %v3493_v40 = vsel %vm9909_vm8, %v3490_v38, %v3487_v15  ;;  %v3793_v63 = vmul.f32 0.6931472, %v5912_v7  ;;  %v2651_v26 = vmul.f32 -0.5, %v9922_v9  ;;  %v2347_v16 = vmul.f32 %v9891_v19, %v2346_v14  ;;  %4936 = vmatmul.f32.vlgmr.msra.gmra.mxu0 %v9947_v55 }
 0x3f6   : > { %v4720_v23 = vadd.f32 %v4528_v49, %v2128_v37  ;;  %v4562_v34 = vmul.f32 %v11618_v31, %v4082_v5  ;;  %v4173_v47 = vmul.f32 %v9860_v43, %v3493_v40  ;;  %v1548_v37 = vld [vmem:[%s7394_s6 + $0x8] sm:$0xff]  ;;  %vm9941_vm10 = vcmp.lt.f32.partialorder %v2348_v17, 0.0004427343 }
 0x3f7   : > { %5917 = vlog2.f32 %v2648_v44  ;;  %v2654_v2 = vand.u32 2147483647, %v9922_v9  ;;  %v4915_v43 = vld [vmem:[%s9837_s11 + $0x18] sm:$0xff]  ;;  %v5914_v49 = vpop.eup %5913  ;;  %v11621_v15 = vunpack.c.l.bf16 %v9807_v48  ;;  %v3799_v14 = vsel %vm9913_vm9, %v3796_v0, %v3793_v63  ;;  %v1582_v44 = vld [vmem:[%s7394_s6 + $0x118] sm:$0xff] }
 0x3f8   : > { %5053 = vmatpush.msrb.mxu2 %v4720_v23  ;;  %v4754_v4 = vadd.f32 %v4562_v34, %v2162_v21  ;;  %v2652_v17 = vadd.f32 1.0, %v2651_v26  ;;  %4996 = vmatmul.f32.vlgmr.msra.gmra.mxu3 %v4915_v43  ;;  %v4207_v7 = vmul.f32 %v9875_v53, %v3799_v14  ;;  %v2344_v23 = vmul.f32 0.6931472, %v5914_v49  ;;  %v2287_v21 = vld [vmem:[%s7392_s30 + $0x520] sm:$0xff] }
 0x3f9   : > { %v4653_v5 = vmul.f32 %v11621_v15, %v4173_v47  ;;  %5919 = vpow2.f32 %v2063_v3  ;;  %v9958_v31 = vpop.eup %5915  ;;  %vm9962_vm11 = vcmp.lt.f32.partialorder %v2654_v2, 0.0004427343  ;;  %v1741_v53 = vmul.f32 1.442695, %v1548_v37  ;;  %v1707_v43 = vld [vmem:[%s7394_s6 + $0x500] sm:$0xff] }
 0x3fa   : > { %5072 = vmatpush.msrb.mxu3 %v4754_v4  ;;  %v2653_v51 = vmul.f32 %v9922_v9, %v2652_v17  ;;  %v11624_v3 = vunpack.c.l.bf16 %v9832_v59  ;;  %v2350_v47 = vsel %vm9941_vm10, %v2347_v16, %v2344_v23  ;;  %v3467_v63 = vadd.f32 1.0, %v9958_v31  ;;  %v1706_v59 = vld [vmem:[%s7394_s6 + $0x4f8] sm:$0xff]  ;;  %v9978_v15 = vld [vmem:[%s7396_s18] sm:$0xff] }
 0x3fb   : > { %v4845_v48 = vadd.f32 %v4653_v5, %v2253_v30  ;;  %v3470_v30 = vmul.f32 -0.5, %v9958_v31  ;;  %v4046_v26 = vmul.f32 %v9891_v19, %v2350_v47  ;;  %v3473_v2 = vand.u32 2147483647, %v9958_v31  ;;  %v2126_v16 = vld [vmem:[%s7392_s30 + $0x18] sm:$0xff]  ;;  %v1704_v5 = vld [vmem:[%s7394_s6 + $0x4e8] sm:$0xff] }
 0x3fc   : > { %v4687_v34 = vmul.f32 %v11624_v3, %v4207_v7  ;;  %5921 = vpow2.f32 %v1741_v53  ;;  %v1809_v37 = vmul.f32 1.442695, %v1582_v44  ;;  %v11625_v19 = vunpack.c.h.bf16 %v9864_v57  ;;  %v9984_v7 = vld [vmem:[%s7396_s18 + $0x88] sm:$0xff]  ;;  %v2218_v44 = vld [vmem:[%s7392_s30 + $0x2f8] sm:$0xff] }
 0x3fd   : > { %5014 = vmatpush.msrb.mxu0 %v4845_v48  ;;  %v5918_v38 = vpop.eup %5917  ;;  %5923 = vlog2.f32 %v3467_v63  ;;  %v3471_v4 = vadd.f32 1.0, %v3470_v30  ;;  %v9989_v48 = vld [vmem:[%s7396_s18 + $0x280] sm:$0xff]  ;;  %vm9995_vm12 = vcmp.lt.f32.partialorder %v3473_v2, 0.0004427343  ;;  %v2057_v57 = vmul.f32 1.442695, %v1706_v59 }
 0x3fe   : > { %v4879_v49 = vadd.f32 %v4687_v34, %v2287_v21  ;;  %v4526_v14 = vmul.f32 %v11625_v19, %v4046_v26  ;;  %v2650_v17 = vmul.f32 0.6931472, %v5918_v38  ;;  %5925 = vpow2.f32 %v1809_v37  ;;  %v1580_v21 = vld [vmem:[%s7394_s6 + $0x108] sm:$0xff]  ;;  %v2250_v23 = vld [vmem:[%s7392_s30 + $0x3f8] sm:$0xff] }
 0x3ff   : > { %v9992_v53 = vpop.eup %5919  ;;  %v3472_v3 = vmul.f32 %v9958_v31, %v3471_v4  ;;  %v2059_v47 = vmul.f32 1.442695, %v1707_v43  ;;  %v10006_v2 = vadd.f32 %v7583_v18, %v2218_v44  ;;  %5927 = vpow2.f32 %v2057_v57  ;;  %v2160_v59 = vld [vmem:[%s7392_s30 + $0x128] sm:$0xff] }
 0x400   : > { %5033 = vmatpush.msrb.mxu1 %v4879_v49  ;;  %v4718_v63 = vadd.f32 %v4526_v14, %v2126_v16  ;;  %v2656_v30 = vsel %vm9962_vm11, %v2653_v51, %v2650_v17  ;;  %v3773_v26 = vadd.f32 1.0, %v9992_v53  ;;  %v3776_v37 = vmul.f32 -0.5, %v9992_v53  ;;  %v10013_v16 = vld [vmem:[%s9837_s11 + $0x8] sm:$0xff]  ;;  %v1640_v34 = vld [vmem:[%s7394_s6 + $0x2e8] sm:$0xff] }
 0x401   : > { %v4080_v38 = vmul.f32 %v9922_v9, %v2656_v30  ;;  %v3779_v49 = vand.u32 2147483647, %v9992_v53  ;;  %v1805_v0 = vmul.f32 1.442695, %v1580_v21  ;;  %v11628_v9 = vunpack.c.h.bf16 %v9895_v50  ;;  %4956 = vmatmul.f32.vlgmr.msra.gmra.mxu1 %v10013_v16 }
 0x402   : > { %v10008_v4 = vpop.eup %5921  ;;  %5054 = vmatpush.msrb.mxu2 %v4718_v63  ;;  %5929 = vlog2.f32 %v3773_v26  ;;  %v3777_v43 = vadd.f32 1.0, %v3776_v37  ;;  %v1925_v51 = vmul.f32 1.442695, %v1640_v34 }
 0x403   : > { %v5924_v19 = vpop.eup %5923  ;;  %v4560_v14 = vmul.f32 %v11628_v9, %v4080_v38  ;;  %vm10017_vm13 = vcmp.lt.f32.partialorder %v3779_v49, 0.0004427343  ;;  %v2324_v18 = vadd.f32 1.0, %v10008_v4  ;;  %v2327_v44 = vmul.f32 -0.5, %v10008_v4 }
 0x404   : > { %v10024_v57 = vpop.eup %5925  ;;  %v3469_v63 = vmul.f32 0.6931472, %v5924_v19  ;;  %v3778_v21 = vmul.f32 %v9992_v53, %v3777_v43  ;;  %v2330_v30 = vand.u32 2147483647, %v10008_v4  ;;  %5931 = vpow2.f32 %v2059_v47 }
 0x405   : > { %v4752_v50 = vadd.f32 %v4560_v14, %v2160_v59  ;;  %5933 = vlog2.f32 %v2324_v18  ;;  %v2328_v26 = vadd.f32 1.0, %v2327_v44  ;;  %v2630_v37 = vadd.f32 1.0, %v10024_v57  ;;  %v10037_v9 = vpop.eup %5927  ;;  %v10042_v14 = vld [vmem:[%s7396_s18 + $0x80] sm:$0xff] }
 0x406   : > { %v3475_v38 = vsel %vm9995_vm12, %v3472_v3, %v3469_v63  ;;  %vm10031_vm14 = vcmp.lt.f32.partialorder %v2330_v30, 0.0004427343  ;;  %v2633_v43 = vmul.f32 -0.5, %v10024_v57  ;;  %v2636_v19 = vand.u32 2147483647, %v10024_v57  ;;  %v2251_v44 = vld [vmem:[%s7392_s30 + $0x400] sm:$0xff] }
 0x407   : > { %5073 = vmatpush.msrb.mxu3 %v4752_v50  ;;  %v4171_v47 = vmul.f32 %v9958_v31, %v3475_v38  ;;  %v2329_v59 = vmul.f32 %v10008_v4, %v2328_v26  ;;  %5935 = vlog2.f32 %v2630_v37  ;;  %v3746_v50 = vadd.f32 1.0, %v10037_v9 }
 0x408   : > { %v5930_v18 = vpop.eup %5929  ;;  %v2634_v63 = vadd.f32 1.0, %v2633_v43  ;;  %vm10047_vm15 = vcmp.lt.f32.partialorder %v2636_v19, 0.0004427343  ;;  %v3749_v31 = vmul.f32 -0.5, %v10037_v9  ;;  %v3752_v38 = vand.u32 2147483647, %v10037_v9 }
 0x409   : > { %v4651_v26 = vmul.f32 %v4459_v6, %v4171_v47  ;;  %v3775_v37 = vmul.f32 0.6931472, %v5930_v18  ;;  %5937 = vpow2.f32 %v1805_v0 }
 0x40a   : > { %v10056_v3 = vpop.eup %5931  ;;  %v2635_v43 = vmul.f32 %v10024_v57, %v2634_v63  ;;  %5939 = vlog2.f32 %v3746_v50  ;;  %v3750_v19 = vadd.f32 1.0, %v3749_v31  ;;  %vm10063_vm0 = vcmp.lt.f32.partialorder %v3752_v38, 0.0004427343  ;;  %v1738_v50 = vld [vmem:[%s7394_s6 + $0x5f8] sm:$0xff] }
 0x40b   : > { %v5934_v40 = vpop.eup %5933  ;;  %v4843_v12 = vadd.f32 %v4651_v26, %v2251_v44  ;;  %v3781_v54 = vsel %vm10017_vm13, %v3778_v21, %v3775_v37  ;;  %v3755_v0 = vadd.f32 1.0, %v10056_v3  ;;  %v3758_v34 = vmul.f32 -0.5, %v10056_v3  ;;  %v2285_v44 = vld [vmem:[%s7392_s30 + $0x510] sm:$0xff] }
 0x40c   : > { %v4205_v47 = vmul.f32 %v9992_v53, %v3781_v54  ;;  %v2326_v18 = vmul.f32 0.6931472, %v5934_v40  ;;  %v3751_v63 = vmul.f32 %v10037_v9, %v3750_v19  ;;  %v3761_v17 = vand.u32 2147483647, %v10056_v3 }
 0x40d   : > { %v5936_v31 = vpop.eup %5935  ;;  %5015 = vmatpush.msrb.mxu0 %v4843_v12  ;;  %5941 = vlog2.f32 %v3755_v0  ;;  %v10075_v21 = vadd.f32 %v7683_v28, %v2250_v23  ;;  %v2053_v26 = vmul.f32 1.442695, %v1704_v5  ;;  %v11637_v40 = vunpack.c.l.bf16 %v9937_v46  ;;  %v1638_v5 = vld [vmem:[%s7394_s6 + $0x2d8] sm:$0xff]  ;;  %v1672_v23 = vld [vmem:[%s7394_s6 + $0x3e8] sm:$0xff] }
 0x40e   : > { %v2332_v37 = vsel %vm10031_vm14, %v2329_v59, %v2326_v18  ;;  %v2632_v38 = vmul.f32 0.6931472, %v5936_v31  ;;  %v3759_v12 = vadd.f32 1.0, %v3758_v34  ;;  %vm10085_vm1 = vcmp.lt.f32.partialorder %v3761_v17, 0.0004427343  ;;  %v2124_v0 = vld [vmem:[%s7392_s30 + $0x8] sm:$0xff] }
 0x40f   : > { %v4685_v53 = vmul.f32 %v11637_v40, %v4205_v47  ;;  %5080 = vmatpush.msra.mxu0 %v10006_v2  ;;  %v10082_v19 = vpop.eup %5937  ;;  %v4044_v54 = vmul.f32 %v10008_v4, %v2332_v37  ;;  %5943 = vpow2.f32 %v1925_v51  ;;  %v2121_v46 = vmul.f32 1.442695, %v1738_v50  ;;  %v2158_v31 = vld [vmem:[%s7392_s30 + $0x118] sm:$0xff] }
 0x410   : > { %v5940_v49 = vpop.eup %5939  ;;  %v2638_v2 = vsel %vm10047_vm15, %v2635_v43, %v2632_v38  ;;  %v3760_v47 = vmul.f32 %v10056_v3, %v3759_v12  ;;  %v2612_v18 = vadd.f32 1.0, %v10082_v19  ;;  %v11640_v4 = vunpack.c.h.bf16 %v9978_v15  ;;  %v1702_v40 = vld [vmem:[%s7394_s6 + $0x4d8] sm:$0xff] }
 0x411   : > { %v4877_v59 = vadd.f32 %v4685_v53, %v2285_v44  ;;  %v4078_v17 = vmul.f32 %v10024_v57, %v2638_v2  ;;  %v3748_v51 = vmul.f32 0.6931472, %v5940_v49  ;;  %v2615_v50 = vmul.f32 -0.5, %v10082_v19 }
 0x412   : > { %v4524_v34 = vmul.f32 %v11640_v4, %v4044_v54  ;;  %5945 = vlog2.f32 %v2612_v18  ;;  %v2618_v30 = vand.u32 2147483647, %v10082_v19  ;;  %v1921_v43 = vmul.f32 1.442695, %v1638_v5  ;;  %v1736_v5 = vld [vmem:[%s7394_s6 + $0x5e8] sm:$0xff] }
 0x413   : > { %5034 = vmatpush.msrb.mxu1 %v4877_v59  ;;  %v1989_v44 = vmul.f32 1.442695, %v1672_v23  ;;  %v5942_v53 = vpop.eup %5941  ;;  %v11641_v15 = vunpack.c.h.bf16 %v9984_v7  ;;  %v3754_v57 = vsel %vm10063_vm0, %v3751_v63, %v3748_v51  ;;  %v2616_v12 = vadd.f32 1.0, %v2615_v50  ;;  %v2282_v7 = vld [vmem:[%s7392_s30 + $0x4f8] sm:$0xff] }
 0x414   : > { %v4716_v37 = vadd.f32 %v4524_v34, %v2124_v0  ;;  %v4202_v54 = vmul.f32 %v10037_v9, %v3754_v57  ;;  %v3757_v49 = vmul.f32 0.6931472, %v5942_v53  ;;  %vm10108_vm2 = vcmp.lt.f32.partialorder %v2618_v30, 0.0004427343  ;;  %v1636_v9 = vld [vmem:[%s7394_s6 + $0x2c8] sm:$0xff]  ;;  %v1670_v51 = vld [vmem:[%s7394_s6 + $0x3d8] sm:$0xff] }
 0x415   : > { %v4558_v38 = vmul.f32 %v11641_v15, %v4078_v17  ;;  %5947 = vpow2.f32 %v2053_v26  ;;  %v10113_v23 = vpop.eup %5943  ;;  %v2617_v6 = vmul.f32 %v10082_v19, %v2616_v12  ;;  %v2049_v63 = vmul.f32 1.442695, %v1702_v40  ;;  %v1734_v12 = vld [vmem:[%s7394_s6 + $0x5d8] sm:$0xff] }
 0x416   : > { %5055 = vmatpush.msrb.mxu2 %v4716_v37  ;;  %5949 = vpow2.f32 %v2121_v46  ;;  %v11644_v2 = vunpack.c.h.bf16 %v8683_v41  ;;  %v3763_v26 = vsel %vm10085_vm1, %v3760_v47, %v3757_v49  ;;  %v3152_v4 = vadd.f32 1.0, %v10113_v23  ;;  %v1700_v41 = vld [vmem:[%s7394_s6 + $0x4c8] sm:$0xff]  ;;  %v2283_v47 = vld [vmem:[%s7392_s30 + $0x500] sm:$0xff] }
 0x417   : > { %v4750_v0 = vadd.f32 %v4558_v38, %v2158_v31  ;;  %v3155_v34 = vmul.f32 -0.5, %v10113_v23  ;;  %5056 = vmatmul.f32.vlgmr.msrb.gmra.mxu2 %v9947_v55  ;;  %v4203_v31 = vmul.f32 %v10056_v3, %v3763_v26  ;;  %v3158_v46 = vand.u32 2147483647, %v10113_v23 }
 0x418   : > { %v4682_v18 = vmul.f32 %v11644_v2, %v4202_v54  ;;  %5951 = vpow2.f32 %v1921_v43  ;;  %v10127_v17 = vmul.f32 1.442695, %v1736_v5  ;;  %v5946_v50 = vpop.eup %5945  ;;  %v10132_v30 = vmul.f32 1.442695, %v1636_v9 }
 0x419   : > { %5074 = vmatpush.msrb.mxu3 %v4750_v0  ;;  %5953 = vlog2.f32 %v3152_v4  ;;  %v3156_v40 = vadd.f32 1.0, %v3155_v34  ;;  %v11645_v55 = vunpack.c.l.bf16 %v9989_v48  ;;  %v2614_v37 = vmul.f32 0.6931472, %v5946_v50 }
 0x41a   : > { %v4874_v28 = vadd.f32 %v4682_v18, %v2282_v7  ;;  %vm10136_vm3 = vcmp.lt.f32.partialorder %v3158_v46, 0.0004427343  ;;  %5955 = vpow2.f32 %v1989_v44  ;;  %v10143_v38 = vmul.f32 1.442695, %v1670_v51  ;;  %v2156_v18 = vld [vmem:[%s7392_s30 + $0x108] sm:$0xff] }
 0x41b   : > { %v4683_v53 = vmul.f32 %v11645_v55, %v4203_v31  ;;  %v10140_v43 = vpop.eup %5947  ;;  %v3157_v15 = vmul.f32 %v10113_v23, %v3156_v40  ;;  %5957 = vpow2.f32 %v2049_v63  ;;  %v10145_v57 = vmul.f32 1.442695, %v1700_v41  ;;  %v4916_v31 = vld [vmem:[%s9837_s11 + $0x20] sm:$0xff] }
 0x41c   : > { %5120 = vmatpush.msra.mxu2 %v4874_v28  ;;  %v10148_v48 = vpop.eup %5949  ;;  %v2620_v49 = vsel %vm10108_vm2, %v2617_v6, %v2614_v37  ;;  %v3728_v44 = vadd.f32 1.0, %v10140_v43  ;;  %v3731_v5 = vmul.f32 -0.5, %v10140_v43  ;;  %v3734_v7 = vand.u32 2147483647, %v10140_v43  ;;  %5016 = vmatmul.f32.vlgmr.msrb.gmra.mxu0 %v4916_v31 }
 0x41d   : > { %v4875_v54 = vadd.f32 %v4683_v53, %v2283_v47  ;;  %v4076_v0 = vmul.f32 %v10082_v19, %v2620_v49  ;;  %v4034_v63 = vadd.f32 1.0, %v10148_v48  ;;  %v4037_v9 = vmul.f32 -0.5, %v10148_v48 }
 0x41e   : > { %v10158_v2 = vpop.eup %5951  ;;  %5959 = vlog2.f32 %v3728_v44  ;;  %v3732_v26 = vadd.f32 1.0, %v3731_v5  ;;  %v4040_v59 = vand.u32 2147483647, %v10148_v48  ;;  %v10162_v6 = vmul.f32 1.442695, %v1734_v12 }
 0x41f   : > { %5035 = vmatpush.msrb.mxu1 %v4875_v54  ;;  %v5954_v4 = vpop.eup %5953  ;;  %v11648_v34 = vunpack.c.h.bf16 %v10042_v14  ;;  %vm10167_vm4 = vcmp.lt.f32.partialorder %v3734_v7, 0.0004427343  ;;  %5961 = vlog2.f32 %v4034_v63  ;;  %v4038_v46 = vadd.f32 1.0, %v4037_v9  ;;  %v2216_v63 = vld [vmem:[%s7392_s30 + $0x2e8] sm:$0xff] }
 0x420   : > { %v10171_v51 = vpop.eup %5955  ;;  %v3154_v41 = vmul.f32 0.6931472, %v5954_v4  ;;  %v3733_v50 = vmul.f32 %v10140_v43, %v3732_v26  ;;  %vm10174_vm5 = vcmp.lt.f32.partialorder %v4040_v59, 0.0004427343  ;;  %v3134_v14 = vadd.f32 1.0, %v10158_v2 }
 0x421   : > { %v4556_v19 = vmul.f32 %v11648_v34, %v4076_v0  ;;  %5100 = vmatpush.msra.mxu1 %v10075_v21  ;;  %v10179_v47 = vpop.eup %5957  ;;  %v4039_v40 = vmul.f32 %v10148_v48, %v4038_v46  ;;  %v3137_v55 = vmul.f32 -0.5, %v10158_v2  ;;  %v3140_v53 = vand.u32 2147483647, %v10158_v2  ;;  %v2248_v34 = vld [vmem:[%s7392_s30 + $0x3e8] sm:$0xff] }
 0x422   : > { %v3160_v37 = vsel %vm10136_vm3, %v3157_v15, %v3154_v41  ;;  %5963 = vlog2.f32 %v3134_v14  ;;  %v3440_v12 = vadd.f32 1.0, %v10171_v51  ;;  %v3443_v54 = vmul.f32 -0.5, %v10171_v51 }
 0x423   : > { %v4748_v21 = vadd.f32 %v4556_v19, %v2156_v18  ;;  %v4136_v49 = vmul.f32 %v10113_v23, %v3160_v37  ;;  %v3138_v44 = vadd.f32 1.0, %v3137_v55  ;;  %vm10189_vm6 = vcmp.lt.f32.partialorder %v3140_v53, 0.0004427343  ;;  %v1668_v55 = vld [vmem:[%s7394_s6 + $0x3c8] sm:$0xff] }
 0x424   : > { %v3446_v0 = vand.u32 2147483647, %v10171_v51  ;;  %v5960_v7 = vpop.eup %5959  ;;  %5965 = vlog2.f32 %v3440_v12  ;;  %v3444_v3 = vadd.f32 1.0, %v3443_v54  ;;  %v3710_v15 = vadd.f32 1.0, %v10179_v47 }
 0x425   : > { %5075 = vmatpush.msrb.mxu3 %v4748_v21  ;;  %v3713_v9 = vmul.f32 -0.5, %v10179_v47  ;;  %v5962_v23 = vpop.eup %5961  ;;  %v11655_v18 = vunpack.c.h.bf16 %v7420_v52  ;;  %v3730_v59 = vmul.f32 0.6931472, %v5960_v7  ;;  %v3139_v4 = vmul.f32 %v10158_v2, %v3138_v44  ;;  %v1634_v21 = vld [vmem:[%s7394_s6 + $0x2b8] sm:$0xff] }
 0x426   : > { %5076 = vmatmul.f32.vlgmr.msrb.gmra.mxu3 %v10013_v16  ;;  %vm10201_vm7 = vcmp.lt.f32.partialorder %v3446_v0, 0.0004427343  ;;  %v4036_v19 = vmul.f32 0.6931472, %v5962_v23  ;;  %v3445_v46 = vmul.f32 %v10171_v51, %v3444_v3  ;;  %5967 = vlog2.f32 %v3710_v15  ;;  %v2314_v7 = vld [vmem:[%s7392_s30 + $0x5f8] sm:$0xff] }
 0x427   : > { %v4616_v26 = vmul.f32 %v11655_v18, %v4136_v49  ;;  %v3714_v41 = vadd.f32 1.0, %v3713_v9  ;;  %v3736_v16 = vsel %vm10167_vm4, %v3733_v50, %v3730_v59  ;;  %v3716_v52 = vand.u32 2147483647, %v10179_v47  ;;  %v2280_v50 = vld [vmem:[%s7392_s30 + $0x4e8] sm:$0xff]  ;;  %v2214_v59 = vld [vmem:[%s7392_s30 + $0x2d8] sm:$0xff] }
 0x428   : > { %5969 = vpow2.f32 %v10127_v17  ;;  %v5964_v53 = vpop.eup %5963  ;;  %v4200_v37 = vmul.f32 %v10140_v43, %v3736_v16  ;;  %v4042_v12 = vsel %vm10174_vm5, %v4039_v40, %v4036_v19  ;;  %v1698_v43 = vld [vmem:[%s7394_s6 + $0x4b8] sm:$0xff]  ;;  %v11660_v28 = vunpack.c.h.bf16 %v8750_v42 }
 0x429   : > { %v4808_v14 = vadd.f32 %v4616_v26, %v2216_v63  ;;  %v3715_v54 = vmul.f32 %v10179_v47, %v3714_v41  ;;  %5971 = vpow2.f32 %v10132_v30  ;;  %v4234_v49 = vmul.f32 %v10148_v48, %v4042_v12 }
 0x42a   : > { %v3136_v44 = vmul.f32 0.6931472, %v5964_v53  ;;  %vm10220_vm8 = vcmp.lt.f32.partialorder %v3716_v52, 0.0004427343  ;;  %5973 = vpow2.f32 %v10143_v38  ;;  %v5966_v0 = vpop.eup %5965  ;;  %v4680_v40 = vmul.f32 %v11660_v28, %v4200_v37 }
 0x42b   : > { %5081 = vmatpush.msra.mxu0 %v4808_v14  ;;  %5975 = vpow2.f32 %v10145_v57  ;;  %v1913_v30 = vmul.f32 1.442695, %v1634_v21  ;;  %v1981_v63 = vmul.f32 1.442695, %v1668_v55  ;;  %v11661_v48 = vunpack.c.h.bf16 %v8767_v20 }
 0x42c   : > { %v3142_v15 = vsel %vm10189_vm6, %v3139_v4, %v3136_v44  ;;  %v3442_v9 = vmul.f32 0.6931472, %v5966_v0  ;;  %5977 = vpow2.f32 %v10162_v6  ;;  %v5968_v38 = vpop.eup %5967  ;;  %v4872_v23 = vadd.f32 %v4680_v40, %v2280_v50  ;;  %v2278_v50 = vld [vmem:[%s7392_s30 + $0x4d8] sm:$0xff] }
 0x42d   : > { %v4714_v3 = vmul.f32 %v11661_v48, %v4234_v49  ;;  %v4134_v42 = vmul.f32 %v10158_v2, %v3142_v15  ;;  %5979 = vpow2.f32 %v1913_v30  ;;  %v10236_v18 = vmul.f32 1.442695, %v1698_v43 }
 0x42e   : > { %v10238_v57 = vpop.eup %5969  ;;  %v3448_v20 = vsel %vm10201_vm7, %v3445_v46, %v3442_v9  ;;  %v3712_v5 = vmul.f32 0.6931472, %v5968_v38  ;;  %5981 = vpow2.f32 %v1981_v63  ;;  %5121 = vmatpush.msra.mxu2 %v4872_v23  ;;  %v11662_v6 = vunpack.c.h.bf16 %v7571_v10 }
 0x42f   : > { %v4906_v26 = vadd.f32 %v4714_v3, %v2314_v7  ;;  %v10243_v4 = vpop.eup %5971  ;;  %v4168_v2 = vmul.f32 %v10171_v51, %v3448_v20  ;;  %v4016_v41 = vadd.f32 1.0, %v10238_v57  ;;  %v4019_v14 = vmul.f32 -0.5, %v10238_v57 }
 0x430   : > { %v4614_v19 = vmul.f32 %v11662_v6, %v4134_v42  ;;  %v10250_v16 = vpop.eup %5973  ;;  %v3718_v46 = vsel %vm10220_vm8, %v3715_v54, %v3712_v5  ;;  %v4022_v52 = vand.u32 2147483647, %v10238_v57  ;;  %v3116_v21 = vadd.f32 1.0, %v10243_v4  ;;  %v2312_v54 = vld [vmem:[%s7392_s30 + $0x5e8] sm:$0xff] }
 0x431   : > { %5140 = vmatpush.msra.mxu3 %v4906_v26  ;;  %v3119_v10 = vmul.f32 -0.5, %v10243_v4  ;;  %v10258_v55 = vpop.eup %5975  ;;  %v11663_v53 = vunpack.c.h.bf16 %v7574_v13  ;;  %v4198_v12 = vmul.f32 %v10179_v47, %v3718_v46  ;;  %5983 = vlog2.f32 %v4016_v41 }
 0x432   : > { %v4806_v51 = vadd.f32 %v4614_v19, %v2214_v59  ;;  %v10263_v31 = vpop.eup %5977  ;;  %v4020_v49 = vadd.f32 1.0, %v4019_v14  ;;  %vm10266_vm9 = vcmp.lt.f32.partialorder %v4022_v52, 0.0004427343  ;;  %5985 = vlog2.f32 %v3116_v21  ;;  %v1730_v14 = vld [vmem:[%s7394_s6 + $0x5b8] sm:$0xff] }
 0x433   : > { %v4648_v37 = vmul.f32 %v11663_v53, %v4168_v2  ;;  %v3120_v44 = vadd.f32 1.0, %v3119_v10  ;;  %v10270_v17 = vpop.eup %5979  ;;  %v11666_v13 = vunpack.c.h.bf16 %v8816_v8  ;;  %v3122_v47 = vand.u32 2147483647, %v10243_v4 }
 0x434   : > { %5082 = vmatpush.msra.mxu0 %v4806_v51  ;;  %v3422_v28 = vadd.f32 1.0, %v10250_v16  ;;  %v10276_v40 = vpop.eup %5981  ;;  %v4021_v7 = vmul.f32 %v10238_v57, %v4020_v49  ;;  %v3425_v63 = vmul.f32 -0.5, %v10250_v16  ;;  %v3428_v48 = vand.u32 2147483647, %v10250_v16 }
 0x435   : > { %v4840_v43 = vadd.f32 %v4648_v37, %v2248_v34  ;;  %v4678_v0 = vmul.f32 %v11666_v13, %v4198_v12  ;;  %v3121_v30 = vmul.f32 %v10243_v4, %v3120_v44  ;;  %vm10282_vm10 = vcmp.lt.f32.partialorder %v3122_v47, 0.0004427343 }
 0x436   : > { %5987 = vlog2.f32 %v3422_v28  ;;  %v3692_v8 = vadd.f32 1.0, %v10258_v55  ;;  %v3426_v9 = vadd.f32 1.0, %v3425_v63  ;;  %vm10287_vm11 = vcmp.lt.f32.partialorder %v3428_v48, 0.0004427343  ;;  %v2212_v63 = vld [vmem:[%s7392_s30 + $0x2c8] sm:$0xff] }
 0x437   : > { %5101 = vmatpush.msra.mxu1 %v4840_v43  ;;  %v4870_v3 = vadd.f32 %v4678_v0, %v2278_v50  ;;  %v3695_v23 = vmul.f32 -0.5, %v10258_v55  ;;  %v3698_v42 = vand.u32 2147483647, %v10258_v55  ;;  %v5984_v26 = vpop.eup %5983  ;;  %v3998_v59 = vadd.f32 1.0, %v10263_v31 }
 0x438   : > { %5989 = vlog2.f32 %v3692_v8  ;;  %v4001_v20 = vmul.f32 -0.5, %v10263_v31  ;;  %v4004_v5 = vand.u32 2147483647, %v10263_v31  ;;  %v5986_v6 = vpop.eup %5985  ;;  %v4018_v19 = vmul.f32 0.6931472, %v5984_v26 }
 0x439   : > { %5122 = vmatpush.msra.mxu2 %v4870_v3  ;;  %v3427_v2 = vmul.f32 %v10250_v16, %v3426_v9  ;;  %v3696_v41 = vadd.f32 1.0, %v3695_v23  ;;  %vm10297_vm12 = vcmp.lt.f32.partialorder %v3698_v42, 0.0004427343  ;;  %v3118_v34 = vmul.f32 0.6931472, %v5986_v6  ;;  %v2246_v6 = vld [vmem:[%s7392_s30 + $0x3d8] sm:$0xff] }
 0x43a   : > { %5991 = vlog2.f32 %v3998_v59  ;;  %v4002_v46 = vadd.f32 1.0, %v4001_v20  ;;  %vm10301_vm13 = vcmp.lt.f32.partialorder %v4004_v5, 0.0004427343  ;;  %v4024_v21 = vsel %vm10266_vm9, %v4021_v7, %v4018_v19  ;;  %v1732_v20 = vld [vmem:[%s7394_s6 + $0x5c8] sm:$0xff] }
 0x43b   : > { %v3697_v10 = vmul.f32 %v10258_v55, %v3696_v41  ;;  %v3098_v51 = vadd.f32 1.0, %v10270_v17  ;;  %v3101_v53 = vmul.f32 -0.5, %v10270_v17  ;;  %v4232_v12 = vmul.f32 %v10238_v57, %v4024_v21  ;;  %v1632_v5 = vld [vmem:[%s7394_s6 + $0x2a8] sm:$0xff] }
 0x43c   : > { %v5988_v37 = vpop.eup %5987  ;;  %v3124_v50 = vsel %vm10282_vm10, %v3121_v30, %v3118_v34  ;;  %v4003_v49 = vmul.f32 %v10263_v31, %v4002_v46  ;;  %v3104_v44 = vand.u32 2147483647, %v10270_v17  ;;  %v11675_v28 = vunpack.c.h.bf16 %v8841_v25  ;;  %v2276_v19 = vld [vmem:[%s7392_s30 + $0x4c8] sm:$0xff] }
 0x43d   : > { %v4132_v43 = vmul.f32 %v10243_v4, %v3124_v50  ;;  %v3424_v13 = vmul.f32 0.6931472, %v5988_v37  ;;  %5993 = vlog2.f32 %v3098_v51  ;;  %v3102_v0 = vadd.f32 1.0, %v3101_v53  ;;  %v4917_v4 = vld [vmem:[%s9837_s11 + $0x28] sm:$0xff]  ;;  %v1696_v53 = vld [vmem:[%s7394_s6 + $0x4a8] sm:$0xff] }
 0x43e   : > { %v5990_v47 = vpop.eup %5989  ;;  %v4712_v7 = vmul.f32 %v11675_v28, %v4232_v12  ;;  %vm10320_vm14 = vcmp.lt.f32.partialorder %v3104_v44, 0.0004427343  ;;  %v3404_v30 = vadd.f32 1.0, %v10276_v40  ;;  %v3407_v48 = vmul.f32 -0.5, %v10276_v40  ;;  %5036 = vmatmul.f32.vlgmr.msrb.gmra.mxu1 %v4917_v4  ;;  %v1666_v51 = vld [vmem:[%s7394_s6 + $0x3b8] sm:$0xff] }
 0x43f   : > { %v11678_v3 = vunpack.c.h.bf16 %v7622_v29  ;;  %v3430_v25 = vsel %vm10287_vm11, %v3427_v2, %v3424_v13  ;;  %v3694_v8 = vmul.f32 0.6931472, %v5990_v47  ;;  %v3103_v9 = vmul.f32 %v10270_v17, %v3102_v0  ;;  %v1630_v0 = vld [vmem:[%s7394_s6 + $0x298] sm:$0xff]  ;;  %v1664_v47 = vld [vmem:[%s7394_s6 + $0x3a8] sm:$0xff] }
 0x440   : > { %v5992_v23 = vpop.eup %5991  ;;  %v4904_v42 = vadd.f32 %v4712_v7, %v2312_v54  ;;  %v4166_v26 = vmul.f32 %v10250_v16, %v3430_v25  ;;  %5995 = vlog2.f32 %v3404_v30  ;;  %v3408_v59 = vadd.f32 1.0, %v3407_v48  ;;  %v1694_v25 = vld [vmem:[%s7394_s6 + $0x498] sm:$0xff] }
 0x441   : > { %v4612_v15 = vmul.f32 %v11678_v3, %v4132_v43  ;;  %v3700_v38 = vsel %vm10297_vm12, %v3697_v10, %v3694_v8  ;;  %v4000_v2 = vmul.f32 0.6931472, %v5992_v23  ;;  %v3410_v41 = vand.u32 2147483647, %v10276_v40  ;;  %v2210_v23 = vld [vmem:[%s7392_s30 + $0x2b8] sm:$0xff] }
 0x442   : > { %5141 = vmatpush.msra.mxu3 %v4904_v42  ;;  %v11679_v34 = vunpack.c.h.bf16 %v7676_v61  ;;  %v4196_v46 = vmul.f32 %v10258_v55, %v3700_v38  ;;  %v3409_v21 = vmul.f32 %v10276_v40, %v3408_v59  ;;  %5997 = vpow2.f32 %v10236_v18  ;;  %v2310_v18 = vld [vmem:[%s7392_s30 + $0x5d8] sm:$0xff]  ;;  %v1728_v42 = vld [vmem:[%s7394_s6 + $0x5a8] sm:$0xff] }
 0x443   : > { %v4804_v29 = vadd.f32 %v4612_v15, %v2212_v63  ;;  %v5994_v10 = vpop.eup %5993  ;;  %v4006_v37 = vsel %vm10301_vm13, %v4003_v49, %v4000_v2  ;;  %vm10350_vm15 = vcmp.lt.f32.partialorder %v3410_v41, 0.0004427343  ;;  %v2109_v12 = vmul.f32 1.442695, %v1732_v20  ;;  %v2244_v41 = vld [vmem:[%s7392_s30 + $0x3c8] sm:$0xff] }
 0x444   : > { %v4646_v16 = vmul.f32 %v11679_v34, %v4166_v26  ;;  %v1909_v55 = vmul.f32 1.442695, %v1632_v5  ;;  %v11682_v44 = vunpack.c.h.bf16 %v8902_v1  ;;  %v4230_v43 = vmul.f32 %v10263_v31, %v4006_v37  ;;  %v10365_v31 = vld [vmem:[%s7396_s18 + $0x298] sm:$0xff] }
 0x445   : > { %5083 = vmatpush.msra.mxu0 %v4804_v29  ;;  %v3100_v13 = vmul.f32 0.6931472, %v5994_v10  ;;  %5999 = vpow2.f32 %v2109_v12  ;;  %v1977_v52 = vmul.f32 1.442695, %v1666_v51  ;;  %v2037_v49 = vmul.f32 1.442695, %v1696_v53 }
 0x446   : > { %v4838_v50 = vadd.f32 %v4646_v16, %v2246_v6  ;;  %v4676_v54 = vmul.f32 %v11682_v44, %v4196_v46  ;;  %v2105_v28 = vmul.f32 1.442695, %v1730_v14  ;;  %v5996_v7 = vpop.eup %5995  ;;  %v11683_v30 = vunpack.c.h.bf16 %v8965_v62  ;;  %v1628_v29 = vld [vmem:[%s7394_s6 + $0x288] sm:$0xff] }
 0x447   : > { %v3106_v48 = vsel %vm10320_vm14, %v3103_v9, %v3100_v13  ;;  %6001 = vpow2.f32 %v1909_v55  ;;  %v4498_v4 = vunpack.c.h.bf16 %v10365_v31  ;;  %v3406_v15 = vmul.f32 0.6931472, %v5996_v7 }
 0x448   : > { %5102 = vmatpush.msra.mxu1 %v4838_v50  ;;  %v4868_v63 = vadd.f32 %v4676_v54, %v2276_v19  ;;  %v4710_v1 = vmul.f32 %v11683_v30, %v4230_v43  ;;  %v4130_v3 = vmul.f32 %v10270_v17, %v3106_v48  ;;  %6003 = vpow2.f32 %v1977_v52  ;;  %v10370_v8 = vpop.eup %5997 }
 0x449   : > { %6005 = vpow2.f32 %v2037_v49  ;;  %v10373_v57 = vmul.f32 1.442695, %v1630_v0  ;;  %v10375_v9 = vmul.f32 1.442695, %v1664_v47  ;;  %v11684_v26 = vunpack.c.h.bf16 %v7769_v33 }
 0x44a   : > { %5123 = vmatpush.msra.mxu2 %v4868_v63  ;;  %v4902_v62 = vadd.f32 %v4710_v1, %v2310_v18  ;;  %v3412_v17 = vsel %vm10350_vm15, %v3409_v21, %v3406_v15  ;;  %v3674_v20 = vadd.f32 1.0, %v10370_v8  ;;  %v3677_v5 = vmul.f32 -0.5, %v10370_v8 }
 0x44b   : > { %v4610_v59 = vmul.f32 %v11684_v26, %v4130_v3  ;;  %v4164_v6 = vmul.f32 %v10276_v40, %v3412_v17  ;;  %v3680_v19 = vand.u32 2147483647, %v10370_v8  ;;  %6007 = vpow2.f32 %v2105_v28  ;;  %v10389_v2 = vpop.eup %5999 }
 0x44c   : > { %5142 = vmatpush.msra.mxu3 %v4902_v62  ;;  %v10387_v38 = vmul.f32 1.442695, %v1694_v25  ;;  %6009 = vlog2.f32 %v3674_v20  ;;  %v3678_v34 = vadd.f32 1.0, %v3677_v5  ;;  %v10392_v16 = vmul.f32 1.442695, %v1728_v42 }
 0x44d   : > { %v4802_v33 = vadd.f32 %v4610_v59, %v2210_v23  ;;  %v10394_v46 = vpop.eup %6001  ;;  %v11685_v21 = vunpack.c.h.bf16 %v7781_v60  ;;  %v3980_v40 = vadd.f32 1.0, %v10389_v2  ;;  %v3983_v53 = vmul.f32 -0.5, %v10389_v2 }
 0x44e   : > { %v10400_v14 = vmul.f32 1.442695, %v1628_v29  ;;  %v10402_v10 = vpop.eup %6003  ;;  %vm10404_vm0 = vcmp.lt.f32.partialorder %v3680_v19, 0.0004427343  ;;  %v3986_v61 = vand.u32 2147483647, %v10389_v2  ;;  %v3679_v18 = vmul.f32 %v10370_v8, %v3678_v34 }
 0x44f   : > { %v4644_v51 = vmul.f32 %v11685_v21, %v4164_v6  ;;  %5084 = vmatpush.msra.mxu0 %v4802_v33  ;;  %v3080_v12 = vadd.f32 1.0, %v10394_v46  ;;  %v3083_v60 = vmul.f32 -0.5, %v10394_v46  ;;  %v10411_v55 = vpop.eup %6005  ;;  %6011 = vlog2.f32 %v3980_v40  ;;  %v2274_v34 = vld [vmem:[%s7392_s30 + $0x4b8] sm:$0xff] }
 0x450   : > { %v3984_v44 = vadd.f32 1.0, %v3983_v53  ;;  %v3086_v54 = vand.u32 2147483647, %v10394_v46  ;;  %v3386_v13 = vadd.f32 1.0, %v10402_v10  ;;  %vm10419_vm1 = vcmp.lt.f32.partialorder %v3986_v61, 0.0004427343 }
 0x451   : > { %v4836_v50 = vadd.f32 %v4644_v51, %v2244_v41  ;;  %6013 = vlog2.f32 %v3080_v12  ;;  %v3084_v43 = vadd.f32 1.0, %v3083_v60  ;;  %v10416_v0 = vpop.eup %6007  ;;  %v3389_v49 = vmul.f32 -0.5, %v10402_v10  ;;  %v1662_v41 = vld [vmem:[%s7394_s6 + $0x398] sm:$0xff] }
 0x452   : > { %v3985_v47 = vmul.f32 %v10389_v2, %v3984_v44  ;;  %v3392_v28 = vand.u32 2147483647, %v10402_v10  ;;  %v6010_v7 = vpop.eup %6009  ;;  %vm10425_vm2 = vcmp.lt.f32.partialorder %v3086_v54, 0.0004427343  ;;  %6015 = vlog2.f32 %v3386_v13 }
 0x453   : > { %5103 = vmatpush.msra.mxu1 %v4836_v50  ;;  %v3656_v30 = vadd.f32 1.0, %v10411_v55  ;;  %v3659_v1 = vmul.f32 -0.5, %v10411_v55  ;;  %v3676_v48 = vmul.f32 0.6931472, %v6010_v7  ;;  %v3085_v3 = vmul.f32 %v10394_v46, %v3084_v43 }
 0x454   : > { %v3390_v15 = vadd.f32 1.0, %v3389_v49  ;;  %v3962_v25 = vadd.f32 1.0, %v10416_v0  ;;  %v3662_v23 = vand.u32 2147483647, %v10411_v55  ;;  %v3965_v42 = vmul.f32 -0.5, %v10416_v0  ;;  %v2208_v49 = vld [vmem:[%s7392_s30 + $0x2a8] sm:$0xff] }
 0x455   : > { %6017 = vlog2.f32 %v3656_v30  ;;  %v3660_v62 = vadd.f32 1.0, %v3659_v1  ;;  %v6012_v26 = vpop.eup %6011  ;;  %v3682_v59 = vsel %vm10404_vm0, %v3679_v18, %v3676_v48  ;;  %vm10437_vm3 = vcmp.lt.f32.partialorder %v3392_v28, 0.0004427343  ;;  %v2308_v18 = vld [vmem:[%s7392_s30 + $0x5c8] sm:$0xff]  ;;  %v2242_v48 = vld [vmem:[%s7392_s30 + $0x3b8] sm:$0xff] }
 0x456   : > { %6019 = vlog2.f32 %v3962_v25  ;;  %v3968_v20 = vand.u32 2147483647, %v10416_v0  ;;  %v4194_v29 = vmul.f32 %v10370_v8, %v3682_v59  ;;  %v3982_v6 = vmul.f32 0.6931472, %v6012_v26 }
 0x457   : > { %v6014_v5 = vpop.eup %6013  ;;  %v3391_v19 = vmul.f32 %v10402_v10, %v3390_v15  ;;  %v3661_v33 = vmul.f32 %v10411_v55, %v3660_v62  ;;  %vm10447_vm4 = vcmp.lt.f32.partialorder %v3662_v23, 0.0004427343  ;;  %v3966_v40 = vadd.f32 1.0, %v3965_v42  ;;  %v1726_v23 = vld [vmem:[%s7394_s6 + $0x598] sm:$0xff]  ;;  %v2272_v42 = vld [vmem:[%s7392_s30 + $0x4a8] sm:$0xff] }
 0x458   : > { %v3082_v21 = vmul.f32 0.6931472, %v6014_v5  ;;  %6021 = vpow2.f32 %v10373_v57  ;;  %v6016_v53 = vpop.eup %6015  ;;  %v11696_v8 = vunpack.c.h.bf16 %v8994_v24  ;;  %v3988_v61 = vsel %vm10419_vm1, %v3985_v47, %v3982_v6  ;;  %v1692_v47 = vld [vmem:[%s7394_s6 + $0x488] sm:$0xff]  ;;  %v2306_v6 = vld [vmem:[%s7392_s30 + $0x5b8] sm:$0xff] }
 0x459   : > { %vm10456_vm5 = vcmp.lt.f32.partialorder %v3968_v20, 0.0004427343  ;;  %6023 = vpow2.f32 %v10375_v9  ;;  %v4228_v60 = vmul.f32 %v10389_v2, %v3988_v61  ;;  %v3388_v50 = vmul.f32 0.6931472, %v6016_v53 }
 0x45a   : > { %v4674_v37 = vmul.f32 %v11696_v8, %v4194_v29  ;;  %v3088_v57 = vsel %vm10425_vm2, %v3085_v3, %v3082_v21  ;;  %v1969_v44 = vmul.f32 1.442695, %v1662_v41  ;;  %v3967_v13 = vmul.f32 %v10416_v0, %v3966_v40 }
 0x45b   : > { %v6018_v54 = vpop.eup %6017  ;;  %v4128_v43 = vmul.f32 %v10394_v46, %v3088_v57  ;;  %6025 = vpow2.f32 %v10387_v38  ;;  %v11699_v9 = vunpack.c.h.bf16 %v9000_v56  ;;  %v3394_v28 = vsel %vm10437_vm3, %v3391_v19, %v3388_v50 }
 0x45c   : > { %v4866_v24 = vadd.f32 %v4674_v37, %v2274_v34  ;;  %v6020_v52 = vpop.eup %6019  ;;  %v3658_v7 = vmul.f32 0.6931472, %v6018_v54  ;;  %6027 = vpow2.f32 %v10392_v16  ;;  %v11700_v46 = vunpack.c.h.bf16 %v7822_v27 }
 0x45d   : > { %v4708_v2 = vmul.f32 %v11699_v9, %v4228_v60  ;;  %v4162_v30 = vmul.f32 %v10402_v10, %v3394_v28  ;;  %v3964_v38 = vmul.f32 0.6931472, %v6020_v52  ;;  %6029 = vpow2.f32 %v10400_v14 }
 0x45e   : > { %5124 = vmatpush.msra.mxu2 %v4866_v24  ;;  %v4608_v63 = vmul.f32 %v11700_v46, %v4128_v43  ;;  %v10479_v56 = vpop.eup %6021  ;;  %v3664_v3 = vsel %vm10447_vm4, %v3661_v33, %v3658_v7  ;;  %6031 = vpow2.f32 %v1969_v44  ;;  %v10484_v16 = vmul.f32 1.442695, %v1692_v47 }
 0x45f   : > { %v4900_v1 = vadd.f32 %v4708_v2, %v2308_v18  ;;  %v10486_v15 = vpop.eup %6023  ;;  %v11701_v10 = vunpack.c.h.bf16 %v7876_v36  ;;  %v4192_v62 = vmul.f32 %v10411_v55, %v3664_v3  ;;  %v3970_v14 = vsel %vm10456_vm5, %v3967_v13, %v3964_v38  ;;  %v2238_v3 = vld [vmem:[%s7392_s30 + $0x398] sm:$0xff] }
 0x460   : > { %v4800_v27 = vadd.f32 %v4608_v63, %v2208_v49  ;;  %v4226_v26 = vmul.f32 %v10416_v0, %v3970_v14  ;;  %v3062_v59 = vadd.f32 1.0, %v10479_v56  ;;  %v3065_v17 = vmul.f32 -0.5, %v10479_v56  ;;  %v1626_v14 = vld [vmem:[%s7394_s6 + $0x278] sm:$0xff] }
 0x461   : > { %v4642_v25 = vmul.f32 %v11701_v10, %v4162_v30  ;;  %5143 = vmatpush.msra.mxu3 %v4900_v1  ;;  %v3068_v20 = vand.u32 2147483647, %v10479_v56  ;;  %v10499_v5 = vpop.eup %6025  ;;  %v11702_v55 = vunpack.c.h.bf16 %v9045_v32  ;;  %v3368_v19 = vadd.f32 1.0, %v10486_v15 }
 0x462   : > { %5085 = vmatpush.msra.mxu0 %v4800_v27  ;;  %v3371_v33 = vmul.f32 -0.5, %v10486_v15  ;;  %v10506_v41 = vpop.eup %6027  ;;  %v11703_v0 = vunpack.c.h.bf16 %v9073_v39  ;;  %6033 = vlog2.f32 %v3062_v59  ;;  %v3066_v21 = vadd.f32 1.0, %v3065_v17  ;;  %v1660_v17 = vld [vmem:[%s7394_s6 + $0x388] sm:$0xff] }
 0x463   : > { %v4834_v36 = vadd.f32 %v4642_v25, %v2242_v48  ;;  %v4672_v29 = vmul.f32 %v11702_v55, %v4192_v62  ;;  %v2097_v51 = vmul.f32 1.442695, %v1726_v23  ;;  %v10510_v40 = vpop.eup %6029  ;;  %6035 = vlog2.f32 %v3368_v19  ;;  %v2240_v55 = vld [vmem:[%s7392_s30 + $0x3a8] sm:$0xff] }
 0x464   : > { %v4706_v34 = vmul.f32 %v11703_v0, %v4226_v26  ;;  %v3372_v32 = vadd.f32 1.0, %v3371_v33  ;;  %v3374_v8 = vand.u32 2147483647, %v10486_v15  ;;  %v10513_v37 = vpop.eup %6031  ;;  %vm10515_vm6 = vcmp.lt.f32.partialorder %v3068_v20, 0.0004427343  ;;  %v1690_v33 = vld [vmem:[%s7394_s6 + $0x478] sm:$0xff] }
 0x465   : > { %5104 = vmatpush.msra.mxu1 %v4834_v36  ;;  %v4864_v53 = vadd.f32 %v4672_v29, %v2272_v42  ;;  %v3638_v39 = vadd.f32 1.0, %v10499_v5  ;;  %v3641_v60 = vmul.f32 -0.5, %v10499_v5  ;;  %v3067_v57 = vmul.f32 %v10479_v56, %v3066_v21  ;;  %v2206_v36 = vld [vmem:[%s7392_s30 + $0x298] sm:$0xff] }
 0x466   : > { %v4898_v61 = vadd.f32 %v4706_v34, %v2306_v6  ;;  %v3373_v50 = vmul.f32 %v10486_v15, %v3372_v32  ;;  %v3644_v44 = vand.u32 2147483647, %v10499_v5  ;;  %v3944_v54 = vadd.f32 1.0, %v10506_v41  ;;  %v1658_v21 = vld [vmem:[%s7394_s6 + $0x378] sm:$0xff] }
 0x467   : > { %5125 = vmatpush.msra.mxu2 %v4864_v53  ;;  %6037 = vlog2.f32 %v3638_v39  ;;  %v3642_v24 = vadd.f32 1.0, %v3641_v60  ;;  %v3947_v18 = vmul.f32 -0.5, %v10506_v41  ;;  %v3950_v43 = vand.u32 2147483647, %v10506_v41 }
 0x468   : > { %5144 = vmatpush.msra.mxu3 %v4898_v61  ;;  %vm10527_vm7 = vcmp.lt.f32.partialorder %v3374_v8, 0.0004427343  ;;  %6039 = vlog2.f32 %v3944_v54  ;;  %v3044_v47 = vadd.f32 1.0, %v10510_v40  ;;  %v3047_v52 = vmul.f32 -0.5, %v10510_v40  ;;  %v6034_v9 = vpop.eup %6033 }
 0x469   : > { %v3643_v2 = vmul.f32 %v10499_v5, %v3642_v24  ;;  %vm10534_vm8 = vcmp.lt.f32.partialorder %v3644_v44, 0.0004427343  ;;  %v3948_v28 = vadd.f32 1.0, %v3947_v18  ;;  %v3050_v7 = vand.u32 2147483647, %v10510_v40  ;;  %v6036_v46 = vpop.eup %6035  ;;  %v2270_v44 = vld [vmem:[%s7392_s30 + $0x498] sm:$0xff] }
 0x46a   : > { %v3064_v63 = vmul.f32 0.6931472, %v6034_v9  ;;  %6041 = vlog2.f32 %v3044_v47  ;;  %v3048_v30 = vadd.f32 1.0, %v3047_v52  ;;  %v3350_v38 = vadd.f32 1.0, %v10513_v37 }
 0x46b   : > { %v3370_v1 = vmul.f32 0.6931472, %v6036_v46  ;;  %v3949_v48 = vmul.f32 %v10506_v41, %v3948_v28  ;;  %vm10541_vm9 = vcmp.lt.f32.partialorder %v3950_v43, 0.0004427343  ;;  %v3353_v27 = vmul.f32 -0.5, %v10513_v37  ;;  %v1724_v28 = vld [vmem:[%s7394_s6 + $0x588] sm:$0xff] }
 0x46c   : > { %v3070_v10 = vsel %vm10515_vm6, %v3067_v57, %v3064_v63  ;;  %vm10548_vm10 = vcmp.lt.f32.partialorder %v3050_v7, 0.0004427343  ;;  %6043 = vlog2.f32 %v3350_v38  ;;  %v3356_v62 = vand.u32 2147483647, %v10513_v37  ;;  %v2204_v46 = vld [vmem:[%s7392_s30 + $0x288] sm:$0xff] }
 0x46d   : > { %v6038_v23 = vpop.eup %6037  ;;  %v4126_v42 = vmul.f32 %v10479_v56, %v3070_v10  ;;  %v3376_v26 = vsel %vm10527_vm7, %v3373_v50, %v3370_v1  ;;  %v3354_v59 = vadd.f32 1.0, %v3353_v27  ;;  %6045 = vpow2.f32 %v10484_v16 }
 0x46e   : > { %v6040_v20 = vpop.eup %6039  ;;  %v4160_v29 = vmul.f32 %v10486_v15, %v3376_v26  ;;  %v3640_v6 = vmul.f32 0.6931472, %v6038_v23  ;;  %v3049_v19 = vmul.f32 %v10510_v40, %v3048_v30  ;;  %6047 = vpow2.f32 %v2097_v51  ;;  %v11721_v23 = vld [vmem:[#allocation6_spill] sm:$0xff] }
 0x46f   : > { %v11714_v0 = vunpack.c.h.bf16 %v7906_v35  ;;  %v3946_v34 = vmul.f32 0.6931472, %v6040_v20  ;;  %vm10566_vm11 = vcmp.lt.f32.partialorder %v3356_v62, 0.0004427343  ;;  %v1897_v16 = vmul.f32 1.442695, %v1626_v14 }
 0x470   : > { %v6042_v53 = vpop.eup %6041  ;;  %v11717_v32 = vunpack.c.h.bf16 %v7922_v45  ;;  %v3646_v15 = vsel %vm10534_vm8, %v3643_v2, %v3640_v6  ;;  %v3355_v51 = vmul.f32 %v10513_v37, %v3354_v59  ;;  %v1965_v61 = vmul.f32 1.442695, %v1660_v17 }
 0x471   : > { %v4606_v56 = vmul.f32 %v11714_v0, %v4126_v42  ;;  %v4190_v12 = vmul.f32 %v10499_v5, %v3646_v15  ;;  %v3952_v39 = vsel %vm10541_vm9, %v3949_v48, %v3946_v34  ;;  %v3046_v60 = vmul.f32 0.6931472, %v6042_v53  ;;  %v2304_v5 = vld [vmem:[%s7392_s30 + $0x5a8] sm:$0xff] }
 0x472   : > { %v4640_v8 = vmul.f32 %v11717_v32, %v4160_v29  ;;  %v6044_v57 = vpop.eup %6043  ;;  %v4224_v45 = vmul.f32 %v10506_v41, %v3952_v39  ;;  %6049 = vpow2.f32 %v1897_v16  ;;  %v2025_v54 = vmul.f32 1.442695, %v1690_v33 }
 0x473   : > { %v4798_v35 = vadd.f32 %v4606_v56, %v2206_v36  ;;  %v10580_v24 = vpop.eup %6045  ;;  %v11718_v18 = vunpack.c.h.bf16 %v9195_v58  ;;  %v3052_v13 = vsel %vm10548_vm10, %v3049_v19, %v3046_v60  ;;  %v3352_v47 = vmul.f32 0.6931472, %v6044_v57 }
 0x474   : > { %v4832_v50 = vadd.f32 %v4640_v8, %v2240_v55  ;;  %6051 = vpow2.f32 %v1965_v61  ;;  %v10587_v52 = vpop.eup %6047  ;;  %v11719_v41 = vunpack.c.h.bf16 %v9202_v22  ;;  %v4124_v2 = vmul.f32 %v10510_v40, %v3052_v13  ;;  %v1624_v55 = vld [vmem:[%s7394_s6 + $0x268] sm:$0xff] }
 0x475   : > { %5086 = vmatpush.msra.mxu0 %v4798_v35  ;;  %v4670_v43 = vmul.f32 %v11718_v18, %v4190_v12  ;;  %v3620_v49 = vadd.f32 1.0, %v10580_v24  ;;  %v3623_v58 = vmul.f32 -0.5, %v10580_v24  ;;  %v3358_v63 = vsel %vm10566_vm11, %v3355_v51, %v3352_v47 }
 0x476   : > { %5105 = vmatpush.msra.mxu1 %v4832_v50  ;;  %v4704_v9 = vmul.f32 %v11719_v41, %v4224_v45  ;;  %v3626_v30 = vand.u32 2147483647, %v10580_v24  ;;  %v3926_v38 = vadd.f32 1.0, %v10587_v52  ;;  %v11720_v22 = vunpack.c.h.bf16 %v8002_v11  ;;  %v1688_v50 = vld [vmem:[%s7394_s6 + $0x468] sm:$0xff] }
 0x477   : > { %v4862_v7 = vadd.f32 %v4670_v43, %v2270_v44  ;;  %v4158_v40 = vmul.f32 %v10513_v37, %v3358_v63  ;;  %6053 = vlog2.f32 %v3620_v49  ;;  %v3624_v27 = vadd.f32 1.0, %v3623_v58  ;;  %v2268_v41 = vld [vmem:[%s7392_s30 + $0x488] sm:$0xff] }
 0x478   : > { %v4896_v1 = vadd.f32 %v4704_v9, %v2304_v5  ;;  %v4604_v48 = vmul.f32 %v11720_v22, %v4124_v2  ;;  %6055 = vlog2.f32 %v3926_v38  ;;  %v3929_v10 = vmul.f32 -0.5, %v10587_v52  ;;  %v10605_v62 = vpop.eup %6049  ;;  %v2302_v9 = vld [vmem:[%s7392_s30 + $0x598] sm:$0xff] }
 0x479   : > { %5126 = vmatpush.msra.mxu2 %v4862_v7  ;;  %v2093_v25 = vmul.f32 1.442695, %v1724_v28  ;;  %v11722_v42 = vunpack.c.h.bf16 %v11721_v23  ;;  %v3932_v11 = vand.u32 2147483647, %v10587_v52  ;;  %6057 = vpow2.f32 %v2025_v54  ;;  %v11729_v7 = vld [vmem:[#allocation22_spill] sm:$0xff] }
 0x47a   : > { %5145 = vmatpush.msra.mxu3 %v4896_v1  ;;  %v4796_v14 = vadd.f32 %v4604_v48, %v2204_v46  ;;  %v10610_v37 = vpop.eup %6051  ;;  %vm10612_vm12 = vcmp.lt.f32.partialorder %v3626_v30, 0.0004427343  ;;  %v3930_v17 = vadd.f32 1.0, %v3929_v10  ;;  %v3026_v20 = vadd.f32 1.0, %v10605_v62 }
 0x47b   : > { %v4638_v26 = vmul.f32 %v11722_v42, %v4158_v40  ;;  %v3029_v36 = vmul.f32 -0.5, %v10605_v62  ;;  %v3625_v6 = vmul.f32 %v10580_v24, %v3624_v27  ;;  %v3032_v19 = vand.u32 2147483647, %v10605_v62  ;;  %v1722_v42 = vld [vmem:[%s7394_s6 + $0x578] sm:$0xff] }
 0x47c   : > { %5087 = vmatpush.msra.mxu0 %v4796_v14  ;;  %v3332_v33 = vadd.f32 1.0, %v10610_v37  ;;  %vm10622_vm13 = vcmp.lt.f32.partialorder %v3932_v11, 0.0004427343  ;;  %6059 = vlog2.f32 %v3026_v20  ;;  %v3335_v34 = vmul.f32 -0.5, %v10610_v37 }
 0x47d   : > { %v4830_v29 = vadd.f32 %v4638_v26, %v2238_v3  ;;  %v3030_v56 = vadd.f32 1.0, %v3029_v36  ;;  %v6054_v16 = vpop.eup %6053  ;;  %v3931_v53 = vmul.f32 %v10587_v52, %v3930_v17  ;;  %vm10629_vm14 = vcmp.lt.f32.partialorder %v3032_v19, 0.0004427343  ;;  %v2202_v36 = vld [vmem:[%s7392_s30 + $0x278] sm:$0xff] }
 0x47e   : > { %6061 = vlog2.f32 %v3332_v33  ;;  %v1893_v8 = vmul.f32 1.442695, %v1624_v55  ;;  %v6056_v15 = vpop.eup %6055  ;;  %v3622_v51 = vmul.f32 0.6931472, %v6054_v16  ;;  %v3336_v61 = vadd.f32 1.0, %v3335_v34  ;;  %v11737_v33 = vld [vmem:[#allocation7_spill] sm:$0xff] }
 0x47f   : > { %5106 = vmatpush.msra.mxu1 %v4830_v29  ;;  %v3338_v35 = vand.u32 2147483647, %v10610_v37  ;;  %6063 = vpow2.f32 %v2093_v25  ;;  %v10634_v12 = vpop.eup %6057  ;;  %v3928_v39 = vmul.f32 0.6931472, %v6056_v15  ;;  %v3031_v60 = vmul.f32 %v10605_v62, %v3030_v56  ;;  %v2236_v56 = vld [vmem:[%s7392_s30 + $0x388] sm:$0xff] }
 0x480   : > { %6065 = vpow2.f32 %v1893_v8  ;;  %v1961_v57 = vmul.f32 1.442695, %v1658_v21  ;;  %v3628_v44 = vsel %vm10612_vm12, %v3625_v6, %v3622_v51  ;;  %v3337_v45 = vmul.f32 %v10610_v37, %v3336_v61 }
 0x481   : > { %v3602_v54 = vadd.f32 1.0, %v10634_v12  ;;  %v3605_v18 = vmul.f32 -0.5, %v10634_v12  ;;  %v4188_v43 = vmul.f32 %v10580_v24, %v3628_v44  ;;  %v3934_v5 = vsel %vm10622_vm13, %v3931_v53, %v3928_v39  ;;  %v11739_v53 = vld [vmem:[#allocation8_spill] sm:$0xff] }
 0x482   : > { %v3608_v13 = vand.u32 2147483647, %v10634_v12  ;;  %6067 = vpow2.f32 %v1961_v57  ;;  %v6060_v47 = vpop.eup %6059  ;;  %v4222_v2 = vmul.f32 %v10587_v52, %v3934_v5  ;;  %v2021_v58 = vmul.f32 1.442695, %v1688_v50  ;;  %v11735_v52 = vld [vmem:[#allocation23_spill] sm:$0xff] }
 0x483   : > { %6069 = vlog2.f32 %v3602_v54  ;;  %v3606_v49 = vadd.f32 1.0, %v3605_v18  ;;  %v11730_v46 = vunpack.c.h.bf16 %v11729_v7  ;;  %v3028_v24 = vmul.f32 0.6931472, %v6060_v47  ;;  %v1622_v54 = vld [vmem:[%s7394_s6 + $0x258] sm:$0xff] }
 0x484   : > { %v6062_v28 = vpop.eup %6061  ;;  %vm10652_vm15 = vcmp.lt.f32.partialorder %v3338_v35, 0.0004427343  ;;  %vm10656_vm0 = vcmp.lt.f32.partialorder %v3608_v13, 0.0004427343  ;;  %v11736_v22 = vunpack.c.h.bf16 %v11735_v52  ;;  %6071 = vpow2.f32 %v2021_v58  ;;  %v2266_v47 = vld [vmem:[%s7392_s30 + $0x478] sm:$0xff] }
 0x485   : > { %v4668_v63 = vmul.f32 %v11730_v46, %v4188_v43  ;;  %v10660_v1 = vpop.eup %6063  ;;  %v3334_v40 = vmul.f32 0.6931472, %v6062_v28  ;;  %v3607_v3 = vmul.f32 %v10634_v12, %v3606_v49  ;;  %v3034_v25 = vsel %vm10629_vm14, %v3031_v60, %v3028_v24  ;;  %v11745_v49 = vld [vmem:[#allocation24_spill] sm:$0xff]  ;;  %v1686_v24 = vld [vmem:[%s7394_s6 + $0x458] sm:$0xff] }
 0x486   : > { %v4702_v48 = vmul.f32 %v11736_v22, %v4222_v2  ;;  %v10665_v27 = vpop.eup %6065  ;;  %v3908_v14 = vadd.f32 1.0, %v10660_v1  ;;  %v3911_v23 = vmul.f32 -0.5, %v10660_v1  ;;  %v4122_v11 = vmul.f32 %v10605_v62, %v3034_v25 }
 0x487   : > { %v4860_v10 = vadd.f32 %v4668_v63, %v2268_v41  ;;  %v3340_v59 = vsel %vm10652_vm15, %v3337_v45, %v3334_v40  ;;  %v3914_v17 = vand.u32 2147483647, %v10660_v1  ;;  %v3008_v6 = vadd.f32 1.0, %v10665_v27  ;;  %v1656_v63 = vld [vmem:[%s7394_s6 + $0x368] sm:$0xff] }
 0x488   : > { %v4894_v26 = vadd.f32 %v4702_v48, %v2302_v9  ;;  %v10676_v20 = vpop.eup %6067  ;;  %v4156_v55 = vmul.f32 %v10610_v37, %v3340_v59  ;;  %6073 = vlog2.f32 %v3908_v14  ;;  %v3912_v29 = vadd.f32 1.0, %v3911_v23  ;;  %v1720_v48 = vld [vmem:[%s7394_s6 + $0x568] sm:$0xff]  ;;  %v1654_v14 = vld [vmem:[%s7394_s6 + $0x358] sm:$0xff] }
 0x489   : > { %5127 = vmatpush.msra.mxu2 %v4860_v10  ;;  %v6070_v19 = vpop.eup %6069  ;;  %v11738_v0 = vunpack.c.h.bf16 %v11737_v33  ;;  %v3011_v34 = vmul.f32 -0.5, %v10665_v27  ;;  %v3014_v21 = vand.u32 2147483647, %v10665_v27  ;;  %v2089_v16 = vmul.f32 1.442695, %v1722_v42  ;;  %v1620_v40 = vld [vmem:[%s7394_s6 + $0x248] sm:$0xff] }
 0x48a   : > { %5146 = vmatpush.msra.mxu3 %v4894_v26  ;;  %v11740_v32 = vunpack.c.h.bf16 %v11739_v53  ;;  %v3604_v37 = vmul.f32 0.6931472, %v6070_v19  ;;  %vm10688_vm1 = vcmp.lt.f32.partialorder %v3914_v17, 0.0004427343  ;;  %6075 = vlog2.f32 %v3008_v6  ;;  %v10692_v51 = vpop.eup %6071  ;;  %v1684_v23 = vld [vmem:[%s7394_s6 + $0x448] sm:$0xff]  ;;  %v1718_v42 = vld [vmem:[%s7394_s6 + $0x558] sm:$0xff] }
 0x48b   : > { %v4602_v62 = vmul.f32 %v11738_v0, %v4122_v11  ;;  %v3913_v35 = vmul.f32 %v10660_v1, %v3912_v29  ;;  %v3012_v39 = vadd.f32 1.0, %v3011_v34  ;;  %v3314_v60 = vadd.f32 1.0, %v10676_v20  ;;  %v11751_v0 = vld [vmem:[#allocation25_spill] sm:$0xff] }
 0x48c   : > { %v4636_v8 = vmul.f32 %v11740_v32, %v4156_v55  ;;  %v3610_v50 = vsel %vm10656_vm0, %v3607_v3, %v3604_v37  ;;  %v3317_v44 = vmul.f32 -0.5, %v10676_v20  ;;  %v3320_v45 = vand.u32 2147483647, %v10676_v20  ;;  %v2300_v55 = vld [vmem:[%s7392_s30 + $0x588] sm:$0xff]  ;;  %v1682_v11 = vld [vmem:[%s7394_s6 + $0x438] sm:$0xff] }
 0x48d   : > { %v4794_v61 = vadd.f32 %v4602_v62, %v2202_v36  ;;  %v4186_v18 = vmul.f32 %v10634_v12, %v3610_v50  ;;  %vm10702_vm2 = vcmp.lt.f32.partialorder %v3014_v21, 0.0004427343  ;;  %6077 = vlog2.f32 %v3314_v60 }
 0x48e   : > { %v4828_v57 = vadd.f32 %v4636_v8, %v2236_v56  ;;  %v3584_v5 = vadd.f32 1.0, %v10692_v51  ;;  %v6074_v13 = vpop.eup %6073  ;;  %v3013_v41 = vmul.f32 %v10665_v27, %v3012_v39  ;;  %v3318_v9 = vadd.f32 1.0, %v3317_v44  ;;  %v2200_v56 = vld [vmem:[%s7392_s30 + $0x268] sm:$0xff] }
 0x48f   : > { %5088 = vmatpush.msra.mxu0 %v4794_v61  ;;  %v3587_v2 = vmul.f32 -0.5, %v10692_v51  ;;  %v3590_v12 = vand.u32 2147483647, %v10692_v51  ;;  %v11746_v58 = vunpack.c.h.bf16 %v11745_v49  ;;  %v3910_v7 = vmul.f32 0.6931472, %v6074_v13  ;;  %v11753_v61 = vld [vmem:[#allocation9_spill] sm:$0xff] }
 0x490   : > { %5107 = vmatpush.msra.mxu1 %v4828_v57  ;;  %6079 = vlog2.f32 %v3584_v5  ;;  %v1889_v46 = vmul.f32 1.442695, %v1622_v54  ;;  %v6076_v30 = vpop.eup %6075  ;;  %v3319_v38 = vmul.f32 %v10676_v20, %v3318_v9  ;;  %vm10716_vm3 = vcmp.lt.f32.partialorder %v3320_v45, 0.0004427343  ;;  %v2234_v5 = vld [vmem:[%s7392_s30 + $0x378] sm:$0xff]  ;;  %v11755_v9 = vld [vmem:[#allocation10_spill] sm:$0xff] }
 0x491   : > { %v4666_v28 = vmul.f32 %v11746_v58, %v4186_v18  ;;  %v3588_v22 = vadd.f32 1.0, %v3587_v2  ;;  %6081 = vpow2.f32 %v2089_v16  ;;  %v3916_v10 = vsel %vm10688_vm1, %v3913_v35, %v3910_v7  ;;  %v1618_v18 = vld [vmem:[%s7394_s6 + $0x238] sm:$0xff] }
 0x492   : > { %v3010_v25 = vmul.f32 0.6931472, %v6076_v30  ;;  %6083 = vpow2.f32 %v1889_v46  ;;  %v4220_v26 = vmul.f32 %v10660_v1, %v3916_v10  ;;  %vm10728_vm4 = vcmp.lt.f32.partialorder %v3590_v12, 0.0004427343 }
 0x493   : > { %v4858_v3 = vadd.f32 %v4666_v28, %v2266_v47  ;;  %v1957_v59 = vmul.f32 1.442695, %v1656_v63  ;;  %v2017_v17 = vmul.f32 1.442695, %v1686_v24  ;;  %v6078_v36 = vpop.eup %6077  ;;  %v3589_v6 = vmul.f32 %v10692_v51, %v3588_v22  ;;  %v2264_v28 = vld [vmem:[%s7392_s30 + $0x468] sm:$0xff] }
 0x494   : > { %v3016_v29 = vsel %vm10702_vm2, %v3013_v41, %v3010_v25  ;;  %v2085_v19 = vmul.f32 1.442695, %v1720_v48  ;;  %v10736_v33 = vmul.f32 1.442695, %v1620_v40  ;;  %v11752_v62 = vunpack.c.h.bf16 %v11751_v0 }
 0x495   : > { %5128 = vmatpush.msra.mxu2 %v4858_v3  ;;  %v4120_v34 = vmul.f32 %v10665_v27, %v3016_v29  ;;  %v3316_v21 = vmul.f32 0.6931472, %v6078_v36  ;;  %6085 = vpow2.f32 %v1957_v59  ;;  %v10742_v53 = vmul.f32 1.442695, %v1654_v14  ;;  %v1652_v14 = vld [vmem:[%s7394_s6 + $0x348] sm:$0xff] }
 0x496   : > { %v4700_v1 = vmul.f32 %v11752_v62, %v4220_v26  ;;  %v6080_v16 = vpop.eup %6079  ;;  %6087 = vpow2.f32 %v2017_v17  ;;  %v10744_v32 = vmul.f32 1.442695, %v1684_v23  ;;  %v10746_v8 = vmul.f32 1.442695, %v1718_v42 }
 0x497   : > { %v10748_v37 = vpop.eup %6081  ;;  %v11754_v35 = vunpack.c.h.bf16 %v11753_v61  ;;  %v3322_v27 = vsel %vm10716_vm3, %v3319_v38, %v3316_v21  ;;  %v3586_v60 = vmul.f32 0.6931472, %v6080_v16  ;;  %v1881_v63 = vmul.f32 1.442695, %v1618_v18  ;;  %v11757_v38 = vld [vmem:[#allocation26_spill] sm:$0xff]  ;;  %v2298_v18 = vld [vmem:[%s7392_s30 + $0x578] sm:$0xff] }
 0x498   : > { %v4892_v15 = vadd.f32 %v4700_v1, %v2300_v55  ;;  %v10754_v57 = vpop.eup %6083  ;;  %v4154_v50 = vmul.f32 %v10676_v20, %v3322_v27  ;;  %v3890_v44 = vadd.f32 1.0, %v10748_v37  ;;  %v3893_v45 = vmul.f32 -0.5, %v10748_v37  ;;  %v1716_v55 = vld [vmem:[%s7394_s6 + $0x548] sm:$0xff] }
 0x499   : > { %v4600_v39 = vmul.f32 %v11754_v35, %v4120_v34  ;;  %v3896_v54 = vand.u32 2147483647, %v10748_v37  ;;  %v3592_v13 = vsel %vm10728_vm4, %v3589_v6, %v3586_v60  ;;  %v2990_v47 = vadd.f32 1.0, %v10754_v57  ;;  %v1616_v1 = vld [vmem:[%s7394_s6 + $0x228] sm:$0xff] }
 0x49a   : > { %5147 = vmatpush.msra.mxu3 %v4892_v15  ;;  %v2993_v41 = vmul.f32 -0.5, %v10754_v57  ;;  %v11756_v20 = vunpack.c.h.bf16 %v11755_v9  ;;  %v4184_v12 = vmul.f32 %v10692_v51, %v3592_v13  ;;  %6089 = vlog2.f32 %v3890_v44  ;;  %v1714_v13 = vld [vmem:[%s7394_s6 + $0x538] sm:$0xff] }
 0x49b   : > { %v4792_v43 = vadd.f32 %v4600_v39, %v2200_v56  ;;  %v3894_v49 = vadd.f32 1.0, %v3893_v45  ;;  %v10769_v58 = vpop.eup %6085  ;;  %6091 = vlog2.f32 %v2990_v47  ;;  %v2996_v46 = vand.u32 2147483647, %v10754_v57  ;;  %v1680_v39 = vld [vmem:[%s7394_s6 + $0x428] sm:$0xff] }
 0x49c   : > { %v4634_v2 = vmul.f32 %v11756_v20, %v4154_v50  ;;  %v2994_v7 = vadd.f32 1.0, %v2993_v41  ;;  %v10773_v24 = vpop.eup %6087  ;;  %v11758_v52 = vunpack.c.h.bf16 %v11757_v38  ;;  %vm10777_vm5 = vcmp.lt.f32.partialorder %v3896_v54, 0.0004427343  ;;  %v11767_v41 = vld [vmem:[#allocation27_spill] sm:$0xff]  ;;  %v2198_v20 = vld [vmem:[%s7392_s30 + $0x258] sm:$0xff] }
 0x49d   : > { %5089 = vmatpush.msra.mxu0 %v4792_v43  ;;  %v3296_v48 = vadd.f32 1.0, %v10769_v58  ;;  %v3895_v40 = vmul.f32 %v10748_v37, %v3894_v49  ;;  %v3299_v10 = vmul.f32 -0.5, %v10769_v58  ;;  %v3302_v25 = vand.u32 2147483647, %v10769_v58 }
 0x49e   : > { %v4826_v30 = vadd.f32 %v4634_v2, %v2234_v5  ;;  %v4664_v22 = vmul.f32 %v11758_v52, %v4184_v12  ;;  %v2995_v3 = vmul.f32 %v10754_v57, %v2994_v7  ;;  %v3566_v42 = vadd.f32 1.0, %v10773_v24 }
 0x49f   : > { %6093 = vlog2.f32 %v3296_v48  ;;  %v3569_v26 = vmul.f32 -0.5, %v10773_v24  ;;  %vm10790_vm6 = vcmp.lt.f32.partialorder %v2996_v46, 0.0004427343  ;;  %v3300_v17 = vadd.f32 1.0, %v3299_v10 }
 0x4a0   : > { %5108 = vmatpush.msra.mxu1 %v4826_v30  ;;  %v4856_v23 = vadd.f32 %v4664_v22, %v2264_v28  ;;  %v3572_v36 = vand.u32 2147483647, %v10773_v24  ;;  %6095 = vpow2.f32 %v2085_v19  ;;  %v6090_v29 = vpop.eup %6089  ;;  %vm10796_vm7 = vcmp.lt.f32.partialorder %v3302_v25, 0.0004427343  ;;  %v1650_v19 = vld [vmem:[%s7394_s6 + $0x338] sm:$0xff] }
 0x4a1   : > { %6097 = vlog2.f32 %v3566_v42  ;;  %v3570_v0 = vadd.f32 1.0, %v3569_v26  ;;  %v1949_v62 = vmul.f32 1.442695, %v1652_v14  ;;  %v6092_v56 = vpop.eup %6091  ;;  %v3892_v34 = vmul.f32 0.6931472, %v6090_v29 }
 0x4a2   : > { %5129 = vmatpush.msra.mxu2 %v4856_v23  ;;  %v3301_v21 = vmul.f32 %v10769_v58, %v3300_v17  ;;  %6099 = vpow2.f32 %v10736_v33  ;;  %v10803_v16 = vmul.f32 1.442695, %v1682_v11  ;;  %v2992_v15 = vmul.f32 0.6931472, %v6092_v56  ;;  %v11771_v23 = vld [vmem:[#allocation12_spill] sm:$0xff] }
 0x4a3   : > { %v3571_v61 = vmul.f32 %v10773_v24, %v3570_v0  ;;  %vm10807_vm8 = vcmp.lt.f32.partialorder %v3572_v36, 0.0004427343  ;;  %6101 = vpow2.f32 %v10742_v53  ;;  %v3898_v27 = vsel %vm10777_vm5, %v3895_v40, %v3892_v34  ;;  %v2232_v40 = vld [vmem:[%s7392_s30 + $0x368] sm:$0xff]  ;;  %v2262_v36 = vld [vmem:[%s7392_s30 + $0x458] sm:$0xff] }
 0x4a4   : > { %6103 = vpow2.f32 %v10744_v32  ;;  %v10816_v33 = vmul.f32 1.442695, %v1716_v55  ;;  %v10818_v60 = vmul.f32 1.442695, %v1616_v1  ;;  %v4218_v44 = vmul.f32 %v10748_v37, %v3898_v27 }
 0x4a5   : > { %v6094_v50 = vpop.eup %6093  ;;  %v2998_v45 = vsel %vm10790_vm6, %v2995_v3, %v2992_v15  ;;  %6105 = vpow2.f32 %v10746_v8  ;;  %v10824_v53 = vmul.f32 1.442695, %v1650_v19  ;;  %v10830_v5 = vmul.f32 1.442695, %v1680_v39 }
 0x4a6   : > { %v10826_v54 = vpop.eup %6095  ;;  %v4118_v32 = vmul.f32 %v10754_v57, %v2998_v45  ;;  %v3298_v43 = vmul.f32 0.6931472, %v6094_v50  ;;  %6107 = vpow2.f32 %v1881_v63  ;;  %v11768_v37 = vunpack.c.h.bf16 %v11767_v41  ;;  %v11769_v57 = vld [vmem:[#allocation11_spill] sm:$0xff] }
 0x4a7   : > { %v6098_v47 = vpop.eup %6097  ;;  %v3872_v8 = vadd.f32 1.0, %v10826_v54  ;;  %v3875_v2 = vmul.f32 -0.5, %v10826_v54  ;;  %v3878_v12 = vand.u32 2147483647, %v10826_v54  ;;  %v11770_v28 = vunpack.c.h.bf16 %v11769_v57 }
 0x4a8   : > { %v4698_v9 = vmul.f32 %v11768_v37, %v4218_v44  ;;  %v10839_v49 = vpop.eup %6099  ;;  %v3304_v46 = vsel %vm10796_vm7, %v3301_v21, %v3298_v43  ;;  %v3568_v63 = vmul.f32 0.6931472, %v6098_v47  ;;  %6109 = vpow2.f32 %v1949_v62  ;;  %v11775_v62 = vld [vmem:[#allocation28_spill] sm:$0xff] }
 0x4a9   : > { %v4598_v7 = vmul.f32 %v11770_v28, %v4118_v32  ;;  %v10845_v30 = vpop.eup %6101  ;;  %v4152_v52 = vmul.f32 %v10769_v58, %v3304_v46  ;;  %6111 = vlog2.f32 %v3872_v8  ;;  %v10848_v22 = vmul.f32 1.442695, %v1714_v13  ;;  %v2296_v46 = vld [vmem:[%s7392_s30 + $0x568] sm:$0xff]  ;;  %v2294_v28 = vld [vmem:[%s7392_s30 + $0x558] sm:$0xff] }
 0x4aa   : > { %v4890_v38 = vadd.f32 %v4698_v9, %v2298_v18  ;;  %v10850_v51 = vpop.eup %6103  ;;  %v3574_v3 = vsel %vm10807_vm8, %v3571_v61, %v3568_v63  ;;  %v3876_v10 = vadd.f32 1.0, %v3875_v2  ;;  %v2972_v25 = vadd.f32 1.0, %v10839_v49 }
 0x4ab   : > { %v4790_v48 = vadd.f32 %v4598_v7, %v2198_v20  ;;  %v10856_v14 = vpop.eup %6105  ;;  %v11772_v42 = vunpack.c.h.bf16 %v11771_v23  ;;  %v4182_v26 = vmul.f32 %v10773_v24, %v3574_v3  ;;  %vm10861_vm9 = vcmp.lt.f32.partialorder %v3878_v12, 0.0004427343 }
 0x4ac   : > { %5148 = vmatpush.msra.mxu3 %v4890_v38  ;;  %v2975_v59 = vmul.f32 -0.5, %v10839_v49  ;;  %v10866_v17 = vpop.eup %6107  ;;  %6113 = vlog2.f32 %v2972_v25  ;;  %v2978_v55 = vand.u32 2147483647, %v10839_v49  ;;  %v3278_v29 = vadd.f32 1.0, %v10845_v30 }
 0x4ad   : > { %v4632_v58 = vmul.f32 %v11772_v42, %v4152_v52  ;;  %5090 = vmatpush.msra.mxu0 %v4790_v48  ;;  %v3281_v6 = vmul.f32 -0.5, %v10845_v30  ;;  %v11776_v24 = vunpack.c.h.bf16 %v11775_v62  ;;  %v3284_v34 = vand.u32 2147483647, %v10845_v30  ;;  %v11783_v48 = vld [vmem:[#allocation29_spill] sm:$0xff] }
 0x4ae   : > { %v2976_v56 = vadd.f32 1.0, %v2975_v59  ;;  %v10875_v21 = vpop.eup %6109  ;;  %v3877_v19 = vmul.f32 %v10826_v54, %v3876_v10  ;;  %6115 = vlog2.f32 %v3278_v29  ;;  %v3548_v61 = vadd.f32 1.0, %v10850_v51 }
 0x4af   : > { %v4824_v0 = vadd.f32 %v4632_v58, %v2232_v40  ;;  %v4662_v1 = vmul.f32 %v11776_v24, %v4182_v26  ;;  %v3282_v15 = vadd.f32 1.0, %v3281_v6  ;;  %v6112_v35 = vpop.eup %6111  ;;  %vm10880_vm10 = vcmp.lt.f32.partialorder %v2978_v55, 0.0004427343 }
 0x4b0   : > { %v2977_v27 = vmul.f32 %v10839_v49, %v2976_v56  ;;  %v3551_v44 = vmul.f32 -0.5, %v10850_v51  ;;  %v3874_v45 = vmul.f32 0.6931472, %v6112_v35  ;;  %vm10885_vm11 = vcmp.lt.f32.partialorder %v3284_v34, 0.0004427343  ;;  %v1614_v56 = vld [vmem:[%s7394_s6 + $0x218] sm:$0xff] }
 0x4b1   : > { %5109 = vmatpush.msra.mxu1 %v4824_v0  ;;  %v4854_v39 = vadd.f32 %v4662_v1, %v2262_v36  ;;  %6117 = vlog2.f32 %v3548_v61  ;;  %v3554_v32 = vand.u32 2147483647, %v10850_v51  ;;  %v3283_v43 = vmul.f32 %v10845_v30, %v3282_v15  ;;  %v2196_v36 = vld [vmem:[%s7392_s30 + $0x248] sm:$0xff]  ;;  %v11787_v0 = vld [vmem:[#allocation13_spill] sm:$0xff] }
 0x4b2   : > { %v3552_v13 = vadd.f32 1.0, %v3551_v44  ;;  %v3854_v47 = vadd.f32 1.0, %v10856_v14  ;;  %v3857_v41 = vmul.f32 -0.5, %v10856_v14  ;;  %v6114_v37 = vpop.eup %6113  ;;  %v3880_v9 = vsel %vm10861_vm9, %v3877_v19, %v3874_v45  ;;  %v2230_v19 = vld [vmem:[%s7392_s30 + $0x358] sm:$0xff] }
 0x4b3   : > { %5130 = vmatpush.msra.mxu2 %v4854_v39  ;;  %v3860_v20 = vand.u32 2147483647, %v10856_v14  ;;  %v2954_v8 = vadd.f32 1.0, %v10866_v17  ;;  %v2957_v2 = vmul.f32 -0.5, %v10866_v17  ;;  %v4216_v12 = vmul.f32 %v10826_v54, %v3880_v9 }
 0x4b4   : > { %v2974_v57 = vmul.f32 0.6931472, %v6114_v37  ;;  %vm10899_vm12 = vcmp.lt.f32.partialorder %v3554_v32, 0.0004427343  ;;  %6119 = vlog2.f32 %v3854_v47  ;;  %v6116_v7 = vpop.eup %6115  ;;  %v3553_v63 = vmul.f32 %v10850_v51, %v3552_v13  ;;  %v2260_v32 = vld [vmem:[%s7392_s30 + $0x448] sm:$0xff]  ;;  %v11793_v37 = vld [vmem:[#allocation30_spill] sm:$0xff] }
 0x4b5   : > { %v3858_v38 = vadd.f32 1.0, %v3857_v41  ;;  %6121 = vlog2.f32 %v2954_v8  ;;  %v2958_v52 = vadd.f32 1.0, %v2957_v2  ;;  %v11784_v40 = vunpack.c.h.bf16 %v11783_v48 }
 0x4b6   : > { %v2980_v54 = vsel %vm10880_vm10, %v2977_v27, %v2974_v57  ;;  %v3280_v10 = vmul.f32 0.6931472, %v6116_v7  ;;  %v2960_v25 = vand.u32 2147483647, %v10866_v17  ;;  %vm10912_vm13 = vcmp.lt.f32.partialorder %v3860_v20, 0.0004427343 }
 0x4b7   : > { %v4696_v3 = vmul.f32 %v11784_v40, %v4216_v12  ;;  %v6118_v23 = vpop.eup %6117  ;;  %v4116_v42 = vmul.f32 %v10839_v49, %v2980_v54  ;;  %v3859_v58 = vmul.f32 %v10856_v14, %v3858_v38  ;;  %v3260_v11 = vadd.f32 1.0, %v10875_v21  ;;  %v11791_v27 = vld [vmem:[#allocation14_spill] sm:$0xff] }
 0x4b8   : > { %v3286_v55 = vsel %vm10885_vm11, %v3283_v43, %v3280_v10  ;;  %v3550_v29 = vmul.f32 0.6931472, %v6118_v23  ;;  %v2959_v6 = vmul.f32 %v10866_v17, %v2958_v52  ;;  %v11788_v62 = vunpack.c.h.bf16 %v11787_v0  ;;  %v1712_v23 = vld [vmem:[%s7394_s6 + $0x528] sm:$0xff] }
 0x4b9   : > { %v4888_v59 = vadd.f32 %v4696_v3, %v2296_v46  ;;  %v4150_v24 = vmul.f32 %v10845_v30, %v3286_v55  ;;  %6123 = vlog2.f32 %v3260_v11  ;;  %v3263_v1 = vmul.f32 -0.5, %v10875_v21 }
 0x4ba   : > { %v4596_v49 = vmul.f32 %v11788_v62, %v4116_v42  ;;  %v6120_v34 = vpop.eup %6119  ;;  %v3556_v15 = vsel %vm10899_vm12, %v3553_v63, %v3550_v29  ;;  %vm10929_vm14 = vcmp.lt.f32.partialorder %v2960_v25, 0.0004427343  ;;  %v3266_v35 = vand.u32 2147483647, %v10875_v21  ;;  %v11797_v63 = vld [vmem:[#allocation31_spill] sm:$0xff] }
 0x4bb   : > { %5149 = vmatpush.msra.mxu3 %v4888_v59  ;;  %6125 = vpow2.f32 %v10803_v16  ;;  %v6122_v30 = vpop.eup %6121  ;;  %v11792_v50 = vunpack.c.h.bf16 %v11791_v27  ;;  %v4180_v45 = vmul.f32 %v10850_v51, %v3556_v15  ;;  %v3856_v18 = vmul.f32 0.6931472, %v6120_v34  ;;  %v1648_v51 = vld [vmem:[%s7394_s6 + $0x328] sm:$0xff] }
 0x4bc   : > { %v4788_v39 = vadd.f32 %v4596_v49, %v2196_v36  ;;  %v2956_v43 = vmul.f32 0.6931472, %v6122_v30  ;;  %v3264_v13 = vadd.f32 1.0, %v3263_v1  ;;  %6127 = vpow2.f32 %v10816_v33  ;;  %v2228_v36 = vld [vmem:[%s7392_s30 + $0x348] sm:$0xff] }
 0x4bd   : > { %v4630_v44 = vmul.f32 %v11792_v50, %v4150_v24  ;;  %v1873_v47 = vmul.f32 1.442695, %v1614_v56  ;;  %v11794_v16 = vunpack.c.h.bf16 %v11793_v37  ;;  %v3862_v20 = vsel %vm10912_vm13, %v3859_v58, %v3856_v18  ;;  %v11801_v56 = vld [vmem:[#allocation16_spill] sm:$0xff]  ;;  %v1646_v37 = vld [vmem:[%s7394_s6 + $0x318] sm:$0xff] }
 0x4be   : > { %5091 = vmatpush.msra.mxu0 %v4788_v39  ;;  %6129 = vpow2.f32 %v10818_v60  ;;  %v4214_v8 = vmul.f32 %v10856_v14, %v3862_v20  ;;  %v2962_v2 = vsel %vm10929_vm14, %v2959_v6, %v2956_v43  ;;  %v3265_v33 = vmul.f32 %v10875_v21, %v3264_v13  ;;  %v1678_v14 = vld [vmem:[%s7394_s6 + $0x418] sm:$0xff]  ;;  %v2256_v60 = vld [vmem:[%s7392_s30 + $0x428] sm:$0xff] }
 0x4bf   : > { %v4822_v41 = vadd.f32 %v4630_v44, %v2230_v19  ;;  %v4660_v9 = vmul.f32 %v11794_v16, %v4180_v45  ;;  %6131 = vpow2.f32 %v10824_v53  ;;  %v6124_v12 = vpop.eup %6123  ;;  %v4114_v7 = vmul.f32 %v10866_v17, %v2962_v2  ;;  %v2194_v53 = vld [vmem:[%s7392_s30 + $0x238] sm:$0xff]  ;;  %v11799_v17 = vld [vmem:[#allocation15_spill] sm:$0xff] }
 0x4c0   : > { %vm10953_vm15 = vcmp.lt.f32.partialorder %v3266_v35, 0.0004427343  ;;  %6133 = vpow2.f32 %v10830_v5  ;;  %v11798_v38 = vunpack.c.h.bf16 %v11797_v63  ;;  %v3262_v48 = vmul.f32 0.6931472, %v6124_v12 }
 0x4c1   : > { %5110 = vmatpush.msra.mxu1 %v4822_v41  ;;  %v4852_v57 = vadd.f32 %v4660_v9, %v2260_v32  ;;  %v10959_v46 = vpop.eup %6125  ;;  %6135 = vpow2.f32 %v10848_v22  ;;  %v10965_v40 = vmul.f32 1.442695, %v1648_v51  ;;  %v11800_v3 = vunpack.c.h.bf16 %v11799_v17 }
 0x4c2   : > { %v4694_v52 = vmul.f32 %v11798_v38, %v4214_v8  ;;  %v3530_v10 = vadd.f32 1.0, %v10959_v46  ;;  %v3533_v5 = vmul.f32 -0.5, %v10959_v46  ;;  %v3536_v25 = vand.u32 2147483647, %v10959_v46  ;;  %v10973_v42 = vpop.eup %6127  ;;  %v2258_v38 = vld [vmem:[%s7392_s30 + $0x438] sm:$0xff] }
 0x4c3   : > { %5131 = vmatpush.msra.mxu2 %v4852_v57  ;;  %v4594_v54 = vmul.f32 %v11800_v3, %v4114_v7  ;;  %v3268_v26 = vsel %vm10953_vm15, %v3265_v33, %v3262_v48  ;;  %6137 = vpow2.f32 %v1873_v47  ;;  %v10977_v22 = vmul.f32 1.442695, %v1678_v14 }
 0x4c4   : > { %v4886_v58 = vadd.f32 %v4694_v52, %v2294_v28  ;;  %v10979_v11 = vpop.eup %6129  ;;  %v4148_v55 = vmul.f32 %v10875_v21, %v3268_v26  ;;  %6139 = vlog2.f32 %v3530_v10  ;;  %v3534_v29 = vadd.f32 1.0, %v3533_v5 }
 0x4c5   : > { %v4786_v59 = vadd.f32 %v4594_v54, %v2194_v53  ;;  %v10983_v6 = vpop.eup %6131  ;;  %v3836_v0 = vadd.f32 1.0, %v10973_v42  ;;  %v3839_v62 = vmul.f32 -0.5, %v10973_v42  ;;  %v3842_v49 = vand.u32 2147483647, %v10973_v42 }
 0x4c6   : > { %5150 = vmatpush.msra.mxu3 %v4886_v58  ;;  %v10988_v24 = vmul.f32 1.442695, %v1712_v23  ;;  %v10990_v1 = vpop.eup %6133  ;;  %v11802_v34 = vunpack.c.h.bf16 %v11801_v56  ;;  %vm10994_vm0 = vcmp.lt.f32.partialorder %v3536_v25, 0.0004427343  ;;  %v2936_v15 = vadd.f32 1.0, %v10979_v11  ;;  %v11813_v23 = vld [vmem:[#allocation32_spill] sm:$0xff] }
 0x4c7   : > { %5092 = vmatpush.msra.mxu0 %v4786_v59  ;;  %v2939_v61 = vmul.f32 -0.5, %v10979_v11  ;;  %v11000_v35 = vpop.eup %6135  ;;  %v3535_v30 = vmul.f32 %v10959_v46, %v3534_v29  ;;  %6141 = vlog2.f32 %v3836_v0  ;;  %v3840_v39 = vadd.f32 1.0, %v3839_v62 }
 0x4c8   : > { %v4628_v19 = vmul.f32 %v11802_v34, %v4148_v55  ;;  %v2942_v27 = vand.u32 2147483647, %v10979_v11  ;;  %6143 = vlog2.f32 %v2936_v15  ;;  %v3242_v45 = vadd.f32 1.0, %v10983_v6  ;;  %v2292_v34 = vld [vmem:[%s7392_s30 + $0x548] sm:$0xff] }
 0x4c9   : > { %v2940_v44 = vadd.f32 1.0, %v2939_v61  ;;  %v11005_v18 = vpop.eup %6137  ;;  %v3841_v32 = vmul.f32 %v10973_v42, %v3840_v39  ;;  %vm11008_vm1 = vcmp.lt.f32.partialorder %v3842_v49, 0.0004427343  ;;  %v3245_v13 = vmul.f32 -0.5, %v10983_v6  ;;  %v1612_v15 = vld [vmem:[%s7394_s6 + $0x208] sm:$0xff] }
 0x4ca   : > { %v4820_v50 = vadd.f32 %v4628_v19, %v2228_v36  ;;  %v3248_v47 = vand.u32 2147483647, %v10983_v6  ;;  %v6140_v41 = vpop.eup %6139  ;;  %vm11014_vm2 = vcmp.lt.f32.partialorder %v2942_v27, 0.0004427343  ;;  %6145 = vlog2.f32 %v3242_v45  ;;  %v2192_v27 = vld [vmem:[%s7392_s30 + $0x228] sm:$0xff] }
 0x4cb   : > { %v3512_v16 = vadd.f32 1.0, %v10990_v1  ;;  %v3515_v9 = vmul.f32 -0.5, %v10990_v1  ;;  %v3532_v20 = vmul.f32 0.6931472, %v6140_v41  ;;  %v2941_v51 = vmul.f32 %v10979_v11, %v2940_v44 }
 0x4cc   : > { %5111 = vmatpush.msra.mxu1 %v4820_v50  ;;  %v3246_v8 = vadd.f32 1.0, %v3245_v13  ;;  %v3818_v2 = vadd.f32 1.0, %v11000_v35  ;;  %v3518_v12 = vand.u32 2147483647, %v10990_v1  ;;  %v3821_v57 = vmul.f32 -0.5, %v11000_v35 }
 0x4cd   : > { %6147 = vlog2.f32 %v3512_v16  ;;  %v3516_v33 = vadd.f32 1.0, %v3515_v9  ;;  %v6142_v28 = vpop.eup %6141  ;;  %v3538_v7 = vsel %vm10994_vm0, %v3535_v30, %v3532_v20  ;;  %vm11026_vm3 = vcmp.lt.f32.partialorder %v3248_v47, 0.0004427343  ;;  %v11817_v30 = vld [vmem:[#allocation33_spill] sm:$0xff]  ;;  %v1676_v16 = vld [vmem:[%s7394_s6 + $0x408] sm:$0xff] }
 0x4ce   : > { %6149 = vlog2.f32 %v3818_v2  ;;  %v3824_v14 = vand.u32 2147483647, %v11000_v35  ;;  %v6144_v63 = vpop.eup %6143  ;;  %v4178_v52 = vmul.f32 %v10959_v46, %v3538_v7  ;;  %v3838_v53 = vmul.f32 0.6931472, %v6142_v28  ;;  %v2226_v20 = vld [vmem:[%s7392_s30 + $0x338] sm:$0xff] }
 0x4cf   : > { %v3247_v48 = vmul.f32 %v10983_v6, %v3246_v8  ;;  %v3517_v17 = vmul.f32 %v10990_v1, %v3516_v33  ;;  %v2938_v3 = vmul.f32 0.6931472, %v6144_v63  ;;  %vm11035_vm4 = vcmp.lt.f32.partialorder %v3518_v12, 0.0004427343  ;;  %v11821_v33 = vld [vmem:[#allocation18_spill] sm:$0xff]  ;;  %v1710_v7 = vld [vmem:[%s7394_s6 + $0x518] sm:$0xff] }
 0x4d0   : > { %v3822_v10 = vadd.f32 1.0, %v3821_v57  ;;  %v2918_v5 = vadd.f32 1.0, %v11005_v18  ;;  %v6146_v25 = vpop.eup %6145  ;;  %v11814_v58 = vunpack.c.h.bf16 %v11813_v23  ;;  %v3844_v46 = vsel %vm11008_vm1, %v3841_v32, %v3838_v53  ;;  %v11819_v32 = vld [vmem:[#allocation17_spill] sm:$0xff]  ;;  %v11823_v53 = vld [vmem:[#allocation34_spill] sm:$0xff] }
 0x4d1   : > { %vm11044_vm5 = vcmp.lt.f32.partialorder %v3824_v14, 0.0004427343  ;;  %v2921_v36 = vmul.f32 -0.5, %v11005_v18  ;;  %v4212_v55 = vmul.f32 %v10973_v42, %v3844_v46  ;;  %v2944_v29 = vsel %vm11014_vm2, %v2941_v51, %v2938_v3 }
 0x4d2   : > { %v4658_v26 = vmul.f32 %v11814_v58, %v4178_v52  ;;  %v3244_v0 = vmul.f32 0.6931472, %v6146_v25  ;;  %v3823_v62 = vmul.f32 %v11000_v35, %v3822_v10  ;;  %v4112_v19 = vmul.f32 %v10979_v11, %v2944_v29  ;;  %v11092_v10 = vld [vmem:[%s7396_s18 + $0x188] sm:$0xff] }
 0x4d3   : > { %v6148_v49 = vpop.eup %6147  ;;  %6151 = vlog2.f32 %v2918_v5  ;;  %v2922_v21 = vadd.f32 1.0, %v2921_v36  ;;  %v11818_v42 = vunpack.c.h.bf16 %v11817_v30  ;;  %v2924_v45 = vand.u32 2147483647, %v11005_v18  ;;  %v11096_v25 = vld [vmem:[%s7396_s18 + $0x208] sm:$0xff] }
 0x4d4   : > { %v4850_v56 = vadd.f32 %v4658_v26, %v2258_v38  ;;  %v6150_v61 = vpop.eup %6149  ;;  %v3250_v50 = vsel %vm11026_vm3, %v3247_v48, %v3244_v0  ;;  %v3514_v44 = vmul.f32 0.6931472, %v6148_v49  ;;  %v11820_v43 = vunpack.c.h.bf16 %v11819_v32  ;;  %v1644_v26 = vld [vmem:[%s7394_s6 + $0x308] sm:$0xff] }
 0x4d5   : > { %v4692_v39 = vmul.f32 %v11818_v42, %v4212_v55  ;;  %v4146_v13 = vmul.f32 %v10983_v6, %v3250_v50  ;;  %v3820_v47 = vmul.f32 0.6931472, %v6150_v61  ;;  %v2923_v41 = vmul.f32 %v11005_v18, %v2922_v21  ;;  %v11827_v61 = vld [vmem:[#allocation19_spill] sm:$0xff] }
 0x4d6   : > { %5132 = vmatpush.msra.mxu2 %v4850_v56  ;;  %v4592_v11 = vmul.f32 %v11820_v43, %v4112_v19  ;;  %v3520_v51 = vsel %vm11035_vm4, %v3517_v17, %v3514_v44  ;;  %6153 = vpow2.f32 %v10965_v40  ;;  %v1869_v8 = vmul.f32 1.442695, %v1612_v15  ;;  %v2290_v17 = vld [vmem:[%s7392_s30 + $0x538] sm:$0xff]  ;;  %v11116_v56 = vld [vmem:[%s7396_s18 + $0x200] sm:$0xff] }
 0x4d7   : > { %v4884_v9 = vadd.f32 %v4692_v39, %v2292_v34  ;;  %v11822_v12 = vunpack.c.h.bf16 %v11821_v33  ;;  %v4176_v6 = vmul.f32 %v10990_v1, %v3520_v51  ;;  %v3826_v28 = vsel %vm11044_vm5, %v3823_v62, %v3820_v47  ;;  %v2190_v19 = vld [vmem:[%s7392_s30 + $0x218] sm:$0xff] }
 0x4d8   : > { %v4784_v2 = vadd.f32 %v4592_v11, %v2192_v27  ;;  %v4210_v14 = vmul.f32 %v11000_v35, %v3826_v28  ;;  %6155 = vpow2.f32 %v10977_v22  ;;  %v1937_v40 = vmul.f32 1.442695, %v1646_v37 }
 0x4d9   : > { %v4626_v57 = vmul.f32 %v11822_v12, %v4146_v13  ;;  %5151 = vmatpush.msra.mxu3 %v4884_v9  ;;  %v1997_v63 = vmul.f32 1.442695, %v1676_v16  ;;  %v6152_v38 = vpop.eup %6151  ;;  %v11824_v48 = vunpack.c.h.bf16 %v11823_v53  ;;  %vm11084_vm6 = vcmp.lt.f32.partialorder %v2924_v45, 0.0004427343 }
 0x4da   : > { %5093 = vmatpush.msra.mxu0 %v4784_v2  ;;  %6157 = vpow2.f32 %v10988_v24  ;;  %v4690_v22 = vmul.f32 %v4498_v4, %v4210_v14  ;;  %v2920_v35 = vmul.f32 0.6931472, %v6152_v38  ;;  %v2065_v54 = vmul.f32 1.442695, %v1710_v7  ;;  %v1708_v24 = vld [vmem:[%s7394_s6 + $0x508] sm:$0xff]  ;;  %v11104_v4 = vld [vmem:[%s7396_s18 + $0x290] sm:$0xff] }
 0x4db   : > { %v4818_v52 = vadd.f32 %v4626_v57, %v2226_v20  ;;  %v4656_v1 = vmul.f32 %v11824_v48, %v4176_v6  ;;  %6159 = vpow2.f32 %v1869_v8  ;;  %v4430_v5 = vunpack.c.h.bf16 %v11092_v10  ;;  %v6227_v10 = vld [vmem:[%s9837_s11 + $0x10] sm:$0xff] }
 0x4dc   : > { %v4462_v23 = vunpack.c.h.bf16 %v11096_v25  ;;  %6161 = vpow2.f32 %v1937_v40  ;;  %v11101_v31 = vpop.eup %6153  ;;  %v4496_v46 = vunpack.c.h.bf16 %v11104_v4  ;;  %v4882_v59 = vadd.f32 %v4690_v22, %v2290_v17  ;;  %v4977_v4 = vpop.f32.mrf.mxu2 }
 0x4dd   : > { %5112 = vmatpush.msra.mxu1 %v4818_v52  ;;  %v4848_v58 = vadd.f32 %v4656_v1, %v2256_v60  ;;  %v2926_v36 = vsel %vm11084_vm6, %v2923_v41, %v2920_v35  ;;  %6163 = vpow2.f32 %v1997_v63  ;;  %v3224_v29 = vadd.f32 1.0, %v11101_v31 }
 0x4de   : > { %v4110_v55 = vmul.f32 %v11005_v18, %v2926_v36  ;;  %v3227_v0 = vmul.f32 -0.5, %v11101_v31  ;;  %v3230_v62 = vand.u32 2147483647, %v11101_v31  ;;  %v11113_v49 = vpop.eup %6155  ;;  %v4460_v34 = vunpack.c.h.bf16 %v11116_v56  ;;  %5152 = vmatpush.msra.mxu3 %v4882_v59 }
 0x4df   : > { %5133 = vmatpush.msra.mxu2 %v4848_v58  ;;  %6165 = vpow2.f32 %v2065_v54  ;;  %v11120_v21 = vmul.f32 1.442695, %v1644_v26  ;;  %v11122_v15 = vmul.f32 1.442695, %v1708_v24  ;;  %v11828_v30 = vunpack.c.h.bf16 %v11827_v61 }
 0x4e0   : > { %v11124_v18 = vpop.eup %6157  ;;  %6167 = vlog2.f32 %v3224_v29  ;;  %v3228_v39 = vadd.f32 1.0, %v3227_v0  ;;  %vm11128_vm7 = vcmp.lt.f32.partialorder %v3230_v62, 0.0004427343  ;;  %v3494_v44 = vadd.f32 1.0, %v11113_v49  ;;  %v2224_v0 = vld [vmem:[%s7392_s30 + $0x328] sm:$0xff] }
 0x4e1   : > { %v4590_v42 = vmul.f32 %v11828_v30, %v4110_v55  ;;  %v11132_v50 = vpop.eup %6159  ;;  %v3497_v45 = vmul.f32 -0.5, %v11113_v49  ;;  %v3500_v32 = vand.u32 2147483647, %v11113_v49  ;;  %v3800_v43 = vadd.f32 1.0, %v11124_v18  ;;  %v11841_v30 = vld [vmem:[#allocation20_spill] sm:$0xff] }
 0x4e2   : > { %v11138_v11 = vpop.eup %6161  ;;  %v3229_v47 = vmul.f32 %v11101_v31, %v3228_v39  ;;  %v3803_v41 = vmul.f32 -0.5, %v11124_v18  ;;  %v3806_v37 = vand.u32 2147483647, %v11124_v18  ;;  %6169 = vlog2.f32 %v3494_v44 }
 0x4e3   : > { %v4782_v13 = vadd.f32 %v4590_v42, %v2190_v19  ;;  %v11143_v16 = vpop.eup %6163  ;;  %v3498_v9 = vadd.f32 1.0, %v3497_v45  ;;  %vm11145_vm8 = vcmp.lt.f32.partialorder %v3500_v32, 0.0004427343  ;;  %v2900_v51 = vadd.f32 1.0, %v11132_v50  ;;  %v4937_v45 = vpop.f32.mrf.mxu0 }
 0x4e4   : > { %6171 = vlog2.f32 %v3800_v43  ;;  %v3804_v8 = vadd.f32 1.0, %v3803_v41  ;;  %vm11150_vm9 = vcmp.lt.f32.partialorder %v3806_v37, 0.0004427343  ;;  %v2903_v33 = vmul.f32 -0.5, %v11132_v50 }
 0x4e5   : > { %5094 = vmatpush.msra.mxu0 %v4782_v13  ;;  %v11155_v12 = vpop.eup %6165  ;;  %v3499_v57 = vmul.f32 %v11113_v49, %v3498_v9  ;;  %6173 = vlog2.f32 %v2900_v51  ;;  %v2906_v6 = vand.u32 2147483647, %v11132_v50  ;;  %v3206_v28 = vadd.f32 1.0, %v11138_v11  ;;  %v2254_v9 = vld [vmem:[%s7392_s30 + $0x418] sm:$0xff] }
 0x4e6   : > { %v6168_v7 = vpop.eup %6167  ;;  %v3805_v60 = vmul.f32 %v11124_v18, %v3804_v8  ;;  %v2904_v14 = vadd.f32 1.0, %v2903_v33  ;;  %v3209_v40 = vmul.f32 -0.5, %v11138_v11  ;;  %v3212_v63 = vand.u32 2147483647, %v11138_v11  ;;  %v4957_v33 = vpop.f32.mrf.mxu1 }
 0x4e7   : > { %v3226_v38 = vmul.f32 0.6931472, %v6168_v7  ;;  %vm11163_vm10 = vcmp.lt.f32.partialorder %v2906_v6, 0.0004427343  ;;  %6175 = vlog2.f32 %v3206_v28  ;;  %v3476_v53 = vadd.f32 1.0, %v11143_v16  ;;  %v2288_v6 = vld [vmem:[%s7392_s30 + $0x528] sm:$0xff] }
 0x4e8   : > { %v2905_v48 = vmul.f32 %v11132_v50, %v2904_v14  ;;  %v3210_v1 = vadd.f32 1.0, %v3209_v40  ;;  %vm11169_vm11 = vcmp.lt.f32.partialorder %v3212_v63, 0.0004427343  ;;  %v3479_v3 = vmul.f32 -0.5, %v11143_v16  ;;  %v6170_v22 = vpop.eup %6169  ;;  %v11845_v40 = vld [vmem:[#allocation21_spill] sm:$0xff] }
 0x4e9   : > { %v3232_v35 = vsel %vm11128_vm7, %v3229_v47, %v3226_v38  ;;  %6177 = vlog2.f32 %v3476_v53  ;;  %v3482_v54 = vand.u32 2147483647, %v11143_v16  ;;  %v3782_v58 = vadd.f32 1.0, %v11155_v12  ;;  %v2222_v53 = vld [vmem:[%s7392_s30 + $0x318] sm:$0xff] }
 0x4ea   : > { %v6172_v26 = vpop.eup %6171  ;;  %v4144_v24 = vmul.f32 %v11101_v31, %v3232_v35  ;;  %v3496_v59 = vmul.f32 0.6931472, %v6170_v22  ;;  %v3211_v36 = vmul.f32 %v11138_v11, %v3210_v1  ;;  %v3480_v55 = vadd.f32 1.0, %v3479_v3  ;;  %v6226_v3 = vld [vmem:[%s7396_s18 + $0x288] sm:$0xff] }
 0x4eb   : > { %v6174_v29 = vpop.eup %6173  ;;  %v3802_v62 = vmul.f32 0.6931472, %v6172_v26  ;;  %vm11181_vm12 = vcmp.lt.f32.partialorder %v3482_v54, 0.0004427343  ;;  %6179 = vlog2.f32 %v3782_v58  ;;  %v3785_v61 = vmul.f32 -0.5, %v11155_v12  ;;  %v2252_v54 = vld [vmem:[%s7392_s30 + $0x408] sm:$0xff] }
 0x4ec   : > { %v11842_v42 = vunpack.c.h.bf16 %v11841_v30  ;;  %v3502_v31 = vsel %vm11145_vm8, %v3499_v57, %v3496_v59  ;;  %v2902_v27 = vmul.f32 0.6931472, %v6174_v29  ;;  %v3481_v44 = vmul.f32 %v11143_v16, %v3480_v55  ;;  %v2286_v29 = vld [vmem:[%s7392_s30 + $0x518] sm:$0xff] }
 0x4ed   : > { %v6176_v32 = vpop.eup %6175  ;;  %v4174_v43 = vmul.f32 %v11113_v49, %v3502_v31  ;;  %v3808_v13 = vsel %vm11150_vm9, %v3805_v60, %v3802_v62  ;;  %v3786_v47 = vadd.f32 1.0, %v3785_v61  ;;  %v3788_v41 = vand.u32 2147483647, %v11155_v12  ;;  %v2188_v60 = vld [vmem:[%s7392_s30 + $0x208] sm:$0xff] }
 0x4ee   : > { %v4624_v39 = vmul.f32 %v11842_v42, %v4144_v24  ;;  %v4208_v20 = vmul.f32 %v11124_v18, %v3808_v13  ;;  %v2908_v51 = vsel %vm11163_vm10, %v2905_v48, %v2902_v27  ;;  %v3208_v8 = vmul.f32 0.6931472, %v6176_v32  ;;  %v5037_v31 = vpop.f32.mrf.mxu1 }
 0x4ef   : > { %v6178_v57 = vpop.eup %6177  ;;  %v4654_v49 = vmul.f32 %v4462_v23, %v4174_v43  ;;  %v4108_v2 = vmul.f32 %v11132_v50, %v2908_v51  ;;  %v3787_v28 = vmul.f32 %v11155_v12, %v3786_v47  ;;  %vm11204_vm13 = vcmp.lt.f32.partialorder %v3788_v41, 0.0004427343 }
 0x4f0   : > { %v4816_v37 = vadd.f32 %v4624_v39, %v2224_v0  ;;  %v4688_v18 = vmul.f32 %v4496_v46, %v4208_v20  ;;  %v3214_v25 = vsel %vm11169_vm11, %v3211_v36, %v3208_v8  ;;  %v3478_v23 = vmul.f32 0.6931472, %v6178_v57  ;;  %v6229_v8 = vld [vmem:[%s7396_s18 + $0x180] sm:$0xff] }
 0x4f1   : > { %6181 = vpow2.f32 %v11120_v21  ;;  %v6180_v50 = vpop.eup %6179  ;;  %v4846_v14 = vadd.f32 %v4654_v49, %v2254_v9  ;;  %v11846_v63 = vunpack.c.h.bf16 %v11845_v40  ;;  %v4142_v52 = vmul.f32 %v11138_v11, %v3214_v25  ;;  %v6230_v49 = vld [vmem:[%s7396_s18 + $0x280] sm:$0xff] }
 0x4f2   : > { %5113 = vmatpush.msra.mxu1 %v4816_v37  ;;  %6183 = vpow2.f32 %v11122_v15  ;;  %v4880_v46 = vadd.f32 %v4688_v18, %v2288_v6  ;;  %v3484_v48 = vsel %vm11181_vm12, %v3481_v44, %v3478_v23  ;;  %v3784_v1 = vmul.f32 0.6931472, %v6180_v50  ;;  %v4997_v15 = vpop.f32.mrf.mxu3  ;;  %v4918_v44 = vld [vmem:[#allocation2] sm:$0xff]  ;;  %v2220_v18 = vld [vmem:[%s7392_s30 + $0x308] sm:$0xff] }
 0x4f3   : > { %v4588_v38 = vmul.f32 %v11846_v63, %v4108_v2  ;;  %v4958_v17 = vadd.f32 %v4957_v33, %v4937_v45  ;;  %v4494_v21 = vunpack.c.h.bf16 %v6226_v3  ;;  %5134 = vmatpush.msra.mxu2 %v4846_v14  ;;  %v4622_v11 = vmul.f32 %v4430_v5, %v4142_v52  ;;  %v2284_v23 = vld [vmem:[%s7392_s30 + $0x508] sm:$0xff]  ;;  %v5057_v52 = vpop.f32.mrf.mxu2 }
 0x4f4   : > { %v4172_v35 = vmul.f32 %v11143_v16, %v3484_v48  ;;  %5153 = vmatpush.msra.mxu3 %v4880_v46  ;;  %v3790_v58 = vsel %vm11204_vm13, %v3787_v28, %v3784_v1  ;;  %v5017_v16 = vpop.f32.mrf.mxu0  ;;  %v4428_v33 = vunpack.c.h.bf16 %v6229_v8  ;;  %v4492_v6 = vunpack.c.h.bf16 %v6230_v49  ;;  %v6231_v63 = vld [vmem:[%s9837_s11 + $0x18] sm:$0xff] }
 0x4f5   : > { %v4780_v22 = vadd.f32 %v4588_v38, %v2188_v60  ;;  %v4978_v26 = vadd.f32 %v4977_v4, %v4958_v17  ;;  %v4814_v24 = vadd.f32 %v4622_v11, %v2222_v53  ;;  %v4206_v36 = vmul.f32 %v11155_v12, %v3790_v58  ;;  %v6228_v12 = vld [vmem:[%s9837_s11 + $0x20] sm:$0xff]  ;;  %v6232_v38 = vld [vmem:[%s9837_s11 + $0x28] sm:$0xff] }
 0x4f6   : > { %v4652_v59 = vmul.f32 %v4460_v34, %v4172_v35 }
 0x4f7   : > { %5095 = vmatpush.msra.mxu0 %v4780_v22  ;;  %v6182_v55 = vpop.eup %6181  ;;  %v4998_v5 = vadd.f32 %v4997_v15, %v4978_v26  ;;  %5114 = vmatpush.msra.mxu1 %v4814_v24  ;;  %v4686_v19 = vmul.f32 %v4494_v21, %v4206_v36  ;;  %v4919_v22 = vld [vmem:[#allocation2 + $0x8] sm:$0xff] }
 0x4f8   : > { %5096 = vmatmul.f32.vlgmr.msra.gmra.mxu0 %v6227_v10  ;;  %v6184_v0 = vpop.eup %6183  ;;  %v4844_v62 = vadd.f32 %v4652_v59, %v2252_v54  ;;  %v3188_v61 = vadd.f32 1.0, %v6182_v55  ;;  %v3191_v30 = vmul.f32 -0.5, %v6182_v55  ;;  %v3194_v45 = vand.u32 2147483647, %v6182_v55 }
 0x4f9   : > { %v3764_v42 = vadd.f32 1.0, %v6184_v0  ;;  %v3767_v39 = vmul.f32 -0.5, %v6184_v0  ;;  %v4878_v56 = vadd.f32 %v4686_v19, %v2286_v29  ;;  %v5018_v34 = vadd.f32 %v5017_v16, %v4998_v5 }
 0x4fa   : > { %5135 = vmatpush.msra.mxu2 %v4844_v62  ;;  %6185 = vlog2.f32 %v3188_v61  ;;  %v3192_v27 = vadd.f32 1.0, %v3191_v30  ;;  %v3770_v13 = vand.u32 2147483647, %v6184_v0  ;;  %vm3195_vm14 = vcmp.lt.f32.partialorder %v3194_v45, 0.0004427343  ;;  %v5077_v4 = vpop.f32.mrf.mxu3 }
 0x4fb   : > { %5136 = vmatmul.f32.vlgmr.msra.gmra.mxu2 %v6228_v12  ;;  %6187 = vlog2.f32 %v3764_v42  ;;  %5154 = vmatpush.msra.mxu3 %v4878_v56  ;;  %v3768_v32 = vadd.f32 1.0, %v3767_v39  ;;  %v5038_v43 = vadd.f32 %v5037_v31, %v5018_v34  ;;  %v5078_v46 = vadd.f32 %v5077_v4, %v5057_v52 }
 0x4fc   : > { %v3193_v41 = vmul.f32 %v6182_v55, %v3192_v27  ;;  %vm3771_vm15 = vcmp.lt.f32.partialorder %v3770_v13, 0.0004427343 }
 0x4fd   : > { %v5160_v47 = vadd.f32 %v5038_v43, %v4918_v44  ;;  %v3769_v9 = vmul.f32 %v6184_v0, %v3768_v32 }
 0x4ff   : > { %5162 = vst [vmem:[#allocation2] sm:$0xff] %v5160_v47 }
 0x500   : > { %v6186_v37 = vpop.eup %6185 }
 0x501   : > { %v6188_v20 = vpop.eup %6187  ;;  %v3190_v51 = vmul.f32 0.6931472, %v6186_v37 }
 0x502   : > { %v3766_v57 = vmul.f32 0.6931472, %v6188_v20 }
 0x503   : > { %v3196_v2 = vsel %vm3195_vm14, %v3193_v41, %v3190_v51 }
 0x504   : > { %v4140_v28 = vmul.f32 %v6182_v55, %v3196_v2  ;;  %v3772_v7 = vsel %vm3771_vm15, %v3769_v9, %v3766_v57 }
 0x505   : > { %v4204_v60 = vmul.f32 %v6184_v0, %v3772_v7 }
 0x506   : > { %v4620_v25 = vmul.f32 %v4428_v33, %v4140_v28 }
 0x507   : > { %v4684_v50 = vmul.f32 %v4492_v6, %v4204_v60 }
 0x508   : > { %v4812_v14 = vadd.f32 %v4620_v25, %v2220_v18 }
 0x509   : > { %v4876_v40 = vadd.f32 %v4684_v50, %v2284_v23 }
 0x50a   : > { %5115 = vmatpush.msra.mxu1 %v4812_v14 }
 0x50b   : > { %5155 = vmatpush.msra.mxu3 %v4876_v40  ;;  %5116 = vmatmul.f32.vlgmr.msra.gmra.mxu1 %v6231_v63 }
 0x50c   : > { %5156 = vmatmul.f32.vlgmr.msra.gmra.mxu3 %v6232_v38 }
 0x575   : > { %v5097_v53 = vpop.f32.mrf.mxu0 }
 0x576   : > { %v5098_v48 = vadd.f32 %v5097_v53, %v5078_v46 }
 0x57e   : > { %v5137_v17 = vpop.f32.mrf.mxu2 }
 0x588   : > { %v5117_v1 = vpop.f32.mrf.mxu1 }
 0x589   : > { %v5118_v3 = vadd.f32 %v5117_v1, %v5098_v48 }
 0x58b   : > { %v5138_v21 = vadd.f32 %v5137_v17, %v5118_v3 }
 0x58f   : > { %v5157_v11 = vpop.f32.mrf.mxu3 }
 0x590   : > { %v5158_v35 = vadd.f32 %v5157_v11, %v5138_v21  ;;  %5167 = sbr.rel (%p5351_p12) target bundleno = 1463 (0x5b7), region = 132 }
 0x592   : > { %v5161_v15 = vadd.f32 %v5158_v35, %v4919_v22 }
 0x594   : > { %5163 = vst [vmem:[#allocation2 + $0x8] sm:$0xff] %v5161_v15 }
 0x595   : > { %v5352_v54 = vld [vmem:[%s7385_s16 + $0x1] ss:$8 sm:$0x3]  ;;  %v5353_v0 = vld [vmem:[%s7385_s16 + $0x2] ss:$8 sm:$0x3] }
 0x596   : > { %v5170_v58 = vmul.f32 1.442695, %v5352_v54  ;;  %v5172_v19 = vld [vmem:[%s7385_s16] ss:$8 sm:$0x3] }
 0x597   : > { %v5187_v42 = vld [vmem:[#allocation2] sm:$0xff] }
 0x598   : > { %6233 = vpow2.f32 %v5170_v58 }
 0x59b   : > { %v5188_v39 = vld [vmem:[#allocation2 + $0x8] sm:$0xff] }
 0x59e   : > { %v6234_v26 = vpop.eup %6233 }
 0x59f   : > { %v5173_v24 = vadd.f32 1.0, %v6234_v26  ;;  %v5176_v59 = vmul.f32 -0.5, %v6234_v26  ;;  %v5179_v55 = vand.u32 2147483647, %v6234_v26 }
 0x5a1   : > { %6235 = vlog2.f32 %v5173_v24  ;;  %v5177_v36 = vadd.f32 1.0, %v5176_v59  ;;  %vm5180_vm0 = vcmp.lt.f32.partialorder %v5179_v55, 0.0004427343 }
 0x5a3   : > { %v5178_v29 = vmul.f32 %v6234_v26, %v5177_v36 }
 0x5a7   : > { %v6236_v10 = vpop.eup %6235 }
 0x5a8   : > { %v5175_v5 = vmul.f32 0.6931472, %v6236_v10 }
 0x5aa   : > { %v5181_v16 = vsel %vm5180_vm0, %v5178_v29, %v5175_v5 }
 0x5ab   : > { %v5182_v62 = vmul.f32 %v6234_v26, %v5181_v16 }
 0x5ad   : > { %v5185_v61 = vmul.f32 %v5353_v0, %v5182_v62 }
 0x5af   : > { %v5186_v30 = vadd.f32 %v5185_v61, %v5172_v19 }
 0x5b1   : > { %v5190_v31 = vperm.slane %v5186_v30, 0  ;;  %v5191_v56 = vperm.slane %v5186_v30, 1 }
 0x5b3   : > { %v5194_v34 = vadd.f32 %v5190_v31, %v5187_v42  ;;  %v5195_v12 = vadd.f32 %v5191_v56, %v5188_v39 }
 0x5b5   : > { %5196 = vst [vmem:[%s7390_s29] sm:$0xff] %v5194_v34 }
 0x5b6   : > { %5197 = vst [vmem:[%s7390_s29 + $0x8] sm:$0xff] %v5195_v12 }
 0x5b7 PF: > { %s15_s24 = sadd.s32 1, %s6291_s24   ;;  %s11847_s18 = smov %s6271_s19 }
 0x5b8   : > { %p12_p13 = scmp.ge.s32.totalorder %s15_s24, 6   ;;  %s11848_s19 = smov %s6379_s7 }
 0x5b9   : > { %s11849_s20 = smov %s6283_s22  ;;  %s11850_s21 = smov %s6287_s23 }
 0x5ba   : > { %s11851_s22 = smov %s11854_s25  ;;  %s11852_s23 = smov %s11858_s26 }
 0x5bb   :  { %14 = sbr.rel (!%p12_p13) target bundleno = 4 (0x4), region = 189 }

</bundles_post_ra>
